<compile_context>
chip_gen: v5e
topology: v5e:2x2
jax: 0.10.0
libtpu: 0.0.40
codegen_flags: <defaults>
</compile_context>

<pallas_src>
import jax
import jax.numpy as jnp
from jax import lax
from jax.experimental import pallas as pl
from jax.experimental.pallas import tpu as pltpu

LN_EPS = 1e-5                 # torch.nn.LayerNorm default eps
PAD_TOKEN_ID = 0
TEMPERATURE = 1.0
GUMBEL_EPS = 1.1920929e-07    # torch.finfo(torch.float).eps

# murmur3 fmix32 multipliers (int32 two's-complement view of 0x85EBCA6B / 0xC2B2AE35)
_MIX1 = -2048144789
_MIX2 = -1028477387

_VMEM_TILE_BUDGET = 20 * 1024 * 1024   # conservative: fits v7x's 64 MiB VMEM per TC


def _gelu_tanh(x):
    # TODO(synk): HF get_activation("gelu") is erf-GELU; the tanh approximation is kept
    # (EUP-friendly on all TPU generations, matches the previously validated kernel).
    c = jnp.float32(0.7978845608028654)  # sqrt(2/pi)
    return 0.5 * x * (1.0 + jnp.tanh(c * (x + 0.044715 * x * x * x)))


def _hash_u01(counter):
    """Counter-based uniform[0,1) noise from int32 indices (murmur3 finalizer).

    Pure VPU int32 ops (xor / logical shift / wrapping mul) -> lowers everywhere,
    unlike pltpu.prng_* which has no CPU-interpret rule.
    """
    x = counter
    x = x ^ lax.shift_right_logical(x, 16)
    x = x * jnp.int32(_MIX1)
    x = x ^ lax.shift_right_logical(x, 13)
    x = x * jnp.int32(_MIX2)
    x = x ^ lax.shift_right_logical(x, 16)
    # 23 random bits -> uniform in [0, 1)
    return (x & jnp.int32(0x7FFFFF)).astype(jnp.float32) * jnp.float32(1.0 / (1 << 23))


def generator_head_kernel(seed_ref, x_ref, w_ref, b_ref, gamma_ref, beta_ref,
                          labels_ref, logits_ref, stats_ref, sampled_ref):
    tm = x_ref.shape[0]
    E = w_ref.shape[1]

    # ---- dense: bf16 operands into the MXU (cast in-register), f32 accumulation ----
    h = jnp.dot(x_ref[...].astype(jnp.bfloat16), w_ref[...],
                preferred_element_type=jnp.float32) + b_ref[...]

    # ---- activation + layer norm over embedding_size (lane axis), all f32 ----
    g = _gelu_tanh(h)
    mean = jnp.mean(g, axis=-1, keepdims=True)
    cent = g - mean
    var = jnp.mean(cent * cent, axis=-1, keepdims=True)
    logits = cent * lax.rsqrt(var + LN_EPS) * gamma_ref[...] + beta_ref[...]
    logits_ref[...] = logits.astype(logits_ref.dtype)        # single bf16 writeback

    col = lax.broadcasted_iota(jnp.int32, (tm, E), 1)        # reused: CE, RNG, argmax
    labels = labels_ref[...]                                 # (tm, 1) int32

    # ---- per-token cross entropy (f32), reduced to per-tile (loss_sum, count) ----
    m = jnp.max(logits, axis=-1, keepdims=True)
    p = jnp.exp(logits - m)                                  # reused by the sampler
    lse = jnp.log(jnp.sum(p, axis=-1, keepdims=True)) + m
    label_logit = jnp.sum(jnp.where(col == labels, logits, 0.0),
                          axis=-1, keepdims=True)
    ce = lse - label_logit                                   # (tm, 1)
    valid = labels != PAD_TOKEN_ID                           # (tm, 1) bool
    loss_sum = jnp.sum(jnp.where(valid, ce, 0.0), axis=0, keepdims=True)   # (1, 1)
    count = jnp.sum(valid.astype(jnp.float32), axis=0, keepdims=True)      # (1, 1)
    # tiny (8,128) scatter of the two scalars -> lane-dense, unmasked store
    lane = lax.broadcasted_iota(jnp.int32, (8, 128), 1)
    stats_ref[0] = jnp.where(lane == 0, loss_sum, jnp.where(lane == 1, count, 0.0))

    # ---- fused gumbel-argmax sampling ----
    # unique int32 counter per element = seed + global flat index (wrap-around is fine)
    base = seed_ref[0] + pl.program_id(0) * jnp.int32(tm * E)
    row = lax.broadcasted_iota(jnp.int32, (tm, 1), 0)
    u = _hash_u01((base + row * jnp.int32(E)) + col)         # (tm, E) in [0, 1)

    if TEMPERATURE == 1.0:
        # exponential race: argmax(logits + (-log(-log u))) == argmax(p / (-log u)),
        # so reuse p from the softmax -> one log per element instead of two.
        neg_e = jnp.minimum(jnp.log(u + GUMBEL_EPS), jnp.float32(-1e-12))  # = -Exp(1)
        scores = p / neg_e                                   # all <= 0: take the MIN
        best = jnp.min(scores, axis=-1, keepdims=True)
    else:
        gumbel = -jnp.log(-jnp.log(u + GUMBEL_EPS) + GUMBEL_EPS)
        scores = logits * jnp.float32(1.0 / TEMPERATURE) + gumbel
        best = jnp.max(scores, axis=-1, keepdims=True)
    # int32 arg-select (no f32 convert); ties -> smallest index
    sampled_ref[...] = jnp.min(jnp.where(scores == best, col, E),
                               axis=-1, keepdims=True).astype(jnp.int32)


def _round_down8(v):
    return max(8, (v // 8) * 8)


def _vmem_estimate(tm, H, E):
    # double-buffered I/O tiles + ~8 live f32/int32 (tm, E) temporaries in the body
    io = (2 * tm * E * 2          # logits out (bf16)
          + 2 * tm * H * 4        # x in (f32, cast to bf16 in-kernel)
          + 2 * H * E * 2         # dense weight (bf16)
          + 2 * 3 * E * 4         # bias / gamma / beta (f32)
          + 2 * 2 * tm * 4        # labels in + sampled ids out (int32)
          + 2 * 8 * 128 * 4)      # per-tile CE stats
    return io + 8 * tm * E * 4


def _pick_tm(M, E, H, requested=256):
    tm = _round_down8(min(requested, ((M + 7) // 8) * 8))
    while tm > 8 and _vmem_estimate(tm, H, E) > _VMEM_TILE_BUDGET:
        tm = _round_down8(tm // 2)
    # prefer >= 2 row tiles so the "parallel" axis can split across TCs (v7x megacore)
    while tm > 8 and pl.cdiv(M, tm) < 2:
        tm = _round_down8(tm // 2)
    # TODO(synk): for vocab-sized E the class axis needs its own grid dim with an
    # online-softmax CE; not required at embedding_size scale.
    return tm


def generator_head_pallas(seed, x2, W, b2, gamma2, beta2, labels_pad, *, tm,
                          out_dtype=jnp.bfloat16):
    M, H = x2.shape
    E = W.shape[1]
    G = pl.cdiv(M, tm)
    vmem_limit = int(min(64 * 1024 * 1024,
                         max(32 * 1024 * 1024, 2 * _vmem_estimate(tm, H, E))))
    return pl.pallas_call(
        generator_head_kernel,
        out_shape=(
            jax.ShapeDtypeStruct((M, E), out_dtype),          # logits
            jax.ShapeDtypeStruct((G, 8, 128), jnp.float32),   # per-tile (loss_sum, cnt)
            jax.ShapeDtypeStruct((M, 1), jnp.int32),          # gumbel-argmax ids
        ),
        grid_spec=pltpu.PrefetchScalarGridSpec(
            num_scalar_prefetch=1,                            # seed lands in SMEM
            grid=(G,),
            in_specs=[
                pl.BlockSpec((tm, H), lambda i, s: (i, 0)),   # hidden rows (f32)
                # NOTE: the 4 constant blocks below could be single-buffered
                # (pipeline_mode=pl.Buffered(1)) to reclaim VMEM on v7x for large E;
                # left at the default for interpret-mode compatibility (tiny at this H).
                pl.BlockSpec((H, E), lambda i, s: (0, 0)),    # dense weight (bf16)
                pl.BlockSpec((1, E), lambda i, s: (0, 0)),    # dense bias (f32)
                pl.BlockSpec((1, E), lambda i, s: (0, 0)),    # ln gamma (f32)
                pl.BlockSpec((1, E), lambda i, s: (0, 0)),    # ln beta (f32)
                pl.BlockSpec((tm, 1), lambda i, s: (i, 0)),   # labels (int32, padded)
            ],
            out_specs=[
                pl.BlockSpec((tm, E), lambda i, s: (i, 0)),
                pl.BlockSpec((1, 8, 128), lambda i, s: (i, 0, 0)),
                pl.BlockSpec((tm, 1), lambda i, s: (i, 0)),
            ],
        ),
        compiler_params=pltpu.CompilerParams(
            dimension_semantics=("parallel",),
            vmem_limit_bytes=vmem_limit),
    )(seed, x2, W, b2, gamma2, beta2, labels_pad)


def generator_head_forward(x, W, b, gamma, beta, input_ids, mask, key, *, tm=None,
                           logits_dtype=jnp.bfloat16):
    """Mirrors GeneratorHead.forward with every output enabled."""
    B, S, H = x.shape
    E = W.shape[1]
    M = B * S
    if tm is None:
        tm = _pick_tm(M, E, H)
    G = pl.cdiv(M, tm)
    M_pad = G * tm

    x2 = x.reshape(M, H)                                     # no pad, no wrapper cast
    labels = jnp.where(mask, input_ids, PAD_TOKEN_ID).astype(jnp.int32).reshape(M, 1)
    if M_pad != M:
        # only the tiny label vector is padded; x / logits use partial trailing blocks,
        # so there is no extra HBM pass over the big tensors.
        labels = jnp.pad(labels, ((0, M_pad - M), (0, 0)),
                         constant_values=PAD_TOKEN_ID)

    seed = jax.random.randint(key, (1,), 0, 2 ** 31 - 1, dtype=jnp.int32)

    logits2, stats, sampled2 = generator_head_pallas(
        seed, x2,
        W.astype(jnp.bfloat16),
        b.reshape(1, E).astype(jnp.float32),
        gamma.reshape(1, E).astype(jnp.float32),
        beta.reshape(1, E).astype(jnp.float32),
        labels, tm=tm, out_dtype=logits_dtype)

    logits = logits2.reshape(B, S, E)

    # cross_entropy mean over non-ignored tokens (ignore_index = pad_token_id)
    loss_sum = jnp.sum(stats[:, 0, 0])
    valid_count = jnp.sum(stats[:, 0, 1])
    loss = loss_sum / jnp.maximum(valid_count, 1.0)

    sampled_all = sampled2[:, 0].reshape(B, S)
    # TODO(synk): torch.nonzero / boolean gather has a dynamic output shape -> stays in
    # JAX glue (only over the tiny per-token id vector, never over the logits).
    sampled_tokens_ids = sampled_all[mask]

    return dict(last_hidden_state=logits, loss=loss,
                sampled_tokens_ids=sampled_tokens_ids, mask=mask)


def _reference_logits_and_loss(x, W, b, gamma, beta, input_ids, mask):
    """Pure-JAX reference (same bf16-operand matmul) for the deterministic hot path."""
    B, S, H = x.shape
    E = W.shape[1]
    x2 = x.reshape(-1, H).astype(jnp.bfloat16)
    h = jnp.dot(x2, W.astype(jnp.bfloat16), preferred_element_type=jnp.float32) + b
    g = _gelu_tanh(h)
    mean = jnp.mean(g, axis=-1, keepdims=True)
    var = jnp.mean((g - mean) ** 2, axis=-1, keepdims=True)
    logits = (g - mean) * lax.rsqrt(var + LN_EPS) * gamma + beta
    labels = jnp.where(mask, input_ids, PAD_TOKEN_ID).reshape(-1)
    lse = jax.scipy.special.logsumexp(logits, axis=-1)
    label_logit = jnp.take_along_axis(logits, labels[:, None], axis=-1)[:, 0]
    per_tok = lse - label_logit
    valid = (labels != PAD_TOKEN_ID).astype(jnp.float32)
    loss = jnp.sum(per_tok * valid) / jnp.maximum(jnp.sum(valid), 1.0)
    return logits.reshape(B, S, E), loss


if __name__ == "__main__":
    # config: hidden_size=64, embedding_size=256 (class dim of the generator head),
    # batch=2, seq=160 so B*S=320 exercises the partial trailing row block with tm=256,
    # pad_token_id=0, temperature=1, hidden_act="gelu" (tanh approx)
    B, S, H, E = 2, 160, 64, 256

    key = jax.random.PRNGKey(0)
    k_x, k_w, k_ids, k_gumbel = jax.random.split(key, 4)

    x = jax.random.normal(k_x, (B, S, H), dtype=jnp.float32)
    W = jax.random.normal(k_w, (H, E), dtype=jnp.float32) * 0.02
    b = jnp.zeros((E,), dtype=jnp.float32)
    gamma = jnp.ones((E,), dtype=jnp.float32)
    beta = jnp.zeros((E,), dtype=jnp.float32)

    input_ids = jax.random.randint(k_ids, (B, S), 1, E, dtype=jnp.int32)
    # deterministic MLM mask (~1/3 of positions, guaranteed non-empty)
    pos = jnp.arange(B * S).reshape(B, S)
    mask = (pos % 3) == 0

    out = generator_head_forward(x, W, b, gamma, beta, input_ids, mask, k_gumbel)
    jax.block_until_ready(out["last_hidden_state"])
    jax.block_until_ready(out["loss"])
    jax.block_until_ready(out["sampled_tokens_ids"])

    ref_logits, ref_loss = _reference_logits_and_loss(
        x, W, b, gamma, beta, input_ids, mask)

    # logits are stored in bf16 -> tolerance covers bf16 rounding of O(1) LN outputs
    assert jnp.allclose(out["last_hidden_state"].astype(jnp.float32), ref_logits,
                        atol=5e-2, rtol=5e-2)
    assert jnp.allclose(out["loss"], ref_loss, atol=2e-3, rtol=2e-3)
    assert out["sampled_tokens_ids"].shape[0] == int(jnp.sum(mask))
    assert bool(jnp.all(out["sampled_tokens_ids"] >= 0))
    assert bool(jnp.all(out["sampled_tokens_ids"] < E))

    print("KERNEL_OK")
</pallas_src>

<mosaic_0001>
module attributes {stable_mosaic.version = 11 : i64} {
  func.func @generator_head_kernel(%arg0: i32, %arg1: memref<1xi32, #tpu.memory_space<smem>>, %arg2: memref<256x64xf32, #tpu.memory_space<vmem>>, %arg3: memref<64x256xbf16, #tpu.memory_space<vmem>>, %arg4: memref<1x256xf32, #tpu.memory_space<vmem>>, %arg5: memref<1x256xf32, #tpu.memory_space<vmem>>, %arg6: memref<1x256xf32, #tpu.memory_space<vmem>>, %arg7: memref<256x1xi32, #tpu.memory_space<vmem>>, %arg8: memref<256x256xbf16, #tpu.memory_space<vmem>>, %arg9: memref<1x8x128xf32, #tpu.memory_space<vmem>>, %arg10: memref<256x1xi32, #tpu.memory_space<vmem>>) attributes {dimension_semantics = [#tpu.dimension_semantics<parallel>], iteration_bounds = array<i64: 2>, scalar_prefetch = 1 : i64, scratch_operands = 0 : i64, tpu.core_type = #tpu.core_type<tc>, window_params = [{transform_indices = @transform_0, window_bounds = array<i64: 256, 64>}, {pipeline_mode = #tpu.pipeline_mode<synchronous>, transform_indices = @transform_1, window_bounds = array<i64: 64, 256>}, {pipeline_mode = #tpu.pipeline_mode<synchronous>, transform_indices = @transform_2, window_bounds = array<i64: 1, 256>}, {pipeline_mode = #tpu.pipeline_mode<synchronous>, transform_indices = @transform_3, window_bounds = array<i64: 1, 256>}, {pipeline_mode = #tpu.pipeline_mode<synchronous>, transform_indices = @transform_4, window_bounds = array<i64: 1, 256>}, {transform_indices = @transform_5, window_bounds = array<i64: 256, 1>}, {transform_indices = @transform_6, window_bounds = array<i64: 256, 256>}, {transform_indices = @transform_7, window_bounds = array<i64: 1, 8, 128>}, {transform_indices = @transform_8, window_bounds = array<i64: 256, 1>}]} {
    %c0 = arith.constant 0 : index
    %c0_0 = arith.constant 0 : index
    %0 = vector.load %arg2[%c0, %c0_0] : memref<256x64xf32, #tpu.memory_space<vmem>>, vector<256x64xf32>
    %1 = arith.truncf %0 : vector<256x64xf32> to vector<256x64xbf16>
    %c0_1 = arith.constant 0 : index
    %c0_2 = arith.constant 0 : index
    %2 = vector.load %arg3[%c0_1, %c0_2] : memref<64x256xbf16, #tpu.memory_space<vmem>>, vector<64x256xbf16>
    %cst = arith.constant dense<0.000000e+00> : vector<256x256xf32>
    %3 = tpu.matmul %1, %2, %cst {dimension_numbers = #tpu.dot_dimension_numbers<[1], [0], [0], [1], [0, 0, 1, 1], [], []>} : vector<256x64xbf16>, vector<64x256xbf16>, vector<256x256xf32> -> vector<256x256xf32>
    %c0_3 = arith.constant 0 : index
    %c0_4 = arith.constant 0 : index
    %4 = vector.load %arg4[%c0_3, %c0_4] : memref<1x256xf32, #tpu.memory_space<vmem>>, vector<1x256xf32>
    %5 = vector.broadcast %4 : vector<1x256xf32> to vector<256x256xf32>
    %6 = arith.addf %3, %5 : vector<256x256xf32>
    %cst_5 = arith.constant 5.000000e-01 : f32
    %7 = vector.broadcast %cst_5 : f32 to vector<256x256xf32>
    %8 = arith.mulf %7, %6 : vector<256x256xf32>
    %cst_6 = arith.constant 4.471500e-02 : f32
    %9 = vector.broadcast %cst_6 : f32 to vector<256x256xf32>
    %10 = arith.mulf %9, %6 : vector<256x256xf32>
    %11 = arith.mulf %10, %6 : vector<256x256xf32>
    %12 = arith.mulf %11, %6 : vector<256x256xf32>
    %13 = arith.addf %6, %12 : vector<256x256xf32>
    %cst_7 = arith.constant 0.797884583 : f32
    %14 = vector.broadcast %cst_7 : f32 to vector<256x256xf32>
    %15 = arith.mulf %14, %13 : vector<256x256xf32>
    %16 = math.tanh %15 : vector<256x256xf32>
    %cst_8 = arith.constant 1.000000e+00 : f32
    %17 = vector.broadcast %cst_8 : f32 to vector<256x256xf32>
    %18 = arith.addf %17, %16 : vector<256x256xf32>
    %19 = arith.mulf %8, %18 : vector<256x256xf32>
    %cst_9 = arith.constant dense<0.000000e+00> : vector<256xf32>
    %20 = vector.multi_reduction <add>, %19, %cst_9 [1] : vector<256x256xf32> to vector<256xf32>
    %21 = vector.shape_cast %20 : vector<256xf32> to vector<256x1xf32>
    %cst_10 = arith.constant 2.560000e+02 : f32
    %22 = vector.broadcast %cst_10 : f32 to vector<256x1xf32>
    %23 = arith.divf %21, %22 : vector<256x1xf32>
    %24 = vector.broadcast %23 : vector<256x1xf32> to vector<256x256xf32>
    %25 = arith.subf %19, %24 : vector<256x256xf32>
    %26 = arith.mulf %25, %25 : vector<256x256xf32>
    %cst_11 = arith.constant dense<0.000000e+00> : vector<256xf32>
    %27 = vector.multi_reduction <add>, %26, %cst_11 [1] : vector<256x256xf32> to vector<256xf32>
    %28 = vector.shape_cast %27 : vector<256xf32> to vector<256x1xf32>
    %cst_12 = arith.constant 2.560000e+02 : f32
    %29 = vector.broadcast %cst_12 : f32 to vector<256x1xf32>
    %30 = arith.divf %28, %29 : vector<256x1xf32>
    %cst_13 = arith.constant 9.99999974E-6 : f32
    %31 = vector.broadcast %cst_13 : f32 to vector<256x1xf32>
    %32 = arith.addf %30, %31 : vector<256x1xf32>
    %33 = math.rsqrt %32 : vector<256x1xf32>
    %34 = vector.broadcast %33 : vector<256x1xf32> to vector<256x256xf32>
    %35 = arith.mulf %25, %34 : vector<256x256xf32>
    %c0_14 = arith.constant 0 : index
    %c0_15 = arith.constant 0 : index
    %36 = vector.load %arg5[%c0_14, %c0_15] : memref<1x256xf32, #tpu.memory_space<vmem>>, vector<1x256xf32>
    %37 = vector.broadcast %36 : vector<1x256xf32> to vector<256x256xf32>
    %38 = arith.mulf %35, %37 : vector<256x256xf32>
    %c0_16 = arith.constant 0 : index
    %c0_17 = arith.constant 0 : index
    %39 = vector.load %arg6[%c0_16, %c0_17] : memref<1x256xf32, #tpu.memory_space<vmem>>, vector<1x256xf32>
    %40 = vector.broadcast %39 : vector<1x256xf32> to vector<256x256xf32>
    %41 = arith.addf %38, %40 : vector<256x256xf32>
    %42 = arith.truncf %41 : vector<256x256xf32> to vector<256x256xbf16>
    %c0_18 = arith.constant 0 : index
    %c0_19 = arith.constant 0 : index
    %43 = vector.load %arg8[%c0_18, %c0_19] : memref<256x256xbf16, #tpu.memory_space<vmem>>, vector<256x256xbf16>
    tpu.vector_store %arg8[%c0_18, %c0_19], %42 {strides = array<i32>} : memref<256x256xbf16, #tpu.memory_space<vmem>>, vector<256x256xbf16>,
    %44 = tpu.iota {dimensions = array<i32: 1>} : vector<256x256xi32>
    %c0_20 = arith.constant 0 : index
    %c0_21 = arith.constant 0 : index
    %45 = vector.load %arg7[%c0_20, %c0_21] : memref<256x1xi32, #tpu.memory_space<vmem>>, vector<256x1xi32>
    %cst_22 = arith.constant dense<0xFF800000> : vector<256xf32>
    %46 = vector.multi_reduction <maximumf>, %41, %cst_22 [1] : vector<256x256xf32> to vector<256xf32>
    %47 = vector.shape_cast %46 : vector<256xf32> to vector<256x1xf32>
    %48 = vector.broadcast %47 : vector<256x1xf32> to vector<256x256xf32>
    %49 = arith.subf %41, %48 : vector<256x256xf32>
    %50 = math.exp %49 : vector<256x256xf32>
    %cst_23 = arith.constant dense<0.000000e+00> : vector<256xf32>
    %51 = vector.multi_reduction <add>, %50, %cst_23 [1] : vector<256x256xf32> to vector<256xf32>
    %52 = vector.shape_cast %51 : vector<256xf32> to vector<256x1xf32>
    %53 = math.log %52 : vector<256x1xf32>
    %54 = arith.addf %53, %47 : vector<256x1xf32>
    %55 = vector.broadcast %45 : vector<256x1xi32> to vector<256x256xi32>
    %56 = arith.cmpi eq, %44, %55 : vector<256x256xi32>
    %cst_24 = arith.constant 0.000000e+00 : f32
    %57 = vector.broadcast %cst_24 : f32 to vector<256x256xf32>
    %58 = arith.select %56, %41, %57 : vector<256x256xi1>, vector<256x256xf32>
    %cst_25 = arith.constant dense<0.000000e+00> : vector<256xf32>
    %59 = vector.multi_reduction <add>, %58, %cst_25 [1] : vector<256x256xf32> to vector<256xf32>
    %60 = vector.shape_cast %59 : vector<256xf32> to vector<256x1xf32>
    %61 = arith.subf %54, %60 : vector<256x1xf32>
    %c0_i32 = arith.constant 0 : i32
    %62 = vector.broadcast %c0_i32 : i32 to vector<256x1xi32>
    %63 = arith.cmpi ne, %45, %62 : vector<256x1xi32>
    %cst_26 = arith.constant 0.000000e+00 : f32
    %64 = vector.broadcast %cst_26 : f32 to vector<256x1xf32>
    %65 = arith.select %63, %61, %64 : vector<256x1xi1>, vector<256x1xf32>
    %cst_27 = arith.constant dense<0.000000e+00> : vector<1xf32>
    %66 = vector.multi_reduction <add>, %65, %cst_27 [0] : vector<256x1xf32> to vector<1xf32>
    %67 = vector.shape_cast %66 : vector<1xf32> to vector<1x1xf32>
    %68 = arith.extui %63 : vector<256x1xi1> to vector<256x1xi32>
    %69 = arith.sitofp %68 : vector<256x1xi32> to vector<256x1xf32>
    %cst_28 = arith.constant dense<0.000000e+00> : vector<1xf32>
    %70 = vector.multi_reduction <add>, %69, %cst_28 [0] : vector<256x1xf32> to vector<1xf32>
    %71 = vector.shape_cast %70 : vector<1xf32> to vector<1x1xf32>
    %72 = tpu.iota {dimensions = array<i32: 1>} : vector<8x128xi32>
    %c0_i32_29 = arith.constant 0 : i32
    %73 = vector.broadcast %c0_i32_29 : i32 to vector<8x128xi32>
    %74 = arith.cmpi eq, %72, %73 : vector<8x128xi32>
    %c1_i32 = arith.constant 1 : i32
    %75 = vector.broadcast %c1_i32 : i32 to vector<8x128xi32>
    %76 = arith.cmpi eq, %72, %75 : vector<8x128xi32>
    %cst_30 = arith.constant 0.000000e+00 : f32
    %77 = vector.shape_cast %71 : vector<1x1xf32> to vector<1x1xf32>
    %78 = vector.broadcast %77 : vector<1x1xf32> to vector<8x128xf32>
    %79 = vector.broadcast %cst_30 : f32 to vector<8x128xf32>
    %80 = arith.select %76, %78, %79 : vector<8x128xi1>, vector<8x128xf32>
    %81 = vector.shape_cast %67 : vector<1x1xf32> to vector<1x1xf32>
    %82 = vector.broadcast %81 : vector<1x1xf32> to vector<8x128xf32>
    %83 = arith.select %74, %82, %80 : vector<8x128xi1>, vector<8x128xf32>
    %c0_31 = arith.constant 0 : index
    %c0_32 = arith.constant 0 : index
    %c0_33 = arith.constant 0 : index
    %84 = vector.load %arg9[%c0_31, %c0_32, %c0_33] : memref<1x8x128xf32, #tpu.memory_space<vmem>>, vector<1x8x128xf32>
    %85 = vector.shape_cast %84 : vector<1x8x128xf32> to vector<8x128xf32>
    %86 = vector.shape_cast %83 : vector<8x128xf32> to vector<1x8x128xf32>
    tpu.vector_store %arg9[%c0_31, %c0_32, %c0_33], %86 {strides = array<i32>} : memref<1x8x128xf32, #tpu.memory_space<vmem>>, vector<1x8x128xf32>,
    %c0_34 = arith.constant 0 : index
    %87 = memref.load %arg1[%c0_34] : memref<1xi32, #tpu.memory_space<smem>>
    %c65536_i32 = arith.constant 65536 : i32
    %88 = arith.muli %arg0, %c65536_i32 : i32
    %89 = arith.addi %87, %88 : i32
    %90 = tpu.iota {dimensions = array<i32: 0>} : vector<256x1xi32>
    %c256_i32 = arith.constant 256 : i32
    %91 = vector.broadcast %c256_i32 : i32 to vector<256x1xi32>
    %92 = arith.muli %90, %91 : vector<256x1xi32>
    %93 = vector.broadcast %89 : i32 to vector<256x1xi32>
    %94 = arith.addi %93, %92 : vector<256x1xi32>
    %95 = vector.broadcast %94 : vector<256x1xi32> to vector<256x256xi32>
    %96 = arith.addi %95, %44 : vector<256x256xi32>
    %c16_i32 = arith.constant 16 : i32
    %97 = vector.broadcast %c16_i32 : i32 to vector<256x256xi32>
    %98 = arith.shrui %96, %97 : vector<256x256xi32>
    %99 = arith.xori %96, %98 : vector<256x256xi32>
    %c-2048144789_i32 = arith.constant -2048144789 : i32
    %100 = vector.broadcast %c-2048144789_i32 : i32 to vector<256x256xi32>
    %101 = arith.muli %99, %100 : vector<256x256xi32>
    %c13_i32 = arith.constant 13 : i32
    %102 = vector.broadcast %c13_i32 : i32 to vector<256x256xi32>
    %103 = arith.shrui %101, %102 : vector<256x256xi32>
    %104 = arith.xori %101, %103 : vector<256x256xi32>
    %c-1028477387_i32 = arith.constant -1028477387 : i32
    %105 = vector.broadcast %c-1028477387_i32 : i32 to vector<256x256xi32>
    %106 = arith.muli %104, %105 : vector<256x256xi32>
    %c16_i32_35 = arith.constant 16 : i32
    %107 = vector.broadcast %c16_i32_35 : i32 to vector<256x256xi32>
    %108 = arith.shrui %106, %107 : vector<256x256xi32>
    %109 = arith.xori %106, %108 : vector<256x256xi32>
    %c8388607_i32 = arith.constant 8388607 : i32
    %110 = vector.broadcast %c8388607_i32 : i32 to vector<256x256xi32>
    %111 = arith.andi %109, %110 : vector<256x256xi32>
    %112 = arith.sitofp %111 : vector<256x256xi32> to vector<256x256xf32>
    %cst_36 = arith.constant 1.1920929E-7 : f32
    %113 = vector.broadcast %cst_36 : f32 to vector<256x256xf32>
    %114 = arith.mulf %112, %113 : vector<256x256xf32>
    %cst_37 = arith.constant 1.1920929E-7 : f32
    %115 = vector.broadcast %cst_37 : f32 to vector<256x256xf32>
    %116 = arith.addf %114, %115 : vector<256x256xf32>
    %117 = math.log %116 : vector<256x256xf32>
    %cst_38 = arith.constant -9.99999996E-13 : f32
    %118 = vector.broadcast %cst_38 : f32 to vector<256x256xf32>
    %119 = arith.minimumf %117, %118 : vector<256x256xf32>
    %120 = arith.divf %50, %119 : vector<256x256xf32>
    %cst_39 = arith.constant dense<0x7F800000> : vector<256xf32>
    %121 = vector.multi_reduction <minimumf>, %120, %cst_39 [1] : vector<256x256xf32> to vector<256xf32>
    %122 = vector.shape_cast %121 : vector<256xf32> to vector<256x1xf32>
    %123 = vector.broadcast %122 : vector<256x1xf32> to vector<256x256xf32>
    %124 = arith.cmpf oeq, %120, %123 : vector<256x256xf32>
    %c256_i32_40 = arith.constant 256 : i32
    %125 = vector.broadcast %c256_i32_40 : i32 to vector<256x256xi32>
    %126 = arith.select %124, %44, %125 : vector<256x256xi1>, vector<256x256xi32>
    %cst_41 = arith.constant dense<2147483647> : vector<256xi32>
    %127 = vector.multi_reduction <minsi>, %126, %cst_41 [1] : vector<256x256xi32> to vector<256xi32>
    %128 = vector.shape_cast %127 : vector<256xi32> to vector<256x1xi32>
    %c0_42 = arith.constant 0 : index
    %c0_43 = arith.constant 0 : index
    %129 = vector.load %arg10[%c0_42, %c0_43] : memref<256x1xi32, #tpu.memory_space<vmem>>, vector<256x1xi32>
    tpu.vector_store %arg10[%c0_42, %c0_43], %128 {strides = array<i32>} : memref<256x1xi32, #tpu.memory_space<vmem>>, vector<256x1xi32>,
    return
  }
  func.func @transform_0(%arg0: i32, %arg1: memref<1xi32, #tpu.memory_space<smem>>) -> (i32, i32) {
    %c0_i32 = arith.constant 0 : i32
    %c0_i32_0 = arith.constant 0 : i32
    return %arg0, %c0_i32 : i32, i32
  }
  func.func @transform_1(%arg0: i32, %arg1: memref<1xi32, #tpu.memory_space<smem>>) -> (i32, i32) {
    %c0_i32 = arith.constant 0 : i32
    %c0_i32_0 = arith.constant 0 : i32
    %c0_i32_1 = arith.constant 0 : i32
    return %c0_i32, %c0_i32_0 : i32, i32
  }
  func.func @transform_2(%arg0: i32, %arg1: memref<1xi32, #tpu.memory_space<smem>>) -> (i32, i32) {
    %c0_i32 = arith.constant 0 : i32
    %c0_i32_0 = arith.constant 0 : i32
    %c0_i32_1 = arith.constant 0 : i32
    return %c0_i32, %c0_i32_0 : i32, i32
  }
  func.func @transform_3(%arg0: i32, %arg1: memref<1xi32, #tpu.memory_space<smem>>) -> (i32, i32) {
    %c0_i32 = arith.constant 0 : i32
    %c0_i32_0 = arith.constant 0 : i32
    %c0_i32_1 = arith.constant 0 : i32
    return %c0_i32, %c0_i32_0 : i32, i32
  }
  func.func @transform_4(%arg0: i32, %arg1: memref<1xi32, #tpu.memory_space<smem>>) -> (i32, i32) {
    %c0_i32 = arith.constant 0 : i32
    %c0_i32_0 = arith.constant 0 : i32
    %c0_i32_1 = arith.constant 0 : i32
    return %c0_i32, %c0_i32_0 : i32, i32
  }
  func.func @transform_5(%arg0: i32, %arg1: memref<1xi32, #tpu.memory_space<smem>>) -> (i32, i32) {
    %c0_i32 = arith.constant 0 : i32
    %c0_i32_0 = arith.constant 0 : i32
    return %arg0, %c0_i32 : i32, i32
  }
  func.func @transform_6(%arg0: i32, %arg1: memref<1xi32, #tpu.memory_space<smem>>) -> (i32, i32) {
    %c0_i32 = arith.constant 0 : i32
    %c0_i32_0 = arith.constant 0 : i32
    return %arg0, %c0_i32 : i32, i32
  }
  func.func @transform_7(%arg0: i32, %arg1: memref<1xi32, #tpu.memory_space<smem>>) -> (i32, i32, i32) {
    %c0_i32 = arith.constant 0 : i32
    %c0_i32_0 = arith.constant 0 : i32
    %c0_i32_1 = arith.constant 0 : i32
    return %arg0, %c0_i32, %c0_i32_0 : i32, i32, i32
  }
  func.func @transform_8(%arg0: i32, %arg1: memref<1xi32, #tpu.memory_space<smem>>) -> (i32, i32) {
    %c0_i32 = arith.constant 0 : i32
    %c0_i32_0 = arith.constant 0 : i32
    return %arg0, %c0_i32 : i32, i32
  }
}

</mosaic_0001>

<bundles_post_ra>
// kernel: tpu_custom_call.1
= control target key start
LH: loop header
LB: loop body
LE: loop exit
PB: predicated region body
PF: predicated region fallthrough
CT: control target
= control target key end

     0   :  { %s14361_s0 = inlined_call_operand.<no memory space> [shape: s32[1], index: 0, kind: input, shape index: {}]   ;;  %s14362_s1 = inlined_call_operand.vmem [shape: f32[320,64], index: 1, kind: input, shape index: {}]   ;;  %s14363_s2 = inlined_call_operand.vmem [shape: bf16[64,256], index: 2, kind: input, shape index: {}]   ;;  %s14364_s3 = inlined_call_operand.vmem [shape: f32[1,256], index: 3, kind: input, shape index: {}]   ;;  %s14365_s4 = inlined_call_operand.vmem [shape: f32[1,256], index: 4, kind: input, shape index: {}]   ;;  %s14366_s5 = inlined_call_operand.vmem [shape: f32[1,256], index: 5, kind: input, shape index: {}]   ;;  %s14367_s6 = inlined_call_operand.vmem [shape: s32[512,1], index: 6, kind: input, shape index: {}]   ;;  %s14368_s7 = inlined_call_operand.hbm [shape: bf16[320,256], index: 7, kind: output, shape index: {0}]   ;;  %s14369_s8 = inlined_call_operand.hbm [shape: f32[2,8,128], index: 8, kind: output, shape index: {1}]   ;;  %s14370_s9 = inlined_call_operand.vmem [shape: s32[320,1], index: 9, kind: output, shape index: {2}]  }
   0x1   :  { %14812 = sst [smem:[#allocation169_spill]] %s14362_s1 }
   0x2   :  { %14813 = sst [smem:[#allocation170_spill]] %s14363_s2 }
   0x3   :  { %14814 = sst [smem:[#allocation171_spill]] %s14364_s3 }
   0x4   :  { %14815 = sst [smem:[#allocation172_spill]] %s14365_s4 }
   0x5   :  { %14816 = sst [smem:[#allocation173_spill]] %s14366_s5 }
   0x6   :  { %14817 = sst [smem:[#allocation174_spill]] %s14367_s6 }
   0x7   :  { %14818 = sst [smem:[#allocation175_spill]] %s14368_s7 }
   0x8   :  { %15 = sst [smem:[#allocation3]] %s14361_s0 }
   0x9   :  { %16 = vsyncpa [#allocation5], 0 }
   0xa   :  { %18 = vsyncpa [#allocation5 + $0x1], 0 }
   0xb   :  { %19 = vsyncpa [#allocation7], 0 }
   0xc   :  { %21 = vsyncpa [#allocation7 + $0x1], 0  ;;  %s7910_s11 = smov 0   ;;  %s7912_s12 = smov 0  }
   0xd   :  { %s7914_s13 = smov 0   ;;  %s7916_s14 = smov 0  }
   0xe LB: > { %s7931_s0 = sadd.s32 4294967295, %s7817_s14   ;;  %s6765_s15 = sadd.s32 4294967294, %s7817_s14   ;;  %s7817_s14 = sphi %s7916_s14, %s15913_s14   ;;  %s7813_s13 = sphi %s7914_s13, %s15912_s13   ;;  %s7809_s12 = sphi %s7912_s12, %s15911_s12   ;;  %s7805_s11 = sphi %s7910_s11, %s15910_s11  }
   0xf   : > { %s7935_s16 = sadd.s32 1, %s7817_s14   ;;  %s170_s17 = sadd.s32 1, %s7813_s13 }
  0x10   : > { %s167_s18 = ssub.s32 %s7817_s14, %s7935_s16  ;;  %p180_p0 = scmp.ne.s32.totalorder %s7813_s13, %s7809_s12 }
  0x11   : > { %p168_p1 = scmp.eq.s32.totalorder %s167_s18, 0  ;;  %p181_p2 = scmp.eq.s32.totalorder %s7931_s0, 1 }
  0x12   : > { %p186_p3 = scmp.ne.s32.totalorder %s7809_s12, %s7805_s11  ;;  %p187_p4 = scmp.eq.s32.totalorder %s6765_s15, 1 }
  0x13   : > { %s7946_s19 = scalar_select %p168_p1, %s7813_s13, %s170_s17  }
  0x14   : > { %p7948_p5 = por %p181_p2, %p180_p0  ;;  %p7952_p6 = por %p187_p4, %p186_p3 }
  0x15   : > { %p6768_p7 = scmp.ge.s32.totalorder %s7817_s14, 1  ;;  %p295_p8 = scmp.lt.s32.totalorder %s7817_s14, 3 }
  0x17   : > { %p296_p9 = pnand %p6768_p7, %p295_p8 }
  0x19   : > { %299 = sbr.rel (%p296_p9) target bundleno = 1840 (0x730), region = 44 }
  0x1e   : > { %s14821_s2 = sld [smem:[#allocation170_spill]]  ;;  %s7974_s15 = sshll.u32 %s7931_s0, 5  ;;  %v7851_v7 = vmov 0   ;;  %vm3226_vm0 = vcmask 7168   ;;  %v7852_v27 = vmov 0.0   ;;  %vm481_vm6 = vcmask 523264  }
  0x1f   : > { %7037 = vset.pattern.permute.xlu1 %v7851_v7  ;;  %7036 = vset.pattern.permute.xlu0 %v7851_v7  ;;  %p362_p10 = scmp.lt.s32.totalorder %s7974_s15, 63  ;;  %p352_p11 = scmp.lt.s32.totalorder %s7974_s15, 39 }
  0x20   : > { %7035 = vset.pattern.permute.xlu2 %v7851_v7  ;;  %s14822_s6 = sld [smem:[#allocation174_spill]]  ;;  %s6872_s25 = sshll.u32 %s7931_s0, 16 }
  0x21   : > { %s363_s30 = scalar_select %p362_p10, %s7974_s15, 63 }
  0x22   : > { %s353_s23 = scalar_select %p352_p11, %s7974_s15, 39 }
  0x23   : > { %s6775_s24 = sshll.u32 %s363_s30, 3  ;;  %s14826_s1 = sld [smem:[#allocation169_spill]] }
  0x24   : > { %v6802_v0 = vld [vmem:[%s14821_s2 + $0x30] sm:$0xf]  ;;  %v6908_v1 = vld [vmem:[%s14821_s2 + $0x34] sm:$0xf0]  ;;  %v6907_v2 = vld [vmem:[%s14821_s2 + $0x34] sm:$0xf] }
  0x25   : > { %v6803_v3 = vor.u32 %v6908_v1, %v6802_v0  ;;  %v6804_v4 = vld [vmem:[%s14821_s2 + $0x38] sm:$0xf0]  ;;  %v6794_v5 = vld [vmem:[%s14821_s2 + $0x20] sm:$0xf]  ;;  %v6906_v8 = vld [vmem:[%s14821_s2 + $0x24] sm:$0xf0] }
  0x26   : > { %v6807_v6 = vor.u32 %v6907_v2, %v6804_v4  ;;  %v6905_v9 = vld [vmem:[%s14821_s2 + $0x24] sm:$0xf]  ;;  %v6796_v10 = vld [vmem:[%s14821_s2 + $0x28] sm:$0xf0]  ;;  %v6795_v11 = vor.u32 %v6906_v8, %v6794_v5  ;;  %v6786_v13 = vld [vmem:[%s14821_s2 + $0x10] sm:$0xf]  ;;  %s8010_s17 = scalar_lea.vmem %s14822_s6, %s6775_s24 }
  0x27   : > { %534 = vmatpush.bf16.msra.mxu0 %v6803_v3  ;;  %6915 = vmatpush.bf16.msra.mxu2 %v6803_v3  ;;  %v6799_v12 = vor.u32 %v6905_v9, %v6796_v10  ;;  %v6904_v14 = vld [vmem:[%s14821_s2 + $0x14] sm:$0xf0]  ;;  %v6903_v15 = vld [vmem:[%s14821_s2 + $0x14] sm:$0xf]  ;;  %v6788_v16 = vld [vmem:[%s14821_s2 + $0x18] sm:$0xf0] }
  0x28   : > { %623 = vmatpush.bf16.msra.mxu1 %v6807_v6  ;;  %6919 = vmatpush.bf16.msra.mxu3 %v6807_v6  ;;  %v6787_v17 = vor.u32 %v6904_v14, %v6786_v13  ;;  %v6778_v18 = vld [vmem:[%s14821_s2] sm:$0xf]  ;;  %v6902_v19 = vld [vmem:[%s14821_s2 + $0x4] sm:$0xf0]  ;;  %v6791_v20 = vor.u32 %v6903_v15, %v6788_v16  ;;  %v6901_v21 = vld [vmem:[%s14821_s2 + $0x4] sm:$0xf] }
  0x29   : > { %v6780_v22 = vld [vmem:[%s14821_s2 + $0x8] sm:$0xf0]  ;;  %s6773_s26 = sshll.u32 %s353_s23, 3  ;;  %v8019_v23 = vld [vmem:[%s8010_s17 + $0x10] sm:$0xff]  ;;  %v8025_v25 = vld [vmem:[%s8010_s17] sm:$0xff]  ;;  %v6779_v26 = vor.u32 %v6902_v19, %v6778_v18  ;;  %s14856_s3 = sld [smem:[#allocation171_spill]] }
  0x2a   : > { %14823 = vst [vmem:[#allocation11_spill] sm:$0xff] %v8019_v23  ;;  %v8022_v24 = vld [vmem:[%s8010_s17 + $0x8] sm:$0xff]  ;;  %s8030_s28 = scalar_lea.vmem %s14826_s1, %s6773_s26  ;;  %2817 = vperm.xlu1 %7037, %v8019_v23   ;;  %vm14668_vm1 = vcmp.ne.s32.totalorder %v8019_v23, 0  ;;  %vm3162_vm3 = vcmp.ne.s32.totalorder %v8025_v25, 0  ;;  %2811 = vperm.xlu2 %7035, %v8025_v25   ;;  %v6783_v31 = vor.u32 %v6901_v21, %v6780_v22  ;;  %v8051_v33 = vld [vmem:[%s8010_s17 + $0x18] sm:$0xff]  ;;  %v8063_v42 = vld [vmem:[%s8010_s17 + $0x20] sm:$0xff] }
  0x2b   : > { %535 = vmatpush.bf16.msra.mxu0 %v6795_v11  ;;  %6916 = vmatpush.bf16.msra.mxu2 %v6795_v11  ;;  %14824 = vst [vmem:[#allocation12_spill] sm:$0xff] %v8022_v24  ;;  %vm3163_vm2 = vcmp.ne.s32.totalorder %v8022_v24, 0  ;;  %v6842_v28 = vsel %vm14668_vm1, 1.0, %v7852_v27  ;;  %v6840_v30 = vsel %vm3162_vm3, 1.0, %v7852_v27  ;;  %v8048_v32 = vld [vmem:[%s8010_s17 + $0x28] sm:$0xff]  ;;  %v379_v37 = vld [vmem:[%s8030_s28] sm:$0xff] }
  0x2c   : > { %624 = vmatpush.bf16.msra.mxu1 %v6799_v12  ;;  %6920 = vmatpush.bf16.msra.mxu3 %v6799_v12  ;;  %14825 = vst [vmem:[#allocation13_spill] sm:$0xff] %v8025_v25  ;;  %v6841_v29 = vsel %vm3163_vm2, 1.0, %v7852_v27  ;;  %v3363_v34 = vsel %vm3226_vm0, %v6842_v28, 0.0  ;;  %v3360_v36 = vsel %vm3226_vm0, %v6840_v30, 0.0  ;;  %vm14570_vm4 = vcmp.ne.s32.totalorder %v8048_v32, 0  ;;  %v380_v38 = vld [vmem:[%s8030_s28 + $0x8] sm:$0xff] }
  0x2d   : > { %2814 = vperm.xlu0 %7036, %v8022_v24   ;;  %14827 = vst [vmem:[#allocation14_spill] sm:$0xff] %v8048_v32  ;;  %v3361_v35 = vsel %vm3226_vm0, %v6841_v29, 0.0  ;;  %vm14571_vm5 = vcmp.ne.s32.totalorder %v8051_v33, 0  ;;  %v395_v40 = vld [vmem:[%s8030_s28 + $0x80] sm:$0xff]  ;;  %v396_v41 = vld [vmem:[%s8030_s28 + $0x88] sm:$0xff]  ;;  %v6845_v45 = vsel %vm14570_vm4, 1.0, %v7852_v27  ;;  %v411_v48 = vpack.c.bf16 %v380_v38, %v379_v37 }
  0x2e   : > { %14828 = vst [vmem:[#allocation15_spill] sm:$0xff] %v8051_v33  ;;  %v3362_v39 = vadd.f32 %v3361_v35, %v3360_v36  ;;  %v6843_v43 = vsel %vm14571_vm5, 1.0, %v7852_v27  ;;  %v8072_v46 = vld [vmem:[%s8010_s17 + $0x40] sm:$0xff]  ;;  %v8076_v49 = vld [vmem:[%s8010_s17 + $0x38] sm:$0xff]  ;;  %v419_v50 = vpack.c.bf16 %v396_v41, %v395_v40  ;;  %vm14667_vm8 = vcmp.ne.s32.totalorder %v8063_v42, 0  ;;  %v8081_v51 = vld [vmem:[%s8010_s17 + $0x30] sm:$0xff] }
  0x2f   : > { %536 = vmatpush.bf16.msra.mxu0 %v6787_v17  ;;  %6917 = vmatpush.bf16.msra.mxu2 %v6787_v17  ;;  %14829 = vst [vmem:[#allocation16_spill] sm:$0xff] %v8063_v42  ;;  %v3365_v47 = vsel %vm3226_vm0, %v6843_v43, 0.0  ;;  %vm14569_vm7 = vcmp.ne.s32.totalorder %v8076_v49, 0  ;;  %v6844_v53 = vsel %vm14667_vm8, 1.0, %v7852_v27  ;;  %v3369_v54 = vsel %vm3226_vm0, %v6845_v45, 0.0  ;;  %v8098_v58 = vld [vmem:[%s8010_s17 + $0x48] sm:$0xff] }
  0x30   : > { %625 = vmatpush.bf16.msra.mxu1 %v6791_v20  ;;  %6921 = vmatpush.bf16.msra.mxu3 %v6791_v20  ;;  %v3364_v44 = vadd.f32 %v3363_v34, %v3362_v39  ;;  %14830 = vst [vmem:[#allocation17_spill] sm:$0xff] %v8072_v46  ;;  %vm14529_vm9 = vcmp.ne.s32.totalorder %v8072_v46, 0  ;;  %v3367_v55 = vsel %vm3226_vm0, %v6844_v53, 0.0  ;;  %v6847_v56 = vsel %vm14569_vm7, 1.0, %v7852_v27  ;;  %v8110_v61 = vld [vmem:[%s8010_s17 + $0x50] sm:$0xff]  ;;  %v8117_v1 = vld [vmem:[%s8010_s17 + $0x58] sm:$0xff] }
  0x31   : > { %14831 = vst [vmem:[#allocation18_spill] sm:$0xff] %v8076_v49  ;;  %vm14530_vm10 = vcmp.ne.s32.totalorder %v8081_v51, 0  ;;  %v6848_v60 = vsel %vm14529_vm9, 1.0, %v7852_v27  ;;  %v3373_v0 = vsel %vm3226_vm0, %v6847_v56, 0.0  ;;  %vm14528_vm11 = vcmp.ne.s32.totalorder %v8110_v61, 0  ;;  %v8123_v4 = vld [vmem:[%s8010_s17 + $0x60] sm:$0xff] }
  0x32   : > { %14832 = vst [vmem:[#allocation19_spill] sm:$0xff] %v8081_v51  ;;  %v3366_v52 = vadd.f32 %v3365_v47, %v3364_v44  ;;  %2826 = vperm.xlu1 %7037, %v8048_v32   ;;  %2820 = vperm.xlu2 %7035, %v8051_v33   ;;  %v6846_v59 = vsel %vm14530_vm10, 1.0, %v7852_v27  ;;  %vm14376_vm12 = vcmp.ne.s32.totalorder %v8098_v58, 0  ;;  %v3375_v5 = vsel %vm3226_vm0, %v6848_v60, 0.0  ;;  %v8139_v10 = vld [vmem:[%s8010_s17 + $0x68] sm:$0xff]  ;;  %v8143_v13 = vld [vmem:[%s8010_s17 + $0x70] sm:$0xff] }
  0x33   : > { %537 = vmatpush.bf16.msra.mxu0 %v6779_v26  ;;  %6918 = vmatpush.bf16.msra.mxu2 %v6779_v26  ;;  %14833 = vst [vmem:[#allocation20_spill] sm:$0xff] %v8098_v58  ;;  %v3371_v62 = vsel %vm3226_vm0, %v6846_v59, 0.0  ;;  %v6849_v3 = vsel %vm14376_vm12, 1.0, %v7852_v27  ;;  %vm14371_vm13 = vcmp.ne.s32.totalorder %v8117_v1, 0  ;;  %v6850_v6 = vsel %vm14528_vm11, 1.0, %v7852_v27  ;;  %v381_v14 = vld [vmem:[%s8030_s28 + $0x10] sm:$0xff] }
  0x34   : > { %626 = vmatpush.bf16.msra.mxu1 %v6783_v31  ;;  %6922 = vmatpush.bf16.msra.mxu3 %v6783_v31  ;;  %v3368_v57 = vadd.f32 %v3367_v55, %v3366_v52  ;;  %14834 = vst [vmem:[#allocation21_spill] sm:$0xff] %v8110_v61  ;;  %v3377_v8 = vsel %vm3226_vm0, %v6849_v3, 0.0  ;;  %vm14372_vm14 = vcmp.ne.s32.totalorder %v8123_v4, 0  ;;  %v6851_v9 = vsel %vm14371_vm13, 1.0, %v7852_v27  ;;  %v382_v15 = vld [vmem:[%s8030_s28 + $0x18] sm:$0xff]  ;;  %v397_v16 = vld [vmem:[%s8030_s28 + $0x90] sm:$0xff] }
  0x35   : > { %2835 = vperm.xlu0 %7036, %v8072_v46   ;;  %14835 = vst [vmem:[#allocation22_spill] sm:$0xff] %v8117_v1  ;;  %v3379_v12 = vsel %vm3226_vm0, %v6850_v6, 0.0  ;;  %vm14373_vm15 = vcmp.ne.s32.totalorder %v8139_v10, 0  ;;  %v398_v17 = vld [vmem:[%s8030_s28 + $0x98] sm:$0xff]  ;;  %v6852_v19 = vsel %vm14372_vm14, 1.0, %v7852_v27  ;;  %v3381_v21 = vsel %vm3226_vm0, %v6851_v9, 0.0 }
  0x36   : > { %6808 = vmatmul.msk.bf16.vlgmr.msra.gmra.mxu0 %vm481_vm6, %v411_v48  ;;  %6816 = vmatmul.msk.bf16.vlgmr.msra.gmra.mxu2 %vm481_vm6, %v419_v50  ;;  %v3370_v63 = vadd.f32 %v3369_v54, %v3368_v57  ;;  %14836 = vst [vmem:[#allocation23_spill] sm:$0xff] %v8123_v4  ;;  %v8154_v20 = vld [vmem:[%s8010_s17 + $0x78] sm:$0xff]  ;;  %vm14374_vm13 = vcmp.ne.s32.totalorder %v8143_v13, 0  ;;  %v412_v22 = vpack.c.bf16 %v382_v15, %v381_v14  ;;  %v6853_v26 = vsel %vm14373_vm15, 1.0, %v7852_v27  ;;  %v8162_v29 = vld [vmem:[%s8010_s17 + $0x80] sm:$0xff]  ;;  %v8176_v37 = vld [vmem:[%s8010_s17 + $0x88] sm:$0xff] }
  0x37   : > { %6824 = vmatmul.msk.bf16.vlgmr.msra.gmra.mxu1 %vm481_vm6, %v411_v48  ;;  %6832 = vmatmul.msk.bf16.vlgmr.msra.gmra.mxu3 %vm481_vm6, %v419_v50  ;;  %14837 = vst [vmem:[#allocation24_spill] sm:$0xff] %v8139_v10  ;;  %v420_v30 = vpack.c.bf16 %v398_v17, %v397_v16  ;;  %v3383_v31 = vsel %vm3226_vm0, %v6852_v19, 0.0  ;;  %vm14375_vm14 = vcmp.ne.s32.totalorder %v8154_v20, 0  ;;  %v6854_v34 = vsel %vm14374_vm13, 1.0, %v7852_v27  ;;  %v8182_v40 = vld [vmem:[%s8010_s17 + $0x90] sm:$0xff]  ;;  %v8193_v45 = vld [vmem:[%s8010_s17 + $0x98] sm:$0xff] }
  0x38   : > { %v3372_v2 = vadd.f32 %v3371_v62, %v3370_v63  ;;  %14838 = vst [vmem:[#allocation25_spill] sm:$0xff] %v8143_v13  ;;  %v3385_v36 = vsel %vm3226_vm0, %v6853_v26, 0.0  ;;  %vm14388_vm15 = vcmp.ne.s32.totalorder %v8162_v29, 0  ;;  %v6855_v39 = vsel %vm14375_vm14, 1.0, %v7852_v27  ;;  %v8203_v53 = vld [vmem:[%s8010_s17 + $0xa0] sm:$0xff]  ;;  %v8209_v56 = vld [vmem:[%s8010_s17 + $0xa8] sm:$0xff] }
  0x39   : > { %14839 = vst [vmem:[#allocation26_spill] sm:$0xff] %v8154_v20  ;;  %v3387_v41 = vsel %vm3226_vm0, %v6854_v34, 0.0  ;;  %vm14377_vm13 = vcmp.ne.s32.totalorder %v8176_v37, 0  ;;  %v6856_v43 = vsel %vm14388_vm15, 1.0, %v7852_v27  ;;  %v3389_v47 = vsel %vm3226_vm0, %v6855_v39, 0.0  ;;  %v8220_v62 = vld [vmem:[%s8010_s17 + $0xb0] sm:$0xff] }
  0x3a   : > { %v3374_v7 = vadd.f32 %v3373_v0, %v3372_v2  ;;  %2832 = vperm.xlu1 %7037, %v8076_v49   ;;  %2823 = vperm.xlu2 %7035, %v8063_v42   ;;  %14840 = vst [vmem:[#allocation27_spill] sm:$0xff] %v8162_v29  ;;  %vm14378_vm14 = vcmp.ne.s32.totalorder %v8182_v40, 0  ;;  %v6857_v48 = vsel %vm14377_vm13, 1.0, %v7852_v27  ;;  %v3391_v52 = vsel %vm3226_vm0, %v6856_v43, 0.0  ;;  %v383_v63 = vld [vmem:[%s8030_s28 + $0x20] sm:$0xff]  ;;  %v384_v0 = vld [vmem:[%s8030_s28 + $0x28] sm:$0xff] }
  0x3b   : > { %14841 = vst [vmem:[#allocation28_spill] sm:$0xff] %v8176_v37  ;;  %vm14379_vm12 = vcmp.ne.s32.totalorder %v8193_v45, 0  ;;  %v6858_v55 = vsel %vm14378_vm14, 1.0, %v7852_v27  ;;  %v3393_v57 = vsel %vm3226_vm0, %v6857_v48, 0.0  ;;  %vm14380_vm13 = vcmp.ne.s32.totalorder %v8203_v53, 0  ;;  %v400_v6 = vld [vmem:[%s8030_s28 + $0xa8] sm:$0xff] }
  0x3c   : > { %v3376_v11 = vadd.f32 %v3375_v5, %v3374_v7  ;;  %14842 = vst [vmem:[#allocation29_spill] sm:$0xff] %v8182_v40  ;;  %v6859_v59 = vsel %vm14379_vm12, 1.0, %v7852_v27  ;;  %v3395_v2 = vsel %vm3226_vm0, %v6858_v55, 0.0  ;;  %vm14381_vm14 = vcmp.ne.s32.totalorder %v8209_v56, 0  ;;  %v399_v5 = vld [vmem:[%s8030_s28 + $0xa0] sm:$0xff]  ;;  %s14991_s4 = sld [smem:[#allocation172_spill]] }
  0x3d   : > { %2844 = vperm.xlu0 %7036, %v8117_v1   ;;  %14843 = vst [vmem:[#allocation30_spill] sm:$0xff] %v8193_v45  ;;  %v6860_v3 = vsel %vm14380_vm13, 1.0, %v7852_v27  ;;  %vm14382_vm12 = vcmp.ne.s32.totalorder %v8220_v62, 0  ;;  %v413_v9 = vpack.c.bf16 %v384_v0, %v383_v63  ;;  %v6861_v14 = vsel %vm14381_vm14, 1.0, %v7852_v27  ;;  %v8240_v15 = vld [vmem:[%s8010_s17 + $0xc0] sm:$0xff]  ;;  %v386_v63 = vld [vmem:[%s8030_s28 + $0x38] sm:$0xff] }
  0x3e   : > { %v3378_v18 = vadd.f32 %v3377_v8, %v3376_v11  ;;  %14844 = vst [vmem:[#allocation31_spill] sm:$0xff] %v8203_v53  ;;  %v3397_v8 = vsel %vm3226_vm0, %v6859_v59, 0.0  ;;  %v8234_v11 = vld [vmem:[%s8010_s17 + $0xb8] sm:$0xff]  ;;  %v3399_v16 = vsel %vm3226_vm0, %v6860_v3, 0.0  ;;  %v421_v17 = vpack.c.bf16 %v400_v6, %v399_v5  ;;  %v8279_v43 = vld [vmem:[%s8010_s17 + $0xe0] sm:$0xff]  ;;  %v401_v0 = vld [vmem:[%s8030_s28 + $0xb0] sm:$0xff] }
  0x3f   : > { %14845 = vst [vmem:[#allocation32_spill] sm:$0xff] %v8209_v56  ;;  %vm14383_vm13 = vcmp.ne.s32.totalorder %v8234_v11, 0  ;;  %vm14384_vm14 = vcmp.ne.s32.totalorder %v8240_v15, 0  ;;  %v8310_v6 = vld [vmem:[%s8010_s17 + $0xf8] sm:$0xff]  ;;  %s14992_s5 = sld [smem:[#allocation173_spill]]  ;;  %s11789_s24 = sand.u32 1, %s7809_s12  }
  0x40   : > { %v3380_v28 = vadd.f32 %v3379_v12, %v3378_v18  ;;  %14846 = vst [vmem:[#allocation33_spill] sm:$0xff] %v8220_v62  ;;  %v6862_v18 = vsel %vm14382_vm12, 1.0, %v7852_v27  ;;  %v6863_v26 = vsel %vm14383_vm13, 1.0, %v7852_v27  ;;  %vm14505_vm15 = vcmp.ne.s32.totalorder %v8310_v6, 0  ;;  %s10679_s22 = sld [smem:[#allocation3]]  ;;  %s6769_s27 = sshll.u32 %s11789_s24, 8 }
  0x41   : > { %14847 = vst [vmem:[#allocation34_spill] sm:$0xff] %v8234_v11  ;;  %s14015_s23 = scalar_lea.vmem [#allocation8], %s6769_s27   ;;  %s6770_s29 = sshll.u32 %s11789_s24, 3 }
  0x42   : > { %v3382_v35 = vadd.f32 %v3381_v21, %v3380_v28  ;;  %2841 = vperm.xlu1 %7037, %v8110_v61   ;;  %2829 = vperm.xlu2 %7035, %v8081_v51   ;;  %14848 = vst [vmem:[#allocation35_spill] sm:$0xff] %v8240_v15  ;;  %v8248_v21 = vld [vmem:[%s8010_s17 + $0xc8] sm:$0xff]  ;;  %s14106_s10 = scalar_lea.vmem [#allocation6], %s6770_s29  ;;  %s6315_s18 = ssub.s32 (%p7948_p5), 40, %s7974_s15 }
  0x43   : > { %14849 = vst [vmem:[#allocation36_spill] sm:$0xff] %v8248_v21  ;;  %vm14385_vm12 = vcmp.ne.s32.totalorder %v8248_v21, 0  ;;  %p6316_p12 = scmp.lt.s32.totalorder (%p7948_p5), %s6315_s18, 32 }
  0x44   : > { %v3384_v38 = vadd.f32 %v3383_v31, %v3382_v35  ;;  %v8265_v31 = vld [vmem:[%s8010_s17 + $0xd0] sm:$0xff]  ;;  %v6864_v35 = vsel %vm14384_vm14, 1.0, %v7852_v27  ;;  %v6865_v39 = vsel %vm14385_vm12, 1.0, %v7852_v27  ;;  %14852 = vst [vmem:[#allocation39_spill] sm:$0xff] %v8279_v43  ;;  %vm14518_vm12 = vcmp.ne.s32.totalorder %v8279_v43, 0 }
  0x45   : > { %2853 = vperm.xlu0 %7036, %v8143_v13   ;;  %14850 = vst [vmem:[#allocation37_spill] sm:$0xff] %v8265_v31  ;;  %vm14386_vm13 = vcmp.ne.s32.totalorder %v8265_v31, 0  ;;  %v6868_v3 = vsel %vm14518_vm12, 1.0, %v7852_v27 }
  0x46   : > { %6809 = vmatmul.msk.bf16.gmra.mxu0 %vm481_vm6, %v412_v22  ;;  %6817 = vmatmul.msk.bf16.gmra.mxu2 %vm481_vm6, %v420_v30  ;;  %v3386_v44 = vadd.f32 %v3385_v36, %v3384_v38  ;;  %v8271_v36 = vld [vmem:[%s8010_s17 + $0xd8] sm:$0xff]  ;;  %v3405_v38 = vsel %vm3226_vm0, %v6863_v26, 0.0  ;;  %14855 = vst [vmem:[#allocation42_spill] sm:$0xff] %v8310_v6  ;;  %s3446_s26 = sadd.s32 %s6872_s25, %s10679_s22 }
  0x47   : > { %6825 = vmatmul.msk.bf16.gmra.mxu1 %vm481_vm6, %v412_v22  ;;  %6833 = vmatmul.msk.bf16.gmra.mxu3 %vm481_vm6, %v420_v30  ;;  %v3401_v22 = vsel %vm3226_vm0, %v6861_v14, 0.0  ;;  %v3403_v30 = vsel %vm3226_vm0, %v6862_v18, 0.0  ;;  %14851 = vst [vmem:[#allocation38_spill] sm:$0xff] %v8271_v36  ;;  %vm14387_vm14 = vcmp.ne.s32.totalorder %v8271_v36, 0 }
  0x48   : > { %v3388_v50 = vadd.f32 %v3387_v41, %v3386_v44  ;;  %v3407_v44 = vsel %vm3226_vm0, %v6864_v35, 0.0  ;;  %v6867_v55 = vsel %vm14387_vm14, 1.0, %v7852_v27 }
  0x4a   : > { %v3390_v54 = vadd.f32 %v3389_v47, %v3388_v50  ;;  %2850 = vperm.xlu1 %7037, %v8139_v10   ;;  %2838 = vperm.xlu2 %7035, %v8098_v58   ;;  %v6866_v47 = vsel %vm14386_vm13, 1.0, %v7852_v27  ;;  %v3409_v50 = vsel %vm3226_vm0, %v6865_v39, 0.0  ;;  %v387_v39 = vld [vmem:[%s8030_s28 + $0x40] sm:$0xff] }
  0x4b   : > { %v3411_v59 = vsel %vm3226_vm0, %v6866_v47, 0.0  ;;  %v404_v47 = vld [vmem:[%s8030_s28 + $0xc8] sm:$0xff] }
  0x4c   : > { %v3392_v60 = vadd.f32 %v3391_v52, %v3390_v54  ;;  %v8292_v52 = vld [vmem:[%s8010_s17 + $0xe8] sm:$0xff] }
  0x4d   : > { %2862 = vperm.xlu0 %7036, %v8176_v37   ;;  %14853 = vst [vmem:[#allocation40_spill] sm:$0xff] %v8292_v52  ;;  %vm14514_vm13 = vcmp.ne.s32.totalorder %v8292_v52, 0 }
  0x4e   : > { %v3394_v7 = vadd.f32 %v3393_v57, %v3392_v60  ;;  %v8298_v57 = vld [vmem:[%s8010_s17 + $0xf0] sm:$0xff]  ;;  %s14810_s17 = scalar_lea.sflag [#allocation5], %s11789_s24 }
  0x4f   : > { %14854 = vst [vmem:[#allocation41_spill] sm:$0xff] %v8298_v57  ;;  %v385_v60 = vld [vmem:[%s8030_s28 + $0x30] sm:$0xff]  ;;  %vm14506_vm14 = vcmp.ne.s32.totalorder %v8298_v57, 0 }
  0x50   : > { %v3396_v12 = vadd.f32 %v3395_v2, %v3394_v7  ;;  %v402_v2 = vld [vmem:[%s8030_s28 + $0xb8] sm:$0xff]  ;;  %v3413_v7 = vsel %vm3226_vm0, %v6867_v55, 0.0  ;;  %v6870_v18 = vsel %vm14506_vm14, 1.0, %v7852_v27 }
  0x51   : > { %v422_v14 = vpack.c.bf16 %v402_v2, %v401_v0  ;;  %v390_v0 = vld [vmem:[%s8030_s28 + $0x58] sm:$0xff]  ;;  %v405_v2 = vld [vmem:[%s8030_s28 + $0xd0] sm:$0xff] }
  0x52   : > { %v3398_v19 = vadd.f32 %v3397_v8, %v3396_v12  ;;  %2859 = vperm.xlu1 %7037, %v8162_v29   ;;  %2847 = vperm.xlu2 %7035, %v8123_v4   ;;  %v414_v8 = vpack.c.bf16 %v386_v63, %v385_v60  ;;  %v389_v63 = vld [vmem:[%s8030_s28 + $0x50] sm:$0xff] }
  0x54   : > { %v3400_v28 = vadd.f32 %v3399_v16, %v3398_v19  ;;  %v3415_v16 = vsel %vm3226_vm0, %v6868_v3, 0.0  ;;  %v406_v3 = vld [vmem:[%s8030_s28 + $0xd8] sm:$0xff] }
  0x55   : > { %2871 = vperm.xlu0 %7036, %v8203_v53  }
  0x56   : > { %6810 = vmatmul.msk.bf16.gmra.mxu0 %vm481_vm6, %v413_v9  ;;  %6818 = vmatmul.msk.bf16.gmra.mxu2 %vm481_vm6, %v421_v17  ;;  %v3402_v34 = vadd.f32 %v3401_v22, %v3400_v28  ;;  %v6871_v22 = vsel %vm14505_vm15, 1.0, %v7852_v27  ;;  %v3419_v28 = vsel %vm3226_vm0, %v6870_v18, 0.0 }
  0x57   : > { %6826 = vmatmul.msk.bf16.gmra.mxu1 %vm481_vm6, %v413_v9  ;;  %6834 = vmatmul.msk.bf16.gmra.mxu3 %vm481_vm6, %v421_v17  ;;  %v6869_v9 = vsel %vm14514_vm13, 1.0, %v7852_v27 }
  0x58   : > { %v3404_v41 = vadd.f32 %v3403_v30, %v3402_v34  ;;  %v3417_v19 = vsel %vm3226_vm0, %v6869_v9, 0.0  ;;  %v3421_v34 = vsel %vm3226_vm0, %v6871_v22, 0.0  ;;  %v391_v9 = vld [vmem:[%s8030_s28 + $0x60] sm:$0xff]  ;;  %v394_v22 = vld [vmem:[%s8030_s28 + $0x78] sm:$0xff] }
  0x5a   : > { %v3406_v48 = vadd.f32 %v3405_v38, %v3404_v41  ;;  %2868 = vperm.xlu1 %7037, %v8193_v45   ;;  %2856 = vperm.xlu2 %7035, %v8154_v20   ;;  %v388_v41 = vld [vmem:[%s8030_s28 + $0x48] sm:$0xff] }
  0x5c   : > { %v3408_v54 = vadd.f32 %v3407_v44, %v3406_v48  ;;  %v403_v44 = vld [vmem:[%s8030_s28 + $0xc0] sm:$0xff] }
  0x5d   : > { %2880 = vperm.xlu0 %7036, %v8234_v11  }
  0x5e   : > { %v3410_v5 = vadd.f32 %v3409_v50, %v3408_v54  ;;  %v415_v50 = vpack.c.bf16 %v388_v41, %v387_v39  ;;  %v423_v54 = vpack.c.bf16 %v404_v47, %v403_v44 }
  0x60   : > { %v3412_v12 = vadd.f32 %v3411_v59, %v3410_v5 }
  0x62   : > { %v3414_v17 = vadd.f32 %v3413_v7, %v3412_v12  ;;  %2877 = vperm.xlu1 %7037, %v8220_v62   ;;  %2865 = vperm.xlu2 %7035, %v8182_v40   ;;  %v416_v7 = vpack.c.bf16 %v390_v0, %v389_v63  ;;  %v392_v12 = vld [vmem:[%s8030_s28 + $0x68] sm:$0xff] }
  0x64   : > { %v3416_v26 = vadd.f32 %v3415_v16, %v3414_v17  ;;  %v408_v16 = vld [vmem:[%s8030_s28 + $0xe8] sm:$0xff]  ;;  %v417_v17 = vpack.c.bf16 %v392_v12, %v391_v9 }
  0x65   : > { %2889 = vperm.xlu0 %7036, %v8265_v31  }
  0x66   : > { %6811 = vmatmul.msk.bf16.gmra.mxu0 %vm481_vm6, %v414_v8  ;;  %6819 = vmatmul.msk.bf16.gmra.mxu2 %vm481_vm6, %v422_v14  ;;  %v3418_v30 = vadd.f32 %v3417_v19, %v3416_v26  ;;  %v393_v19 = vld [vmem:[%s8030_s28 + $0x70] sm:$0xff] }
  0x67   : > { %6827 = vmatmul.msk.bf16.gmra.mxu1 %vm481_vm6, %v414_v8  ;;  %6835 = vmatmul.msk.bf16.gmra.mxu3 %vm481_vm6, %v422_v14  ;;  %v424_v8 = vpack.c.bf16 %v406_v3, %v405_v2  ;;  %v407_v14 = vld [vmem:[%s8030_s28 + $0xe0] sm:$0xff]  ;;  %v409_v26 = vld [vmem:[%s8030_s28 + $0xf0] sm:$0xff] }
  0x68   : > { %v3420_v35 = vadd.f32 %v3419_v28, %v3418_v30  ;;  %v425_v18 = vpack.c.bf16 %v408_v16, %v407_v14  ;;  %v410_v28 = vld [vmem:[%s8030_s28 + $0xf8] sm:$0xff]  ;;  %v418_v30 = vpack.c.bf16 %v394_v22, %v393_v19  ;;  %s11815_s28 = scalar_lea.vmem [#allocation4], %s6769_s27 }
  0x6a   : > { %v3422_v38 = vadd.f32 %v3421_v34, %v3420_v35  ;;  %2886 = vperm.xlu1 %7037, %v8248_v21   ;;  %2874 = vperm.xlu2 %7035, %v8209_v56   ;;  %v426_v34 = vpack.c.bf16 %v410_v28, %v409_v26  ;;  %v435_v35 = vld [vmem:[%s14856_s3] sm:$0x3] }
  0x6c   : > { %v3423_v27 = vrot.slane %v3422_v38, 4 }
  0x6d   : > { %2898 = vperm.xlu0 %7036, %v8292_v52  }
  0x6e   : > { %v3424_v48 = vadd.f32 %v3423_v27, %v3422_v38  ;;  %v8378_v38 = vperm.slane %v435_v35, 0  ;;  %v8380_v27 = vperm.slane %v435_v35, 1 }
  0x70   : > { %v3425_v55 = vrot.slane %v3424_v48, 2 }
  0x72   : > { %2895 = vperm.xlu1 %7037, %v8279_v43   ;;  %2883 = vperm.xlu2 %7035, %v8240_v15   ;;  %v3426_v59 = vadd.f32 %v3425_v55, %v3424_v48 }
  0x74   : > { %v3427_v60 = vrot.slane %v3426_v59, 1 }
  0x76   : > { %6812 = vmatmul.msk.bf16.gmra.mxu0 %vm481_vm6, %v415_v50  ;;  %6820 = vmatmul.msk.bf16.gmra.mxu2 %vm481_vm6, %v423_v54  ;;  %v3428_v5 = vadd.f32 %v3427_v60, %v3426_v59 }
  0x77   : > { %6828 = vmatmul.msk.bf16.gmra.mxu1 %vm481_vm6, %v415_v50  ;;  %6836 = vmatmul.msk.bf16.gmra.mxu3 %vm481_vm6, %v423_v54 }
  0x7a   : > { %2904 = vperm.xlu1 %7037, %v8310_v6   ;;  %2892 = vperm.xlu2 %7035, %v8271_v36  }
  0x82   : > { %3433 = vperm.xlu1 %7037, %v3428_v5   ;;  %2901 = vperm.xlu2 %7035, %v8298_v57  }
  0x86   : > { %6813 = vmatmul.msk.bf16.gmra.mxu0 %vm481_vm6, %v416_v7  ;;  %6821 = vmatmul.msk.bf16.gmra.mxu2 %vm481_vm6, %v424_v8 }
  0x87   : > { %6829 = vmatmul.msk.bf16.gmra.mxu1 %vm481_vm6, %v416_v7  ;;  %6837 = vmatmul.msk.bf16.gmra.mxu3 %vm481_vm6, %v424_v8 }
  0x96   : > { %6814 = vmatmul.msk.bf16.gmra.mxu0 %vm481_vm6, %v417_v17  ;;  %6822 = vmatmul.msk.bf16.gmra.mxu2 %vm481_vm6, %v425_v18 }
  0x97   : > { %6830 = vmatmul.msk.bf16.gmra.mxu1 %vm481_vm6, %v417_v17  ;;  %6838 = vmatmul.msk.bf16.gmra.mxu3 %vm481_vm6, %v425_v18 }
  0xa6   : > { %6815 = vmatmul.msk.bf16.gmra.mxu0 %vm481_vm6, %v418_v30  ;;  %6823 = vmatmul.msk.bf16.gmra.mxu2 %vm481_vm6, %v426_v34 }
  0xa7   : > { %6831 = vmatmul.msk.bf16.gmra.mxu1 %vm481_vm6, %v418_v30  ;;  %6839 = vmatmul.msk.bf16.gmra.mxu3 %vm481_vm6, %v426_v34 }
  0xb3   : > { %v539_v39 = vpop.f32.mrf.mxu0 }
  0xb4   : > { %v540_v41 = vadd.f32 %v539_v39, %v8378_v38  ;;  %v628_v44 = vpop.f32.mrf.mxu1 }
  0xb5   : > { %v629_v47 = vadd.f32 %v628_v44, %v8380_v27 }
  0xb6   : > { %v772_v48 = vmul.f32 0.044715, %v540_v41 }
  0xb7   : > { %v773_v50 = vmul.f32 0.044715, %v629_v47 }
  0xb8   : > { %v836_v54 = vmul.f32 %v772_v48, %v540_v41 }
  0xb9   : > { %v837_v55 = vmul.f32 %v773_v50, %v629_v47  ;;  %v579_v59 = vpop.f32.mrf.mxu2 }
  0xba   : > { %v900_v60 = vmul.f32 %v836_v54, %v540_v41  ;;  %v580_v63 = vadd.f32 %v579_v59, %v8378_v38  ;;  %v668_v0 = vpop.f32.mrf.mxu3 }
  0xbb   : > { %v541_v2 = vpop.f32.mrf.mxu0  ;;  %v901_v3 = vmul.f32 %v837_v55, %v629_v47  ;;  %v8386_v5 = vadd.f32 %v668_v0, %v8380_v27 }
  0xbc   : > { %v8389_v7 = vadd.f32 %v541_v2, %v8378_v38  ;;  %v630_v8 = vpop.f32.mrf.mxu1  ;;  %v964_v9 = vadd.f32 %v900_v60, %v540_v41  ;;  %v804_v12 = vmul.f32 0.044715, %v580_v63 }
  0xbd   : > { %v8392_v14 = vadd.f32 %v630_v8, %v8380_v27  ;;  %v965_v16 = vadd.f32 %v901_v3, %v629_v47  ;;  %v805_v17 = vmul.f32 0.044715, %v8386_v5 }
  0xbe   : > { %v774_v18 = vmul.f32 0.044715, %v8389_v7  ;;  %v1028_v19 = vmul.f32 0.7978846, %v964_v9  ;;  %v868_v28 = vmul.f32 %v804_v12, %v580_v63 }
  0xbf   : > { %v775_v22 = vmul.f32 0.044715, %v8392_v14  ;;  %v1029_v26 = vmul.f32 0.7978846, %v965_v16  ;;  %v869_v30 = vmul.f32 %v805_v17, %v8386_v5 }
  0xc0   : > { %7038 = vtanh.f32 %v1028_v19  ;;  %v932_v34 = vmul.f32 %v868_v28, %v580_v63  ;;  %v838_v35 = vmul.f32 %v774_v18, %v8389_v7 }
  0xc1   : > { %7040 = vtanh.f32 %v1029_v26  ;;  %v839_v39 = vmul.f32 %v775_v22, %v8392_v14  ;;  %v581_v44 = vpop.f32.mrf.mxu2  ;;  %v933_v48 = vmul.f32 %v869_v30, %v8386_v5  ;;  %v708_v26 = vmul.f32 0.5, %v540_v41 }
  0xc2   : > { %v8402_v50 = vadd.f32 %v581_v44, %v8378_v38  ;;  %v670_v54 = vpop.f32.mrf.mxu3  ;;  %v996_v59 = vadd.f32 %v932_v34, %v580_v63  ;;  %v902_v60 = vmul.f32 %v838_v35, %v8389_v7 }
  0xc3   : > { %v544_v55 = vpop.f32.mrf.mxu0  ;;  %v903_v0 = vmul.f32 %v839_v39, %v8392_v14  ;;  %v8407_v2 = vadd.f32 %v670_v54, %v8380_v27  ;;  %v997_v9 = vadd.f32 %v933_v48, %v8386_v5  ;;  %v709_v48 = vmul.f32 0.5, %v629_v47 }
  0xc4   : > { %v8410_v3 = vadd.f32 %v544_v55, %v8378_v38  ;;  %v633_v8 = vpop.f32.mrf.mxu1  ;;  %v806_v12 = vmul.f32 0.044715, %v8402_v50  ;;  %v1060_v17 = vmul.f32 0.7978846, %v996_v59  ;;  %v966_v18 = vadd.f32 %v902_v60, %v8389_v7 }
  0xc5   : > { %v8415_v16 = vadd.f32 %v633_v8, %v8380_v27  ;;  %v807_v22 = vmul.f32 0.044715, %v8407_v2  ;;  %v1061_v28 = vmul.f32 0.7978846, %v997_v9  ;;  %v967_v30 = vadd.f32 %v903_v0, %v8392_v14 }
  0xc6   : > { %v7039_v19 = vpop.eup %7038  ;;  %v776_v35 = vmul.f32 0.044715, %v8410_v3  ;;  %7042 = vtanh.f32 %v1060_v17  ;;  %v1030_v44 = vmul.f32 0.7978846, %v966_v18  ;;  %v870_v41 = vmul.f32 %v806_v12, %v8402_v50 }
  0xc7   : > { %v7041_v34 = vpop.eup %7040  ;;  %v1156_v39 = vadd.f32 1.0, %v7039_v19  ;;  %7044 = vtanh.f32 %v1061_v28  ;;  %v1031_v55 = vmul.f32 0.7978846, %v967_v30  ;;  %v777_v59 = vmul.f32 0.044715, %v8415_v16 }
  0xc8   : > { %v1157_v54 = vadd.f32 1.0, %v7041_v34  ;;  %7046 = vtanh.f32 %v1030_v44  ;;  %v871_v0 = vmul.f32 %v807_v22, %v8407_v2  ;;  %v740_v18 = vmul.f32 0.5, %v580_v63 }
  0xc9   : > { %v8422_v60 = vmul.f32 %v1156_v39, %v708_v26  ;;  %v584_v8 = vpop.f32.mrf.mxu2  ;;  %7048 = vtanh.f32 %v1031_v55  ;;  %v934_v47 = vmul.f32 %v870_v41, %v8402_v50  ;;  %v840_v28 = vmul.f32 %v776_v35, %v8410_v3 }
  0xca   : > { %v8425_v9 = vmul.f32 %v1157_v54, %v709_v48  ;;  %v673_v19 = vpop.f32.mrf.mxu3  ;;  %v741_v34 = vmul.f32 0.5, %v8386_v5  ;;  %v710_v12 = vmul.f32 0.5, %v8389_v7  ;;  %v935_v39 = vmul.f32 %v871_v0, %v8407_v2 }
  0xcb   : > { %v546_v17 = vpop.f32.mrf.mxu0  ;;  %v8436_v22 = vadd.f32 %v584_v8, %v8378_v38  ;;  %v711_v63 = vmul.f32 0.5, %v8392_v14  ;;  %v998_v48 = vadd.f32 %v934_v47, %v8402_v50  ;;  %v841_v35 = vmul.f32 %v777_v59, %v8415_v16 }
  0xcc   : > { %v635_v30 = vpop.f32.mrf.mxu1  ;;  %v1284_v26 = vadd.f32 %v8425_v9, %v8422_v60  ;;  %v7043_v44 = vpop.eup %7042  ;;  %v8442_v55 = vadd.f32 %v673_v19, %v8380_v27  ;;  %v8445_v5 = vadd.f32 %v546_v17, %v8378_v38  ;;  %v999_v41 = vadd.f32 %v935_v39, %v8407_v2 }
  0xcd   : > { %v7045_v54 = vpop.eup %7044  ;;  %v1188_v7 = vadd.f32 1.0, %v7043_v44  ;;  %v8449_v8 = vadd.f32 %v635_v30, %v8380_v27  ;;  %v1062_v6 = vmul.f32 0.7978846, %v998_v48  ;;  %v904_v47 = vmul.f32 %v840_v28, %v8410_v3 }
  0xce   : > { %1285 = vadd.xlane.f32.xlu0 %v1284_v26  ;;  %v7047_v0 = vpop.eup %7046  ;;  %v1189_v14 = vadd.f32 1.0, %v7045_v54  ;;  %v1063_v52 = vmul.f32 0.7978846, %v999_v41  ;;  %v905_v17 = vmul.f32 %v841_v35, %v8415_v16  ;;  %v808_v30 = vmul.f32 0.044715, %v8436_v22 }
  0xcf   : > { %v7049_v59 = vpop.eup %7048  ;;  %v8452_v57 = vmul.f32 %v1188_v7, %v740_v18  ;;  %v1158_v19 = vadd.f32 1.0, %v7047_v0  ;;  %7050 = vtanh.f32 %v1062_v6  ;;  %v968_v39 = vadd.f32 %v904_v47, %v8410_v3 }
  0xd0   : > { %v8455_v43 = vmul.f32 %v1189_v14, %v741_v34  ;;  %v1159_v26 = vadd.f32 1.0, %v7049_v59  ;;  %7052 = vtanh.f32 %v1063_v52  ;;  %v969_v28 = vadd.f32 %v905_v17, %v8415_v16 }
  0xd1   : > { %14857 = vst [vmem:[#allocation43_spill] sm:$0xff] %v8452_v57  ;;  %v586_v44 = vpop.f32.mrf.mxu2  ;;  %v8459_v54 = vmul.f32 %v1158_v19, %v710_v12  ;;  %v809_v18 = vmul.f32 0.044715, %v8442_v55  ;;  %v1032_v6 = vmul.f32 0.7978846, %v968_v39  ;;  %v872_v59 = vmul.f32 %v808_v30, %v8436_v22 }
  0xd2   : > { %14858 = vst [vmem:[#allocation44_spill] sm:$0xff] %v8455_v43  ;;  %v675_v48 = vpop.f32.mrf.mxu3  ;;  %v1332_v35 = vadd.f32 %v8455_v43, %v8452_v57  ;;  %v8465_v7 = vmul.f32 %v1159_v26, %v711_v63  ;;  %v778_v41 = vmul.f32 0.044715, %v8445_v5  ;;  %v779_v0 = vmul.f32 0.044715, %v8449_v8 }
  0xd3   : > { %14859 = vst [vmem:[#allocation45_spill] sm:$0xff] %v8459_v54  ;;  %v549_v34 = vpop.f32.mrf.mxu0  ;;  %v1033_v12 = vmul.f32 0.7978846, %v969_v28  ;;  %7054 = vtanh.f32 %v1032_v6  ;;  %v742_v19 = vmul.f32 0.5, %v8402_v50  ;;  %v873_v17 = vmul.f32 %v809_v18, %v8442_v55 }
  0xd4   : > { %14860 = vst [vmem:[#allocation46_spill] sm:$0xff] %v8465_v7  ;;  %v638_v14 = vpop.f32.mrf.mxu1  ;;  %1333 = vadd.xlane.f32.xlu1 %v1332_v35  ;;  %v1287_v52 = vadd.f32 %v8465_v7, %v8459_v54  ;;  %v8472_v47 = vadd.f32 %v549_v34, %v8378_v38  ;;  %v936_v28 = vmul.f32 %v872_v59, %v8436_v22  ;;  %v743_v34 = vmul.f32 0.5, %v8407_v2 }
  0xd5   : > { %7056 = vtanh.f32 %v1033_v12  ;;  %v7051_v63 = vpop.eup %7050  ;;  %v842_v35 = vmul.f32 %v778_v41, %v8445_v5  ;;  %v843_v6 = vmul.f32 %v779_v0, %v8449_v8  ;;  %v937_v12 = vmul.f32 %v873_v17, %v8442_v55 }
  0xd6   : > { %1288 = vadd.xlane.f32.xlu0 %v1287_v52  ;;  %v7053_v26 = vpop.eup %7052  ;;  %v1190_v39 = vadd.f32 1.0, %v7051_v63  ;;  %v780_v30 = vmul.f32 0.044715, %v8472_v47  ;;  %v8484_v52 = vadd.f32 %v638_v14, %v8380_v27  ;;  %v1000_v63 = vadd.f32 %v936_v28, %v8436_v22 }
  0xd7   : > { %v1191_v36 = vadd.f32 1.0, %v7053_v26  ;;  %v8490_v41 = vadd.f32 %v586_v44, %v8378_v38  ;;  %v1001_v17 = vadd.f32 %v937_v12, %v8442_v55  ;;  %v906_v26 = vmul.f32 %v842_v35, %v8445_v5 }
  0xd8   : > { %v8486_v18 = vmul.f32 %v1190_v39, %v742_v19  ;;  %v712_v21 = vmul.f32 0.5, %v8410_v3  ;;  %v1064_v39 = vmul.f32 0.7978846, %v1000_v63  ;;  %v907_v28 = vmul.f32 %v843_v6, %v8449_v8 }
  0xd9   : > { %v589_v50 = vpop.f32.mrf.mxu2  ;;  %v7055_v59 = vpop.eup %7054  ;;  %v8492_v31 = vmul.f32 %v1191_v36, %v743_v34  ;;  %v8499_v56 = vadd.f32 %v675_v48, %v8380_v27  ;;  %v713_v44 = vmul.f32 0.5, %v8415_v16  ;;  %v781_v12 = vmul.f32 0.044715, %v8484_v52 }
  0xda   : > { %v678_v0 = vpop.f32.mrf.mxu3  ;;  %v1160_v19 = vadd.f32 1.0, %v7055_v59  ;;  %v1065_v11 = vmul.f32 0.7978846, %v1001_v17  ;;  %v844_v3 = vmul.f32 %v780_v30, %v8472_v47  ;;  %v810_v63 = vmul.f32 0.044715, %v8490_v41 }
  0xdb   : > { %14861 = vst [vmem:[#allocation47_spill] sm:$0xff] %v8492_v31  ;;  %v551_v2 = vpop.f32.mrf.mxu0  ;;  %v7057_v15 = vpop.eup %7056  ;;  %v1335_v36 = vadd.f32 %v8492_v31, %v8486_v18  ;;  %7058 = vtanh.f32 %v1064_v39  ;;  %v970_v48 = vadd.f32 %v906_v26, %v8445_v5  ;;  %v744_v59 = vmul.f32 0.5, %v8436_v22 }
  0xdc   : > { %v640_v14 = vpop.f32.mrf.mxu1  ;;  %v1161_v34 = vadd.f32 1.0, %v7057_v15  ;;  %v8505_v35 = vmul.f32 %v1160_v19, %v712_v21  ;;  %v745_v16 = vmul.f32 0.5, %v8442_v55  ;;  %7060 = vtanh.f32 %v1065_v11 }
  0xdd   : > { %1336 = vadd.xlane.f32.xlu2 %v1335_v36  ;;  %v971_v15 = vadd.f32 %v907_v28, %v8449_v8  ;;  %v811_v21 = vmul.f32 0.044715, %v8499_v56  ;;  %v8517_v17 = vadd.f32 %v589_v50, %v8378_v38  ;;  %v1034_v19 = vmul.f32 0.7978846, %v970_v48  ;;  %v8521_v36 = vpop.permute.xlu1 %2817 }
  0xde   : > { %14862 = vst [vmem:[#allocation48_spill] sm:$0xff] %v8505_v35  ;;  %v8509_v6 = vmul.f32 %v1161_v34, %v713_v44  ;;  %v8524_v26 = vadd.f32 %v678_v0, %v8380_v27  ;;  %v845_v11 = vmul.f32 %v781_v12, %v8484_v52  ;;  %v908_v55 = vmul.f32 %v844_v3, %v8472_v47 }
  0xdf   : > { %14864 = vst [vmem:[#allocation50_spill] sm:$0xff] %v8521_v36  ;;  %v1035_v39 = vmul.f32 0.7978846, %v971_v15  ;;  %v8529_v28 = vadd.f32 %v551_v2, %v8378_v38  ;;  %v714_v34 = vmul.f32 0.5, %v8445_v5  ;;  %7062 = vtanh.f32 %v1034_v19 }
  0xe0   : > { %14863 = vst [vmem:[#allocation49_spill] sm:$0xff] %v8509_v6  ;;  %v1290_v30 = vadd.f32 %v8509_v6, %v8505_v35  ;;  %v874_v48 = vmul.f32 %v810_v63, %v8490_v41  ;;  %v715_v0 = vmul.f32 0.5, %v8449_v8  ;;  %v8535_v15 = vmul.f32 0.5, %v8472_v47 }
  0xe1   : > { %v591_v22 = vpop.f32.mrf.mxu2  ;;  %7064 = vtanh.f32 %v1035_v39  ;;  %v909_v12 = vmul.f32 %v845_v11, %v8484_v52  ;;  %v7059_v3 = vpop.eup %7058  ;;  %v812_v2 = vmul.f32 0.044715, %v8517_v17  ;;  %v972_v5 = vadd.f32 %v908_v55, %v8472_v47 }
  0xe2   : > { %1291 = vadd.xlane.f32.xlu1 %v1290_v30  ;;  %v680_v50 = vpop.f32.mrf.mxu3  ;;  %v8540_v30 = vmul.f32 0.5, %v8484_v52  ;;  %v875_v19 = vmul.f32 %v811_v21, %v8499_v56  ;;  %v7061_v63 = vpop.eup %7060  ;;  %v813_v20 = vmul.f32 0.044715, %v8524_v26  ;;  %v8546_v8 = vadd.f32 %v640_v14, %v8380_v27 }
  0xe3   : > { %v554_v44 = vpop.f32.mrf.mxu0  ;;  %v1192_v39 = vadd.f32 1.0, %v7059_v3  ;;  %v973_v53 = vadd.f32 %v909_v12, %v8484_v52  ;;  %v8550_v11 = vmul.f32 0.044715, %v8529_v28  ;;  %v1193_v40 = vadd.f32 1.0, %v7061_v63 }
  0xe4   : > { %v643_v62 = vpop.f32.mrf.mxu1  ;;  %v1036_v13 = vmul.f32 0.7978846, %v972_v5  ;;  %v938_v45 = vmul.f32 %v874_v48, %v8490_v41  ;;  %v8554_v47 = vadd.f32 %v591_v22, %v8378_v38  ;;  %v939_v37 = vmul.f32 %v875_v19, %v8499_v56 }
  0xe5   : > { %v8556_v21 = vmul.f32 %v1192_v39, %v744_v59  ;;  %v1037_v55 = vmul.f32 0.7978846, %v973_v53  ;;  %v7063_v14 = vpop.eup %7062  ;;  %v8560_v3 = vadd.f32 %v680_v50, %v8380_v27  ;;  %v8562_v52 = vmul.f32 %v1193_v40, %v745_v16  ;;  %v8572_v16 = vpop.permute.xlu1 %2826 }
  0xe6   : > { %7066 = vtanh.f32 %v1036_v13  ;;  %v1002_v12 = vadd.f32 %v938_v45, %v8490_v41  ;;  %v8566_v48 = vadd.f32 %v554_v44, %v8378_v38  ;;  %v1162_v22 = vadd.f32 1.0, %v7063_v14  ;;  %14865 = vst [vmem:[#allocation51_spill] sm:$0xff] %v8572_v16 }
  0xe7   : > { %v7065_v5 = vpop.eup %7064  ;;  %7068 = vtanh.f32 %v1037_v55  ;;  %v1003_v53 = vadd.f32 %v939_v37, %v8499_v56  ;;  %v1338_v59 = vadd.f32 %v8562_v52, %v8556_v21  ;;  %v876_v13 = vmul.f32 %v812_v2, %v8517_v17  ;;  %v8586_v2 = vpop.permute.xlu2 %2811 }
  0xe8   : > { %v1163_v19 = vadd.f32 1.0, %v7065_v5  ;;  %v1066_v40 = vmul.f32 0.7978846, %v1002_v12  ;;  %v8575_v45 = vmul.f32 0.044715, %v8546_v8  ;;  %v8578_v44 = vadd.f32 %v643_v62, %v8380_v27  ;;  %14868 = vst [vmem:[#allocation54_spill] sm:$0xff] %v8586_v2 }
  0xe9   : > { %v594_v63 = vpop.f32.mrf.mxu2  ;;  %v8580_v55 = vmul.f32 %v1162_v22, %v714_v34  ;;  %v1067_v14 = vmul.f32 0.7978846, %v1003_v53  ;;  %1339 = vadd.xlane.f32.xlu0 %v1338_v59  ;;  %v746_v5 = vmul.f32 0.5, %v8490_v41  ;;  %v747_v12 = vmul.f32 0.5, %v8499_v56 }
  0xea   : > { %v683_v50 = vpop.f32.mrf.mxu3  ;;  %v8582_v29 = vmul.f32 %v1163_v19, %v715_v0  ;;  %7070 = vtanh.f32 %v1066_v40  ;;  %v814_v4 = vmul.f32 0.044715, %v8554_v47  ;;  %v815_v10 = vmul.f32 0.044715, %v8560_v3 }
  0xeb   : > { %v556_v39 = vpop.f32.mrf.mxu0  ;;  %14866 = vst [vmem:[#allocation52_spill] sm:$0xff] %v8580_v55  ;;  %7072 = vtanh.f32 %v1067_v14  ;;  %v877_v62 = vmul.f32 %v813_v20, %v8524_v26  ;;  %v8592_v22 = vmul.f32 0.044715, %v8566_v48  ;;  %v8597_v41 = vadd.f32 %v594_v63, %v8378_v38 }
  0xec   : > { %v645_v37 = vpop.f32.mrf.mxu1  ;;  %14867 = vst [vmem:[#allocation53_spill] sm:$0xff] %v8582_v29  ;;  %v7067_v34 = vpop.eup %7066  ;;  %v1293_v0 = vadd.f32 %v8582_v29, %v8580_v55  ;;  %v940_v56 = vmul.f32 %v876_v13, %v8517_v17  ;;  %v8601_v59 = vmul.f32 0.044715, %v8578_v44  ;;  %v8604_v19 = vadd.f32 %v683_v50, %v8380_v27 }
  0xed   : > { %v7069_v53 = vpop.eup %7068  ;;  %v1164_v20 = vadd.f32 1.0, %v7067_v34  ;;  %v941_v40 = vmul.f32 %v877_v62, %v8524_v26  ;;  %v8608_v14 = vadd.f32 %v556_v39, %v8378_v38  ;;  %v8611_v1 = vadd.f32 %v645_v37, %v8380_v27 }
  0xee   : > { %1294 = vadd.xlane.f32.xlu1 %v1293_v0  ;;  %v1165_v63 = vadd.f32 1.0, %v7069_v53  ;;  %v1004_v13 = vadd.f32 %v940_v56, %v8517_v17  ;;  %v8618_v50 = vmul.f32 0.5, %v8517_v17  ;;  %v8621_v34 = vmul.f32 0.5, %v8524_v26 }
  0xef   : > { %v8615_v58 = vmul.f32 %v1164_v20, %v8535_v15  ;;  %v1005_v62 = vadd.f32 %v941_v40, %v8524_v26  ;;  %v816_v0 = vmul.f32 0.044715, %v8597_v41  ;;  %v878_v15 = vmul.f32 %v814_v4, %v8554_v47  ;;  %v8655_v23 = vpop.permute.xlu2 %2820 }
  0xf0   : > { %v7071_v39 = vpop.eup %7070  ;;  %v8626_v37 = vmul.f32 %v1165_v63, %v8540_v30  ;;  %v1068_v46 = vmul.f32 0.7978846, %v1004_v13  ;;  %v817_v17 = vmul.f32 0.044715, %v8604_v19  ;;  %v879_v33 = vmul.f32 %v815_v10, %v8560_v3  ;;  %v8639_v13 = vpop.permute.xlu1 %2832  ;;  %14874 = vst [vmem:[#allocation60_spill] sm:$0xff] %v8655_v23 }
  0xf1   : > { %14869 = vst [vmem:[#allocation55_spill] sm:$0xff] %v8615_v58  ;;  %v596_v61 = vpop.f32.mrf.mxu2  ;;  %v7073_v20 = vpop.eup %7072  ;;  %v1194_v51 = vadd.f32 1.0, %v7071_v39  ;;  %v1069_v32 = vmul.f32 0.7978846, %v1005_v62  ;;  %v8632_v26 = vmul.f32 0.044715, %v8608_v14 }
  0xf2   : > { %14870 = vst [vmem:[#allocation56_spill] sm:$0xff] %v8626_v37  ;;  %v685_v53 = vpop.f32.mrf.mxu3  ;;  %v8635_v40 = vmul.f32 0.044715, %v8611_v1  ;;  %v1296_v30 = vadd.f32 %v8626_v37, %v8615_v58  ;;  %v1195_v63 = vadd.f32 1.0, %v7073_v20  ;;  %v8644_v39 = vadd.f32 %v596_v61, %v8378_v38 }
  0xf3   : > { %v559_v56 = vpop.f32.mrf.mxu0  ;;  %14871 = vst [vmem:[#allocation57_spill] sm:$0xff] %v8639_v13  ;;  %v8641_v4 = vmul.f32 %v1194_v51, %v746_v5  ;;  %v8647_v62 = vadd.f32 %v685_v53, %v8380_v27  ;;  %7074 = vtanh.f32 %v1068_v46  ;;  %v942_v20 = vmul.f32 %v878_v15, %v8554_v47  ;;  %v8674_v15 = vpop.permute.xlu0 %2814 }
  0xf4   : > { %v648_v49 = vpop.f32.mrf.mxu1  ;;  %1297 = vadd.xlane.f32.xlu2 %v1296_v30  ;;  %v8649_v10 = vmul.f32 %v1195_v63, %v747_v12  ;;  %v8652_v42 = vadd.f32 %v559_v56, %v8378_v38  ;;  %7076 = vtanh.f32 %v1069_v32  ;;  %v8658_v51 = vmul.f32 0.5, %v8554_v47  ;;  %14875 = vst [vmem:[#allocation61_spill] sm:$0xff] %v8674_v15 }
  0xf5   : > { %14872 = vst [vmem:[#allocation58_spill] sm:$0xff] %v8641_v4  ;;  %v8661_v61 = vmul.f32 0.5, %v8560_v3  ;;  %v943_v5 = vmul.f32 %v879_v33, %v8560_v3  ;;  %v846_v46 = vmul.f32 %v8550_v11, %v8529_v28  ;;  %v8669_v32 = vadd.f32 %v648_v49, %v8380_v27 }
  0xf6   : > { %14873 = vst [vmem:[#allocation59_spill] sm:$0xff] %v8649_v10  ;;  %v1341_v12 = vadd.f32 %v8649_v10, %v8641_v4  ;;  %v1006_v53 = vadd.f32 %v942_v20, %v8554_v47  ;;  %v847_v56 = vmul.f32 %v8575_v45, %v8546_v8  ;;  %v8677_v30 = vmul.f32 0.044715, %v8644_v39 }
  0xf7   : > { %v1007_v63 = vadd.f32 %v943_v5, %v8560_v3  ;;  %v8681_v11 = vmul.f32 0.5, %v8529_v28  ;;  %v910_v24 = vmul.f32 %v846_v46, %v8529_v28  ;;  %v8685_v49 = vmul.f32 0.044715, %v8647_v62 }
  0xf8   : > { %1342 = vadd.xlane.f32.xlu1 %v1341_v12  ;;  %v8688_v47 = vmul.f32 0.044715, %v8652_v42  ;;  %v1070_v25 = vmul.f32 0.7978846, %v1006_v53  ;;  %v911_v13 = vmul.f32 %v847_v56, %v8546_v8  ;;  %v880_v15 = vmul.f32 %v816_v0, %v8597_v41 }
  0xf9   : > { %v599_v33 = vpop.f32.mrf.mxu2  ;;  %v7075_v16 = vpop.eup %7074  ;;  %v1071_v3 = vmul.f32 0.7978846, %v1007_v63  ;;  %v974_v5 = vadd.f32 %v910_v24, %v8529_v28  ;;  %v881_v46 = vmul.f32 %v817_v17, %v8604_v19  ;;  %v8695_v36 = vmul.f32 0.044715, %v8669_v32 }
  0xfa   : > { %v688_v45 = vpop.f32.mrf.mxu3  ;;  %v7077_v12 = vpop.eup %7076  ;;  %v1196_v2 = vadd.f32 1.0, %v7075_v16  ;;  %7078 = vtanh.f32 %v1070_v25  ;;  %v8698_v37 = vmul.f32 0.5, %v8546_v8  ;;  %v8701_v56 = vadd.f32 %v599_v33, %v8378_v38 }
  0xfb   : > { %v561_v20 = vpop.f32.mrf.mxu0  ;;  %v1197_v53 = vadd.f32 1.0, %v7077_v12  ;;  %7080 = vtanh.f32 %v1071_v3  ;;  %v8704_v24 = vmul.f32 0.5, %v8597_v41  ;;  %v8710_v0 = vadd.f32 %v688_v45, %v8380_v27  ;;  %v8713_v17 = vpop.permute.xlu1 %2841 }
  0xfc   : > { %v650_v23 = vpop.f32.mrf.mxu1  ;;  %v8707_v28 = vmul.f32 %v1196_v2, %v8618_v50  ;;  %v975_v16 = vadd.f32 %v911_v13, %v8546_v8  ;;  %v1038_v25 = vmul.f32 0.7978846, %v974_v5  ;;  %14877 = vst [vmem:[#allocation63_spill] sm:$0xff] %v8713_v17  ;;  %v8719_v33 = vadd.f32 %v561_v20, %v8378_v38  ;;  %v8728_v13 = vpop.permute.xlu2 %2823 }
  0xfd   : > { %v8716_v63 = vmul.f32 %v1197_v53, %v8621_v34  ;;  %v944_v3 = vmul.f32 %v880_v15, %v8597_v41  ;;  %v945_v12 = vmul.f32 %v881_v46, %v8604_v19  ;;  %v8724_v2 = vadd.f32 %v650_v23, %v8380_v27  ;;  %14879 = vst [vmem:[#allocation65_spill] sm:$0xff] %v8728_v13  ;;  %v8749_v58 = vpop.permute.xlu0 %2835 }
  0xfe   : > { %14876 = vst [vmem:[#allocation62_spill] sm:$0xff] %v8707_v28  ;;  %v1039_v50 = vmul.f32 0.7978846, %v975_v16  ;;  %7082 = vtanh.f32 %v1038_v25  ;;  %v848_v8 = vmul.f32 %v8592_v22, %v8566_v48  ;;  %v8733_v20 = vmul.f32 0.5, %v8604_v19 }
  0xff   : > { %14878 = vst [vmem:[#allocation64_spill] sm:$0xff] %v8716_v63  ;;  %v1344_v34 = vadd.f32 %v8716_v63, %v8707_v28  ;;  %v1008_v15 = vadd.f32 %v944_v3, %v8597_v41  ;;  %v1009_v5 = vadd.f32 %v945_v12, %v8604_v19  ;;  %v8738_v46 = vmul.f32 0.044715, %v8701_v56 }
 0x100   : > { %v7079_v23 = vpop.eup %7078  ;;  %v8741_v53 = vmul.f32 0.044715, %v8710_v0  ;;  %7084 = vtanh.f32 %v1039_v50  ;;  %v849_v25 = vmul.f32 %v8601_v59, %v8578_v44  ;;  %v8746_v13 = vmul.f32 0.044715, %v8719_v33  ;;  %14880 = vst [vmem:[#allocation66_spill] sm:$0xff] %v8749_v58 }
 0x101   : > { %v601_v45 = vpop.f32.mrf.mxu2  ;;  %v7081_v17 = vpop.eup %7080  ;;  %1345 = vadd.xlane.f32.xlu2 %v1344_v34  ;;  %v1198_v41 = vadd.f32 1.0, %v7079_v23  ;;  %v1072_v3 = vmul.f32 0.7978846, %v1008_v15  ;;  %v912_v12 = vmul.f32 %v848_v8, %v8566_v48  ;;  %v8752_v10 = vmul.f32 0.044715, %v8724_v2 }
 0x102   : > { %v690_v22 = vpop.f32.mrf.mxu3  ;;  %v1199_v50 = vadd.f32 1.0, %v7081_v17  ;;  %v1073_v4 = vmul.f32 0.7978846, %v1009_v5  ;;  %v8755_v7 = vmul.f32 0.5, %v8566_v48  ;;  %v8761_v34 = vadd.f32 %v601_v45, %v8378_v38 }
 0x103   : > { %v564_v16 = vpop.f32.mrf.mxu0  ;;  %v8758_v59 = vmul.f32 %v1198_v41, %v8658_v51  ;;  %7086 = vtanh.f32 %v1072_v3  ;;  %v8764_v15 = vmul.f32 0.5, %v8578_v44  ;;  %v8770_v17 = vadd.f32 %v690_v22, %v8380_v27 }
 0x104   : > { %v653_v19 = vpop.f32.mrf.mxu1  ;;  %v7083_v8 = vpop.eup %7082  ;;  %v8767_v23 = vmul.f32 %v1199_v50, %v8661_v61  ;;  %7088 = vtanh.f32 %v1073_v4  ;;  %v913_v5 = vmul.f32 %v849_v25, %v8578_v44  ;;  %v8774_v51 = vadd.f32 %v564_v16, %v8378_v38 }
 0x105   : > { %14881 = vst [vmem:[#allocation67_spill] sm:$0xff] %v8758_v59  ;;  %v1166_v58 = vadd.f32 1.0, %v7083_v8  ;;  %v976_v45 = vadd.f32 %v912_v12, %v8566_v48  ;;  %v882_v41 = vmul.f32 %v8677_v30, %v8644_v39  ;;  %v8782_v50 = vadd.f32 %v653_v19, %v8380_v27  ;;  %v8787_v25 = vpop.permute.xlu1 %2850  ;;  %v8825_v28 = vpop.permute.xlu0 %2844 }
 0x106   : > { %14882 = vst [vmem:[#allocation68_spill] sm:$0xff] %v8767_v23  ;;  %v7085_v3 = vpop.eup %7084  ;;  %v1347_v61 = vadd.f32 %v8767_v23, %v8758_v59  ;;  %v977_v4 = vadd.f32 %v913_v5, %v8578_v44  ;;  %v883_v22 = vmul.f32 %v8685_v49, %v8647_v62  ;;  %v8793_v8 = vmul.f32 0.5, %v8644_v39 }
 0x107   : > { %14883 = vst [vmem:[#allocation69_spill] sm:$0xff] %v8787_v25  ;;  %v1167_v16 = vadd.f32 1.0, %v7085_v3  ;;  %v8790_v48 = vmul.f32 %v1166_v58, %v8681_v11  ;;  %v1040_v12 = vmul.f32 0.7978846, %v976_v45  ;;  %v8796_v19 = vmul.f32 0.044715, %v8761_v34 }
 0x108   : > { %1348 = vadd.xlane.f32.xlu0 %v1347_v61  ;;  %v1041_v23 = vmul.f32 0.7978846, %v977_v4  ;;  %v946_v49 = vmul.f32 %v882_v41, %v8644_v39  ;;  %v947_v25 = vmul.f32 %v883_v22, %v8647_v62  ;;  %v8804_v11 = vmul.f32 0.044715, %v8770_v17  ;;  %v8809_v4 = vpop.permute.xlu2 %2829  ;;  %14887 = vst [vmem:[#allocation73_spill] sm:$0xff] %v8825_v28 }
 0x109   : > { %14884 = vst [vmem:[#allocation70_spill] sm:$0xff] %v8790_v48  ;;  %v604_v30 = vpop.f32.mrf.mxu2  ;;  %v7087_v3 = vpop.eup %7086  ;;  %v8801_v58 = vmul.f32 %v1167_v16, %v8698_v37  ;;  %v8807_v45 = vmul.f32 0.044715, %v8774_v51  ;;  %7090 = vtanh.f32 %v1040_v12  ;;  %v8812_v54 = vmul.f32 0.044715, %v8782_v50 }
 0x10a   : > { %v693_v44 = vpop.f32.mrf.mxu3  ;;  %v7089_v59 = vpop.eup %7088  ;;  %14886 = vst [vmem:[#allocation72_spill] sm:$0xff] %v8809_v4  ;;  %v1200_v41 = vadd.f32 1.0, %v7087_v3  ;;  %7092 = vtanh.f32 %v1041_v23  ;;  %v8815_v22 = vmul.f32 0.5, %v8647_v62  ;;  %v8820_v63 = vadd.f32 %v604_v30, %v8378_v38 }
 0x10b   : > { %v566_v5 = vpop.f32.mrf.mxu0  ;;  %14885 = vst [vmem:[#allocation71_spill] sm:$0xff] %v8801_v58  ;;  %v1299_v37 = vadd.f32 %v8801_v58, %v8790_v48  ;;  %v1201_v16 = vadd.f32 1.0, %v7089_v59  ;;  %v8823_v12 = vmul.f32 0.5, %v8608_v14  ;;  %v1010_v23 = vadd.f32 %v946_v49, %v8644_v39 }
 0x10c   : > { %v655_v61 = vpop.f32.mrf.mxu1  ;;  %v8828_v4 = vmul.f32 %v1200_v41, %v8704_v24  ;;  %v1011_v3 = vadd.f32 %v947_v25, %v8647_v62  ;;  %v8833_v6 = vmul.f32 0.5, %v8611_v1  ;;  %v8839_v30 = vadd.f32 %v693_v44, %v8380_v27 }
 0x10d   : > { %1300 = vadd.xlane.f32.xlu2 %v1299_v37  ;;  %v8836_v59 = vmul.f32 %v1201_v16, %v8733_v20  ;;  %v850_v28 = vmul.f32 %v8632_v26, %v8608_v14  ;;  %v851_v24 = vmul.f32 %v8635_v40, %v8611_v1  ;;  %v8846_v39 = vadd.f32 %v566_v5, %v8378_v38 }
 0x10e   : > { %14888 = vst [vmem:[#allocation74_spill] sm:$0xff] %v8828_v4  ;;  %v1074_v62 = vmul.f32 0.7978846, %v1010_v23  ;;  %v1075_v25 = vmul.f32 0.7978846, %v1011_v3  ;;  %v852_v49 = vmul.f32 %v8688_v47, %v8652_v42  ;;  %v8853_v44 = vadd.f32 %v655_v61, %v8380_v27 }
 0x10f   : > { %14889 = vst [vmem:[#allocation75_spill] sm:$0xff] %v8836_v59  ;;  %v7091_v41 = vpop.eup %7090  ;;  %v1350_v20 = vadd.f32 %v8836_v59, %v8828_v4  ;;  %v914_v26 = vmul.f32 %v850_v28, %v8608_v14  ;;  %v915_v37 = vmul.f32 %v851_v24, %v8611_v1  ;;  %v853_v47 = vmul.f32 %v8695_v36, %v8669_v32  ;;  %v8862_v4 = vpop.permute.xlu1 %2859 }
 0x110   : > { %v7093_v16 = vpop.eup %7092  ;;  %v1168_v5 = vadd.f32 1.0, %v7091_v41  ;;  %7094 = vtanh.f32 %v1074_v62  ;;  %v916_v58 = vmul.f32 %v852_v49, %v8652_v42  ;;  %14890 = vst [vmem:[#allocation76_spill] sm:$0xff] %v8862_v4  ;;  %v8868_v62 = vmul.f32 0.044715, %v8820_v63 }
 0x111   : > { %v606_v40 = vpop.f32.mrf.mxu2  ;;  %1351 = vadd.xlane.f32.xlu1 %v1350_v20  ;;  %v1169_v59 = vadd.f32 1.0, %v7093_v16  ;;  %7096 = vtanh.f32 %v1075_v25  ;;  %v978_v61 = vadd.f32 %v914_v26, %v8608_v14  ;;  %v979_v28 = vadd.f32 %v915_v37, %v8611_v1 }
 0x112   : > { %v695_v23 = vpop.f32.mrf.mxu3  ;;  %v8865_v24 = vmul.f32 %v1168_v5, %v8755_v7  ;;  %v8871_v41 = vmul.f32 0.044715, %v8839_v30  ;;  %v8874_v36 = vmul.f32 0.044715, %v8846_v39  ;;  %v8880_v14 = vmul.f32 0.044715, %v8853_v44  ;;  %v8882_v7 = vpop.permute.xlu2 %2838 }
 0x113   : > { %v569_v3 = vpop.f32.mrf.mxu0  ;;  %v8877_v25 = vmul.f32 %v1169_v59, %v8764_v15  ;;  %v1042_v1 = vmul.f32 0.7978846, %v978_v61  ;;  %v1043_v49 = vmul.f32 0.7978846, %v979_v28  ;;  %14893 = vst [vmem:[#allocation79_spill] sm:$0xff] %v8882_v7  ;;  %v8885_v26 = vadd.f32 %v606_v40, %v8378_v38  ;;  %v8900_v40 = vpop.permute.xlu0 %2853 }
 0x114   : > { %14891 = vst [vmem:[#allocation77_spill] sm:$0xff] %v8865_v24  ;;  %v658_v20 = vpop.f32.mrf.mxu1  ;;  %v8888_v37 = vmul.f32 0.5, %v8652_v42  ;;  %v917_v16 = vmul.f32 %v853_v47, %v8669_v32  ;;  %v980_v5 = vadd.f32 %v916_v58, %v8652_v42  ;;  %v8895_v59 = vadd.f32 %v695_v23, %v8380_v27 }
 0x115   : > { %14892 = vst [vmem:[#allocation78_spill] sm:$0xff] %v8877_v25  ;;  %v1302_v15 = vadd.f32 %v8877_v25, %v8865_v24  ;;  %7098 = vtanh.f32 %v1042_v1  ;;  %v8898_v61 = vadd.f32 %v569_v3, %v8378_v38  ;;  %v8903_v7 = vadd.f32 %v658_v20, %v8380_v27 }
 0x116   : > { %v7095_v28 = vpop.eup %7094  ;;  %14894 = vst [vmem:[#allocation80_spill] sm:$0xff] %v8900_v40  ;;  %7100 = vtanh.f32 %v1043_v49  ;;  %v981_v47 = vadd.f32 %v917_v16, %v8669_v32  ;;  %v1044_v42 = vmul.f32 0.7978846, %v980_v5  ;;  %v725_v1 = vmul.f32 0.5, %v8669_v32 }
 0x117   : > { %v7097_v58 = vpop.eup %7096  ;;  %1303 = vadd.xlane.f32.xlu0 %v1302_v15  ;;  %v1202_v4 = vadd.f32 1.0, %v7095_v28  ;;  %v884_v23 = vmul.f32 %v8738_v46, %v8701_v56  ;;  %v885_v3 = vmul.f32 %v8741_v53, %v8710_v0  ;;  %v8912_v49 = vmul.f32 0.044715, %v8885_v26 }
 0x118   : > { %v1203_v25 = vadd.f32 1.0, %v7097_v58  ;;  %v1045_v20 = vmul.f32 0.7978846, %v981_v47  ;;  %7102 = vtanh.f32 %v1044_v42  ;;  %v8918_v15 = vmul.f32 0.044715, %v8895_v59 }
 0x119   : > { %v609_v40 = vpop.f32.mrf.mxu2  ;;  %v8915_v5 = vmul.f32 %v1202_v4, %v8793_v8  ;;  %v948_v32 = vmul.f32 %v884_v23, %v8701_v56  ;;  %v949_v46 = vmul.f32 %v885_v3, %v8710_v0  ;;  %v8926_v28 = vmul.f32 0.044715, %v8898_v61  ;;  %v8939_v3 = vpop.permute.xlu1 %2868 }
 0x11a   : > { %v698_v16 = vpop.f32.mrf.mxu3  ;;  %v8923_v53 = vmul.f32 %v1203_v25, %v8815_v22  ;;  %v8929_v47 = vmul.f32 0.044715, %v8903_v7  ;;  %7104 = vtanh.f32 %v1045_v20  ;;  %v8932_v4 = vmul.f32 0.5, %v8701_v56  ;;  %14897 = vst [vmem:[#allocation83_spill] sm:$0xff] %v8939_v3 }
 0x11b   : > { %14895 = vst [vmem:[#allocation81_spill] sm:$0xff] %v8915_v5  ;;  %v571_v42 = vpop.f32.mrf.mxu0  ;;  %v7099_v8 = vpop.eup %7098  ;;  %v8935_v58 = vmul.f32 0.5, %v8710_v0  ;;  %v1012_v23 = vadd.f32 %v948_v32, %v8701_v56  ;;  %v1013_v22 = vadd.f32 %v949_v46, %v8710_v0  ;;  %v8944_v20 = vadd.f32 %v609_v40, %v8378_v38 }
 0x11c   : > { %14896 = vst [vmem:[#allocation82_spill] sm:$0xff] %v8923_v53  ;;  %v7101_v25 = vpop.eup %7100  ;;  %v1353_v24 = vadd.f32 %v8923_v53, %v8915_v5  ;;  %v1170_v48 = vadd.f32 1.0, %v7099_v8  ;;  %v8947_v35 = vmul.f32 0.5, %v8761_v34  ;;  %v886_v56 = vmul.f32 %v8796_v19, %v8761_v34  ;;  %v8951_v32 = vpop.permute.xlu2 %2847 }
 0x11d   : > { %v1171_v43 = vadd.f32 1.0, %v7101_v25  ;;  %v1076_v57 = vmul.f32 0.7978846, %v1012_v23  ;;  %v1077_v29 = vmul.f32 0.7978846, %v1013_v22  ;;  %14898 = vst [vmem:[#allocation84_spill] sm:$0xff] %v8951_v32  ;;  %v8957_v8 = vadd.f32 %v698_v16, %v8380_v27  ;;  %v660_v25 = vpop.f32.mrf.mxu1 }
 0x11e   : > { %v7103_v0 = vpop.eup %7102  ;;  %1354 = vadd.xlane.f32.xlu2 %v1353_v24  ;;  %v8954_v46 = vmul.f32 %v1170_v48, %v8823_v12  ;;  %v8960_v40 = vadd.f32 %v571_v42, %v8378_v38  ;;  %v887_v23 = vmul.f32 %v8804_v11, %v8770_v17  ;;  %v950_v24 = vmul.f32 %v886_v56, %v8761_v34  ;;  %v8968_v48 = vpop.permute.xlu0 %2862 }
 0x11f   : > { %v8965_v22 = vmul.f32 %v1171_v43, %v8833_v6  ;;  %v1172_v19 = vadd.f32 1.0, %v7103_v0  ;;  %7106 = vtanh.f32 %v1076_v57  ;;  %14901 = vst [vmem:[#allocation87_spill] sm:$0xff] %v8968_v48  ;;  %v8971_v12 = vmul.f32 0.044715, %v8944_v20 }
 0x120   : > { %14899 = vst [vmem:[#allocation85_spill] sm:$0xff] %v8954_v46  ;;  %v7105_v32 = vpop.eup %7104  ;;  %7108 = vtanh.f32 %v1077_v29  ;;  %v951_v16 = vmul.f32 %v887_v23, %v8770_v17  ;;  %v854_v11 = vmul.f32 %v8746_v13, %v8719_v33  ;;  %v1014_v42 = vadd.f32 %v950_v24, %v8761_v34 }
 0x121   : > { %14900 = vst [vmem:[#allocation86_spill] sm:$0xff] %v8965_v22  ;;  %v1305_v43 = vadd.f32 %v8965_v22, %v8954_v46  ;;  %v1173_v6 = vadd.f32 1.0, %v7105_v32  ;;  %v8979_v57 = vmul.f32 %v1172_v19, %v8888_v37  ;;  %v8983_v56 = vmul.f32 0.044715, %v8957_v8  ;;  %v611_v13 = vpop.f32.mrf.mxu2 }
 0x122   : > { %v1015_v29 = vadd.f32 %v951_v16, %v8770_v17  ;;  %v855_v0 = vmul.f32 %v8752_v10, %v8724_v2  ;;  %v918_v23 = vmul.f32 %v854_v11, %v8719_v33  ;;  %v700_v3 = vpop.f32.mrf.mxu3  ;;  %v8992_v37 = vmul.f32 0.044715, %v8960_v40 }
 0x123   : > { %14902 = vst [vmem:[#allocation88_spill] sm:$0xff] %v8979_v57  ;;  %1306 = vadd.xlane.f32.xlu1 %v1305_v43  ;;  %v8989_v48 = vmul.f32 %v1173_v6, %v725_v1  ;;  %v8995_v34 = vadd.f32 %v660_v25, %v8380_v27  ;;  %v1078_v32 = vmul.f32 0.7978846, %v1014_v42  ;;  %v759_v19 = vmul.f32 0.5, %v8770_v17  ;;  %v574_v11 = vpop.f32.mrf.mxu0  ;;  %v9008_v42 = vpop.permute.xlu1 %2877 }
 0x124   : > { %v1079_v24 = vmul.f32 0.7978846, %v1015_v29  ;;  %v919_v16 = vmul.f32 %v855_v0, %v8724_v2  ;;  %v982_v10 = vadd.f32 %v918_v23, %v8719_v33  ;;  %v9003_v43 = vadd.f32 %v611_v13, %v8378_v38  ;;  %14904 = vst [vmem:[#allocation90_spill] sm:$0xff] %v9008_v42 }
 0x125   : > { %14903 = vst [vmem:[#allocation89_spill] sm:$0xff] %v8989_v48  ;;  %v7107_v22 = vpop.eup %7106  ;;  %v1308_v1 = vadd.f32 %v8989_v48, %v8979_v57  ;;  %7110 = vtanh.f32 %v1078_v32  ;;  %v9006_v25 = vadd.f32 %v700_v3, %v8380_v27  ;;  %v9012_v46 = vmul.f32 0.044715, %v8995_v34  ;;  %v9018_v3 = vpop.permute.xlu2 %2856 }
 0x126   : > { %v7109_v6 = vpop.eup %7108  ;;  %v1204_v17 = vadd.f32 1.0, %v7107_v22  ;;  %7112 = vtanh.f32 %v1079_v24  ;;  %v983_v29 = vadd.f32 %v919_v16, %v8724_v2  ;;  %v1046_v0 = vmul.f32 0.7978846, %v982_v10  ;;  %14905 = vst [vmem:[#allocation91_spill] sm:$0xff] %v9018_v3 }
 0x127   : > { %1309 = vadd.xlane.f32.xlu2 %v1308_v1  ;;  %v1205_v23 = vadd.f32 1.0, %v7109_v6  ;;  %v726_v32 = vmul.f32 0.5, %v8719_v33  ;;  %v9016_v13 = vadd.f32 %v574_v11, %v8378_v38  ;;  %v888_v24 = vmul.f32 %v8868_v62, %v8820_v63  ;;  %v663_v11 = vpop.f32.mrf.mxu1  ;;  %v9034_v6 = vpop.permute.xlu0 %2871 }
 0x128   : > { %v9021_v48 = vmul.f32 %v1204_v17, %v8932_v4  ;;  %v1047_v22 = vmul.f32 0.7978846, %v983_v29  ;;  %7114 = vtanh.f32 %v1046_v0  ;;  %v727_v10 = vmul.f32 0.5, %v8724_v2  ;;  %14908 = vst [vmem:[#allocation94_spill] sm:$0xff] %v9034_v6 }
 0x129   : > { %v9026_v16 = vmul.f32 %v1205_v23, %v8935_v58  ;;  %v9030_v33 = vmul.f32 0.044715, %v9003_v43  ;;  %v889_v1 = vmul.f32 %v8871_v41, %v8839_v30  ;;  %v9037_v4 = vmul.f32 0.044715, %v9006_v25 }
 0x12a   : > { %14906 = vst [vmem:[#allocation92_spill] sm:$0xff] %v9021_v48  ;;  %7116 = vtanh.f32 %v1047_v22  ;;  %v952_v62 = vmul.f32 %v888_v24, %v8820_v63  ;;  %v856_v58 = vmul.f32 %v8807_v45, %v8774_v51  ;;  %v9045_v29 = vmul.f32 0.044715, %v9016_v13  ;;  %v703_v57 = vpop.f32.mrf.mxu3 }
 0x12b   : > { %14907 = vst [vmem:[#allocation93_spill] sm:$0xff] %v9026_v16  ;;  %v7111_v17 = vpop.eup %7110  ;;  %v1356_v2 = vadd.f32 %v9026_v16, %v9021_v48  ;;  %v953_v41 = vmul.f32 %v889_v1, %v8839_v30  ;;  %v857_v0 = vmul.f32 %v8812_v54, %v8782_v50  ;;  %v9051_v3 = vadd.f32 %v663_v11, %v8380_v27  ;;  %v614_v48 = vpop.f32.mrf.mxu2 }
 0x12c   : > { %v7113_v23 = vpop.eup %7112  ;;  %v1206_v22 = vadd.f32 1.0, %v7111_v17  ;;  %v1016_v24 = vadd.f32 %v952_v62, %v8820_v63  ;;  %v920_v45 = vmul.f32 %v856_v58, %v8774_v51  ;;  %v760_v6 = vmul.f32 0.5, %v8820_v63 }
 0x12d   : > { %1357 = vadd.xlane.f32.xlu0 %v1356_v2  ;;  %v1207_v42 = vadd.f32 1.0, %v7113_v23  ;;  %v1017_v16 = vadd.f32 %v953_v41, %v8839_v30  ;;  %v921_v1 = vmul.f32 %v857_v0, %v8782_v50  ;;  %v761_v11 = vmul.f32 0.5, %v8839_v30  ;;  %v576_v41 = vpop.f32.mrf.mxu0  ;;  %v9066_v0 = vpop.permute.xlu1 %2886 }
 0x12e   : > { %v7115_v54 = vpop.eup %7114  ;;  %v9059_v17 = vmul.f32 %v1206_v22, %v8947_v35  ;;  %v1080_v53 = vmul.f32 0.7978846, %v1016_v24  ;;  %v984_v62 = vadd.f32 %v920_v45, %v8774_v51  ;;  %14911 = vst [vmem:[#allocation97_spill] sm:$0xff] %v9066_v0  ;;  %v9069_v35 = vadd.f32 %v614_v48, %v8378_v38 }
 0x12f   : > { %v9063_v58 = vmul.f32 %v1207_v42, %v759_v19  ;;  %v1174_v2 = vadd.f32 1.0, %v7115_v54  ;;  %v1081_v23 = vmul.f32 0.7978846, %v1017_v16  ;;  %v985_v63 = vadd.f32 %v921_v1, %v8782_v50  ;;  %v9078_v16 = vpop.permute.xlu2 %2865  ;;  %v9092_v54 = vpop.permute.xlu0 %2880 }
 0x130   : > { %14909 = vst [vmem:[#allocation95_spill] sm:$0xff] %v9059_v17  ;;  %v7117_v5 = vpop.eup %7116  ;;  %7118 = vtanh.f32 %v1080_v53  ;;  %v1048_v55 = vmul.f32 0.7978846, %v984_v62  ;;  %v9072_v30 = vadd.f32 %v703_v57, %v8380_v27  ;;  %v9081_v24 = vmul.f32 0.044715, %v9051_v3 }
 0x131   : > { %14910 = vst [vmem:[#allocation96_spill] sm:$0xff] %v9063_v58  ;;  %v1359_v19 = vadd.f32 %v9063_v58, %v9059_v17  ;;  %v1175_v42 = vadd.f32 1.0, %v7117_v5  ;;  %v9076_v22 = vmul.f32 %v1174_v2, %v726_v32  ;;  %7120 = vtanh.f32 %v1081_v23  ;;  %v665_v32 = vpop.f32.mrf.mxu1 }
 0x132   : > { %14913 = vst [vmem:[#allocation99_spill] sm:$0xff] %v9078_v16  ;;  %v1049_v53 = vmul.f32 0.7978846, %v985_v63  ;;  %7122 = vtanh.f32 %v1048_v55  ;;  %v9084_v48 = vadd.f32 %v576_v41, %v8378_v38  ;;  %v728_v45 = vmul.f32 0.5, %v8774_v51 }
 0x133   : > { %14912 = vst [vmem:[#allocation98_spill] sm:$0xff] %v9076_v22  ;;  %1360 = vadd.xlane.f32.xlu1 %v1359_v19  ;;  %v9086_v57 = vmul.f32 %v1175_v42, %v727_v10  ;;  %v729_v5 = vmul.f32 0.5, %v8782_v50  ;;  %v858_v1 = vmul.f32 %v8874_v36, %v8846_v39  ;;  %v9095_v62 = vmul.f32 0.044715, %v9069_v35  ;;  %v616_v0 = vpop.f32.mrf.mxu2 }
 0x134   : > { %14915 = vst [vmem:[#allocation101_spill] sm:$0xff] %v9092_v54  ;;  %7124 = vtanh.f32 %v1049_v53  ;;  %v9098_v55 = vmul.f32 0.044715, %v9072_v30  ;;  %v859_v10 = vmul.f32 %v8880_v14, %v8853_v44  ;;  %v890_v36 = vmul.f32 %v8912_v49, %v8885_v26 }
 0x135   : > { %14914 = vst [vmem:[#allocation100_spill] sm:$0xff] %v9086_v57  ;;  %v1311_v51 = vadd.f32 %v9086_v57, %v9076_v22  ;;  %v922_v50 = vmul.f32 %v858_v1, %v8846_v39  ;;  %v891_v2 = vmul.f32 %v8918_v15, %v8895_v59  ;;  %v9110_v63 = vmul.f32 0.044715, %v9084_v48 }
 0x136   : > { %v7119_v23 = vpop.eup %7118  ;;  %v9113_v41 = vadd.f32 %v665_v32, %v8380_v27  ;;  %v9116_v14 = vmul.f32 0.5, %v8846_v39  ;;  %v923_v19 = vmul.f32 %v859_v10, %v8853_v44  ;;  %v954_v1 = vmul.f32 %v890_v36, %v8885_v26  ;;  %v9132_v36 = vpop.permute.xlu1 %2895 }
 0x137   : > { %v7121_v42 = vpop.eup %7120  ;;  %1312 = vadd.xlane.f32.xlu0 %v1311_v51  ;;  %v1208_v53 = vadd.f32 1.0, %v7119_v23  ;;  %v986_v49 = vadd.f32 %v922_v50, %v8846_v39  ;;  %v955_v15 = vmul.f32 %v891_v2, %v8895_v59  ;;  %v9123_v32 = vmul.f32 0.5, %v8853_v44  ;;  %14916 = vst [vmem:[#allocation102_spill] sm:$0xff] %v9132_v36 }
 0x138   : > { %v7123_v54 = vpop.eup %7122  ;;  %v1209_v16 = vadd.f32 1.0, %v7121_v42  ;;  %v987_v57 = vadd.f32 %v923_v19, %v8853_v44  ;;  %v9127_v22 = vmul.f32 0.5, %v8885_v26  ;;  %v1018_v39 = vadd.f32 %v954_v1, %v8885_v26  ;;  %v705_v44 = vpop.f32.mrf.mxu3 }
 0x139   : > { %v9129_v10 = vmul.f32 %v1208_v53, %v760_v6  ;;  %v1176_v51 = vadd.f32 1.0, %v7123_v54  ;;  %v1050_v23 = vmul.f32 0.7978846, %v986_v49  ;;  %v1019_v58 = vadd.f32 %v955_v15, %v8895_v59  ;;  %v9142_v54 = vpop.permute.xlu2 %2874 }
 0x13a   : > { %v7125_v50 = vpop.eup %7124  ;;  %v9134_v2 = vmul.f32 %v1209_v16, %v761_v11  ;;  %v1051_v42 = vmul.f32 0.7978846, %v987_v57  ;;  %v9138_v17 = vadd.f32 %v616_v0, %v8378_v38  ;;  %v1082_v6 = vmul.f32 0.7978846, %v1018_v39  ;;  %14917 = vst [vmem:[#allocation103_spill] sm:$0xff] %v9142_v54 }
 0x13b   : > { %v1177_v19 = vadd.f32 1.0, %v7125_v50  ;;  %v9140_v31 = vmul.f32 %v1176_v51, %v728_v45  ;;  %7126 = vtanh.f32 %v1050_v23  ;;  %v1083_v11 = vmul.f32 0.7978846, %v1019_v58  ;;  %v9155_v45 = vpop.permute.xlu0 %2889 }
 0x13c   : > { %v1362_v26 = vadd.f32 %v9134_v2, %v9129_v10  ;;  %7128 = vtanh.f32 %v1051_v42  ;;  %v892_v16 = vmul.f32 %v8971_v12, %v8944_v20  ;;  %v9151_v38 = vadd.f32 %v705_v44, %v8380_v27  ;;  %14918 = vst [vmem:[#allocation104_spill] sm:$0xff] %v9155_v45 }
 0x13d   : > { %v9148_v57 = vmul.f32 %v1177_v19, %v729_v5  ;;  %7130 = vtanh.f32 %v1082_v6  ;;  %v893_v0 = vmul.f32 %v8983_v56, %v8957_v8  ;;  %v763_v53 = vmul.f32 0.5, %v8895_v59 }
 0x13e   : > { %1363 = vadd.xlane.f32.xlu2 %v1362_v26  ;;  %7132 = vtanh.f32 %v1083_v11  ;;  %v956_v58 = vmul.f32 %v892_v16, %v8944_v20  ;;  %v860_v12 = vmul.f32 %v8926_v28, %v8898_v61  ;;  %v9164_v27 = vmul.f32 0.5, %v8944_v20 }
 0x13f   : > { %v1314_v5 = vadd.f32 %v9148_v57, %v9140_v31  ;;  %v957_v49 = vmul.f32 %v893_v0, %v8957_v8  ;;  %v861_v56 = vmul.f32 %v8929_v47, %v8903_v7  ;;  %v9170_v1 = vmul.f32 0.044715, %v9138_v17 }
 0x140   : > { %v1020_v59 = vadd.f32 %v956_v58, %v8944_v20  ;;  %v924_v15 = vmul.f32 %v860_v12, %v8898_v61  ;;  %v894_v28 = vmul.f32 %v9030_v33, %v9003_v43  ;;  %v9177_v23 = vmul.f32 0.044715, %v9151_v38  ;;  %v9187_v12 = vpop.permute.xlu1 %2904 }
 0x141   : > { %v7127_v51 = vpop.eup %7126  ;;  %1315 = vadd.xlane.f32.xlu1 %v1314_v5  ;;  %v1021_v39 = vadd.f32 %v957_v49, %v8957_v8  ;;  %v925_v50 = vmul.f32 %v861_v56, %v8903_v7  ;;  %v895_v47 = vmul.f32 %v9037_v4, %v9006_v25  ;;  %14919 = vst [vmem:[#allocation105_spill] sm:$0xff] %v9187_v12 }
 0x142   : > { %v7129_v42 = vpop.eup %7128  ;;  %v1178_v44 = vadd.f32 1.0, %v7127_v51  ;;  %v1084_v20 = vmul.f32 0.7978846, %v1020_v59  ;;  %v988_v19 = vadd.f32 %v924_v15, %v8898_v61  ;;  %v958_v6 = vmul.f32 %v894_v28, %v9003_v43  ;;  %v9195_v28 = vpop.permute.xlu2 %2883 }
 0x143   : > { %v7131_v33 = vpop.eup %7130  ;;  %v1179_v26 = vadd.f32 1.0, %v7129_v42  ;;  %v1085_v11 = vmul.f32 0.7978846, %v1021_v39  ;;  %v989_v16 = vadd.f32 %v925_v50, %v8903_v7  ;;  %v959_v0 = vmul.f32 %v895_v47, %v9006_v25  ;;  %14920 = vst [vmem:[#allocation106_spill] sm:$0xff] %v9195_v28  ;;  %v9207_v42 = vpop.permute.xlu0 %2898 }
 0x144   : > { %v7133_v58 = vpop.eup %7132  ;;  %v9190_v5 = vmul.f32 %v1178_v44, %v9116_v14  ;;  %v1210_v4 = vadd.f32 1.0, %v7131_v33  ;;  %7134 = vtanh.f32 %v1084_v20  ;;  %v1052_v49 = vmul.f32 0.7978846, %v988_v19  ;;  %14921 = vst [vmem:[#allocation107_spill] sm:$0xff] %v9207_v42 }
 0x145   : > { %v9193_v56 = vmul.f32 %v1179_v26, %v9123_v32  ;;  %v1211_v59 = vadd.f32 1.0, %v7133_v58  ;;  %7136 = vtanh.f32 %v1085_v11  ;;  %v1053_v15 = vmul.f32 0.7978846, %v989_v16 }
 0x146   : > { %v9198_v51 = vmul.f32 %v1210_v4, %v9127_v22  ;;  %7138 = vtanh.f32 %v1052_v49  ;;  %v1022_v39 = vadd.f32 %v958_v6, %v9003_v43  ;;  %v1023_v14 = vadd.f32 %v959_v0, %v9006_v25 }
 0x147   : > { %v1317_v50 = vadd.f32 %v9193_v56, %v9190_v5  ;;  %v9204_v47 = vmul.f32 %v1211_v59, %v763_v53  ;;  %v765_v32 = vmul.f32 0.5, %v8957_v8  ;;  %7140 = vtanh.f32 %v1053_v15 }
 0x148   : > { %v1086_v44 = vmul.f32 0.7978846, %v1022_v39  ;;  %v1087_v20 = vmul.f32 0.7978846, %v1023_v14  ;;  %v862_v22 = vmul.f32 %v8992_v37, %v8960_v40  ;;  %v863_v19 = vmul.f32 %v9012_v46, %v8995_v34 }
 0x149   : > { %1318 = vadd.xlane.f32.xlu2 %v1317_v50  ;;  %v1365_v6 = vadd.f32 %v9204_v47, %v9198_v51  ;;  %v732_v53 = vmul.f32 0.5, %v8898_v61  ;;  %v733_v33 = vmul.f32 0.5, %v8903_v7  ;;  %v864_v37 = vmul.f32 %v9045_v29, %v9016_v13  ;;  %v9231_v50 = vpop.permute.xlu1 %3433 }
 0x14a   : > { %v7135_v8 = vpop.eup %7134  ;;  %7142 = vtanh.f32 %v1086_v44  ;;  %v926_v26 = vmul.f32 %v862_v22, %v8960_v40  ;;  %v927_v11 = vmul.f32 %v863_v19, %v8995_v34  ;;  %v766_v0 = vmul.f32 0.5, %v9003_v43  ;;  %14922 = vst [vmem:[#allocation108_spill] sm:$0xff] %v9231_v50 }
 0x14b   : > { %v7137_v16 = vpop.eup %7136  ;;  %1366 = vadd.xlane.f32.xlu0 %v1365_v6  ;;  %v1212_v46 = vadd.f32 1.0, %v7135_v8  ;;  %7144 = vtanh.f32 %v1087_v20  ;;  %v865_v61 = vmul.f32 %v9081_v24, %v9051_v3  ;;  %v7853_v59 = vmov 256.0  }
 0x14c   : > { %v7139_v58 = vpop.eup %7138  ;;  %v1213_v7 = vadd.f32 1.0, %v7137_v16  ;;  %v990_v4 = vadd.f32 %v926_v26, %v8960_v40  ;;  %v991_v49 = vadd.f32 %v927_v11, %v8995_v34  ;;  %7146 = vrcp.f32 %v7853_v59  ;;  %v9240_v11 = vpop.permute.xlu2 %2892 }
 0x14d   : > { %v7141_v15 = vpop.eup %7140  ;;  %v9227_v29 = vmul.f32 %v1212_v46, %v9164_v27  ;;  %v1180_v39 = vadd.f32 1.0, %v7139_v58  ;;  %v928_v14 = vmul.f32 %v864_v37, %v9016_v13  ;;  %v929_v43 = vmul.f32 %v865_v61, %v9051_v3  ;;  %14923 = vst [vmem:[#allocation109_spill] sm:$0xff] %v9240_v11  ;;  %v14942_v11 = vld [vmem:[#allocation70_spill] sm:$0xff] }
 0x14e   : > { %v9233_v24 = vmul.f32 %v1213_v7, %v765_v32  ;;  %v1181_v44 = vadd.f32 1.0, %v7141_v15  ;;  %v1054_v20 = vmul.f32 0.7978846, %v990_v4  ;;  %v1055_v22 = vmul.f32 0.7978846, %v991_v49  ;;  %v1286_v32 = vpop.xlane.xlu0 %1285 }
 0x14f   : > { %v9235_v19 = vmul.f32 %v1180_v39, %v732_v53  ;;  %v767_v6 = vmul.f32 0.5, %v9006_v25  ;;  %v992_v8 = vadd.f32 %v928_v14, %v9016_v13  ;;  %v993_v27 = vadd.f32 %v929_v43, %v9051_v3 }
 0x150   : > { %v7143_v26 = vpop.eup %7142  ;;  %v1368_v37 = vadd.f32 %v9233_v24, %v9227_v29  ;;  %v9244_v16 = vmul.f32 %v1181_v44, %v733_v33  ;;  %7148 = vtanh.f32 %v1054_v20  ;;  %v896_v53 = vmul.f32 %v9095_v62, %v9069_v35 }
 0x151   : > { %v7145_v46 = vpop.eup %7144  ;;  %v1214_v61 = vadd.f32 1.0, %v7143_v26  ;;  %7150 = vtanh.f32 %v1055_v22  ;;  %v1056_v25 = vmul.f32 0.7978846, %v992_v8  ;;  %v1057_v58 = vmul.f32 0.7978846, %v993_v27 }
 0x152   : > { %v7147_v7 = vpop.eup %7146  ;;  %1369 = vadd.xlane.f32.xlu1 %v1368_v37  ;;  %v1320_v4 = vadd.f32 %v9244_v16, %v9235_v19  ;;  %v1215_v49 = vadd.f32 1.0, %v7145_v46  ;;  %v897_v33 = vmul.f32 %v9098_v55, %v9072_v30  ;;  %v960_v59 = vmul.f32 %v896_v53, %v9069_v35  ;;  %v9267_v37 = vpop.xlane.xlu1 %1333 }
 0x153   : > { %v803_v15 = vmul.f32 0.044715, %v9113_v41  ;;  %v9254_v39 = vmul.f32 %v1214_v61, %v766_v0  ;;  %v1381_v62 = vmul.f32 256.0, %v7147_v7  ;;  %7152 = vtanh.f32 %v1056_v25 }
 0x154   : > { %1321 = vadd.xlane.f32.xlu0 %v1320_v4  ;;  %v9256_v14 = vmul.f32 %v1215_v49, %v767_v6  ;;  %7154 = vtanh.f32 %v1057_v58  ;;  %v961_v43 = vmul.f32 %v897_v33, %v9072_v30  ;;  %v1024_v44 = vadd.f32 %v960_v59, %v9069_v35 }
 0x155   : > { %v734_v20 = vmul.f32 0.5, %v8960_v40  ;;  %v735_v55 = vmul.f32 0.5, %v8995_v34  ;;  %v1382_v22 = vsub.f32 1.0, %v1381_v62  ;;  %v898_v8 = vmul.f32 %v9170_v1, %v9138_v17 }
 0x156   : > { %v7149_v0 = vpop.eup %7148  ;;  %v1371_v27 = vadd.f32 %v9256_v14, %v9254_v39  ;;  %v1025_v6 = vadd.f32 %v961_v43, %v9072_v30  ;;  %v1088_v26 = vmul.f32 0.7978846, %v1024_v44  ;;  %v899_v53 = vmul.f32 %v9177_v23, %v9151_v38  ;;  %v9277_v43 = vpop.permute.xlu2 %2901 }
 0x157   : > { %v7151_v46 = vpop.eup %7150  ;;  %v1182_v40 = vadd.f32 1.0, %v7149_v0  ;;  %v1383_v61 = vmul.f32 %v7147_v7, %v1382_v22  ;;  %vm1385_vm6 = vweird.f32 %v7147_v7  ;;  %v962_v34 = vmul.f32 %v898_v8, %v9138_v17  ;;  %14924 = vst [vmem:[#allocation110_spill] sm:$0xff] %v9277_v43  ;;  %v9281_v8 = vpop.xlane.xlu0 %1288 }
 0x158   : > { %1372 = vadd.xlane.f32.xlu2 %v1371_v27  ;;  %v1183_v1 = vadd.f32 1.0, %v7151_v46  ;;  %v1089_v25 = vmul.f32 0.7978846, %v1025_v6  ;;  %7156 = vtanh.f32 %v1088_v26  ;;  %v963_v58 = vmul.f32 %v899_v53, %v9151_v38 }
 0x159   : > { %v7153_v4 = vpop.eup %7152  ;;  %v9273_v49 = vmul.f32 %v1182_v40, %v734_v20  ;;  %v1384_v33 = vadd.f32 %v7147_v7, %v1383_v61  ;;  %v736_v59 = vmul.f32 0.5, %v9016_v13  ;;  %v1026_v23 = vadd.f32 %v962_v34, %v9138_v17 }
 0x15a   : > { %v7155_v62 = vpop.eup %7154  ;;  %v9279_v44 = vmul.f32 %v1183_v1, %v735_v55  ;;  %v1184_v22 = vadd.f32 1.0, %v7153_v4  ;;  %7158 = vtanh.f32 %v1089_v25  ;;  %v1027_v0 = vadd.f32 %v963_v58, %v9151_v38  ;;  %v1292_v1 = vpop.xlane.xlu1 %1291 }
 0x15b   : > { %v9285_v27 = vsel %vm1385_vm6, %v7147_v7, %v1384_v33  ;;  %v737_v20 = vmul.f32 0.5, %v9051_v3  ;;  %v1185_v6 = vadd.f32 1.0, %v7155_v62  ;;  %v1090_v13 = vmul.f32 0.7978846, %v1026_v23 }
 0x15c   : > { %v1323_v26 = vadd.f32 %v9279_v44, %v9273_v49  ;;  %v1387_v53 = vmul.f32 %v9285_v27, %v1286_v32  ;;  %v9291_v55 = vmul.f32 %v1184_v22, %v736_v59  ;;  %v866_v46 = vmul.f32 %v9110_v63, %v9084_v48 }
 0x15d   : > { %v9295_v40 = vmul.f32 %v1185_v6, %v737_v20  ;;  %v1091_v61 = vmul.f32 0.7978846, %v1027_v0  ;;  %7160 = vtanh.f32 %v1090_v13  ;;  %v768_v25 = vmul.f32 0.5, %v9069_v35 }
 0x15e   : > { %v7157_v7 = vpop.eup %7156  ;;  %1324 = vadd.xlane.f32.xlu1 %v1323_v26  ;;  %v9298_v3 = vsub.f32 %v8422_v60, %v1387_v53  ;;  %v9301_v34 = vsub.f32 %v8425_v9, %v1387_v53  ;;  %v867_v4 = vmul.f32 %v803_v15, %v9113_v41  ;;  %v930_v33 = vmul.f32 %v866_v46, %v9084_v48  ;;  %v1337_v0 = vpop.xlane.xlu2 %1336 }
 0x15f   : > { %v1326_v32 = vadd.f32 %v9295_v40, %v9291_v55  ;;  %v1216_v58 = vadd.f32 1.0, %v7157_v7  ;;  %7162 = vtanh.f32 %v1091_v61  ;;  %v769_v60 = vmul.f32 0.5, %v9072_v30  ;;  %v1340_v15 = vpop.xlane.xlu0 %1339 }
 0x160   : > { %v7159_v63 = vpop.eup %7158  ;;  %v931_v9 = vmul.f32 %v867_v4, %v9113_v41  ;;  %v994_v62 = vadd.f32 %v930_v33, %v9084_v48  ;;  %v1483_v35 = vmul.f32 %v9298_v3, %v9298_v3  ;;  %v1484_v22 = vmul.f32 %v9301_v34, %v9301_v34 }
 0x161   : > { %1327 = vadd.xlane.f32.xlu2 %v1326_v32  ;;  %v1217_v59 = vadd.f32 1.0, %v7159_v63  ;;  %v9309_v23 = vmul.f32 %v1216_v58, %v768_v25  ;;  %v770_v46 = vmul.f32 0.5, %v9138_v17  ;;  %v1404_v61 = vmul.f32 %v9285_v27, %v1337_v0 }
 0x162   : > { %v995_v30 = vadd.f32 %v931_v9, %v9113_v41  ;;  %v1058_v26 = vmul.f32 0.7978846, %v994_v62  ;;  %v1405_v7 = vmul.f32 %v9285_v27, %v1340_v15  ;;  %v771_v25 = vmul.f32 0.5, %v9151_v38  ;;  %v1295_v17 = vpop.xlane.xlu1 %1294  ;;  %v14925_v62 = vld [vmem:[#allocation47_spill] sm:$0xff] }
 0x163   : > { %v7161_v20 = vpop.eup %7160  ;;  %v9317_v6 = vmul.f32 %v1217_v59, %v769_v60  ;;  %v1547_v63 = vadd.f32 %v1484_v22, %v1483_v35  ;;  %v9337_v38 = vsub.f32 %v8486_v18, %v1404_v61  ;;  %v9340_v35 = vsub.f32 %v14925_v62, %v1404_v61 }
 0x164   : > { %v1218_v13 = vadd.f32 1.0, %v7161_v20  ;;  %v1059_v58 = vmul.f32 0.7978846, %v995_v30  ;;  %7164 = vtanh.f32 %v1058_v26  ;;  %v9329_v60 = vsub.f32 %v8556_v21, %v1405_v7 }
 0x165   : > { %v1374_v53 = vadd.f32 %v9317_v6, %v9309_v23  ;;  %v7163_v32 = vpop.eup %7162  ;;  %v9332_v59 = vsub.f32 %v8562_v52, %v1405_v7  ;;  %v1390_v52 = vmul.f32 %v9285_v27, %v1295_v17  ;;  %v738_v18 = vmul.f32 0.5, %v9084_v48  ;;  %v14926_v48 = vld [vmem:[#allocation52_spill] sm:$0xff] }
 0x166   : > { %v1219_v4 = vadd.f32 1.0, %v7163_v32  ;;  %v9326_v33 = vmul.f32 %v1218_v13, %v770_v46  ;;  %7166 = vtanh.f32 %v1059_v58  ;;  %v1519_v22 = vmul.f32 %v9329_v60, %v9329_v60 }
 0x167   : > { %1375 = vadd.xlane.f32.xlu0 %v1374_v53  ;;  %v9344_v0 = vpop.xlane.xlu2 %1297  ;;  %v1520_v15 = vmul.f32 %v9332_v59, %v9332_v59  ;;  %v1517_v30 = vmul.f32 %v9337_v38, %v9337_v38  ;;  %v1518_v26 = vmul.f32 %v9340_v35, %v9340_v35  ;;  %v1403_v61 = vmul.f32 %v9285_v27, %v9267_v37  ;;  %v14929_v37 = vld [vmem:[#allocation44_spill] sm:$0xff] }
 0x168   : > { %v9334_v9 = vmul.f32 %v1219_v4, %v771_v25  ;;  %v739_v7 = vmul.f32 0.5, %v9113_v41  ;;  %v1389_v32 = vmul.f32 %v9285_v27, %v1292_v1  ;;  %v14927_v4 = vld [vmem:[#allocation53_spill] sm:$0xff]  ;;  %v14930_v1 = vld [vmem:[#allocation48_spill] sm:$0xff] }
 0x169   : > { %1548 = vadd.xlane.f32.xlu2 %v1547_v63  ;;  %v1601_v53 = vadd.f32 %v1520_v15, %v1519_v22  ;;  %v9363_v63 = vsub.f32 %v14926_v48, %v1390_v52  ;;  %v9366_v17 = vsub.f32 %v14927_v4, %v1390_v52  ;;  %v1598_v22 = vadd.f32 %v1518_v26, %v1517_v30 }
 0x16a   : > { %v1377_v21 = vadd.f32 %v9334_v9, %v9326_v33  ;;  %v7165_v20 = vpop.eup %7164  ;;  %v9374_v41 = vsub.f32 %v14929_v37, %v1403_v61 }
 0x16b   : > { %v1186_v13 = vadd.f32 1.0, %v7165_v20  ;;  %v9377_v20 = vsub.f32 %v14930_v1, %v1389_v32  ;;  %v1489_v52 = vmul.f32 %v9363_v63, %v9363_v63  ;;  %v1490_v30 = vmul.f32 %v9366_v17, %v9366_v17  ;;  %v14933_v1 = vld [vmem:[#allocation64_spill] sm:$0xff] }
 0x16c   : > { %1378 = vadd.xlane.f32.xlu1 %v1377_v21  ;;  %v7167_v46 = vpop.eup %7166  ;;  %v14928_v21 = vld [vmem:[#allocation43_spill] sm:$0xff] }
 0x16d   : > { %v1187_v25 = vadd.f32 1.0, %v7167_v46  ;;  %v9360_v58 = vmul.f32 %v1186_v13, %v738_v18  ;;  %v9371_v15 = vsub.f32 %v14928_v21, %v1403_v61  ;;  %v14931_v13 = vld [vmem:[#allocation49_spill] sm:$0xff]  ;;  %v1388_v61 = vmul.f32 %v9285_v27, %v9281_v8  ;;  %v1343_v21 = vpop.xlane.xlu1 %1342 }
 0x16e   : > { %v9382_v46 = vsub.f32 %v14931_v13, %v1389_v32  ;;  %v1516_v32 = vmul.f32 %v9374_v41, %v9374_v41  ;;  %v1556_v4 = vadd.f32 %v1490_v30, %v1489_v52  ;;  %v1406_v36 = vmul.f32 %v9285_v27, %v1343_v21  ;;  %v14941_v21 = vld [vmem:[#allocation59_spill] sm:$0xff] }
 0x16f   : > { %v9368_v62 = vmul.f32 %v1187_v25, %v739_v7  ;;  %v1515_v7 = vmul.f32 %v9371_v15, %v9371_v15  ;;  %v1487_v25 = vmul.f32 %v9377_v20, %v9377_v20 }
 0x170   : > { %v1488_v48 = vmul.f32 %v9382_v46, %v9382_v46 }
 0x171   : > { %1602 = vadd.xlane.f32.xlu2 %v1601_v53  ;;  %v1329_v18 = vadd.f32 %v9368_v62, %v9360_v58  ;;  %v1595_v12 = vadd.f32 %v1516_v32, %v1515_v7 }
 0x172   : > { %v1553_v43 = vadd.f32 %v1488_v48, %v1487_v25 }
 0x173   : > { %1330 = vadd.xlane.f32.xlu0 %v1329_v18  ;;  %v14934_v18 = vld [vmem:[#allocation45_spill] sm:$0xff] }
 0x174   : > { %v1346_v26 = vpop.xlane.xlu2 %1345  ;;  %1599 = vadd.xlane.f32.xlu1 %v1598_v22  ;;  %v14932_v22 = vld [vmem:[#allocation62_spill] sm:$0xff]  ;;  %v9406_v13 = vsub.f32 %v14934_v18, %v1388_v61  ;;  %v9435_v18 = vsub.f32 %v14941_v21, %v1406_v36 }
 0x175   : > { %v1407_v53 = vmul.f32 %v9285_v27, %v1346_v26  ;;  %v14935_v26 = vld [vmem:[#allocation46_spill] sm:$0xff] }
 0x176   : > { %v9409_v50 = vsub.f32 %v14935_v26, %v1388_v61  ;;  %v14938_v61 = vld [vmem:[#allocation68_spill] sm:$0xff]  ;;  %v1485_v7 = vmul.f32 %v9406_v13, %v9406_v13 }
 0x177   : > { %v9400_v37 = vsub.f32 %v14932_v22, %v1407_v53  ;;  %v9403_v8 = vsub.f32 %v14933_v1, %v1407_v53 }
 0x179   : > { %1557 = vadd.xlane.f32.xlu2 %v1556_v4  ;;  %v1523_v30 = vmul.f32 %v9400_v37, %v9400_v37  ;;  %v1524_v53 = vmul.f32 %v9403_v8, %v9403_v8  ;;  %v14936_v4 = vld [vmem:[#allocation67_spill] sm:$0xff] }
 0x17b   : > { %v1349_v42 = vpop.xlane.xlu0 %1348  ;;  %1596 = vadd.xlane.f32.xlu0 %v1595_v12  ;;  %v14940_v12 = vld [vmem:[#allocation58_spill] sm:$0xff] }
 0x17c   : > { %v1408_v52 = vmul.f32 %v9285_v27, %v1349_v42  ;;  %1554 = vadd.xlane.f32.xlu1 %v1553_v43  ;;  %v1486_v42 = vmul.f32 %v9409_v50, %v9409_v50  ;;  %v9428_v43 = vsub.f32 %v14940_v12, %v1406_v36  ;;  %v14943_v12 = vld [vmem:[#allocation71_spill] sm:$0xff]  ;;  %v1522_v36 = vmul.f32 %v9435_v18, %v9435_v18 }
 0x17e   : > { %v9418_v22 = vsub.f32 %v14936_v4, %v1408_v52  ;;  %v9421_v1 = vsub.f32 %v14938_v61, %v1408_v52  ;;  %v1607_v52 = vadd.f32 %v1524_v53, %v1523_v30  ;;  %v1550_v61 = vadd.f32 %v1486_v42, %v1485_v7 }
 0x17f   : > { %v1521_v54 = vmul.f32 %v9428_v43, %v9428_v43 }
 0x180   : > { %14937 = vst [vmem:[#allocation47_spill] sm:$0xff] %v9418_v22  ;;  %v1301_v32 = vpop.xlane.xlu2 %1300  ;;  %v1525_v25 = vmul.f32 %v9418_v22, %v9418_v22  ;;  %v1526_v48 = vmul.f32 %v9421_v1, %v9421_v1  ;;  %v14949_v22 = vld [vmem:[#allocation78_spill] sm:$0xff] }
 0x181   : > { %14939 = vst [vmem:[#allocation52_spill] sm:$0xff] %v9421_v1  ;;  %v1392_v26 = vmul.f32 %v9285_v27, %v1301_v32  ;;  %v1604_v7 = vadd.f32 %v1522_v36, %v1521_v54 }
 0x182   : > { %v1610_v4 = vadd.f32 %v1526_v48, %v1525_v25  ;;  %v14945_v48 = vld [vmem:[#allocation55_spill] sm:$0xff] }
 0x183   : > { %v9439_v45 = vsub.f32 %v14942_v11, %v1392_v26  ;;  %v9442_v28 = vsub.f32 %v14943_v12, %v1392_v26  ;;  %1551 = vadd.xlane.f32.xlu0 %v1550_v61  ;;  %v1391_v11 = vmul.f32 %v9285_v27, %v9344_v0  ;;  %v14946_v26 = vld [vmem:[#allocation56_spill] sm:$0xff]  ;;  %v14947_v12 = vld [vmem:[#allocation77_spill] sm:$0xff] }
 0x184   : > { %1611 = vadd.xlane.f32.xlu2 %v1610_v4  ;;  %1608 = vadd.xlane.f32.xlu1 %v1607_v52  ;;  %v1352_v32 = vpop.xlane.xlu1 %1351 }
 0x185   : > { %14944 = vst [vmem:[#allocation53_spill] sm:$0xff] %v9442_v28  ;;  %v1493_v30 = vmul.f32 %v9439_v45, %v9439_v45  ;;  %v1494_v53 = vmul.f32 %v9442_v28, %v9442_v28  ;;  %v9455_v21 = vsub.f32 %v14945_v48, %v1391_v11  ;;  %v9458_v4 = vsub.f32 %v14946_v26, %v1391_v11  ;;  %v14951_v11 = vld [vmem:[#allocation74_spill] sm:$0xff] }
 0x186   : > { %v1409_v61 = vmul.f32 %v9285_v27, %v1352_v32  ;;  %v14953_v32 = vld [vmem:[#allocation75_spill] sm:$0xff]  ;;  %v14957_v28 = vld [vmem:[#allocation82_spill] sm:$0xff] }
 0x187   : > { %v1562_v42 = vadd.f32 %v1494_v53, %v1493_v30  ;;  %v1491_v54 = vmul.f32 %v9455_v21, %v9455_v21  ;;  %v1492_v36 = vmul.f32 %v9458_v4, %v9458_v4 }
 0x189   : > { %v1559_v26 = vadd.f32 %v1492_v36, %v1491_v54 }
 0x18a   : > { %v1304_v25 = vpop.xlane.xlu0 %1303 }
 0x18b   : > { %v1393_v52 = vmul.f32 %v9285_v27, %v1304_v25  ;;  %1605 = vadd.xlane.f32.xlu0 %v1604_v7  ;;  %v9477_v7 = vsub.f32 %v14951_v11, %v1409_v61  ;;  %v9480_v25 = vsub.f32 %v14953_v32, %v1409_v61 }
 0x18c   : > { %1563 = vadd.xlane.f32.xlu1 %v1562_v42 }
 0x18d   : > { %v9463_v1 = vsub.f32 %v14947_v12, %v1393_v52  ;;  %v9466_v0 = vsub.f32 %v14949_v22, %v1393_v52  ;;  %14952 = vst [vmem:[#allocation48_spill] sm:$0xff] %v9477_v7  ;;  %v14955_v52 = vld [vmem:[#allocation81_spill] sm:$0xff]  ;;  %v1527_v11 = vmul.f32 %v9477_v7, %v9477_v7  ;;  %v1528_v61 = vmul.f32 %v9480_v25, %v9480_v25 }
 0x18e   : > { %14954 = vst [vmem:[#allocation49_spill] sm:$0xff] %v9480_v25  ;;  %v14961_v25 = vld [vmem:[#allocation88_spill] sm:$0xff]  ;;  %v14963_v7 = vld [vmem:[#allocation89_spill] sm:$0xff] }
 0x18f   : > { %14948 = vst [vmem:[#allocation43_spill] sm:$0xff] %v9463_v1  ;;  %v1495_v30 = vmul.f32 %v9463_v1, %v9463_v1  ;;  %v1496_v53 = vmul.f32 %v9466_v0, %v9466_v0 }
 0x190   : > { %14950 = vst [vmem:[#allocation44_spill] sm:$0xff] %v9466_v0 }
 0x191   : > { %v1355_v22 = vpop.xlane.xlu2 %1354  ;;  %v1565_v42 = vadd.f32 %v1496_v53, %v1495_v30 }
 0x192   : > { %v1410_v48 = vmul.f32 %v9285_v27, %v1355_v22  ;;  %v14959_v22 = vld [vmem:[#allocation85_spill] sm:$0xff] }
 0x193   : > { %1566 = vadd.xlane.f32.xlu2 %v1565_v42  ;;  %1560 = vadd.xlane.f32.xlu0 %v1559_v26  ;;  %v14960_v42 = vld [vmem:[#allocation86_spill] sm:$0xff]  ;;  %v1613_v26 = vadd.f32 %v1528_v61, %v1527_v11 }
 0x194   : > { %v9484_v12 = vsub.f32 %v14955_v52, %v1410_v48  ;;  %v9487_v1 = vsub.f32 %v14957_v28, %v1410_v48 }
 0x196   : > { %14956 = vst [vmem:[#allocation62_spill] sm:$0xff] %v9484_v12  ;;  %v1307_v32 = vpop.xlane.xlu1 %1306  ;;  %v1529_v30 = vmul.f32 %v9484_v12, %v9484_v12  ;;  %v1530_v54 = vmul.f32 %v9487_v1, %v9487_v1 }
 0x197   : > { %14958 = vst [vmem:[#allocation64_spill] sm:$0xff] %v9487_v1  ;;  %v1394_v36 = vmul.f32 %v9285_v27, %v1307_v32 }
 0x198   : > { %v1616_v53 = vadd.f32 %v1530_v54, %v1529_v30 }
 0x199   : > { %v9499_v28 = vsub.f32 %v14959_v22, %v1394_v36  ;;  %v9502_v48 = vsub.f32 %v14960_v42, %v1394_v36  ;;  %v14965_v22 = vld [vmem:[#allocation92_spill] sm:$0xff] }
 0x19a   : > { %v1310_v52 = vpop.xlane.xlu2 %1309  ;;  %1617 = vadd.xlane.f32.xlu1 %v1616_v53 }
 0x19b   : > { %v1395_v0 = vmul.f32 %v9285_v27, %v1310_v52  ;;  %1614 = vadd.xlane.f32.xlu0 %v1613_v26  ;;  %v1497_v32 = vmul.f32 %v9499_v28, %v9499_v28  ;;  %v1498_v30 = vmul.f32 %v9502_v48, %v9502_v48 }
 0x19d   : > { %v9506_v12 = vsub.f32 %v14961_v25, %v1395_v0  ;;  %v9509_v1 = vsub.f32 %v14963_v7, %v1395_v0  ;;  %v1568_v25 = vadd.f32 %v1498_v30, %v1497_v32  ;;  %v14966_v7 = vld [vmem:[#allocation93_spill] sm:$0xff]  ;;  %v14968_v32 = vld [vmem:[#allocation95_spill] sm:$0xff] }
 0x19f   : > { %14962 = vst [vmem:[#allocation45_spill] sm:$0xff] %v9506_v12  ;;  %v1499_v11 = vmul.f32 %v9506_v12, %v9506_v12  ;;  %v1500_v61 = vmul.f32 %v9509_v1, %v9509_v1 }
 0x1a0   : > { %14964 = vst [vmem:[#allocation46_spill] sm:$0xff] %v9509_v1  ;;  %v1358_v54 = vpop.xlane.xlu0 %1357 }
 0x1a1   : > { %v1411_v36 = vmul.f32 %v9285_v27, %v1358_v54  ;;  %v1571_v53 = vadd.f32 %v1500_v61, %v1499_v11  ;;  %v14969_v11 = vld [vmem:[#allocation96_spill] sm:$0xff] }
 0x1a3   : > { %v9521_v0 = vsub.f32 %v14965_v22, %v1411_v36  ;;  %v9524_v42 = vsub.f32 %v14966_v7, %v1411_v36  ;;  %1572 = vadd.xlane.f32.xlu1 %v1571_v53  ;;  %1569 = vadd.xlane.f32.xlu0 %v1568_v25  ;;  %v14971_v7 = vld [vmem:[#allocation98_spill] sm:$0xff] }
 0x1a5   : > { %14967 = vst [vmem:[#allocation67_spill] sm:$0xff] %v9524_v42  ;;  %v1531_v26 = vmul.f32 %v9521_v0, %v9521_v0  ;;  %v1532_v52 = vmul.f32 %v9524_v42, %v9524_v42 }
 0x1a6   : > { %v1361_v1 = vpop.xlane.xlu1 %1360 }
 0x1a7   : > { %v1412_v12 = vmul.f32 %v9285_v27, %v1361_v1  ;;  %v1619_v54 = vadd.f32 %v1532_v52, %v1531_v26  ;;  %v14972_v1 = vld [vmem:[#allocation100_spill] sm:$0xff] }
 0x1a9   : > { %v9532_v30 = vsub.f32 %v14968_v32, %v1412_v12  ;;  %v9535_v61 = vsub.f32 %v14969_v11, %v1412_v12  ;;  %1620 = vadd.xlane.f32.xlu2 %v1619_v54 }
 0x1aa   : > { %v1313_v36 = vpop.xlane.xlu0 %1312 }
 0x1ab   : > { %14970 = vst [vmem:[#allocation68_spill] sm:$0xff] %v9535_v61  ;;  %v1396_v25 = vmul.f32 %v9285_v27, %v1313_v36  ;;  %v1533_v53 = vmul.f32 %v9532_v30, %v9532_v30  ;;  %v1534_v22 = vmul.f32 %v9535_v61, %v9535_v61 }
 0x1ad   : > { %v9543_v42 = vsub.f32 %v14971_v7, %v1396_v25  ;;  %v9546_v26 = vsub.f32 %v14972_v1, %v1396_v25  ;;  %v1622_v52 = vadd.f32 %v1534_v22, %v1533_v53 }
 0x1af   : > { %1623 = vadd.xlane.f32.xlu0 %v1622_v52  ;;  %v1501_v12 = vmul.f32 %v9543_v42, %v9543_v42  ;;  %v1502_v54 = vmul.f32 %v9546_v26, %v9546_v26 }
 0x1b1   : > { %v1364_v32 = vpop.xlane.xlu2 %1363  ;;  %v1574_v11 = vadd.f32 %v1502_v54, %v1501_v12 }
 0x1b2   : > { %v1413_v36 = vmul.f32 %v9285_v27, %v1364_v32 }
 0x1b3   : > { %1575 = vadd.xlane.f32.xlu2 %v1574_v11 }
 0x1b4   : > { %v9554_v61 = vsub.f32 %v9129_v10, %v1413_v36  ;;  %v9557_v7 = vsub.f32 %v9134_v2, %v1413_v36  ;;  %v1316_v25 = vpop.xlane.xlu1 %1315 }
 0x1b5   : > { %v1397_v53 = vmul.f32 %v9285_v27, %v1316_v25 }
 0x1b6   : > { %v1535_v22 = vmul.f32 %v9554_v61, %v9554_v61  ;;  %v1536_v1 = vmul.f32 %v9557_v7, %v9557_v7 }
 0x1b7   : > { %v9565_v52 = vsub.f32 %v9140_v31, %v1397_v53  ;;  %v9568_v12 = vsub.f32 %v9148_v57, %v1397_v53 }
 0x1b8   : > { %v1625_v10 = vadd.f32 %v1536_v1, %v1535_v22 }
 0x1b9   : > { %v1503_v2 = vmul.f32 %v9565_v52, %v9565_v52  ;;  %v1504_v54 = vmul.f32 %v9568_v12, %v9568_v12 }
 0x1ba   : > { %1626 = vadd.xlane.f32.xlu1 %v1625_v10 }
 0x1bb   : > { %v1577_v32 = vadd.f32 %v1504_v54, %v1503_v2 }
 0x1bc   : > { %v1319_v11 = vpop.xlane.xlu2 %1318 }
 0x1bd   : > { %v1398_v36 = vmul.f32 %v9285_v27, %v1319_v11  ;;  %1578 = vadd.xlane.f32.xlu0 %v1577_v32 }
 0x1be   : > { %v1367_v25 = vpop.xlane.xlu0 %1366 }
 0x1bf   : > { %v9576_v31 = vsub.f32 %v9190_v5, %v1398_v36  ;;  %v9579_v57 = vsub.f32 %v9193_v56, %v1398_v36  ;;  %v1414_v53 = vmul.f32 %v9285_v27, %v1367_v25 }
 0x1c1   : > { %v9583_v22 = vsub.f32 %v9198_v51, %v1414_v53  ;;  %v9586_v1 = vsub.f32 %v9204_v47, %v1414_v53  ;;  %v1505_v10 = vmul.f32 %v9576_v31, %v9576_v31  ;;  %v1506_v2 = vmul.f32 %v9579_v57, %v9579_v57 }
 0x1c3   : > { %14973 = vst [vmem:[#allocation58_spill] sm:$0xff] %v9583_v22  ;;  %v1580_v54 = vadd.f32 %v1506_v2, %v1505_v10  ;;  %v1537_v5 = vmul.f32 %v9583_v22, %v9583_v22  ;;  %v1538_v56 = vmul.f32 %v9586_v1, %v9586_v1 }
 0x1c4   : > { %14974 = vst [vmem:[#allocation59_spill] sm:$0xff] %v9586_v1 }
 0x1c5   : > { %v1370_v32 = vpop.xlane.xlu1 %1369  ;;  %1581 = vadd.xlane.f32.xlu1 %v1580_v54  ;;  %v1628_v51 = vadd.f32 %v1538_v56, %v1537_v5 }
 0x1c6   : > { %v1415_v11 = vmul.f32 %v9285_v27, %v1370_v32 }
 0x1c7   : > { %v1322_v47 = vpop.xlane.xlu0 %1321  ;;  %1629 = vadd.xlane.f32.xlu2 %v1628_v51 }
 0x1c8   : > { %v9598_v36 = vsub.f32 %v9227_v29, %v1415_v11  ;;  %v9601_v25 = vsub.f32 %v9233_v24, %v1415_v11  ;;  %v1399_v53 = vmul.f32 %v9285_v27, %v1322_v47 }
 0x1ca   : > { %14975 = vst [vmem:[#allocation70_spill] sm:$0xff] %v9598_v36  ;;  %v9605_v10 = vsub.f32 %v9235_v19, %v1399_v53  ;;  %v9608_v2 = vsub.f32 %v9244_v16, %v1399_v53  ;;  %v1539_v54 = vmul.f32 %v9598_v36, %v9598_v36  ;;  %v1540_v5 = vmul.f32 %v9601_v25, %v9601_v25 }
 0x1cb   : > { %14976 = vst [vmem:[#allocation71_spill] sm:$0xff] %v9601_v25  ;;  %v1373_v56 = vpop.xlane.xlu2 %1372 }
 0x1cc   : > { %14977 = vst [vmem:[#allocation55_spill] sm:$0xff] %v9605_v10  ;;  %v1416_v29 = vmul.f32 %v9285_v27, %v1373_v56  ;;  %v1631_v32 = vadd.f32 %v1540_v5, %v1539_v54  ;;  %v1507_v24 = vmul.f32 %v9605_v10, %v9605_v10  ;;  %v1508_v19 = vmul.f32 %v9608_v2, %v9608_v2 }
 0x1cd   : > { %14978 = vst [vmem:[#allocation56_spill] sm:$0xff] %v9608_v2 }
 0x1ce   : > { %v9620_v51 = vsub.f32 %v9254_v39, %v1416_v29  ;;  %v9623_v16 = vsub.f32 %v9256_v14, %v1416_v29  ;;  %1632 = vadd.xlane.f32.xlu0 %v1631_v32  ;;  %v1583_v11 = vadd.f32 %v1508_v19, %v1507_v24 }
 0x1d0   : > { %14979 = vst [vmem:[#allocation77_spill] sm:$0xff] %v9620_v51  ;;  %1584 = vadd.xlane.f32.xlu2 %v1583_v11  ;;  %v1541_v47 = vmul.f32 %v9620_v51, %v9620_v51  ;;  %v1542_v53 = vmul.f32 %v9623_v16, %v9623_v16 }
 0x1d1   : > { %14980 = vst [vmem:[#allocation78_spill] sm:$0xff] %v9623_v16  ;;  %v1325_v54 = vpop.xlane.xlu1 %1324  ;;  %v14996_v16 = vld [vmem:[#allocation54_spill] sm:$0xff] }
 0x1d2   : > { %v1400_v5 = vmul.f32 %v9285_v27, %v1325_v54  ;;  %v1634_v56 = vadd.f32 %v1542_v53, %v1541_v47 }
 0x1d4   : > { %v9631_v2 = vsub.f32 %v9273_v49, %v1400_v5  ;;  %v9634_v39 = vsub.f32 %v9279_v44, %v1400_v5  ;;  %v1328_v14 = vpop.xlane.xlu2 %1327  ;;  %1635 = vadd.xlane.f32.xlu1 %v1634_v56 }
 0x1d5   : > { %v1401_v29 = vmul.f32 %v9285_v27, %v1328_v14 }
 0x1d6   : > { %14981 = vst [vmem:[#allocation74_spill] sm:$0xff] %v9631_v2  ;;  %v1509_v32 = vmul.f32 %v9631_v2, %v9631_v2  ;;  %v1510_v24 = vmul.f32 %v9634_v39, %v9634_v39 }
 0x1d7   : > { %14982 = vst [vmem:[#allocation75_spill] sm:$0xff] %v9634_v39  ;;  %v9642_v19 = vsub.f32 %v9291_v55, %v1401_v29  ;;  %v9645_v11 = vsub.f32 %v9295_v40, %v1401_v29 }
 0x1d8   : > { %v1586_v49 = vadd.f32 %v1510_v24, %v1509_v32 }
 0x1d9   : > { %14983 = vst [vmem:[#allocation81_spill] sm:$0xff] %v9642_v19  ;;  %v1511_v44 = vmul.f32 %v9642_v19, %v9642_v19  ;;  %v1512_v47 = vmul.f32 %v9645_v11, %v9645_v11 }
 0x1da   : > { %14984 = vst [vmem:[#allocation82_spill] sm:$0xff] %v9645_v11  ;;  %v1376_v53 = vpop.xlane.xlu0 %1375  ;;  %1587 = vadd.xlane.f32.xlu0 %v1586_v49 }
 0x1db   : > { %v1417_v54 = vmul.f32 %v9285_v27, %v1376_v53  ;;  %v1589_v5 = vadd.f32 %v1512_v47, %v1511_v44 }
 0x1dc   : > { %v1549_v56 = vpop.xlane.xlu2 %1548 }
 0x1dd   : > { %v9653_v14 = vsub.f32 %v9309_v23, %v1417_v54  ;;  %v9656_v55 = vsub.f32 %v9317_v6, %v1417_v54  ;;  %v1643_v40 = vmul.f32 %v1549_v56, %v9285_v27  ;;  %1590 = vadd.xlane.f32.xlu1 %v1589_v5 }
 0x1df   : > { %14985 = vst [vmem:[#allocation85_spill] sm:$0xff] %v9653_v14  ;;  %v1675_v29 = vadd.f32 1e-05, %v1643_v40  ;;  %v1543_v32 = vmul.f32 %v9653_v14, %v9653_v14  ;;  %v1544_v24 = vmul.f32 %v9656_v55, %v9656_v55  ;;  %v1379_v49 = vpop.xlane.xlu1 %1378 }
 0x1e0   : > { %14986 = vst [vmem:[#allocation86_spill] sm:$0xff] %v9656_v55  ;;  %v1418_v44 = vmul.f32 %v9285_v27, %v1379_v49 }
 0x1e1   : > { %7168 = vrsqrt.f32 %v1675_v29  ;;  %v1637_v47 = vadd.f32 %v1544_v24, %v1543_v32  ;;  %vm1713_vm15 = vweird.f32 %v1675_v29 }
 0x1e2   : > { %v9665_v23 = vsub.f32 %v9326_v33, %v1418_v44  ;;  %v9668_v6 = vsub.f32 %v9334_v9, %v1418_v44 }
 0x1e3   : > { %1638 = vadd.xlane.f32.xlu2 %v1637_v47 }
 0x1e4   : > { %14987 = vst [vmem:[#allocation88_spill] sm:$0xff] %v9665_v23  ;;  %v1545_v53 = vmul.f32 %v9665_v23, %v9665_v23  ;;  %v1546_v54 = vmul.f32 %v9668_v6, %v9668_v6  ;;  %v1603_v24 = vpop.xlane.xlu2 %1602 }
 0x1e5   : > { %14988 = vst [vmem:[#allocation89_spill] sm:$0xff] %v9668_v6 }
 0x1e6   : > { %v1640_v56 = vadd.f32 %v1546_v54, %v1545_v53  ;;  %v1331_v55 = vpop.xlane.xlu0 %1330  ;;  %v1661_v53 = vmul.f32 %v1603_v24, %v9285_v27 }
 0x1e7   : > { %v7169_v5 = vpop.eup %7168  ;;  %v1600_v49 = vpop.xlane.xlu1 %1599  ;;  %v1402_v32 = vmul.f32 %v9285_v27, %v1331_v55 }
 0x1e8   : > { %v1708_v40 = vmul.f32 %v7169_v5, %v1675_v29  ;;  %1641 = vadd.xlane.f32.xlu0 %v1640_v56  ;;  %v1660_v33 = vmul.f32 %v1600_v49, %v9285_v27  ;;  %vm1714_vm6 = vweird.f32 %v7169_v5 }
 0x1e9   : > { %v9677_v44 = vsub.f32 %v9360_v58, %v1402_v32  ;;  %v9680_v47 = vsub.f32 %v9368_v62, %v1402_v32  ;;  %v2091_v58 = vld [vmem:[%s14991_s4] sm:$0x3]  ;;  %vm1715_vm14 = vmor %vm1713_vm15, %vm1714_vm6 }
 0x1ea   : > { %v1709_v9 = vmul.f32 %v7169_v5, %v1708_v40  ;;  %v1692_v23 = vadd.f32 1e-05, %v1660_v33  ;;  %v2161_v40 = vld [vmem:[%s14992_s5] sm:$0x3]  ;;  %v9702_v14 = vperm.slane %v2091_v58, 1 }
 0x1eb   : > { %14989 = vst [vmem:[#allocation92_spill] sm:$0xff] %v9677_v44  ;;  %v1513_v54 = vmul.f32 %v9677_v44, %v9677_v44  ;;  %v1514_v55 = vmul.f32 %v9680_v47, %v9680_v47  ;;  %v14993_v44 = vlaneseq }
 0x1ec   : > { %14990 = vst [vmem:[#allocation93_spill] sm:$0xff] %v9680_v47  ;;  %v1710_v6 = vmul.f32 0.5, %v1709_v9  ;;  %7170 = vrsqrt.f32 %v1692_v23  ;;  %v9693_v9 = vadd.f32 1e-05, %v1661_v53  ;;  %v9697_v47 = vperm.slane %v2091_v58, 0 }
 0x1ed   : > { %v1592_v62 = vadd.f32 %v1514_v55, %v1513_v54  ;;  %v9700_v54 = vand.u32 127, %v14993_v44  ;;  %v1558_v44 = vpop.xlane.xlu2 %1557  ;;  %vm1883_vm6 = vweird.f32 %v1692_v23 }
 0x1ee   : > { %v1711_v49 = vsub.f32 1.5, %v1710_v6  ;;  %v1597_v33 = vpop.xlane.xlu0 %1596  ;;  %7172 = vrsqrt.f32 %v9693_v9  ;;  %v1646_v39 = vmul.f32 %v1558_v44, %v9285_v27 }
 0x1ef   : > { %v1555_v24 = vpop.xlane.xlu1 %1554  ;;  %v1659_v56 = vmul.f32 %v1597_v33, %v9285_v27  ;;  %1593 = vadd.xlane.f32.xlu2 %v1592_v62  ;;  %vm2906_vm15 = vcmp.eq.s32.totalorder %v9700_v54, %v14996_v16 }
 0x1f0   : > { %v1712_v32 = vmul.f32 %v7169_v5, %v1711_v49  ;;  %v1645_v6 = vmul.f32 %v1555_v24, %v9285_v27  ;;  %v9704_v49 = vperm.slane %v2161_v40, 0  ;;  %v9711_v24 = vperm.slane %v2161_v40, 1 }
 0x1f1   : > { %v1691_v19 = vadd.f32 1e-05, %v1659_v56 }
 0x1f2   : > { %v1716_v55 = vsel %vm1715_vm14, %v7169_v5, %v1712_v32  ;;  %v7171_v29 = vpop.eup %7170  ;;  %v9708_v33 = vadd.f32 1e-05, %v1645_v6 }
 0x1f3   : > { %v2027_v53 = vmul.f32 %v1716_v55, %v9298_v3  ;;  %v2028_v11 = vmul.f32 %v1716_v55, %v9301_v34  ;;  %v1878_v62 = vmul.f32 %v7171_v29, %v1692_v23  ;;  %7174 = vrsqrt.f32 %v1691_v19 }
 0x1f4   : > { %7176 = vrsqrt.f32 %v9708_v33  ;;  %v9717_v3 = vadd.s32 128, %v9700_v54  ;;  %vm1884_vm14 = vweird.f32 %v7171_v29 }
 0x1f5   : > { %v2097_v5 = vmul.f32 %v9697_v47, %v2027_v53  ;;  %v1879_v58 = vmul.f32 %v7171_v29, %v1878_v62  ;;  %v2098_v32 = vmul.f32 %v9702_v14, %v2028_v11  ;;  %v9726_v53 = vpop.eup %7172  ;;  %vm1885_vm12 = vmor %vm1883_vm6, %vm1884_vm14 }
 0x1f6   : > { %v1552_v6 = vpop.xlane.xlu0 %1551  ;;  %vm2907_vm13 = vcmp.eq.s32.totalorder %v9717_v3, %v14996_v16  ;;  %v1888_v44 = vmul.f32 %v9726_v53, %v9693_v9 }
 0x1f7   : > { %v9720_v34 = vadd.f32 %v9704_v49, %v2097_v5  ;;  %v1880_v56 = vmul.f32 0.5, %v1879_v58  ;;  %v9723_v55 = vadd.f32 %v9711_v24, %v2098_v32  ;;  %v1644_v40 = vmul.f32 %v1552_v6, %v9285_v27 }
 0x1f9   : > { %14994 = vst [vmem:[#allocation95_spill] sm:$0xff] %v9720_v34  ;;  %v1881_v62 = vsub.f32 1.5, %v1880_v56  ;;  %v2330_v11 = vmax.f32 %v9720_v34, %v9723_v55  ;;  %v7175_v5 = vpop.eup %7174  ;;  %v9732_v58 = vadd.f32 1e-05, %v1644_v40  ;;  %v2970_v32 = vsel %vm2906_vm15, %v9720_v34, 0.0 }
 0x1fa   : > { %14995 = vst [vmem:[#allocation96_spill] sm:$0xff] %v9723_v55  ;;  %v9737_v6 = vpop.eup %7176  ;;  %v1868_v51 = vmul.f32 %v7175_v5, %v1691_v19  ;;  %v2971_v2 = vsel %vm2907_vm13, %v9723_v55, 0.0  ;;  %v9749_v55 = vadd.f32 1e-05, %v1646_v39  ;;  %vm1873_vm13 = vweird.f32 %v1691_v19 }
 0x1fb   : > { %v1882_v56 = vmul.f32 %v7171_v29, %v1881_v62  ;;  %2331 = vmax.xlane.f32.xlu1 %v2330_v11  ;;  %7178 = vrsqrt.f32 %v9732_v58  ;;  %v1728_v23 = vmul.f32 %v9737_v6, %v9708_v33  ;;  %v3034_v16 = vadd.f32 %v2971_v2, %v2970_v32 }
 0x1fc   : > { %v1869_v40 = vmul.f32 %v7175_v5, %v1868_v51  ;;  %7180 = vrsqrt.f32 %v9749_v55 }
 0x1fd   : > { %v1886_v25 = vsel %vm1885_vm12, %v7171_v29, %v1882_v56  ;;  %v1729_v62 = vmul.f32 %v9737_v6, %v1728_v23  ;;  %3035 = vadd.xlane.f32.xlu0 %v3034_v16  ;;  %vm1874_vm12 = vweird.f32 %v7175_v5  ;;  %v1609_v29 = vpop.xlane.xlu1 %1608  ;;  %v14997_v23 = vld [vmem:[#allocation76_spill] sm:$0xff] }
 0x1fe   : > { %v2061_v34 = vmul.f32 %v1886_v25, %v9337_v38  ;;  %v2062_v36 = vmul.f32 %v1886_v25, %v9340_v35  ;;  %v1870_v11 = vmul.f32 0.5, %v1869_v40  ;;  %v1606_v10 = vpop.xlane.xlu0 %1605  ;;  %v1889_v35 = vmul.f32 %v9726_v53, %v1888_v44  ;;  %vm1875_vm14 = vmor %vm1873_vm13, %vm1874_vm12 }
 0x1ff   : > { %v1730_v1 = vmul.f32 0.5, %v1729_v62  ;;  %v1662_v22 = vmul.f32 %v1606_v10, %v9285_v27  ;;  %vm2938_vm15 = vcmp.eq.s32.totalorder %v9700_v54, %v14997_v23  ;;  %v1663_v19 = vmul.f32 %v1609_v29, %v9285_v27 }
 0x200   : > { %v1871_v51 = vsub.f32 1.5, %v1870_v11  ;;  %v2131_v2 = vmul.f32 %v9697_v47, %v2061_v34  ;;  %v2132_v32 = vmul.f32 %v9702_v14, %v2062_v36  ;;  %v14998_v34 = vld [vmem:[#allocation87_spill] sm:$0xff]  ;;  %v1890_v62 = vmul.f32 0.5, %v1889_v35 }
 0x201   : > { %v7179_v38 = vpop.eup %7178  ;;  %v9754_v25 = vadd.f32 1e-05, %v1662_v22  ;;  %v1731_v10 = vsub.f32 1.5, %v1730_v1  ;;  %vm2940_vm6 = vcmp.eq.s32.totalorder %v9700_v54, %v14998_v34  ;;  %vm2941_vm11 = vcmp.eq.s32.totalorder %v9717_v3, %v14998_v34 }
 0x202   : > { %v1872_v56 = vmul.f32 %v7175_v5, %v1871_v51  ;;  %v1718_v39 = vmul.f32 %v7179_v38, %v9732_v58  ;;  %v9768_v40 = vadd.f32 %v9704_v49, %v2131_v2  ;;  %v9773_v44 = vadd.f32 %v9711_v24, %v2132_v32  ;;  %v9782_v35 = vpop.eup %7180 }
 0x203   : > { %7182 = vrsqrt.f32 %v9754_v25  ;;  %vm1733_vm12 = vweird.f32 %v9708_v33  ;;  %vm1734_vm13 = vweird.f32 %v9737_v6  ;;  %v1732_v29 = vmul.f32 %v9737_v6, %v1731_v10 }
 0x204   : > { %v1876_v22 = vsel %vm1875_vm14, %v7175_v5, %v1872_v56  ;;  %v1719_v36 = vmul.f32 %v7179_v38, %v1718_v39  ;;  %14999 = vst [vmem:[#allocation98_spill] sm:$0xff] %v9768_v40  ;;  %v3004_v51 = vsel %vm2940_vm6, %v9768_v40, 0.0  ;;  %vm1724_vm14 = vweird.f32 %v7179_v38  ;;  %vm1735_vm9 = vmor %vm1733_vm12, %vm1734_vm13 }
 0x205   : > { %v2059_v1 = vmul.f32 %v1876_v22, %v9371_v15  ;;  %v2060_v16 = vmul.f32 %v1876_v22, %v9374_v41  ;;  %15000 = vst [vmem:[#allocation100_spill] sm:$0xff] %v9773_v44  ;;  %v9784_v56 = vadd.f32 1e-05, %v1663_v19  ;;  %v3005_v39 = vsel %vm2941_vm11, %v9773_v44, 0.0 }
 0x206   : > { %v1720_v11 = vmul.f32 0.5, %v1719_v36  ;;  %v1561_v5 = vpop.xlane.xlu0 %1560  ;;  %vm1723_vm6 = vweird.f32 %v9732_v58  ;;  %vm2939_vm11 = vcmp.eq.s32.totalorder %v9717_v3, %v14997_v23  ;;  %v1736_v19 = vsel %vm1735_vm9, %v9737_v6, %v1732_v29 }
 0x207   : > { %v1647_v2 = vmul.f32 %v1561_v5, %v9285_v27  ;;  %v2129_v15 = vmul.f32 %v9697_v47, %v2059_v1  ;;  %v2130_v41 = vmul.f32 %v9702_v14, %v2060_v16  ;;  %v3085_v16 = vadd.f32 %v3005_v39, %v3004_v51  ;;  %vm1725_vm10 = vmor %vm1723_vm6, %vm1724_vm14 }
 0x208   : > { %v1721_v32 = vsub.f32 1.5, %v1720_v11  ;;  %v1891_v5 = vsub.f32 1.5, %v1890_v62  ;;  %v1738_v33 = vmul.f32 %v9782_v35, %v9749_v55  ;;  %vm1894_vm9 = vweird.f32 %v9726_v53 }
 0x209   : > { %v9790_v22 = vpop.eup %7182  ;;  %v9792_v10 = vadd.f32 1e-05, %v1647_v2  ;;  %v9795_v36 = vadd.f32 %v9704_v49, %v2129_v15  ;;  %v9798_v1 = vadd.f32 %v9711_v24, %v2130_v41  ;;  %3086 = vadd.xlane.f32.xlu1 %v3085_v16  ;;  %v1564_v15 = vpop.xlane.xlu1 %1563  ;;  %v2032_v41 = vmul.f32 %v1736_v19, %v9382_v46 }
 0x20a   : > { %v1722_v11 = vmul.f32 %v7179_v38, %v1721_v32  ;;  %v1898_v34 = vmul.f32 %v9790_v22, %v9754_v25  ;;  %v1648_v16 = vmul.f32 %v1564_v15, %v9285_v27 }
 0x20b   : > { %15001 = vst [vmem:[#allocation54_spill] sm:$0xff] %v9795_v36  ;;  %7184 = vrsqrt.f32 %v9792_v10  ;;  %v2378_v58 = vmax.f32 %v9795_v36, %v9798_v1  ;;  %v3002_v2 = vsel %vm2938_vm15, %v9795_v36, 0.0  ;;  %v3003_v29 = vsel %vm2939_vm11, %v9798_v1, 0.0 }
 0x20c   : > { %15002 = vst [vmem:[#allocation76_spill] sm:$0xff] %v9798_v1  ;;  %v1726_v51 = vsel %vm1725_vm10, %v7179_v38, %v1722_v11  ;;  %7186 = vrsqrt.f32 %v9784_v56  ;;  %v2031_v38 = vmul.f32 %v1736_v19, %v9377_v20  ;;  %v1899_v32 = vmul.f32 %v9790_v22, %v1898_v34 }
 0x20d   : > { %v2029_v6 = vmul.f32 %v1726_v51, %v9406_v13  ;;  %v2030_v62 = vmul.f32 %v1726_v51, %v9409_v50  ;;  %2379 = vmax.xlane.f32.xlu2 %v2378_v58  ;;  %v3082_v39 = vadd.f32 %v3003_v29, %v3002_v2  ;;  %v1892_v13 = vmul.f32 %v9726_v53, %v1891_v5  ;;  %v1612_v51 = vpop.xlane.xlu2 %1611 }
 0x20e   : > { %v1739_v50 = vmul.f32 %v9782_v35, %v1738_v33  ;;  %v9834_v20 = vadd.f32 1e-05, %v1648_v16  ;;  %vm1893_vm10 = vweird.f32 %v9693_v9  ;;  %v1900_v5 = vmul.f32 0.5, %v1899_v32  ;;  %v15007_v16 = vld [vmem:[#allocation50_spill] sm:$0xff] }
 0x20f   : > { %v2099_v23 = vmul.f32 %v9697_v47, %v2029_v6  ;;  %v2100_v11 = vmul.f32 %v9702_v14, %v2030_v62  ;;  %3083 = vadd.xlane.f32.xlu0 %v3082_v39  ;;  %v2101_v2 = vmul.f32 %v9697_v47, %v2031_v38  ;;  %v2102_v33 = vmul.f32 %v9702_v14, %v2032_v41  ;;  %vm1895_vm15 = vmor %vm1893_vm10, %vm1894_vm9 }
 0x210   : > { %v1896_v15 = vsel %vm1895_vm15, %v9726_v53, %v1892_v13  ;;  %v1740_v6 = vmul.f32 0.5, %v1739_v50  ;;  %v1664_v39 = vmul.f32 %v1612_v51, %v9285_v27  ;;  %7188 = vrsqrt.f32 %v9834_v20 }
 0x211   : > { %v9832_v58 = vpop.eup %7184  ;;  %v9837_v46 = vadd.f32 %v9704_v49, %v2099_v23  ;;  %v9840_v34 = vadd.f32 %v9711_v24, %v2100_v11  ;;  %v1901_v38 = vsub.f32 1.5, %v1900_v5  ;;  %v2381_v41 = vmax.f32 %v9768_v40, %v9773_v44  ;;  %v15008_v23 = vld [vmem:[#allocation61_spill] sm:$0xff] }
 0x212   : > { %v9842_v19 = vpop.eup %7186  ;;  %v1748_v62 = vmul.f32 %v9832_v58, %v9792_v10  ;;  %v9859_v53 = vadd.f32 %v9704_v49, %v2101_v2  ;;  %v9862_v32 = vadd.f32 %v9711_v24, %v2102_v33  ;;  %vm2910_vm12 = vcmp.eq.s32.totalorder %v9700_v54, %v15007_v16 }
 0x213   : > { %15003 = vst [vmem:[#allocation87_spill] sm:$0xff] %v9837_v46  ;;  %v1908_v29 = vmul.f32 %v9842_v19, %v9784_v56  ;;  %v2333_v9 = vmax.f32 %v9837_v46, %v9840_v34  ;;  %vm2911_vm13 = vcmp.eq.s32.totalorder %v9717_v3, %v15007_v16  ;;  %vm2908_vm14 = vcmp.eq.s32.totalorder %v9700_v54, %v15008_v23 }
 0x214   : > { %15004 = vst [vmem:[#allocation111_spill] sm:$0xff] %v9840_v34  ;;  %vm2909_vm6 = vcmp.eq.s32.totalorder %v9717_v3, %v15008_v23  ;;  %v2063_v11 = vmul.f32 %v1896_v15, %v9329_v60  ;;  %v1741_v13 = vsub.f32 1.5, %v1740_v6  ;;  %v1749_v50 = vmul.f32 %v9832_v58, %v1748_v62 }
 0x215   : > { %15005 = vst [vmem:[#allocation112_spill] sm:$0xff] %v9859_v53  ;;  %2334 = vmax.xlane.f32.xlu2 %v2333_v9  ;;  %v2974_v5 = vsel %vm2910_vm12, %v9859_v53, 0.0  ;;  %v2064_v51 = vmul.f32 %v1896_v15, %v9332_v59  ;;  %v1909_v2 = vmul.f32 %v9842_v19, %v1908_v29  ;;  %v9877_v33 = vadd.f32 1e-05, %v1664_v39  ;;  %v1615_v29 = vpop.xlane.xlu0 %1614 }
 0x216   : > { %15006 = vst [vmem:[#allocation113_spill] sm:$0xff] %v9862_v32  ;;  %v2975_v9 = vsel %vm2911_vm13, %v9862_v32, 0.0  ;;  %v1902_v16 = vmul.f32 %v9790_v22, %v1901_v38  ;;  %vm1904_vm11 = vweird.f32 %v9790_v22  ;;  %v2972_v60 = vsel %vm2908_vm14, %v9837_v46, 0.0  ;;  %v9884_v62 = vpop.eup %7188  ;;  %v1567_v38 = vpop.xlane.xlu2 %1566 }
 0x217   : > { %2382 = vmax.xlane.f32.xlu0 %v2381_v41  ;;  %v2973_v6 = vsel %vm2909_vm6, %v9840_v34, 0.0  ;;  %vm1743_vm9 = vweird.f32 %v9749_v55  ;;  %v3040_v41 = vadd.f32 %v2975_v9, %v2974_v5  ;;  %v1742_v59 = vmul.f32 %v9782_v35, %v1741_v13 }
 0x218   : > { %vm1744_vm10 = vweird.f32 %v9782_v35  ;;  %vm1903_vm15 = vweird.f32 %v9754_v25  ;;  %v1750_v15 = vmul.f32 0.5, %v1749_v50  ;;  %v1910_v39 = vmul.f32 0.5, %v1909_v2 }
 0x219   : > { %vm1905_vm12 = vmor %vm1903_vm15, %vm1904_vm11  ;;  %7190 = vrsqrt.f32 %v9877_v33  ;;  %3041 = vadd.xlane.f32.xlu1 %v3040_v41  ;;  %v3037_v23 = vadd.f32 %v2973_v6, %v2972_v60  ;;  %v2133_v44 = vmul.f32 %v9697_v47, %v2063_v11  ;;  %v1758_v13 = vmul.f32 %v9884_v62, %v9834_v20  ;;  %v15011_v60 = vld [vmem:[#allocation99_spill] sm:$0xff] }
 0x21a   : > { %v1906_v40 = vsel %vm1905_vm12, %v9790_v22, %v1902_v16  ;;  %v2336_v5 = vmax.f32 %v9859_v53, %v9862_v32  ;;  %v2134_v25 = vmul.f32 %v9702_v14, %v2064_v51  ;;  %vm1745_vm13 = vmor %vm1743_vm9, %vm1744_vm10  ;;  %v1665_v50 = vmul.f32 %v1615_v29, %v9285_v27 }
 0x21b   : > { %v9904_v11 = vadd.f32 %v9704_v49, %v2133_v44  ;;  %v1746_v22 = vsel %vm1745_vm13, %v9782_v35, %v1742_v59  ;;  %v1751_v2 = vsub.f32 1.5, %v1750_v15  ;;  %v1649_v9 = vmul.f32 %v1567_v38, %v9285_v27 }
 0x21c   : > { %v9909_v16 = vadd.f32 %v9711_v24, %v2134_v25  ;;  %v2065_v51 = vmul.f32 %v1906_v40, %v9428_v43  ;;  %vm2942_vm14 = vcmp.eq.s32.totalorder %v9700_v54, %v15011_v60  ;;  %vm2943_vm6 = vcmp.eq.s32.totalorder %v9717_v3, %v15011_v60 }
 0x21d   : > { %3038 = vadd.xlane.f32.xlu2 %v3037_v23  ;;  %15009 = vst [vmem:[#allocation50_spill] sm:$0xff] %v9904_v11  ;;  %v2066_v55 = vmul.f32 %v1906_v40, %v9435_v18  ;;  %v1911_v44 = vsub.f32 1.5, %v1910_v39  ;;  %v1759_v35 = vmul.f32 %v9884_v62, %v1758_v13  ;;  %v3006_v6 = vsel %vm2942_vm14, %v9904_v11, 0.0  ;;  %v1570_v25 = vpop.xlane.xlu0 %1569 }
 0x21e   : > { %15010 = vst [vmem:[#allocation61_spill] sm:$0xff] %v9909_v16  ;;  %v2033_v59 = vmul.f32 %v1746_v22, %v9363_v63  ;;  %v2034_v15 = vmul.f32 %v1746_v22, %v9366_v17  ;;  %v9923_v43 = vadd.f32 1e-05, %v1665_v50  ;;  %v2384_v29 = vmax.f32 %v9904_v11, %v9909_v16  ;;  %v1618_v63 = vpop.xlane.xlu1 %1617 }
 0x21f   : > { %2337 = vmax.xlane.f32.xlu0 %v2336_v5  ;;  %v9919_v41 = vpop.eup %7190  ;;  %v1752_v38 = vmul.f32 %v9832_v58, %v1751_v2  ;;  %vm1754_vm11 = vweird.f32 %v9832_v58  ;;  %v9929_v18 = vadd.f32 1e-05, %v1649_v9  ;;  %v3007_v40 = vsel %vm2943_vm6, %v9909_v16, 0.0  ;;  %v15013_v9 = vld [vmem:[#allocation83_spill] sm:$0xff] }
 0x220   : > { %vm1914_vm9 = vweird.f32 %v9842_v19  ;;  %vm1753_vm10 = vweird.f32 %v9792_v10  ;;  %v3088_v17 = vadd.f32 %v3007_v40, %v3006_v6  ;;  %v2135_v39 = vmul.f32 %v9697_v47, %v2065_v51 }
 0x221   : > { %2385 = vmax.xlane.f32.xlu1 %v2384_v29  ;;  %v1912_v23 = vmul.f32 %v9842_v19, %v1911_v44  ;;  %v1918_v13 = vmul.f32 %v9919_v41, %v9877_v33  ;;  %v1760_v5 = vmul.f32 0.5, %v1759_v35  ;;  %v2136_v50 = vmul.f32 %v9702_v14, %v2066_v55  ;;  %vm1755_vm15 = vmor %vm1753_vm10, %vm1754_vm11 }
 0x222   : > { %7192 = vrsqrt.f32 %v9923_v43  ;;  %v9941_v10 = vadd.f32 %v9704_v49, %v2135_v39  ;;  %v2103_v22 = vmul.f32 %v9697_v47, %v2033_v59  ;;  %vm1913_vm12 = vweird.f32 %v9784_v56  ;;  %v15016_v39 = vld [vmem:[#allocation60_spill] sm:$0xff] }
 0x223   : > { %v1756_v2 = vsel %vm1755_vm15, %v9832_v58, %v1752_v38  ;;  %7194 = vrsqrt.f32 %v9929_v18  ;;  %vm2944_vm13 = vcmp.eq.s32.totalorder %v9700_v54, %v15013_v9  ;;  %vm1915_vm14 = vmor %vm1913_vm12, %vm1914_vm9  ;;  %v1650_v51 = vmul.f32 %v1570_v25, %v9285_v27 }
 0x224   : > { %15012 = vst [vmem:[#allocation99_spill] sm:$0xff] %v9941_v10  ;;  %v9953_v60 = vadd.f32 %v9711_v24, %v2136_v50  ;;  %vm2945_vm6 = vcmp.eq.s32.totalorder %v9717_v3, %v15013_v9  ;;  %v3008_v56 = vsel %vm2944_vm13, %v9941_v10, 0.0  ;;  %v1916_v58 = vsel %vm1915_vm14, %v9842_v19, %v1912_v23 }
 0x225   : > { %3089 = vadd.xlane.f32.xlu2 %v3088_v17  ;;  %v1919_v55 = vmul.f32 %v9919_v41, %v1918_v13  ;;  %v1761_v44 = vsub.f32 1.5, %v1760_v5  ;;  %v2104_v35 = vmul.f32 %v9702_v14, %v2034_v15  ;;  %v2035_v6 = vmul.f32 %v1756_v2, %v9455_v21  ;;  %v15017_v21 = vld [vmem:[#allocation65_spill] sm:$0xff] }
 0x226   : > { %15014 = vst [vmem:[#allocation83_spill] sm:$0xff] %v9953_v60  ;;  %v2036_v59 = vmul.f32 %v1756_v2, %v9458_v4  ;;  %v3009_v29 = vsel %vm2945_vm6, %v9953_v60, 0.0  ;;  %v9965_v38 = vadd.f32 %v9704_v49, %v2103_v22  ;;  %v1666_v40 = vmul.f32 %v1618_v63, %v9285_v27  ;;  %v1573_v25 = vpop.xlane.xlu1 %1572 }
 0x227   : > { %v3091_v17 = vadd.f32 %v3009_v29, %v3008_v56  ;;  %vm2912_vm11 = vcmp.eq.s32.totalorder %v9700_v54, %v15016_v39  ;;  %v2067_v23 = vmul.f32 %v1916_v58, %v9400_v37  ;;  %v9973_v15 = vadd.f32 1e-05, %v1650_v51 }
 0x228   : > { %15015 = vst [vmem:[#allocation114_spill] sm:$0xff] %v9965_v38  ;;  %v9970_v19 = vpop.eup %7192  ;;  %vm2913_vm9 = vcmp.eq.s32.totalorder %v9717_v3, %v15016_v39  ;;  %vm2914_vm10 = vcmp.eq.s32.totalorder %v9700_v54, %v15017_v21  ;;  %v2068_v63 = vmul.f32 %v1916_v58, %v9403_v8  ;;  %v1762_v13 = vmul.f32 %v9884_v62, %v1761_v44 }
 0x229   : > { %v9979_v4 = vpop.eup %7194  ;;  %vm1764_vm15 = vweird.f32 %v9884_v62  ;;  %3092 = vadd.xlane.f32.xlu0 %v3091_v17  ;;  %v9985_v5 = vadd.f32 %v9711_v24, %v2104_v35  ;;  %v1920_v37 = vmul.f32 0.5, %v1919_v55  ;;  %v2976_v50 = vsel %vm2912_vm11, %v9965_v38, 0.0 }
 0x22a   : > { %v2105_v22 = vmul.f32 %v9697_v47, %v2035_v6  ;;  %v2106_v2 = vmul.f32 %v9702_v14, %v2036_v59  ;;  %vm1763_vm12 = vweird.f32 %v9834_v20  ;;  %v1928_v8 = vmul.f32 %v9970_v19, %v9923_v43 }
 0x22b   : > { %15018 = vst [vmem:[#allocation60_spill] sm:$0xff] %v9985_v5  ;;  %v9993_v9 = vadd.f32 1e-05, %v1666_v40  ;;  %v2339_v51 = vmax.f32 %v9965_v38, %v9985_v5  ;;  %vm1765_vm13 = vmor %vm1763_vm12, %vm1764_vm15  ;;  %v1768_v56 = vmul.f32 %v9979_v4, %v9929_v18  ;;  %7196 = vrsqrt.f32 %v9973_v15 }
 0x22c   : > { %v2977_v58 = vsel %vm2913_vm9, %v9985_v5, 0.0  ;;  %v10005_v20 = vadd.f32 %v9704_v49, %v2105_v22  ;;  %v1766_v55 = vsel %vm1765_vm13, %v9884_v62, %v1762_v13  ;;  %v1651_v44 = vmul.f32 %v1573_v25, %v9285_v27  ;;  %v15021_v13 = vld [vmem:[#allocation53_spill] sm:$0xff] }
 0x22d   : > { %2340 = vmax.xlane.f32.xlu1 %v2339_v51  ;;  %v3043_v35 = vadd.f32 %v2977_v58, %v2976_v50  ;;  %v10010_v6 = vadd.f32 %v9711_v24, %v2106_v2  ;;  %v1921_v59 = vsub.f32 1.5, %v1920_v37  ;;  %vm2915_vm14 = vcmp.eq.s32.totalorder %v9717_v3, %v15017_v21 }
 0x22e   : > { %15019 = vst [vmem:[#allocation65_spill] sm:$0xff] %v10005_v20  ;;  %v2978_v29 = vsel %vm2914_vm10, %v10005_v20, 0.0  ;;  %v2137_v40 = vmul.f32 %v9697_v47, %v2067_v23  ;;  %v1929_v62 = vmul.f32 %v9970_v19, %v1928_v8  ;;  %7198 = vrsqrt.f32 %v9993_v9 }
 0x22f   : > { %15020 = vst [vmem:[#allocation115_spill] sm:$0xff] %v10010_v6  ;;  %3044 = vadd.xlane.f32.xlu2 %v3043_v35  ;;  %v2979_v17 = vsel %vm2915_vm14, %v10010_v6, 0.0  ;;  %v2037_v39 = vmul.f32 %v1766_v55, %v9439_v45  ;;  %v2038_v37 = vmul.f32 %v1766_v55, %v15021_v13  ;;  %v1769_v25 = vmul.f32 %v9979_v4, %v1768_v56  ;;  %v15023_v45 = vld [vmem:[#allocation94_spill] sm:$0xff]  ;;  %v1621_v56 = vpop.xlane.xlu2 %1620 }
 0x230   : > { %v3046_v50 = vadd.f32 %v2979_v17, %v2978_v29  ;;  %v10025_v22 = vadd.f32 1e-05, %v1651_v44  ;;  %v2138_v21 = vmul.f32 %v9702_v14, %v2068_v63  ;;  %v10029_v23 = vadd.f32 %v9704_v49, %v2137_v40 }
 0x231   : > { %v10031_v2 = vpop.eup %7196  ;;  %v1922_v8 = vmul.f32 %v9919_v41, %v1921_v59  ;;  %vm1924_vm6 = vweird.f32 %v9919_v41  ;;  %vm2946_vm11 = vcmp.eq.s32.totalorder %v9700_v54, %v15023_v45  ;;  %vm1923_vm9 = vweird.f32 %v9877_v33 }
 0x232   : > { %15022 = vst [vmem:[#allocation53_spill] sm:$0xff] %v10029_v23  ;;  %3047 = vadd.xlane.f32.xlu0 %v3046_v50  ;;  %v1930_v51 = vmul.f32 0.5, %v1929_v62  ;;  %v10039_v58 = vadd.f32 %v9711_v24, %v2138_v21  ;;  %vm2947_vm10 = vcmp.eq.s32.totalorder %v9717_v3, %v15023_v45  ;;  %v1770_v63 = vmul.f32 0.5, %v1769_v25  ;;  %vm1925_vm15 = vmor %vm1923_vm9, %vm1924_vm6  ;;  %v15027_v45 = vld [vmem:[#allocation47_spill] sm:$0xff] }
 0x233   : > { %v3010_v55 = vsel %vm2946_vm11, %v10029_v23, 0.0  ;;  %v2107_v44 = vmul.f32 %v9697_v47, %v2037_v39  ;;  %v2108_v35 = vmul.f32 %v9702_v14, %v2038_v37  ;;  %v1778_v33 = vmul.f32 %v10031_v2, %v9973_v15 }
 0x234   : > { %15024 = vst [vmem:[#allocation94_spill] sm:$0xff] %v10039_v58  ;;  %v10046_v59 = vpop.eup %7198  ;;  %7200 = vrsqrt.f32 %v10025_v22  ;;  %v3011_v29 = vsel %vm2947_vm10, %v10039_v58, 0.0  ;;  %v2387_v40 = vmax.f32 %v9941_v10, %v9953_v60  ;;  %v1926_v62 = vsel %vm1925_vm15, %v9919_v41, %v1922_v8 }
 0x235   : > { %v1667_v17 = vmul.f32 %v1621_v56, %v9285_v27  ;;  %v3094_v39 = vadd.f32 %v3011_v29, %v3010_v55  ;;  %v1931_v13 = vsub.f32 1.5, %v1930_v51  ;;  %v1771_v37 = vsub.f32 1.5, %v1770_v63  ;;  %v15028_v56 = vld [vmem:[#allocation51_spill] sm:$0xff] }
 0x236   : > { %v2390_v25 = vmax.f32 %v10029_v23, %v10039_v58  ;;  %v10059_v50 = vadd.f32 %v9704_v49, %v2107_v44  ;;  %v10062_v21 = vadd.f32 %v9711_v24, %v2108_v35  ;;  %v2069_v60 = vmul.f32 %v1926_v62, %v15027_v45 }
 0x237   : > { %2388 = vmax.xlane.f32.xlu2 %v2387_v40  ;;  %3095 = vadd.xlane.f32.xlu1 %v3094_v39  ;;  %v1938_v41 = vmul.f32 %v10046_v59, %v9993_v9  ;;  %v1779_v8 = vmul.f32 %v10031_v2, %v1778_v33  ;;  %v10068_v51 = vadd.f32 1e-05, %v1667_v17  ;;  %vm2916_vm12 = vcmp.eq.s32.totalorder %v9700_v54, %v15028_v56  ;;  %v15029_v33 = vld [vmem:[#allocation52_spill] sm:$0xff] }
 0x238   : > { %15025 = vst [vmem:[#allocation116_spill] sm:$0xff] %v10059_v50  ;;  %vm2917_vm13 = vcmp.eq.s32.totalorder %v9717_v3, %v15028_v56  ;;  %v1932_v55 = vmul.f32 %v9970_v19, %v1931_v13  ;;  %vm1934_vm14 = vweird.f32 %v9970_v19  ;;  %v2980_v44 = vsel %vm2916_vm12, %v10059_v50, 0.0 }
 0x239   : > { %15026 = vst [vmem:[#allocation117_spill] sm:$0xff] %v10062_v21  ;;  %v2981_v35 = vsel %vm2917_vm13, %v10062_v21, 0.0  ;;  %v2070_v29 = vmul.f32 %v1926_v62, %v15029_v33  ;;  %v1772_v40 = vmul.f32 %v9979_v4, %v1771_v37  ;;  %vm1774_vm6 = vweird.f32 %v9979_v4  ;;  %v1576_v37 = vpop.xlane.xlu2 %1575 }
 0x23a   : > { %2391 = vmax.xlane.f32.xlu0 %v2390_v25  ;;  %v10074_v63 = vpop.eup %7200  ;;  %vm1933_vm11 = vweird.f32 %v9923_v43  ;;  %v1939_v17 = vmul.f32 %v10046_v59, %v1938_v41  ;;  %v1780_v39 = vmul.f32 0.5, %v1779_v8  ;;  %v1624_v25 = vpop.xlane.xlu0 %1623  ;;  %v2342_v13 = vmax.f32 %v10005_v20, %v10010_v6  ;;  %v15032_v20 = vld [vmem:[#allocation49_spill] sm:$0xff] }
 0x23b   : > { %v2139_v45 = vmul.f32 %v9697_v47, %v2069_v60  ;;  %vm1935_vm9 = vmor %vm1933_vm11, %vm1934_vm14  ;;  %v1788_v56 = vmul.f32 %v10074_v63, %v10025_v22  ;;  %7202 = vrsqrt.f32 %v10068_v51  ;;  %v3049_v62 = vadd.f32 %v2981_v35, %v2980_v44  ;;  %v15031_v35 = vld [vmem:[#allocation48_spill] sm:$0xff] }
 0x23c   : > { %vm1773_vm10 = vweird.f32 %v9929_v18  ;;  %v1936_v43 = vsel %vm1935_vm9, %v9970_v19, %v1932_v55  ;;  %v2345_v41 = vmax.f32 %v10059_v50, %v10062_v21  ;;  %v2140_v60 = vmul.f32 %v9702_v14, %v2070_v29  ;;  %v15034_v29 = vld [vmem:[#allocation103_spill] sm:$0xff] }
 0x23d   : > { %vm1775_vm15 = vmor %vm1773_vm10, %vm1774_vm6  ;;  %v10097_v8 = vadd.f32 %v9704_v49, %v2139_v45  ;;  %v1940_v6 = vmul.f32 0.5, %v1939_v17  ;;  %v1781_v44 = vsub.f32 1.5, %v1780_v39  ;;  %v2071_v18 = vmul.f32 %v1936_v43, %v15031_v35  ;;  %v15035_v45 = vld [vmem:[#allocation43_spill] sm:$0xff] }
 0x23e   : > { %v1776_v33 = vsel %vm1775_vm15, %v9979_v4, %v1772_v40  ;;  %v2072_v19 = vmul.f32 %v1936_v43, %v15032_v20  ;;  %v1789_v55 = vmul.f32 %v10074_v63, %v1788_v56  ;;  %vm2948_vm12 = vcmp.eq.s32.totalorder %v9700_v54, %v15034_v29  ;;  %v1627_v40 = vpop.xlane.xlu1 %1626 }
 0x23f   : > { %2343 = vmax.xlane.f32.xlu2 %v2342_v13  ;;  %3050 = vadd.xlane.f32.xlu1 %v3049_v62  ;;  %15030 = vst [vmem:[#allocation47_spill] sm:$0xff] %v10097_v8  ;;  %v10104_v13 = vadd.f32 %v9711_v24, %v2140_v60  ;;  %v1652_v62 = vmul.f32 %v1576_v37, %v9285_v27  ;;  %vm1783_vm14 = vweird.f32 %v9973_v15  ;;  %v3012_v17 = vsel %vm2948_vm12, %v10097_v8, 0.0 }
 0x240   : > { %vm2949_vm13 = vcmp.eq.s32.totalorder %v9717_v3, %v15034_v29  ;;  %v1668_v20 = vmul.f32 %v1624_v25, %v9285_v27  ;;  %v2039_v56 = vmul.f32 %v1776_v33, %v15035_v45  ;;  %v1941_v43 = vsub.f32 1.5, %v1940_v6  ;;  %v15036_v29 = vld [vmem:[#allocation44_spill] sm:$0xff] }
 0x241   : > { %15033 = vst [vmem:[#allocation51_spill] sm:$0xff] %v10104_v13  ;;  %v10111_v4 = vpop.eup %7202  ;;  %v3013_v39 = vsel %vm2949_vm13, %v10104_v13, 0.0  ;;  %v1782_v37 = vmul.f32 %v10031_v2, %v1781_v44  ;;  %vm1784_vm6 = vweird.f32 %v10031_v2  ;;  %v2393_v60 = vmax.f32 %v10097_v8, %v10104_v13 }
 0x242   : > { %2346 = vmax.xlane.f32.xlu0 %v2345_v41  ;;  %v1790_v41 = vmul.f32 0.5, %v1789_v55  ;;  %v2141_v35 = vmul.f32 %v9697_v47, %v2071_v18  ;;  %v2142_v25 = vmul.f32 %v9702_v14, %v2072_v19  ;;  %v2040_v21 = vmul.f32 %v1776_v33, %v15036_v29  ;;  %v1579_v6 = vpop.xlane.xlu0 %1578  ;;  %vm1785_vm11 = vmor %vm1783_vm14, %vm1784_vm6  ;;  %v15037_v55 = vld [vmem:[#allocation90_spill] sm:$0xff] }
 0x243   : > { %v1948_v50 = vmul.f32 %v10111_v4, %v10068_v51  ;;  %v10127_v58 = vadd.f32 1e-05, %v1652_v62  ;;  %v3097_v45 = vadd.f32 %v3013_v39, %v3012_v17  ;;  %v10131_v44 = vadd.f32 1e-05, %v1668_v20 }
 0x244   : > { %vm2950_vm9 = vcmp.eq.s32.totalorder %v9700_v54, %v15037_v55  ;;  %v1942_v18 = vmul.f32 %v10046_v59, %v1941_v43  ;;  %vm1944_vm10 = vweird.f32 %v10046_v59  ;;  %v1786_v33 = vsel %vm1785_vm11, %v10031_v2, %v1782_v37 }
 0x245   : > { %vm2951_vm15 = vcmp.eq.s32.totalorder %v9717_v3, %v15037_v55  ;;  %v1791_v19 = vsub.f32 1.5, %v1790_v41  ;;  %v1653_v15 = vmul.f32 %v1579_v6, %v9285_v27  ;;  %v10142_v62 = vadd.f32 %v9704_v49, %v2141_v35 }
 0x246   : > { %v10145_v20 = vadd.f32 %v9711_v24, %v2142_v25  ;;  %v1949_v17 = vmul.f32 %v10111_v4, %v1948_v50  ;;  %7204 = vrsqrt.f32 %v10127_v58  ;;  %v2109_v39 = vmul.f32 %v9697_v47, %v2039_v56 }
 0x247   : > { %2394 = vmax.xlane.f32.xlu1 %v2393_v60  ;;  %3098 = vadd.xlane.f32.xlu2 %v3097_v45  ;;  %15038 = vst [vmem:[#allocation52_spill] sm:$0xff] %v10142_v62  ;;  %v2110_v2 = vmul.f32 %v9702_v14, %v2040_v21  ;;  %vm1943_vm12 = vweird.f32 %v9993_v9  ;;  %v2041_v43 = vmul.f32 %v1786_v33, %v9499_v28  ;;  %7206 = vrsqrt.f32 %v10131_v44  ;;  %v1582_v28 = vpop.xlane.xlu1 %1581 }
 0x248   : > { %15039 = vst [vmem:[#allocation48_spill] sm:$0xff] %v10145_v20  ;;  %v1669_v37 = vmul.f32 %v1627_v40, %v9285_v27  ;;  %vm1945_vm13 = vmor %vm1943_vm12, %vm1944_vm10  ;;  %v3014_v50 = vsel %vm2950_vm9, %v10142_v62, 0.0  ;;  %v3015_v56 = vsel %vm2951_vm15, %v10145_v20, 0.0  ;;  %vm1794_vm14 = vweird.f32 %v10074_v63 }
 0x249   : > { %v1946_v21 = vsel %vm1945_vm13, %v10046_v59, %v1942_v18  ;;  %v10164_v9 = vadd.f32 1e-05, %v1653_v15  ;;  %v3100_v41 = vadd.f32 %v3015_v56, %v3014_v50  ;;  %v1792_v40 = vmul.f32 %v10074_v63, %v1791_v19  ;;  %v15042_v59 = vld [vmem:[#allocation72_spill] sm:$0xff] }
 0x24a   : > { %v1950_v60 = vmul.f32 0.5, %v1949_v17  ;;  %v10168_v35 = vadd.f32 %v9704_v49, %v2109_v39  ;;  %v10171_v25 = vadd.f32 %v9711_v24, %v2110_v2  ;;  %v2042_v29 = vmul.f32 %v1786_v33, %v9502_v48  ;;  %v15043_v33 = vld [vmem:[#allocation62_spill] sm:$0xff]  ;;  %v1630_v17 = vpop.xlane.xlu2 %1629  ;;  %v15044_v39 = vld [vmem:[#allocation57_spill] sm:$0xff] }
 0x24b   : > { %v10174_v6 = vadd.f32 1e-05, %v1669_v37  ;;  %3101 = vadd.xlane.f32.xlu0 %v3100_v41  ;;  %vm2918_vm6 = vcmp.eq.s32.totalorder %v9700_v54, %v15042_v59  ;;  %v2111_v45 = vmul.f32 %v9697_v47, %v2041_v43  ;;  %vm1793_vm11 = vweird.f32 %v10025_v22  ;;  %v15045_v22 = vld [vmem:[#allocation64_spill] sm:$0xff] }
 0x24c   : > { %15040 = vst [vmem:[#allocation49_spill] sm:$0xff] %v10168_v35  ;;  %v10179_v55 = vpop.eup %7204  ;;  %v1654_v18 = vmul.f32 %v1582_v28, %v9285_v27  ;;  %v2348_v19 = vmax.f32 %v10168_v35, %v10171_v25  ;;  %vm2919_vm9 = vcmp.eq.s32.totalorder %v9717_v3, %v15042_v59  ;;  %v2073_v15 = vmul.f32 %v1946_v21, %v15043_v33  ;;  %vm1795_vm10 = vmor %vm1793_vm11, %vm1794_vm14 }
 0x24d   : > { %15041 = vst [vmem:[#allocation103_spill] sm:$0xff] %v10171_v25  ;;  %v10187_v48 = vpop.eup %7206  ;;  %7208 = vrsqrt.f32 %v10164_v9  ;;  %vm2920_vm15 = vcmp.eq.s32.totalorder %v9700_v54, %v15044_v39  ;;  %vm2921_vm12 = vcmp.eq.s32.totalorder %v9717_v3, %v15044_v39  ;;  %v2074_v2 = vmul.f32 %v1946_v21, %v15045_v22  ;;  %v15049_v22 = vld [vmem:[#allocation45_spill] sm:$0xff] }
 0x24e   : > { %v1796_v43 = vsel %vm1795_vm10, %v10074_v63, %v1792_v40  ;;  %v1951_v37 = vsub.f32 1.5, %v1950_v60  ;;  %v2982_v50 = vsel %vm2918_vm6, %v10168_v35, 0.0  ;;  %7210 = vrsqrt.f32 %v10174_v6 }
 0x24f   : > { %2349 = vmax.xlane.f32.xlu1 %v2348_v19  ;;  %v2983_v56 = vsel %vm2919_vm9, %v10171_v25, 0.0  ;;  %v2112_v28 = vmul.f32 %v9702_v14, %v2042_v29  ;;  %v10207_v41 = vadd.f32 %v9704_v49, %v2111_v45  ;;  %v1798_v21 = vmul.f32 %v10179_v55, %v10127_v58 }
 0x250   : > { %v1958_v63 = vmul.f32 %v10187_v48, %v10131_v44  ;;  %v10213_v40 = vadd.f32 1e-05, %v1654_v18  ;;  %v3052_v60 = vadd.f32 %v2983_v56, %v2982_v50  ;;  %v1670_v59 = vmul.f32 %v1630_v17, %v9285_v27  ;;  %v15048_v18 = vld [vmem:[#allocation101_spill] sm:$0xff]  ;;  %v15050_v56 = vld [vmem:[#allocation46_spill] sm:$0xff] }
 0x251   : > { %15046 = vst [vmem:[#allocation43_spill] sm:$0xff] %v10207_v41  ;;  %v10217_v19 = vadd.f32 %v9711_v24, %v2112_v28  ;;  %v2984_v29 = vsel %vm2920_vm15, %v10207_v41, 0.0  ;;  %v2143_v45 = vmul.f32 %v9697_v47, %v2073_v15  ;;  %vm1954_vm13 = vweird.f32 %v10111_v4 }
 0x252   : > { %3053 = vadd.xlane.f32.xlu2 %v3052_v60  ;;  %v2144_v33 = vmul.f32 %v9702_v14, %v2074_v2  ;;  %vm2952_vm14 = vcmp.eq.s32.totalorder %v9700_v54, %v15048_v18  ;;  %vm2953_vm6 = vcmp.eq.s32.totalorder %v9717_v3, %v15048_v18  ;;  %v2043_v50 = vmul.f32 %v1796_v43, %v15049_v22 }
 0x253   : > { %15047 = vst [vmem:[#allocation44_spill] sm:$0xff] %v10217_v19  ;;  %v10230_v17 = vpop.eup %7208  ;;  %v2044_v28 = vmul.f32 %v1796_v43, %v15050_v56  ;;  %v2985_v15 = vsel %vm2921_vm12, %v10217_v19, 0.0  ;;  %v10239_v60 = vadd.f32 %v9704_v49, %v2143_v45  ;;  %v1952_v2 = vmul.f32 %v10111_v4, %v1951_v37 }
 0x254   : > { %v1799_v25 = vmul.f32 %v10179_v55, %v1798_v21  ;;  %v3055_v35 = vadd.f32 %v2985_v15, %v2984_v29  ;;  %v10244_v13 = vadd.f32 %v9711_v24, %v2144_v33  ;;  %v10246_v8 = vpop.eup %7210  ;;  %v1959_v43 = vmul.f32 %v10187_v48, %v1958_v63  ;;  %v1585_v63 = vpop.xlane.xlu2 %1584 }
 0x255   : > { %15051 = vst [vmem:[#allocation90_spill] sm:$0xff] %v10239_v60  ;;  %7212 = vrsqrt.f32 %v10213_v40  ;;  %v10250_v22 = vadd.f32 1e-05, %v1670_v59  ;;  %v3016_v39 = vsel %vm2952_vm14, %v10239_v60, 0.0  ;;  %vm1953_vm11 = vweird.f32 %v10068_v51  ;;  %v1633_v29 = vpop.xlane.xlu0 %1632 }
 0x256   : > { %15052 = vst [vmem:[#allocation72_spill] sm:$0xff] %v10244_v13  ;;  %v1808_v37 = vmul.f32 %v10230_v17, %v10164_v9  ;;  %3056 = vadd.xlane.f32.xlu0 %v3055_v35  ;;  %v3017_v21 = vsel %vm2953_vm6, %v10244_v13, 0.0  ;;  %vm1955_vm9 = vmor %vm1953_vm11, %vm1954_vm13  ;;  %v1800_v33 = vmul.f32 0.5, %v1799_v25  ;;  %v2396_v51 = vmax.f32 %v10142_v62, %v10145_v20 }
 0x257   : > { %v3103_v59 = vadd.f32 %v3017_v21, %v3016_v39  ;;  %v1956_v45 = vsel %vm1955_vm9, %v10111_v4, %v1952_v2  ;;  %v2113_v56 = vmul.f32 %v9697_v47, %v2043_v50  ;;  %v1960_v35 = vmul.f32 0.5, %v1959_v43  ;;  %v15053_v2 = vld [vmem:[#allocation66_spill] sm:$0xff]  ;;  %v15054_v43 = vld [vmem:[#allocation67_spill] sm:$0xff] }
 0x258   : > { %v1968_v15 = vmul.f32 %v10246_v8, %v10174_v6  ;;  %7214 = vrsqrt.f32 %v10250_v22  ;;  %v2114_v18 = vmul.f32 %v9702_v14, %v2044_v28  ;;  %v1809_v23 = vmul.f32 %v10230_v17, %v1808_v37 }
 0x259   : > { %3104 = vadd.xlane.f32.xlu1 %v3103_v59  ;;  %v1655_v39 = vmul.f32 %v1585_v63, %v9285_v27  ;;  %v10273_v4 = vadd.f32 %v9704_v49, %v2113_v56  ;;  %v1671_v50 = vmul.f32 %v1633_v29, %v9285_v27  ;;  %vm2922_vm10 = vcmp.eq.s32.totalorder %v9700_v54, %v15053_v2 }
 0x25a   : > { %2397 = vmax.xlane.f32.xlu2 %v2396_v51  ;;  %vm2923_vm15 = vcmp.eq.s32.totalorder %v9717_v3, %v15053_v2  ;;  %v2075_v28 = vmul.f32 %v1956_v45, %v9521_v0  ;;  %v2076_v37 = vmul.f32 %v1956_v45, %v15054_v43  ;;  %v2399_v21 = vmax.f32 %v10239_v60, %v10244_v13 }
 0x25b   : > { %v10275_v25 = vpop.eup %7212  ;;  %v10287_v63 = vadd.f32 %v9711_v24, %v2114_v18  ;;  %v1801_v59 = vsub.f32 1.5, %v1800_v33  ;;  %v1961_v51 = vsub.f32 1.5, %v1960_v35  ;;  %v1969_v29 = vmul.f32 %v10246_v8, %v1968_v15  ;;  %v1636_v35 = vpop.xlane.xlu1 %1635 }
 0x25c   : > { %v2986_v56 = vsel %vm2922_vm10, %v10273_v4, 0.0  ;;  %v1810_v20 = vmul.f32 0.5, %v1809_v23  ;;  %v1818_v2 = vmul.f32 %v10275_v25, %v10213_v40  ;;  %v10293_v62 = vadd.f32 1e-05, %v1655_v39 }
 0x25d   : > { %v2987_v0 = vsel %vm2923_vm15, %v10287_v63, 0.0  ;;  %vm1803_vm12 = vweird.f32 %v10127_v58  ;;  %vm1804_vm13 = vweird.f32 %v10179_v55  ;;  %v10300_v33 = vadd.f32 1e-05, %v1671_v50  ;;  %v1588_v13 = vpop.xlane.xlu0 %1587 }
 0x25e   : > { %2400 = vmax.xlane.f32.xlu0 %v2399_v21  ;;  %v10296_v45 = vpop.eup %7214  ;;  %vm1964_vm14 = vweird.f32 %v10187_v48  ;;  %v3058_v23 = vadd.f32 %v2987_v0, %v2986_v56  ;;  %v2145_v15 = vmul.f32 %v9697_v47, %v2075_v28  ;;  %v2146_v18 = vmul.f32 %v9702_v14, %v2076_v37  ;;  %vm1805_vm6 = vmor %vm1803_vm12, %vm1804_vm13 }
 0x25f   : > { %v1802_v39 = vmul.f32 %v10179_v55, %v1801_v59  ;;  %v1962_v43 = vmul.f32 %v10187_v48, %v1961_v51  ;;  %v1970_v21 = vmul.f32 0.5, %v1969_v29  ;;  %v2351_v60 = vmax.f32 %v10207_v41, %v10217_v19 }
 0x260   : > { %v1811_v10 = vsub.f32 1.5, %v1810_v20  ;;  %v1819_v50 = vmul.f32 %v10275_v25, %v1818_v2  ;;  %v1978_v5 = vmul.f32 %v10296_v45, %v10250_v22  ;;  %7216 = vrsqrt.f32 %v10293_v62 }
 0x261   : > { %3059 = vadd.xlane.f32.xlu1 %v3058_v23  ;;  %vm1963_vm11 = vweird.f32 %v10131_v44  ;;  %7218 = vrsqrt.f32 %v10300_v33  ;;  %v1672_v28 = vmul.f32 %v1636_v35, %v9285_v27  ;;  %v1656_v20 = vmul.f32 %v1588_v13, %v9285_v27  ;;  %v15056_v35 = vld [vmem:[#allocation68_spill] sm:$0xff] }
 0x262   : > { %2352 = vmax.xlane.f32.xlu2 %v2351_v60  ;;  %vm1965_vm9 = vmor %vm1963_vm11, %vm1964_vm14  ;;  %v2354_v37 = vmax.f32 %v10273_v4, %v10287_v63  ;;  %v10326_v59 = vadd.f32 %v9704_v49, %v2145_v15  ;;  %v10329_v58 = vadd.f32 %v9711_v24, %v2146_v18  ;;  %v1806_v44 = vsel %vm1805_vm6, %v10179_v55, %v1802_v39  ;;  %v15055_v60 = vld [vmem:[#allocation106_spill] sm:$0xff]  ;;  %v15057_v15 = vld [vmem:[#allocation97_spill] sm:$0xff] }
 0x263   : > { %v1966_v51 = vsel %vm1965_vm9, %v10187_v48, %v1962_v43  ;;  %vm1814_vm10 = vweird.f32 %v10230_v17  ;;  %vm2954_vm15 = vcmp.eq.s32.totalorder %v9700_v54, %v15055_v60  ;;  %v1971_v29 = vsub.f32 1.5, %v1970_v21 }
 0x264   : > { %v1812_v13 = vmul.f32 %v10230_v17, %v1811_v10  ;;  %v1820_v56 = vmul.f32 0.5, %v1819_v50  ;;  %v1979_v2 = vmul.f32 %v10296_v45, %v1978_v5  ;;  %vm1973_vm12 = vweird.f32 %v10174_v6 }
 0x265   : > { %vm1813_vm13 = vweird.f32 %v10164_v9  ;;  %v10340_v0 = vadd.f32 1e-05, %v1672_v28  ;;  %vm2955_vm14 = vcmp.eq.s32.totalorder %v9717_v3, %v15055_v60  ;;  %v2077_v48 = vmul.f32 %v1966_v51, %v9532_v30  ;;  %v1591_v28 = vpop.xlane.xlu1 %1590 }
 0x266   : > { %2355 = vmax.xlane.f32.xlu0 %v2354_v37  ;;  %v10344_v55 = vpop.eup %7216  ;;  %v2078_v23 = vmul.f32 %v1966_v51, %v15056_v35  ;;  %v10348_v10 = vadd.f32 1e-05, %v1656_v20  ;;  %v2402_v5 = vmax.f32 %v10326_v59, %v10329_v58  ;;  %vm2956_vm6 = vcmp.eq.s32.totalorder %v9700_v54, %v15057_v15  ;;  %vm1815_vm9 = vmor %vm1813_vm13, %vm1814_vm10 }
 0x267   : > { %v10354_v9 = vpop.eup %7218  ;;  %v2045_v18 = vmul.f32 %v1806_v44, %v9543_v42  ;;  %v2046_v39 = vmul.f32 %v1806_v44, %v9546_v26  ;;  %vm1974_vm11 = vweird.f32 %v10246_v8  ;;  %vm1823_vm7 = vweird.f32 %v10213_v40 }
 0x268   : > { %vm2957_vm4 = vcmp.eq.s32.totalorder %v9717_v3, %v15057_v15  ;;  %v1972_v30 = vmul.f32 %v10246_v8, %v1971_v29  ;;  %v1816_v43 = vsel %vm1815_vm9, %v10230_v17, %v1812_v13  ;;  %v1821_v21 = vsub.f32 1.5, %v1820_v56  ;;  %v15058_v17 = vld [vmem:[#allocation79_spill] sm:$0xff] }
 0x269   : > { %v1980_v50 = vmul.f32 0.5, %v1979_v2  ;;  %2403 = vmax.xlane.f32.xlu1 %v2402_v5  ;;  %v1828_v42 = vmul.f32 %v10344_v55, %v10293_v62  ;;  %7220 = vrsqrt.f32 %v10340_v0  ;;  %v3018_v26 = vsel %vm2954_vm15, %v10326_v59, 0.0  ;;  %vm1975_vm15 = vmor %vm1973_vm12, %vm1974_vm11 }
 0x26a   : > { %v3019_v20 = vsel %vm2955_vm14, %v10329_v58, 0.0  ;;  %vm2924_vm10 = vcmp.eq.s32.totalorder %v9700_v54, %v15058_v17  ;;  %7222 = vrsqrt.f32 %v10348_v10  ;;  %v2147_v44 = vmul.f32 %v9697_v47, %v2077_v48 }
 0x26b   : > { %v3106_v37 = vadd.f32 %v3019_v20, %v3018_v26  ;;  %v2148_v51 = vmul.f32 %v9702_v14, %v2078_v23  ;;  %vm2925_vm13 = vcmp.eq.s32.totalorder %v9717_v3, %v15058_v17  ;;  %v1988_v60 = vmul.f32 %v10354_v9, %v10300_v33 }
 0x26c   : > { %v1657_v29 = vmul.f32 %v1591_v28, %v9285_v27  ;;  %v2115_v13 = vmul.f32 %v9697_v47, %v2045_v18  ;;  %v2116_v56 = vmul.f32 %v9702_v14, %v2046_v39  ;;  %v1976_v2 = vsel %vm1975_vm15, %v10246_v8, %v1972_v30  ;;  %v15061_v18 = vld [vmem:[#allocation63_spill] sm:$0xff] }
 0x26d   : > { %v2047_v48 = vmul.f32 %v1816_v43, %v9565_v52  ;;  %v2048_v35 = vmul.f32 %v1816_v43, %v9568_v12  ;;  %3107 = vadd.xlane.f32.xlu2 %v3106_v37  ;;  %v10397_v23 = vadd.f32 %v9704_v49, %v2147_v44  ;;  %v1822_v6 = vmul.f32 %v10275_v25, %v1821_v21  ;;  %v1639_v12 = vpop.xlane.xlu2 %1638 }
 0x26e   : > { %vm1824_vm12 = vweird.f32 %v10275_v25  ;;  %v1981_v5 = vsub.f32 1.5, %v1980_v50  ;;  %v10402_v28 = vadd.f32 %v9711_v24, %v2148_v51  ;;  %vm2926_vm14 = vcmp.eq.s32.totalorder %v9700_v54, %v15061_v18 }
 0x26f   : > { %15059 = vst [vmem:[#allocation62_spill] sm:$0xff] %v10397_v23  ;;  %vm2927_vm11 = vcmp.eq.s32.totalorder %v9717_v3, %v15061_v18  ;;  %vm1983_vm9 = vweird.f32 %v10250_v22  ;;  %v1829_v52 = vmul.f32 %v10344_v55, %v1828_v42  ;;  %v10411_v8 = vadd.f32 %v9704_v49, %v2115_v13  ;;  %v10416_v30 = vpop.eup %7220  ;;  %vm1825_vm15 = vmor %vm1823_vm7, %vm1824_vm12 }
 0x270   : > { %15060 = vst [vmem:[#allocation57_spill] sm:$0xff] %v10402_v28  ;;  %v10414_v39 = vadd.f32 %v9711_v24, %v2116_v56  ;;  %v2079_v43 = vmul.f32 %v1976_v2, %v9554_v61  ;;  %v1989_v21 = vmul.f32 %v10354_v9, %v1988_v60  ;;  %v10420_v50 = vadd.f32 1e-05, %v1657_v29  ;;  %v10426_v26 = vpop.eup %7222  ;;  %v15064_v29 = vld [vmem:[#allocation104_spill] sm:$0xff] }
 0x271   : > { %15062 = vst [vmem:[#allocation64_spill] sm:$0xff] %v10411_v8  ;;  %v3020_v42 = vsel %vm2956_vm6, %v10397_v23, 0.0  ;;  %v2080_v20 = vmul.f32 %v1976_v2, %v9557_v7  ;;  %v3021_v61 = vsel %vm2957_vm4, %v10402_v28, 0.0  ;;  %v2117_v37 = vmul.f32 %v9697_v47, %v2047_v48 }
 0x272   : > { %15063 = vst [vmem:[#allocation101_spill] sm:$0xff] %v10414_v39  ;;  %v2118_v44 = vmul.f32 %v9702_v14, %v2048_v35  ;;  %v1826_v51 = vsel %vm1825_vm15, %v10275_v25, %v1822_v6  ;;  %v1982_v60 = vmul.f32 %v10296_v45, %v1981_v5  ;;  %vm1984_vm6 = vweird.f32 %v10296_v45 }
 0x273   : > { %v3109_v7 = vadd.f32 %v3021_v61, %v3020_v42  ;;  %vm2958_vm5 = vcmp.eq.s32.totalorder %v9700_v54, %v15064_v29  ;;  %vm2959_vm7 = vcmp.eq.s32.totalorder %v9717_v3, %v15064_v29  ;;  %v1830_v40 = vmul.f32 0.5, %v1829_v52  ;;  %v15070_v29 = vld [vmem:[#allocation59_spill] sm:$0xff] }
 0x274   : > { %v1673_v15 = vmul.f32 %v1639_v12, %v9285_v27  ;;  %v2357_v13 = vmax.f32 %v10411_v8, %v10414_v39  ;;  %v2988_v25 = vsel %vm2924_vm10, %v10411_v8, 0.0  ;;  %v1990_v56 = vmul.f32 0.5, %v1989_v21  ;;  %vm1985_vm10 = vmor %vm1983_vm9, %vm1984_vm6 }
 0x275   : > { %v1838_v2 = vmul.f32 %v10426_v26, %v10348_v10  ;;  %7224 = vrsqrt.f32 %v10420_v50  ;;  %3110 = vadd.xlane.f32.xlu0 %v3109_v7  ;;  %v2989_v48 = vsel %vm2925_vm13, %v10414_v39, 0.0  ;;  %v1998_v35 = vmul.f32 %v10416_v30, %v10340_v0  ;;  %v1594_v22 = vpop.xlane.xlu2 %1593 }
 0x276   : > { %2358 = vmax.xlane.f32.xlu1 %v2357_v13  ;;  %v3061_v6 = vadd.f32 %v2989_v48, %v2988_v25  ;;  %v10463_v5 = vadd.f32 %v9704_v49, %v2117_v37  ;;  %v10466_v52 = vadd.f32 %v9711_v24, %v2118_v44  ;;  %v2049_v12 = vmul.f32 %v1826_v51, %v9576_v31 }
 0x277   : > { %v2050_v21 = vmul.f32 %v1826_v51, %v9579_v57  ;;  %v2149_v42 = vmul.f32 %v9697_v47, %v2079_v43  ;;  %v2150_v17 = vmul.f32 %v9702_v14, %v2080_v20  ;;  %v1831_v61 = vsub.f32 1.5, %v1830_v40  ;;  %v1642_v20 = vpop.xlane.xlu0 %1641 }
 0x278   : > { %15065 = vst [vmem:[#allocation45_spill] sm:$0xff] %v10463_v5  ;;  %vm1833_vm4 = vweird.f32 %v10293_v62  ;;  %3062 = vadd.xlane.f32.xlu2 %v3061_v6  ;;  %v2990_v37 = vsel %vm2926_vm14, %v10463_v5, 0.0  ;;  %v2991_v31 = vsel %vm2927_vm11, %v10466_v52, 0.0  ;;  %v1991_v57 = vsub.f32 1.5, %v1990_v56 }
 0x279   : > { %15066 = vst [vmem:[#allocation46_spill] sm:$0xff] %v10466_v52  ;;  %v1839_v43 = vmul.f32 %v10426_v26, %v1838_v2  ;;  %v10487_v44 = vadd.f32 %v9704_v49, %v2149_v42  ;;  %v10490_v51 = vadd.f32 %v9711_v24, %v2150_v17  ;;  %v1986_v7 = vsel %vm1985_vm10, %v10296_v45, %v1982_v60 }
 0x27a   : > { %vm1993_vm13 = vweird.f32 %v10300_v33  ;;  %v1999_v18 = vmul.f32 %v10416_v30, %v1998_v35  ;;  %v10495_v40 = vadd.f32 1e-05, %v1673_v15  ;;  %vm1834_vm12 = vweird.f32 %v10344_v55 }
 0x27b   : > { %15067 = vst [vmem:[#allocation66_spill] sm:$0xff] %v10487_v44  ;;  %v10497_v13 = vpop.eup %7224  ;;  %vm1994_vm14 = vweird.f32 %v10354_v9  ;;  %v3064_v25 = vadd.f32 %v2991_v31, %v2990_v37  ;;  %v2119_v56 = vmul.f32 %v9697_v47, %v2049_v12  ;;  %v1832_v2 = vmul.f32 %v10344_v55, %v1831_v61  ;;  %v15069_v37 = vld [vmem:[#allocation58_spill] sm:$0xff] }
 0x27c   : > { %15068 = vst [vmem:[#allocation67_spill] sm:$0xff] %v10490_v51  ;;  %v1674_v45 = vmul.f32 %v1642_v20, %v9285_v27  ;;  %v3022_v60 = vsel %vm2958_vm5, %v10487_v44, 0.0  ;;  %v3023_v15 = vsel %vm2959_vm7, %v10490_v51, 0.0  ;;  %v1992_v48 = vmul.f32 %v10354_v9, %v1991_v57  ;;  %vm1835_vm5 = vmor %vm1833_vm4, %vm1834_vm12 }
 0x27d   : > { %v1840_v35 = vmul.f32 0.5, %v1839_v43  ;;  %v1658_v6 = vmul.f32 %v1594_v22, %v9285_v27  ;;  %3065 = vadd.xlane.f32.xlu0 %v3064_v25  ;;  %v3112_v12 = vadd.f32 %v3023_v15, %v3022_v60  ;;  %v2000_v42 = vmul.f32 0.5, %v1999_v18  ;;  %vm1995_vm11 = vmor %vm1993_vm13, %vm1994_vm14 }
 0x27e   : > { %v1848_v17 = vmul.f32 %v10497_v13, %v10420_v50  ;;  %7226 = vrsqrt.f32 %v10495_v40  ;;  %v2405_v61 = vmax.f32 %v10397_v23, %v10402_v28  ;;  %v2081_v31 = vmul.f32 %v1986_v7, %v15069_v37 }
 0x27f   : > { %v2082_v20 = vmul.f32 %v1986_v7, %v15070_v29  ;;  %3113 = vadd.xlane.f32.xlu1 %v3112_v12  ;;  %v2120_v27 = vmul.f32 %v9702_v14, %v2050_v21  ;;  %v10527_v57 = vadd.f32 %v9704_v49, %v2119_v56  ;;  %v1836_v43 = vsel %vm1835_vm5, %v10344_v55, %v1832_v2  ;;  %v15072_v7 = vld [vmem:[#allocation73_spill] sm:$0xff] }
 0x280   : > { %v10534_v18 = vadd.f32 1e-05, %v1674_v45  ;;  %2406 = vmax.xlane.f32.xlu2 %v2405_v61  ;;  %vm2928_vm9 = vcmp.eq.s32.totalorder %v9700_v54, %v15072_v7  ;;  %vm2929_vm15 = vcmp.eq.s32.totalorder %v9717_v3, %v15072_v7  ;;  %v1996_v62 = vsel %vm1995_vm11, %v10354_v9, %v1992_v48  ;;  %v15074_v48 = vld [vmem:[#allocation55_spill] sm:$0xff] }
 0x281   : > { %15071 = vst [vmem:[#allocation106_spill] sm:$0xff] %v10527_v57  ;;  %v1841_v21 = vsub.f32 1.5, %v1840_v35  ;;  %v10541_v22 = vadd.f32 1e-05, %v1658_v6  ;;  %v10544_v55 = vadd.f32 %v9711_v24, %v2120_v27  ;;  %v2001_v25 = vsub.f32 1.5, %v2000_v42  ;;  %v15075_v6 = vld [vmem:[#allocation70_spill] sm:$0xff] }
 0x282   : > { %vm2004_vm6 = vweird.f32 %v10416_v30  ;;  %v1849_v33 = vmul.f32 %v10497_v13, %v1848_v17  ;;  %v2992_v56 = vsel %vm2928_vm9, %v10527_v57, 0.0  ;;  %v2408_v2 = vmax.f32 %v10487_v44, %v10490_v51  ;;  %v15076_v42 = vld [vmem:[#allocation71_spill] sm:$0xff] }
 0x283   : > { %15073 = vst [vmem:[#allocation68_spill] sm:$0xff] %v10544_v55  ;;  %v2993_v45 = vsel %vm2929_vm15, %v10544_v55, 0.0  ;;  %v2151_v9 = vmul.f32 %v9697_v47, %v2081_v31  ;;  %v2152_v60 = vmul.f32 %v9702_v14, %v2082_v20  ;;  %v2051_v35 = vmul.f32 %v1836_v43, %v15074_v48  ;;  %v15077_v31 = vld [vmem:[#allocation56_spill] sm:$0xff] }
 0x284   : > { %v10554_v15 = vpop.eup %7226  ;;  %v2083_v12 = vmul.f32 %v1996_v62, %v15075_v6  ;;  %v2084_v61 = vmul.f32 %v1996_v62, %v15076_v42  ;;  %7228 = vrsqrt.f32 %v10534_v18  ;;  %v1842_v17 = vmul.f32 %v10426_v26, %v1841_v21 }
 0x285   : > { %vm1844_vm7 = vweird.f32 %v10426_v26  ;;  %7230 = vrsqrt.f32 %v10541_v22  ;;  %2409 = vmax.xlane.f32.xlu0 %v2408_v2  ;;  %v3067_v37 = vadd.f32 %v2993_v45, %v2992_v56  ;;  %v2052_v29 = vmul.f32 %v1836_v43, %v15077_v31  ;;  %v10577_v43 = vpop.xlane.xlu0 %3035  ;;  %v15084_v31 = vld [vmem:[#allocation75_spill] sm:$0xff] }
 0x286   : > { %v2002_v20 = vmul.f32 %v10416_v30, %v2001_v25  ;;  %v1850_v27 = vmul.f32 0.5, %v1849_v33  ;;  %v2360_v7 = vmax.f32 %v10463_v5, %v10466_v52  ;;  %vm1843_vm4 = vweird.f32 %v10348_v10  ;;  %15080 = vst [vmem:[#allocation63_spill] sm:$0xff] %v10577_v43  ;;  %v15081_v25 = vld [vmem:[#allocation109_spill] sm:$0xff] }
 0x287   : > { %v2008_v62 = vmul.f32 %v10554_v15, %v10495_v40  ;;  %3068 = vadd.xlane.f32.xlu1 %v3067_v37  ;;  %v10571_v21 = vadd.f32 %v9704_v49, %v2151_v9  ;;  %v10574_v2 = vadd.f32 %v9711_v24, %v2152_v60  ;;  %vm2003_vm10 = vweird.f32 %v10340_v0  ;;  %vm1845_vm13 = vmor %vm1843_vm4, %vm1844_vm7  ;;  %v15082_v0 = vld [vmem:[#allocation102_spill] sm:$0xff] }
 0x288   : > { %2361 = vmax.xlane.f32.xlu2 %v2360_v7  ;;  %vm2960_vm12 = vcmp.eq.s32.totalorder %v9700_v54, %v15081_v25  ;;  %v2153_v10 = vmul.f32 %v9697_v47, %v2083_v12  ;;  %v2154_v33 = vmul.f32 %v9702_v14, %v2084_v61  ;;  %vm2005_vm14 = vmor %vm2003_vm10, %vm2004_vm6  ;;  %v1846_v56 = vsel %vm1845_vm13, %v10426_v26, %v1842_v17  ;;  %v15088_v7 = vld [vmem:[#allocation77_spill] sm:$0xff] }
 0x289   : > { %15078 = vst [vmem:[#allocation97_spill] sm:$0xff] %v10571_v21  ;;  %vm2961_vm5 = vcmp.eq.s32.totalorder %v9717_v3, %v15081_v25  ;;  %vm2962_vm11 = vcmp.eq.s32.totalorder %v9700_v54, %v15082_v0  ;;  %vm2963_vm9 = vcmp.eq.s32.totalorder %v9717_v3, %v15082_v0  ;;  %v2121_v9 = vmul.f32 %v9697_v47, %v2051_v35  ;;  %v15083_v35 = vld [vmem:[#allocation74_spill] sm:$0xff] }
 0x28a   : > { %15079 = vst [vmem:[#allocation79_spill] sm:$0xff] %v10574_v2  ;;  %v10592_v45 = vpop.eup %7228  ;;  %v2122_v60 = vmul.f32 %v9702_v14, %v2052_v29  ;;  %v2006_v48 = vsel %vm2005_vm14, %v10416_v30, %v2002_v20  ;;  %v1851_v6 = vsub.f32 1.5, %v1850_v27  ;;  %v2009_v26 = vmul.f32 %v10554_v15, %v2008_v62  ;;  %v10609_v30 = vpop.xlane.xlu2 %2379 }
 0x28b   : > { %v10597_v12 = vpop.eup %7230  ;;  %v2363_v42 = vmax.f32 %v10527_v57, %v10544_v55  ;;  %v3024_v61 = vsel %vm2960_vm12, %v10571_v21, 0.0  ;;  %v3025_v17 = vsel %vm2961_vm5, %v10574_v2, 0.0  ;;  %v2053_v37 = vmul.f32 %v1846_v56, %v15083_v35  ;;  %15085 = vst [vmem:[#allocation104_spill] sm:$0xff] %v10609_v30 }
 0x28c   : > { %v2054_v29 = vmul.f32 %v1846_v56, %v15084_v31  ;;  %v10612_v20 = vadd.f32 %v9704_v49, %v2153_v10  ;;  %v10615_v27 = vadd.f32 %v9711_v24, %v2154_v33  ;;  %v2085_v62 = vmul.f32 %v2006_v48, %v15088_v7  ;;  %v15089_v56 = vld [vmem:[#allocation78_spill] sm:$0xff] }
 0x28d   : > { %vm1854_vm15 = vweird.f32 %v10497_v13  ;;  %v2018_v25 = vmul.f32 %v10592_v45, %v10534_v18  ;;  %2364 = vmax.xlane.f32.xlu0 %v2363_v42  ;;  %v2411_v35 = vmax.f32 %v10571_v21, %v10574_v2  ;;  %v2086_v31 = vmul.f32 %v2006_v48, %v15089_v56  ;;  %v10659_v2 = vpop.xlane.xlu1 %2331 }
 0x28e   : > { %15086 = vst [vmem:[#allocation58_spill] sm:$0xff] %v10612_v20  ;;  %v1852_v43 = vmul.f32 %v10497_v13, %v1851_v6  ;;  %v1858_v10 = vmul.f32 %v10597_v12, %v10541_v22  ;;  %v3115_v33 = vadd.f32 %v3025_v17, %v3024_v61  ;;  %vm1853_vm6 = vweird.f32 %v10420_v50 }
 0x28f   : > { %15087 = vst [vmem:[#allocation59_spill] sm:$0xff] %v10615_v27  ;;  %v2010_v7 = vmul.f32 0.5, %v2009_v26  ;;  %2412 = vmax.xlane.f32.xlu1 %v2411_v35  ;;  %v10629_v55 = vadd.f32 %v9704_v49, %v2121_v9  ;;  %v10632_v42 = vadd.f32 %v9711_v24, %v2122_v60  ;;  %v3026_v48 = vsel %vm2962_vm11, %v10612_v20, 0.0  ;;  %v15092_v9 = vld [vmem:[#allocation84_spill] sm:$0xff]  ;;  %vm1855_vm10 = vmor %vm1853_vm6, %vm1854_vm15 }
 0x290   : > { %3116 = vadd.xlane.f32.xlu2 %v3115_v33  ;;  %v3027_v6 = vsel %vm2963_vm9, %v10615_v27, 0.0  ;;  %v2123_v50 = vmul.f32 %v9697_v47, %v2053_v37  ;;  %v2124_v26 = vmul.f32 %v9702_v14, %v2054_v29  ;;  %vm2930_vm7 = vcmp.eq.s32.totalorder %v9700_v54, %v15092_v9  ;;  %v10655_v29 = vpop.xlane.xlu0 %3083  ;;  %15094 = vst [vmem:[#allocation71_spill] sm:$0xff] %v10659_v2 }
 0x291   : > { %15090 = vst [vmem:[#allocation73_spill] sm:$0xff] %v10629_v55  ;;  %vm2931_vm4 = vcmp.eq.s32.totalorder %v9717_v3, %v15092_v9  ;;  %v2019_v60 = vmul.f32 %v10592_v45, %v2018_v25  ;;  %v2155_v61 = vmul.f32 %v9697_v47, %v2085_v62  ;;  %v2156_v0 = vmul.f32 %v9702_v14, %v2086_v31  ;;  %v15097_v31 = vld [vmem:[#allocation81_spill] sm:$0xff] }
 0x292   : > { %15091 = vst [vmem:[#allocation55_spill] sm:$0xff] %v10632_v42  ;;  %v1856_v17 = vsel %vm1855_vm10, %v10497_v13, %v1852_v43  ;;  %v1859_v37 = vmul.f32 %v10597_v12, %v1858_v10  ;;  %v3118_v35 = vadd.f32 %v3027_v6, %v3026_v48  ;;  %v2994_v56 = vsel %vm2930_vm7, %v10629_v55, 0.0  ;;  %v15098_v43 = vld [vmem:[#allocation82_spill] sm:$0xff] }
 0x293   : > { %15093 = vst [vmem:[#allocation70_spill] sm:$0xff] %v10655_v29  ;;  %v2995_v33 = vsel %vm2931_vm4, %v10632_v42, 0.0  ;;  %v2011_v9 = vsub.f32 1.5, %v2010_v7  ;;  %v10662_v25 = vadd.f32 %v9704_v49, %v2123_v50  ;;  %v10665_v62 = vadd.f32 %v9711_v24, %v2124_v26  ;;  %v10671_v29 = vpop.xlane.xlu2 %2334  ;;  %v15102_v26 = vld [vmem:[#allocation107_spill] sm:$0xff] }
 0x294   : > { %v2055_v13 = vmul.f32 %v1856_v17, %v15097_v31  ;;  %v2056_v10 = vmul.f32 %v1856_v17, %v15098_v43  ;;  %v2020_v21 = vmul.f32 0.5, %v2019_v60  ;;  %v2366_v48 = vmax.f32 %v10629_v55, %v10632_v42  ;;  %15099 = vst [vmem:[#allocation102_spill] sm:$0xff] %v10671_v29  ;;  %v15103_v60 = vld [vmem:[#allocation69_spill] sm:$0xff]  ;;  %v15117_v55 = vld [vmem:[#allocation95_spill] sm:$0xff] }
 0x295   : > { %15095 = vst [vmem:[#allocation56_spill] sm:$0xff] %v10662_v25  ;;  %3119 = vadd.xlane.f32.xlu0 %v3118_v35  ;;  %v1860_v6 = vmul.f32 0.5, %v1859_v37  ;;  %v3070_v7 = vadd.f32 %v2995_v33, %v2994_v56  ;;  %v10674_v57 = vadd.f32 %v9704_v49, %v2155_v61  ;;  %v10677_v50 = vadd.f32 %v9711_v24, %v2156_v0 }
 0x296   : > { %15096 = vst [vmem:[#allocation109_spill] sm:$0xff] %v10665_v62  ;;  %vm2964_vm13 = vcmp.eq.s32.totalorder %v9700_v54, %v15102_v26  ;;  %vm2932_vm12 = vcmp.eq.s32.totalorder %v9700_v54, %v15103_v60  ;;  %vm2933_vm14 = vcmp.eq.s32.totalorder %v9717_v3, %v15103_v60  ;;  %v2012_v17 = vmul.f32 %v10554_v15, %v2011_v9  ;;  %v15108_v60 = vld [vmem:[#allocation85_spill] sm:$0xff] }
 0x297   : > { %15100 = vst [vmem:[#allocation74_spill] sm:$0xff] %v10674_v57  ;;  %2367 = vmax.xlane.f32.xlu1 %v2366_v48  ;;  %vm2014_vm5 = vweird.f32 %v10554_v15  ;;  %v2996_v61 = vsel %vm2932_vm12, %v10662_v25, 0.0  ;;  %v2997_v0 = vsel %vm2933_vm14, %v10665_v62, 0.0  ;;  %vm2965_vm11 = vcmp.eq.s32.totalorder %v9717_v3, %v15102_v26 }
 0x298   : > { %15101 = vst [vmem:[#allocation75_spill] sm:$0xff] %v10677_v50  ;;  %3071 = vadd.xlane.f32.xlu2 %v3070_v7  ;;  %v2125_v37 = vmul.f32 %v9697_v47, %v2055_v13  ;;  %vm2013_vm9 = vweird.f32 %v10495_v40  ;;  %v2021_v35 = vsub.f32 1.5, %v2020_v21  ;;  %v2126_v56 = vmul.f32 %v9702_v14, %v2056_v10  ;;  %v10700_v7 = vpop.xlane.xlu1 %3086  ;;  %v10702_v26 = vpop.xlane.xlu0 %2382 }
 0x299   : > { %v1861_v33 = vsub.f32 1.5, %v1860_v6  ;;  %v3028_v9 = vsel %vm2964_vm13, %v10674_v57, 0.0  ;;  %v3029_v31 = vsel %vm2965_vm11, %v10677_v50, 0.0  ;;  %vm2015_vm15 = vmor %vm2013_vm9, %vm2014_vm5  ;;  %v3073_v43 = vadd.f32 %v2997_v0, %v2996_v61  ;;  %15104 = vst [vmem:[#allocation77_spill] sm:$0xff] %v10700_v7  ;;  %v15109_v61 = vld [vmem:[#allocation86_spill] sm:$0xff]  ;;  %v15116_v7 = vld [vmem:[#allocation93_spill] sm:$0xff] }
 0x29a   : > { %v2016_v48 = vsel %vm2015_vm15, %v10554_v15, %v2012_v17  ;;  %15105 = vst [vmem:[#allocation78_spill] sm:$0xff] %v10702_v26  ;;  %vm1864_vm6 = vweird.f32 %v10597_v12  ;;  %v2022_v40 = vmul.f32 %v10592_v45, %v2021_v35  ;;  %vm2024_vm7 = vweird.f32 %v10592_v45 }
 0x29b   : > { %v3121_v21 = vadd.f32 %v3029_v31, %v3028_v9  ;;  %v1862_v13 = vmul.f32 %v10597_v12, %v1861_v33  ;;  %v2414_v10 = vmax.f32 %v10612_v20, %v10615_v27  ;;  %v10711_v6 = vadd.f32 %v9704_v49, %v2125_v37  ;;  %v10721_v35 = vpop.xlane.xlu2 %3038  ;;  %v15112_v9 = vld [vmem:[#allocation80_spill] sm:$0xff] }
 0x29c   : > { %v10714_v15 = vadd.f32 %v9711_v24, %v2126_v56  ;;  %v2087_v17 = vmul.f32 %v2016_v48, %v15108_v60  ;;  %v2088_v0 = vmul.f32 %v2016_v48, %v15109_v61  ;;  %vm2023_vm4 = vweird.f32 %v10534_v18  ;;  %15110 = vst [vmem:[#allocation82_spill] sm:$0xff] %v10721_v35  ;;  %v15113_v61 = vld [vmem:[#allocation88_spill] sm:$0xff] }
 0x29d   : > { %3074 = vadd.xlane.f32.xlu0 %v3073_v43  ;;  %15106 = vst [vmem:[#allocation84_spill] sm:$0xff] %v10711_v6  ;;  %vm1863_vm10 = vweird.f32 %v10541_v22  ;;  %vm2025_vm13 = vmor %vm2023_vm4, %vm2024_vm7  ;;  %v15111_v33 = vlaneseq  ;;  %vm2934_vm12 = vcmp.eq.s32.totalorder %v9700_v54, %v15112_v9  ;;  %vm2935_vm14 = vcmp.eq.s32.totalorder %v9717_v3, %v15112_v9 }
 0x29e   : > { %15107 = vst [vmem:[#allocation81_spill] sm:$0xff] %v10714_v15  ;;  %vm1865_vm5 = vmor %vm1863_vm10, %vm1864_vm6  ;;  %v2026_v18 = vsel %vm2025_vm13, %v10592_v45, %v2022_v40  ;;  %v10733_v56 = vstv %s3446_s26  ;;  %v2998_v31 = vsel %vm2934_vm12, %v10711_v6, 0.0  ;;  %v2999_v43 = vsel %vm2935_vm14, %v10714_v15, 0.0  ;;  %v15114_v45 = vld [vmem:[#allocation89_spill] sm:$0xff] }
 0x29f   : > { %3122 = vadd.xlane.f32.xlu1 %v3121_v21  ;;  %v10724_v37 = vshrl.u32 %v15111_v33, 7  ;;  %v1866_v22 = vsel %vm1865_vm5, %v10597_v12, %v1862_v13  ;;  %v2157_v21 = vmul.f32 %v9697_v47, %v2087_v17  ;;  %v2417_v60 = vmax.f32 %v10674_v57, %v10677_v50  ;;  %v15115_v12 = vld [vmem:[#allocation92_spill] sm:$0xff] }
 0x2a0   : > { %2415 = vmax.xlane.f32.xlu2 %v2414_v10  ;;  %v2158_v10 = vmul.f32 %v9702_v14, %v2088_v0  ;;  %v2089_v33 = vmul.f32 %v2026_v18, %v15113_v61  ;;  %v2090_v40 = vmul.f32 %v2026_v18, %v15114_v45  ;;  %v2057_v13 = vmul.f32 %v1866_v22, %v15115_v12  ;;  %v10750_v27 = vpop.xlane.xlu1 %3041  ;;  %v10752_v0 = vpop.xlane.xlu0 %2337  ;;  %v15120_v45 = vld [vmem:[#allocation110_spill] sm:$0xff] }
 0x2a1   : > { %v3480_v48 = vmul.u32 256, %v10724_v37  ;;  %v2058_v35 = vmul.f32 %v1866_v22, %v15116_v7  ;;  %v3076_v42 = vadd.f32 %v2999_v43, %v2998_v31  ;;  %v2426_v17 = vsub.f32 %v15117_v55, %v10659_v2  ;;  %15118 = vst [vmem:[#allocation107_spill] sm:$0xff] %v10750_v27  ;;  %v15150_v55 = vld [vmem:[#allocation115_spill] sm:$0xff] }
 0x2a2   : > { %15119 = vst [vmem:[#allocation69_spill] sm:$0xff] %v10752_v0  ;;  %v2369_v61 = vmax.f32 %v10662_v25, %v10665_v62  ;;  %vm2966_vm11 = vcmp.eq.s32.totalorder %v9700_v54, %v15120_v45  ;;  %v10761_v7 = vadd.f32 %v9704_v49, %v2157_v21  ;;  %v10764_v22 = vadd.f32 %v9711_v24, %v2158_v10  ;;  %v15123_v21 = vld [vmem:[#allocation96_spill] sm:$0xff] }
 0x2a3   : > { %v3513_v9 = vadd.s32 %v10733_v56, %v3480_v48  ;;  %v2159_v31 = vmul.f32 %v9697_v47, %v2089_v33  ;;  %v2160_v43 = vmul.f32 %v9702_v14, %v2090_v40  ;;  %vm2967_vm9 = vcmp.eq.s32.totalorder %v9717_v3, %v15120_v45  ;;  %v10776_v33 = vpop.xlane.xlu2 %3089 }
 0x2a4   : > { %15121 = vst [vmem:[#allocation85_spill] sm:$0xff] %v10761_v7  ;;  %v2427_v27 = vsub.f32 %v15123_v21, %v10659_v2  ;;  %v2490_v50 = vmul.f32 1.442695, %v2426_v17  ;;  %v2458_v10 = vsub.f32 %v9795_v36, %v10609_v30  ;;  %v2459_v57 = vsub.f32 %v9798_v1, %v10609_v30 }
 0x2a5   : > { %2418 = vmax.xlane.f32.xlu0 %v2417_v60  ;;  %v3545_v18 = vadd.s32 %v3513_v9, %v9700_v54  ;;  %v3546_v48 = vadd.s32 %v3513_v9, %v9717_v3  ;;  %15122 = vst [vmem:[#allocation86_spill] sm:$0xff] %v10764_v22  ;;  %v2127_v9 = vmul.f32 %v9697_v47, %v2057_v13  ;;  %v3031_v47 = vsel %vm2967_vm9, %v10764_v22, 0.0 }
 0x2a6   : > { %15124 = vst [vmem:[#allocation80_spill] sm:$0xff] %v10776_v33  ;;  %v2372_v62 = vmax.f32 %v10711_v6, %v10714_v15  ;;  %v10791_v13 = vadd.f32 %v9711_v24, %v2160_v43  ;;  %v2554_v45 = vmul.f32 1.442695, %v2458_v10  ;;  %7232 = vpow2.f32 %v2490_v50 }
 0x2a7   : > { %3077 = vadd.xlane.f32.xlu1 %v3076_v42  ;;  %v3609_v60 = vshrl.u32 %v3545_v18, 16  ;;  %v3610_v12 = vshrl.u32 %v3546_v48, 16  ;;  %v2128_v42 = vmul.f32 %v9702_v14, %v2058_v35  ;;  %v3030_v14 = vsel %vm2966_vm11, %v10761_v7, 0.0 }
 0x2a8   : > { %2370 = vmax.xlane.f32.xlu2 %v2369_v61  ;;  %v10788_v35 = vadd.f32 %v9704_v49, %v2159_v31  ;;  %15126 = vst [vmem:[#allocation89_spill] sm:$0xff] %v10791_v13  ;;  %v3124_v33 = vadd.f32 %v3031_v47, %v3030_v14  ;;  %v10800_v43 = vadd.f32 %v9704_v49, %v2127_v9  ;;  %v10807_v30 = vpop.xlane.xlu0 %3092  ;;  %v15132_v49 = vld [vmem:[#allocation91_spill] sm:$0xff] }
 0x2a9   : > { %v3673_v40 = vxor.u32 %v3609_v60, %v3545_v18  ;;  %v3674_v61 = vxor.u32 %v3610_v12, %v3546_v48  ;;  %v15127_v48 = vld [vmem:[#allocation105_spill] sm:$0xff]  ;;  %v2492_v60 = vmul.f32 1.442695, %v2427_v27  ;;  %v2420_v12 = vmax.f32 %v10761_v7, %v10764_v22 }
 0x2aa   : > { %15125 = vst [vmem:[#allocation88_spill] sm:$0xff] %v10788_v35  ;;  %vm2968_vm15 = vcmp.eq.s32.totalorder %v9700_v54, %v15127_v48  ;;  %vm2969_vm6 = vcmp.eq.s32.totalorder %v9717_v3, %v15127_v48  ;;  %v2556_v27 = vmul.f32 1.442695, %v2459_v57  ;;  %vm2936_vm7 = vcmp.eq.s32.totalorder %v9700_v54, %v15132_v49 }
 0x2ab   : > { %v3737_v17 = vmul.u32 2246822507, %v3673_v40  ;;  %v3738_v18 = vmul.u32 2246822507, %v3674_v61  ;;  %15128 = vst [vmem:[#allocation92_spill] sm:$0xff] %v10800_v43  ;;  %v10803_v40 = vadd.f32 %v9711_v24, %v2128_v42  ;;  %v3032_v10 = vsel %vm2968_vm15, %v10788_v35, 0.0 }
 0x2ac   : > { %15131 = vst [vmem:[#allocation105_spill] sm:$0xff] %v10807_v30  ;;  %v3033_v50 = vsel %vm2969_vm6, %v10791_v13, 0.0  ;;  %7234 = vpow2.f32 %v2492_v60  ;;  %v2428_v24 = vsub.f32 %v9837_v46, %v10671_v29  ;;  %vm2937_vm4 = vcmp.eq.s32.totalorder %v9717_v3, %v15132_v49  ;;  %v15133_v60 = vld [vmem:[#allocation98_spill] sm:$0xff]  ;;  %v15135_v49 = vld [vmem:[#allocation100_spill] sm:$0xff] }
 0x2ad   : > { %2373 = vmax.xlane.f32.xlu0 %v2372_v62  ;;  %v3801_v31 = vshrl.u32 %v3737_v17, 13  ;;  %15129 = vst [vmem:[#allocation93_spill] sm:$0xff] %v10803_v40  ;;  %v3802_v61 = vshrl.u32 %v3738_v18, 13  ;;  %v10805_v62 = vpop.xlane.xlu1 %2385  ;;  %7236 = vpow2.f32 %v2554_v45  ;;  %v2429_v9 = vsub.f32 %v9840_v34, %v10671_v29 }
 0x2ae   : > { %15130 = vst [vmem:[#allocation110_spill] sm:$0xff] %v10805_v62  ;;  %v3000_v47 = vsel %vm2936_vm7, %v10800_v43, 0.0  ;;  %7238 = vpow2.f32 %v2556_v27  ;;  %v2494_v45 = vmul.f32 1.442695, %v2428_v24  ;;  %v2461_v30 = vsub.f32 %v15135_v49, %v10702_v26 }
 0x2af   : > { %2421 = vmax.xlane.f32.xlu1 %v2420_v12  ;;  %v3865_v14 = vxor.u32 %v3801_v31, %v3737_v17  ;;  %v3866_v57 = vxor.u32 %v3802_v61, %v3738_v18  ;;  %v3001_v17 = vsel %vm2937_vm4, %v10803_v40, 0.0  ;;  %v2460_v12 = vsub.f32 %v15133_v60, %v10702_v26  ;;  %v10826_v31 = vpop.xlane.xlu2 %3044  ;;  %v10828_v61 = vpop.eup %7232 }
 0x2b0   : > { %3125 = vadd.xlane.f32.xlu2 %v3124_v33  ;;  %v3127_v33 = vadd.f32 %v3033_v50, %v3032_v10  ;;  %15134 = vst [vmem:[#allocation91_spill] sm:$0xff] %v10826_v31  ;;  %v2375_v10 = vmax.f32 %v10800_v43, %v10803_v40  ;;  %v2430_v31 = vsub.f32 %v9859_v53, %v10752_v0  ;;  %7240 = vpow2.f32 %v2494_v45 }
 0x2b1   : > { %v3929_v42 = vmul.u32 3266489909, %v3865_v14  ;;  %v3930_v48 = vmul.u32 3266489909, %v3866_v57  ;;  %v2496_v14 = vmul.f32 1.442695, %v2429_v9  ;;  %v3079_v57 = vadd.f32 %v3001_v17, %v3000_v47 }
 0x2b2   : > { %v10834_v29 = vpop.eup %7234  ;;  %v2558_v24 = vmul.f32 1.442695, %v2460_v12  ;;  %v2560_v7 = vmul.f32 1.442695, %v2461_v30  ;;  %v2431_v17 = vsub.f32 %v9862_v32, %v10752_v0  ;;  %v10850_v12 = vpop.xlane.xlu0 %3047  ;;  %v2462_v45 = vsub.f32 %v9904_v11, %v10805_v62 }
 0x2b3   : > { %v3993_v18 = vshrl.u32 %v3929_v42, 16  ;;  %v3994_v50 = vshrl.u32 %v3930_v48, 16  ;;  %v10838_v22 = vpop.eup %7236  ;;  %7242 = vpow2.f32 %v2496_v14  ;;  %15137 = vst [vmem:[#allocation119_spill] sm:$0xff] %v10850_v12  ;;  %v2463_v14 = vsub.f32 %v9909_v16, %v10805_v62 }
 0x2b4   : > { %v10842_v47 = vpop.eup %7238  ;;  %7244 = vpow2.f32 %v2558_v24 }
 0x2b5   : > { %3128 = vadd.xlane.f32.xlu0 %v3127_v33  ;;  %v4057_v27 = vxor.u32 %v3993_v18, %v3929_v42  ;;  %v4058_v2 = vxor.u32 %v3994_v50, %v3930_v48  ;;  %v10848_v48 = vpop.xlane.xlu1 %2340  ;;  %7246 = vpow2.f32 %v2560_v7  ;;  %v2500_v42 = vmul.f32 1.442695, %v2431_v17 }
 0x2b6   : > { %15136 = vst [vmem:[#allocation118_spill] sm:$0xff] %v10848_v48  ;;  %v3464_v50 = vadd.s32 128, %v10724_v37  ;;  %v10869_v62 = vpop.eup %7240  ;;  %v2564_v17 = vmul.f32 1.442695, %v2463_v14  ;;  %v3449_v7 = vadd.s32 8, %v10724_v37  ;;  %v15141_v14 = vld [vmem:[#allocation83_spill] sm:$0xff] }
 0x2b7   : > { %2376 = vmax.xlane.f32.xlu1 %v2375_v10  ;;  %v4121_v26 = vand.u32 8388607, %v4057_v27  ;;  %v4122_v9 = vand.u32 8388607, %v4058_v2  ;;  %v2498_v10 = vmul.f32 1.442695, %v2430_v31  ;;  %v2618_v2 = vadd.f32 %v10834_v29, %v10828_v61  ;;  %v10864_v33 = vpop.xlane.xlu2 %2388 }
 0x2b8   : > { %3080 = vadd.xlane.f32.xlu2 %v3079_v57  ;;  %v2666_v31 = vadd.f32 %v10842_v47, %v10838_v22  ;;  %15138 = vst [vmem:[#allocation120_spill] sm:$0xff] %v10864_v33 }
 0x2b9   : > { %v4185_v18 = vcvt.s32.f32 %v4121_v26  ;;  %v4186_v30 = vcvt.s32.f32 %v4122_v9  ;;  %v2432_v26 = vsub.f32 %v9965_v38, %v10848_v48  ;;  %v2423_v9 = vmax.f32 %v10788_v35, %v10791_v13  ;;  %v10873_v12 = vpop.eup %7242  ;;  %v15140_v35 = vld [vmem:[#allocation99_spill] sm:$0xff] }
 0x2ba   : > { %7248 = vpow2.f32 %v2498_v10  ;;  %v2464_v60 = vsub.f32 %v15140_v35, %v10864_v33  ;;  %v10880_v10 = vpop.eup %7244 }
 0x2bb   : > { %v4249_v57 = vmul.f32 1.1920929e-07, %v4185_v18  ;;  %v4250_v27 = vmul.f32 1.1920929e-07, %v4186_v30  ;;  %v2562_v18 = vmul.f32 1.442695, %v2462_v45  ;;  %v15139_v30 = vld [vmem:[#allocation60_spill] sm:$0xff] }
 0x2bc   : > { %v2433_v0 = vsub.f32 %v15139_v30, %v10848_v48  ;;  %v2502_v13 = vmul.f32 1.442695, %v2432_v26  ;;  %v10893_v48 = vpop.xlane.xlu0 %2391 }
 0x2bd   : > { %2619 = vadd.xlane.f32.xlu0 %v2618_v2  ;;  %v4313_v24 = vadd.f32 1.1920929e-07, %v4249_v57  ;;  %v4314_v2 = vadd.f32 1.1920929e-07, %v4250_v27  ;;  %v3496_v57 = vmul.u32 256, %v3464_v50  ;;  %15142 = vst [vmem:[#allocation121_spill] sm:$0xff] %v10893_v48  ;;  %v2621_v50 = vadd.f32 %v10873_v12, %v10869_v62 }
 0x2bf   : > { %2667 = vadd.xlane.f32.xlu1 %v2666_v31  ;;  %7250 = vlog2.f32 %v4313_v24  ;;  %v2465_v31 = vsub.f32 %v15141_v14, %v10864_v33  ;;  %v3529_v27 = vadd.s32 %v10733_v56, %v3496_v57  ;;  %v3481_v24 = vmul.u32 256, %v3449_v7  ;;  %v15143_v14 = vld [vmem:[#allocation53_spill] sm:$0xff]  ;;  %v10912_v53 = vpop.xlane.xlu2 %2343 }
 0x2c0   : > { %2424 = vmax.xlane.f32.xlu2 %v2423_v9  ;;  %7252 = vlog2.f32 %v4314_v2  ;;  %v10887_v9 = vpop.eup %7246  ;;  %v2504_v2 = vmul.f32 1.442695, %v2433_v0  ;;  %v2566_v57 = vmul.f32 1.442695, %v2464_v60  ;;  %15145 = vst [vmem:[#allocation123_spill] sm:$0xff] %v10912_v53 }
 0x2c1   : > { %7254 = vpow2.f32 %v2500_v42  ;;  %v3577_v42 = vadd.s32 %v3529_v27, %v9700_v54  ;;  %v3578_v45 = vadd.s32 %v3529_v27, %v9717_v3  ;;  %v10897_v33 = vpop.eup %7248  ;;  %v3514_v11 = vadd.s32 %v10733_v56, %v3481_v24 }
 0x2c2   : > { %7256 = vpow2.f32 %v2562_v18  ;;  %v2568_v18 = vmul.f32 1.442695, %v2465_v31  ;;  %v2669_v0 = vadd.f32 %v10887_v9, %v10880_v10  ;;  %v2466_v27 = vsub.f32 %v15143_v14, %v10893_v48 }
 0x2c3   : > { %7258 = vpow2.f32 %v2564_v17  ;;  %v3641_v7 = vshrl.u32 %v3577_v42, 16  ;;  %v3642_v17 = vshrl.u32 %v3578_v45, 16  ;;  %v3548_v60 = vadd.s32 %v3514_v11, %v9717_v3 }
 0x2c4   : > { %7260 = vpow2.f32 %v2502_v13  ;;  %v3547_v13 = vadd.s32 %v3514_v11, %v9700_v54 }
 0x2c5   : > { %v7251_v26 = vpop.eup %7250  ;;  %7262 = vpow2.f32 %v2504_v2  ;;  %v3705_v31 = vxor.u32 %v3641_v7, %v3577_v42  ;;  %v3706_v36 = vxor.u32 %v3642_v17, %v3578_v45  ;;  %v15147_v45 = vld [vmem:[#allocation94_spill] sm:$0xff] }
 0x2c6   : > { %v7253_v35 = vpop.eup %7252  ;;  %v4378_v16 = vmul.f32 0.6931472, %v7251_v26  ;;  %7264 = vpow2.f32 %v2566_v57  ;;  %v3611_v26 = vshrl.u32 %v3547_v13, 16  ;;  %v15148_v57 = vld [vmem:[#allocation65_spill] sm:$0xff] }
 0x2c7   : > { %2622 = vadd.xlane.f32.xlu1 %v2621_v50  ;;  %v10908_v49 = vpop.eup %7254  ;;  %v4380_v24 = vmul.f32 0.6931472, %v7253_v35  ;;  %v3612_v50 = vshrl.u32 %v3548_v60, 16  ;;  %7266 = vpow2.f32 %v2568_v18  ;;  %v3769_v34 = vmul.u32 2246822507, %v3705_v31 }
 0x2c8   : > { %2670 = vadd.xlane.f32.xlu2 %v2669_v0  ;;  %v10910_v1 = vpop.eup %7256  ;;  %v10914_v32 = vmin.f32 %v4378_v16, -1e-12  ;;  %v3770_v2 = vmul.u32 2246822507, %v3706_v36  ;;  %v10924_v0 = vmul.f32 1.442695, %v2466_v27  ;;  %v3675_v31 = vxor.u32 %v3611_v26, %v3547_v13 }
 0x2c9   : > { %15144 = vst [vmem:[#allocation122_spill] sm:$0xff] %v10910_v1  ;;  %v10916_v46 = vpop.eup %7258  ;;  %v10918_v11 = vmin.f32 %v4380_v24, -1e-12  ;;  %v3465_v16 = vadd.s32 136, %v10724_v37  ;;  %v3676_v27 = vxor.u32 %v3612_v50, %v3548_v60  ;;  %v3833_v7 = vshrl.u32 %v3769_v34, 13 }
 0x2ca   : > { %15146 = vst [vmem:[#allocation124_spill] sm:$0xff] %v10916_v46  ;;  %v10920_v35 = vpop.eup %7260  ;;  %7268 = vrcp.f32 %v10914_v32  ;;  %v4578_v18 = vand.u32 2147483647, %v10914_v32  ;;  %v4580_v17 = vand.u32 2147483648, %v10914_v32  ;;  %vm4574_vm10 = vweird.f32 %v10914_v32  ;;  %v10958_v46 = vpop.xlane.xlu1 %3095 }
 0x2cb   : > { %7270 = vrcp.f32 %v10918_v11  ;;  %v4593_v36 = vand.u32 2147483647, %v10918_v11  ;;  %v4595_v24 = vand.u32 2147483648, %v10918_v11  ;;  %v10935_v42 = vpop.eup %7262  ;;  %v3834_v40 = vshrl.u32 %v3770_v2, 13  ;;  %15157 = vst [vmem:[#allocation128_spill] sm:$0xff] %v10958_v46 }
 0x2cc   : > { %15149 = vst [vmem:[#allocation125_spill] sm:$0xff] %v10935_v42  ;;  %v10940_v43 = vpop.eup %7264  ;;  %vm4589_vm13 = vweird.f32 %v10918_v11  ;;  %v3739_v15 = vmul.u32 2246822507, %v3675_v31  ;;  %v3740_v6 = vmul.u32 2246822507, %v3676_v27  ;;  %v3497_v25 = vmul.u32 256, %v3465_v16 }
 0x2cd   : > { %15151 = vst [vmem:[#allocation126_spill] sm:$0xff] %v10940_v43  ;;  %v10943_v20 = vpop.eup %7266  ;;  %vm10945_vm12 = vcmp.eq.f32.partialorder %v4578_v18, 8.507059e+37  ;;  %v4581_v60 = vor.u32 1.1754944e-38, %v4580_v17  ;;  %v3897_v26 = vxor.u32 %v3833_v7, %v3769_v34  ;;  %v3898_v50 = vxor.u32 %v3834_v40, %v3770_v2 }
 0x2ce   : > { %15152 = vst [vmem:[#allocation127_spill] sm:$0xff] %v10943_v20  ;;  %vm10949_vm14 = vcmp.eq.f32.partialorder %v4593_v36, 8.507059e+37  ;;  %v4596_v44 = vor.u32 1.1754944e-38, %v4595_v24  ;;  %v3803_v52 = vshrl.u32 %v3739_v15, 13  ;;  %v3804_v5 = vshrl.u32 %v3740_v6, 13 }
 0x2cf   : > { %v3530_v31 = vadd.s32 %v10733_v56, %v3497_v25  ;;  %v3961_v18 = vmul.u32 3266489909, %v3897_v26  ;;  %v3962_v39 = vmul.u32 3266489909, %v3898_v50 }
 0x2d0   : > { %v7269_v21 = vpop.eup %7268  ;;  %v3867_v34 = vxor.u32 %v3803_v52, %v3739_v15  ;;  %v3868_v40 = vxor.u32 %v3804_v5, %v3740_v6 }
 0x2d1   : > { %v7271_v16 = vpop.eup %7270  ;;  %v4570_v27 = vmul.f32 %v7269_v21, %v10914_v32  ;;  %vm4575_vm5 = vweird.f32 %v7269_v21  ;;  %v4025_v7 = vshrl.u32 %v3961_v18, 16  ;;  %v4026_v36 = vshrl.u32 %v3962_v39, 16 }
 0x2d2   : > { %v4585_v17 = vmul.f32 %v7271_v16, %v10918_v11  ;;  %vm4590_vm11 = vweird.f32 %v7271_v16  ;;  %v3579_v24 = vadd.s32 %v3530_v31, %v9700_v54  ;;  %v3931_v28 = vmul.u32 3266489909, %v3867_v34  ;;  %vm10963_vm9 = vmor %vm4574_vm10, %vm4575_vm5 }
 0x2d3   : > { %v4571_v2 = vsub.f32 1.0, %v4570_v27  ;;  %v3932_v23 = vmul.u32 3266489909, %v3868_v40  ;;  %v3580_v25 = vadd.s32 %v3530_v31, %v9717_v3  ;;  %v4089_v26 = vxor.u32 %v4025_v7, %v3961_v18  ;;  %vm10970_vm15 = vmor %vm4589_vm13, %vm4590_vm11 }
 0x2d4   : > { %v4586_v8 = vsub.f32 1.0, %v4585_v17  ;;  %v4090_v50 = vxor.u32 %v4026_v36, %v3962_v39  ;;  %v3643_v43 = vshrl.u32 %v3579_v24, 16  ;;  %v3995_v6 = vshrl.u32 %v3931_v28, 16 }
 0x2d5   : > { %v4572_v20 = vmul.f32 %v7269_v21, %v4571_v2  ;;  %v3996_v15 = vshrl.u32 %v3932_v23, 16  ;;  %v3644_v27 = vshrl.u32 %v3580_v25, 16  ;;  %v4153_v39 = vand.u32 8388607, %v4089_v26 }
 0x2d6   : > { %v4587_v52 = vmul.f32 %v7271_v16, %v4586_v8  ;;  %v4154_v18 = vand.u32 8388607, %v4090_v50  ;;  %v3707_v34 = vxor.u32 %v3643_v43, %v3579_v24  ;;  %v4059_v40 = vxor.u32 %v3995_v6, %v3931_v28 }
 0x2d7   : > { %v4573_v17 = vadd.f32 %v7269_v21, %v4572_v20  ;;  %v4060_v2 = vxor.u32 %v3996_v15, %v3932_v23  ;;  %v3708_v7 = vxor.u32 %v3644_v27, %v3580_v25  ;;  %v4217_v36 = vcvt.s32.f32 %v4153_v39  ;;  %v15166_v15 = vld [vmem:[#allocation116_spill] sm:$0xff] }
 0x2d8   : > { %v4588_v32 = vadd.f32 %v7271_v16, %v4587_v52  ;;  %v4218_v46 = vcvt.s32.f32 %v4154_v18  ;;  %v3771_v20 = vmul.u32 2246822507, %v3707_v34  ;;  %v4123_v42 = vand.u32 8388607, %v4059_v40 }
 0x2d9   : > { %v4577_v8 = vsel %vm10963_vm9, %v7269_v21, %v4573_v17  ;;  %v4124_v26 = vand.u32 8388607, %v4060_v2  ;;  %v4281_v28 = vmul.f32 1.1920929e-07, %v4217_v36  ;;  %v10985_v21 = vpop.xlane.xlu0 %2346  ;;  %v3772_v50 = vmul.u32 2246822507, %v3708_v7 }
 0x2da   : > { %v4582_v11 = vsel %vm10945_vm12, %v4581_v60, %v4577_v8  ;;  %v4592_v1 = vsel %vm10970_vm15, %v7271_v16, %v4588_v32  ;;  %v4282_v24 = vmul.f32 1.1920929e-07, %v4218_v46  ;;  %15163 = vst [vmem:[#allocation130_spill] sm:$0xff] %v10985_v21  ;;  %v4187_v13 = vcvt.s32.f32 %v4123_v42  ;;  %v10993_v46 = vpop.xlane.xlu1 %3050 }
 0x2db   : > { %v10981_v43 = vmul.f32 %v10828_v61, %v4582_v11  ;;  %v4597_v23 = vsel %vm10949_vm14, %v4596_v44, %v4592_v1  ;;  %v4188_v60 = vcvt.s32.f32 %v4124_v26  ;;  %v4345_v5 = vadd.f32 1.1920929e-07, %v4281_v28  ;;  %15165 = vst [vmem:[#allocation132_spill] sm:$0xff] %v10993_v46 }
 0x2dc   : > { %v10988_v25 = vmul.f32 %v10834_v29, %v4597_v23  ;;  %v4346_v16 = vadd.f32 1.1920929e-07, %v4282_v24  ;;  %v3835_v52 = vshrl.u32 %v3771_v20, 13  ;;  %v3451_v6 = vadd.s32 24, %v10724_v37 }
 0x2dd   : > { %15162 = vst [vmem:[#allocation129_spill] sm:$0xff] %v10981_v43  ;;  %v4251_v51 = vmul.f32 1.1920929e-07, %v4187_v13  ;;  %v4252_v1 = vmul.f32 1.1920929e-07, %v4188_v60  ;;  %v3836_v44 = vshrl.u32 %v3772_v50, 13  ;;  %v2436_v29 = vsub.f32 %v15166_v15, %v10985_v21 }
 0x2de   : > { %15164 = vst [vmem:[#allocation131_spill] sm:$0xff] %v10988_v25  ;;  %v5529_v61 = vmin.f32 %v10981_v43, %v10988_v25  ;;  %7272 = vlog2.f32 %v4345_v5  ;;  %v3899_v42 = vxor.u32 %v3835_v52, %v3771_v20  ;;  %v3483_v27 = vmul.u32 256, %v3451_v6 }
 0x2df   : > { %v4315_v17 = vadd.f32 1.1920929e-07, %v4251_v51  ;;  %v4316_v31 = vadd.f32 1.1920929e-07, %v4252_v1  ;;  %7274 = vlog2.f32 %v4346_v16  ;;  %v3900_v39 = vxor.u32 %v3836_v44, %v3772_v50  ;;  %v15170_v44 = vld [vmem:[#allocation117_spill] sm:$0xff] }
 0x2e0   : > { %5530 = vmin.xlane.f32.xlu0 %v5529_v61  ;;  %v15167_v18 = vsub.f32 %v15147_v45, %v10893_v48  ;;  %v3963_v32 = vmul.u32 3266489909, %v3899_v42  ;;  %v3516_v40 = vadd.s32 %v10733_v56, %v3483_v27  ;;  %v3466_v2 = vadd.s32 144, %v10724_v37 }
 0x2e1   : > { %v15168_v7 = vsub.f32 %v15148_v57, %v10912_v53  ;;  %v15169_v36 = vsub.f32 %v15150_v55, %v10912_v53  ;;  %7276 = vlog2.f32 %v4315_v17  ;;  %v3964_v11 = vmul.u32 3266489909, %v3900_v39 }
 0x2e2   : > { %v2572_v34 = vmul.f32 1.442695, %v15167_v18  ;;  %7278 = vlog2.f32 %v4316_v31  ;;  %v2624_v26 = vadd.f32 %v10908_v49, %v10897_v33  ;;  %v4027_v23 = vshrl.u32 %v3963_v32, 16 }
 0x2e3   : > { %v2506_v8 = vmul.f32 1.442695, %v15168_v7  ;;  %v2508_v20 = vmul.f32 1.442695, %v15169_v36  ;;  %v3551_v28 = vadd.s32 %v3516_v40, %v9700_v54  ;;  %7280 = vpow2.f32 %v10924_v0  ;;  %v15172_v36 = vld [vmem:[#allocation47_spill] sm:$0xff] }
 0x2e4   : > { %v2510_v24 = vmul.f32 1.442695, %v2436_v29  ;;  %v4028_v13 = vshrl.u32 %v3964_v11, 16  ;;  %v3552_v60 = vadd.s32 %v3516_v40, %v9717_v3  ;;  %v7273_v50 = vpop.eup %7272  ;;  %7282 = vpow2.f32 %v2572_v34  ;;  %2625 = vadd.xlane.f32.xlu2 %v2624_v26  ;;  %v11023_v34 = vpop.xlane.xlu1 %2394 }
 0x2e5   : > { %v4091_v16 = vxor.u32 %v4027_v23, %v3963_v32  ;;  %v3498_v52 = vmul.u32 256, %v3466_v2  ;;  %v7275_v6 = vpop.eup %7274  ;;  %7284 = vpow2.f32 %v2506_v8  ;;  %v4442_v51 = vmul.f32 0.6931472, %v7273_v50  ;;  %15171 = vst [vmem:[#allocation117_spill] sm:$0xff] %v11023_v34 }
 0x2e6   : > { %v3615_v1 = vshrl.u32 %v3551_v28, 16  ;;  %7286 = vpow2.f32 %v2508_v20  ;;  %v4444_v42 = vmul.f32 0.6931472, %v7275_v6  ;;  %v4092_v31 = vxor.u32 %v4028_v13, %v3964_v11  ;;  %v15173_v20 = vld [vmem:[#allocation51_spill] sm:$0xff] }
 0x2e7   : > { %v7277_v27 = vpop.eup %7276  ;;  %7288 = vpow2.f32 %v2510_v24  ;;  %v11021_v17 = vmin.f32 %v4442_v51, -1e-12  ;;  %v3616_v39 = vshrl.u32 %v3552_v60, 16  ;;  %v4155_v2 = vand.u32 8388607, %v4091_v16 }
 0x2e8   : > { %v7279_v18 = vpop.eup %7278  ;;  %v4382_v32 = vmul.f32 0.6931472, %v7277_v27  ;;  %v11025_v40 = vmin.f32 %v4444_v42, -1e-12  ;;  %v11028_v7 = vadd.s32 %v10733_v56, %v3498_v52  ;;  %v11035_v11 = vxor.u32 %v3615_v1, %v3551_v28 }
 0x2e9   : > { %v11030_v8 = vpop.eup %7280  ;;  %v4384_v23 = vmul.f32 0.6931472, %v7279_v18  ;;  %7290 = vrcp.f32 %v11021_v17  ;;  %v5058_v16 = vand.u32 2147483647, %v11021_v17  ;;  %v4156_v28 = vand.u32 8388607, %v4092_v31 }
 0x2ea   : > { %v11037_v24 = vpop.eup %7282  ;;  %v11041_v50 = vmin.f32 %v4382_v32, -1e-12  ;;  %7292 = vrcp.f32 %v11025_v40  ;;  %v11052_v1 = vadd.s32 16, %v10724_v37  ;;  %v4219_v27 = vcvt.s32.f32 %v4155_v2 }
 0x2eb   : > { %v11045_v52 = vpop.eup %7284  ;;  %v11049_v51 = vmin.f32 %v4384_v23, -1e-12  ;;  %v11057_v18 = vxor.u32 %v3616_v39, %v3552_v60  ;;  %v11061_v32 = vadd.s32 %v11028_v7, %v9700_v54  ;;  %vm5054_vm6 = vweird.f32 %v11021_v17 }
 0x2ec   : > { %v11054_v42 = vpop.eup %7286  ;;  %7294 = vrcp.f32 %v11041_v50  ;;  %v4608_v23 = vand.u32 2147483647, %v11041_v50  ;;  %vm11069_vm7 = vcmp.eq.f32.partialorder %v5058_v16, 8.507059e+37  ;;  %v5060_v60 = vand.u32 2147483648, %v11021_v17 }
 0x2ed   : > { %v11063_v26 = vpop.eup %7288  ;;  %7296 = vrcp.f32 %v11049_v51  ;;  %vm5069_vm4 = vweird.f32 %v11025_v40  ;;  %v5073_v39 = vand.u32 2147483647, %v11025_v40  ;;  %vm4604_vm10 = vweird.f32 %v11041_v50 }
 0x2ee   : > { %15174 = vst [vmem:[#allocation133_spill] sm:$0xff] %v11063_v26  ;;  %v4610_v29 = vand.u32 2147483648, %v11041_v50  ;;  %v5075_v61 = vand.u32 2147483648, %v11025_v40  ;;  %v4220_v5 = vcvt.s32.f32 %v4156_v28  ;;  %vm4619_vm13 = vweird.f32 %v11049_v51 }
 0x2ef   : > { %v7291_v2 = vpop.eup %7290  ;;  %v4623_v16 = vand.u32 2147483647, %v11049_v51  ;;  %v4283_v31 = vmul.f32 1.1920929e-07, %v4219_v27  ;;  %vm11082_vm12 = vcmp.eq.f32.partialorder %v4608_v23, 8.507059e+37  ;;  %v4625_v25 = vand.u32 2147483648, %v11049_v51 }
 0x2f0   : > { %v7293_v6 = vpop.eup %7292  ;;  %v5050_v13 = vmul.f32 %v7291_v2, %v11021_v17  ;;  %v4284_v46 = vmul.f32 1.1920929e-07, %v4220_v5  ;;  %vm5055_vm14 = vweird.f32 %v7291_v2  ;;  %v5061_v28 = vor.u32 1.1754944e-38, %v5060_v60 }
 0x2f1   : > { %v5065_v43 = vmul.f32 %v7293_v6, %v11025_v40  ;;  %v4347_v45 = vadd.f32 1.1920929e-07, %v4283_v31  ;;  %vm5070_vm5 = vweird.f32 %v7293_v6  ;;  %v5076_v30 = vor.u32 1.1754944e-38, %v5075_v61  ;;  %vm11092_vm9 = vmor %vm5054_vm6, %vm5055_vm14 }
 0x2f2   : > { %v7295_v53 = vpop.eup %7294  ;;  %v5051_v14 = vsub.f32 1.0, %v5050_v13  ;;  %v4348_v27 = vadd.f32 1.1920929e-07, %v4284_v46  ;;  %vm11098_vm8 = vmor %vm5069_vm4, %vm5070_vm5  ;;  %vm5074_vm6 = vcmp.eq.f32.partialorder %v5073_v39, 8.507059e+37  ;;  %vm11109_vm1 = vcmp.eq.f32.partialorder %v4623_v16, 8.507059e+37 }
 0x2f3   : > { %v7297_v15 = vpop.eup %7296  ;;  %v4600_v57 = vmul.f32 %v7295_v53, %v11041_v50  ;;  %v5066_v55 = vsub.f32 1.0, %v5065_v43  ;;  %7298 = vlog2.f32 %v4347_v45  ;;  %vm4605_vm11 = vweird.f32 %v7295_v53 }
 0x2f4   : > { %v4615_v23 = vmul.f32 %v7297_v15, %v11049_v51  ;;  %v5052_v38 = vmul.f32 %v7291_v2, %v5051_v14  ;;  %7300 = vlog2.f32 %v4348_v27  ;;  %vm4620_vm15 = vweird.f32 %v7297_v15  ;;  %vm11105_vm14 = vmor %vm4604_vm10, %vm4605_vm11 }
 0x2f5   : > { %v4601_v26 = vsub.f32 1.0, %v4600_v57  ;;  %v5067_v13 = vmul.f32 %v7293_v6, %v5066_v55  ;;  %v3744_v14 = vmul.u32 2246822507, %v11057_v18  ;;  %v4611_v57 = vor.u32 1.1754944e-38, %v4610_v29  ;;  %vm11117_vm4 = vmor %vm4619_vm13, %vm4620_vm15 }
 0x2f6   : > { %v4616_v31 = vsub.f32 1.0, %v4615_v23  ;;  %v5053_v43 = vadd.f32 %v7291_v2, %v5052_v38  ;;  %v4626_v40 = vor.u32 1.1754944e-38, %v4625_v25  ;;  %v15189_v39 = vmul.u32 2246822507, %v11035_v11 }
 0x2f7   : > { %v4602_v45 = vmul.f32 %v7295_v53, %v4601_v26  ;;  %v5068_v61 = vadd.f32 %v7293_v6, %v5067_v13  ;;  %v3808_v51 = vshrl.u32 %v3744_v14, 13  ;;  %v15195_v38 = vsub.f32 %v15170_v44, %v10985_v21 }
 0x2f8   : > { %v4617_v17 = vmul.f32 %v7297_v15, %v4616_v31  ;;  %v5057_v60 = vsel %vm11092_vm9, %v7291_v2, %v5053_v43  ;;  %v3807_v16 = vshrl.u32 %v15189_v39, 13 }
 0x2f9   : > { %v4603_v18 = vadd.f32 %v7295_v53, %v4602_v45  ;;  %v5062_v26 = vsel %vm11069_vm7, %v5061_v28, %v5057_v60  ;;  %v5072_v50 = vsel %vm11098_vm8, %v7293_v6, %v5068_v61  ;;  %v7299_v25 = vpop.eup %7298  ;;  %v3582_v6 = vadd.s32 %v11028_v7, %v9717_v3 }
 0x2fa   : > { %v4618_v27 = vadd.f32 %v7297_v15, %v4617_v17  ;;  %v11128_v2 = vmul.f32 %v10838_v22, %v5062_v26  ;;  %v5077_v23 = vsel %vm5074_vm6, %v5076_v30, %v5072_v50  ;;  %v7301_v5 = vpop.eup %7300  ;;  %v4446_v28 = vmul.f32 0.6931472, %v7299_v25 }
 0x2fb   : > { %v4607_v13 = vsel %vm11105_vm14, %v7295_v53, %v4603_v18  ;;  %v11133_v0 = vmul.f32 %v10842_v47, %v5077_v23  ;;  %v4448_v43 = vmul.f32 0.6931472, %v7301_v5  ;;  %v3645_v30 = vshrl.u32 %v11061_v32, 16 }
 0x2fc   : > { %15190 = vst [vmem:[#allocation134_spill] sm:$0xff] %v11128_v2  ;;  %v4612_v31 = vsel %vm11082_vm12, %v4611_v57, %v4607_v13  ;;  %v4622_v22 = vsel %vm11117_vm4, %v7297_v15, %v4618_v27  ;;  %v4539_v45 = vmin.f32 %v4446_v28, -1e-12  ;;  %v15194_v15 = vmov %v15189_v39 }
 0x2fd   : > { %15191 = vst [vmem:[#allocation135_spill] sm:$0xff] %v11133_v0  ;;  %v11143_v46 = vmul.f32 %v10869_v62, %v4612_v31  ;;  %v4627_v53 = vsel %vm11109_vm1, %v4626_v40, %v4622_v22  ;;  %v5577_v47 = vmin.f32 %v11128_v2, %v11133_v0  ;;  %v11152_v48 = vmin.f32 %v4448_v43, -1e-12 }
 0x2fe   : > { %v11150_v7 = vmul.f32 %v10873_v12, %v4627_v53  ;;  %v3871_v57 = vxor.u32 %v3807_v16, %v15194_v15  ;;  %v3872_v61 = vxor.u32 %v3808_v51, %v3744_v14  ;;  %7302 = vrcp.f32 %v4539_v45 }
 0x2ff   : > { %15192 = vst [vmem:[#allocation136_spill] sm:$0xff] %v11143_v46  ;;  %5578 = vmin.xlane.f32.xlu1 %v5577_v47  ;;  %v5090_v62 = vand.u32 2147483648, %v4539_v45  ;;  %v3646_v55 = vshrl.u32 %v3582_v6, 16  ;;  %v3482_v17 = vmul.u32 256, %v11052_v1  ;;  %v11160_v40 = vmul.f32 1.442695, %v15195_v38 }
 0x300   : > { %15193 = vst [vmem:[#allocation137_spill] sm:$0xff] %v11150_v7  ;;  %v5532_v12 = vmin.f32 %v11143_v46, %v11150_v7  ;;  %v5088_v60 = vand.u32 2147483647, %v4539_v45  ;;  %7304 = vrcp.f32 %v11152_v48  ;;  %v15196_v14 = vsub.f32 %v15172_v36, %v11023_v34 }
 0x301   : > { %v5103_v1 = vand.u32 2147483647, %v11152_v48  ;;  %v5105_v29 = vand.u32 2147483648, %v11152_v48  ;;  %vm5084_vm1 = vweird.f32 %v4539_v45  ;;  %v3935_v26 = vmul.u32 3266489909, %v3871_v57 }
 0x302   : > { %v11170_v18 = vmul.f32 1.442695, %v15196_v14  ;;  %5533 = vmin.xlane.f32.xlu0 %v5532_v12  ;;  %v3936_v50 = vmul.u32 3266489909, %v3872_v61  ;;  %v3709_v39 = vxor.u32 %v3645_v30, %v11061_v32  ;;  %v5091_v16 = vor.u32 1.1754944e-38, %v5090_v62  ;;  %v11190_v61 = vpop.xlane.xlu2 %3098 }
 0x303   : > { %vm5099_vm8 = vweird.f32 %v11152_v48  ;;  %v3710_v25 = vxor.u32 %v3646_v55, %v3582_v6  ;;  %v3515_v27 = vadd.s32 %v10733_v56, %v3482_v17  ;;  %vm11177_vm7 = vcmp.eq.f32.partialorder %v5088_v60, 8.507059e+37  ;;  %15201 = vst [vmem:[#allocation138_spill] sm:$0xff] %v11190_v61 }
 0x304   : > { %v5106_v51 = vor.u32 1.1754944e-38, %v5105_v29  ;;  %v3999_v5 = vshrl.u32 %v3935_v26, 16  ;;  %v4000_v13 = vshrl.u32 %v3936_v50, 16  ;;  %v3773_v28 = vmul.u32 2246822507, %v3709_v39  ;;  %v7303_v31 = vpop.eup %7302 }
 0x305   : > { %vm11181_vm10 = vcmp.eq.f32.partialorder %v5103_v1, 8.507059e+37  ;;  %v3774_v32 = vmul.u32 2246822507, %v3710_v25  ;;  %v3549_v43 = vadd.s32 %v3515_v27, %v9700_v54  ;;  %v3550_v6 = vadd.s32 %v3515_v27, %v9717_v3 }
 0x306   : > { %v11188_v30 = vadd.s32 152, %v10724_v37  ;;  %v7305_v53 = vpop.eup %7304  ;;  %v5080_v47 = vmul.f32 %v7303_v31, %v4539_v45  ;;  %vm5085_vm13 = vweird.f32 %v7303_v31  ;;  %v4063_v15 = vxor.u32 %v3999_v5, %v3935_v26 }
 0x307   : > { %v4064_v57 = vxor.u32 %v4000_v13, %v3936_v50  ;;  %v5095_v62 = vmul.f32 %v7305_v53, %v11152_v48  ;;  %vm5100_vm12 = vweird.f32 %v7305_v53  ;;  %v3837_v55 = vshrl.u32 %v3773_v28, 13  ;;  %vm11195_vm5 = vmor %vm5084_vm1, %vm5085_vm13  ;;  %v11228_v50 = vpop.xlane.xlu1 %2349 }
 0x308   : > { %v3838_v17 = vshrl.u32 %v3774_v32, 13  ;;  %v5081_v38 = vsub.f32 1.0, %v5080_v47  ;;  %v4127_v12 = vand.u32 8388607, %v4063_v15  ;;  %v3613_v14 = vshrl.u32 %v3549_v43, 16  ;;  %vm11202_vm11 = vmor %vm5099_vm8, %vm5100_vm12  ;;  %15211 = vst [vmem:[#allocation143_spill] sm:$0xff] %v11228_v50 }
 0x309   : > { %v4128_v60 = vand.u32 8388607, %v4064_v57  ;;  %v5096_v1 = vsub.f32 1.0, %v5095_v62  ;;  %v3901_v29 = vxor.u32 %v3837_v55, %v3773_v28  ;;  %v3614_v25 = vshrl.u32 %v3550_v6, 16  ;;  %v15212_v28 = vld [vmem:[#allocation49_spill] sm:$0xff] }
 0x30a   : > { %v3902_v39 = vxor.u32 %v3838_v17, %v3774_v32  ;;  %v5082_v27 = vmul.f32 %v7303_v31, %v5081_v38  ;;  %v4191_v11 = vcvt.s32.f32 %v4127_v12  ;;  %v3677_v26 = vxor.u32 %v3613_v14, %v3549_v43 }
 0x30b   : > { %v4192_v21 = vcvt.s32.f32 %v4128_v60  ;;  %v5097_v5 = vmul.f32 %v7305_v53, %v5096_v1  ;;  %v3965_v13 = vmul.u32 3266489909, %v3901_v29  ;;  %v3678_v15 = vxor.u32 %v3614_v25, %v3550_v6  ;;  %v11208_v1 = vpop.xlane.xlu0 %3101 }
 0x30c   : > { %v3966_v47 = vmul.u32 3266489909, %v3902_v39  ;;  %v5083_v57 = vadd.f32 %v7303_v31, %v5082_v27  ;;  %v4255_v32 = vmul.f32 1.1920929e-07, %v4191_v11  ;;  %v3741_v62 = vmul.u32 2246822507, %v3677_v26  ;;  %15206 = vst [vmem:[#allocation139_spill] sm:$0xff] %v11208_v1  ;;  %v11219_v27 = vpop.xlane.xlu2 %3053 }
 0x30d   : > { %v4256_v43 = vmul.f32 1.1920929e-07, %v4192_v21  ;;  %v5098_v45 = vadd.f32 %v7305_v53, %v5097_v5  ;;  %v4029_v55 = vshrl.u32 %v3965_v13, 16  ;;  %v3742_v38 = vmul.u32 2246822507, %v3678_v15  ;;  %15208 = vst [vmem:[#allocation141_spill] sm:$0xff] %v11219_v27 }
 0x30e   : > { %v4030_v17 = vshrl.u32 %v3966_v47, 16  ;;  %v5087_v12 = vsel %vm11195_vm5, %v7303_v31, %v5083_v57  ;;  %v4319_v60 = vadd.f32 1.1920929e-07, %v4255_v32  ;;  %v3805_v14 = vshrl.u32 %v3741_v62, 13 }
 0x30f   : > { %v4320_v6 = vadd.f32 1.1920929e-07, %v4256_v43  ;;  %v5092_v48 = vsel %vm11177_vm7, %v5091_v16, %v5087_v12  ;;  %v5102_v11 = vsel %vm11202_vm11, %v7305_v53, %v5098_v45  ;;  %v4093_v21 = vxor.u32 %v4029_v55, %v3965_v13  ;;  %v15213_v43 = vld [vmem:[#allocation103_spill] sm:$0xff]  ;;  %v15215_v12 = vld [vmem:[#allocation48_spill] sm:$0xff] }
 0x310   : > { %v4094_v29 = vxor.u32 %v4030_v17, %v3966_v47  ;;  %v11215_v39 = vmul.f32 %v10880_v10, %v5092_v48  ;;  %v5107_v25 = vsel %vm11181_vm10, %v5106_v51, %v5102_v11  ;;  %7306 = vlog2.f32 %v4319_v60 }
 0x311   : > { %v3806_v31 = vshrl.u32 %v3742_v38, 13  ;;  %v11222_v26 = vmul.f32 %v10887_v9, %v5107_v25  ;;  %7308 = vlog2.f32 %v4320_v6  ;;  %v4157_v16 = vand.u32 8388607, %v4093_v21 }
 0x312   : > { %15207 = vst [vmem:[#allocation140_spill] sm:$0xff] %v11215_v39  ;;  %v4158_v23 = vand.u32 8388607, %v4094_v29  ;;  %7310 = vpow2.f32 %v11160_v40  ;;  %v15210_v53 = vsub.f32 %v15173_v20, %v11023_v34  ;;  %v3869_v22 = vxor.u32 %v3805_v14, %v3741_v62 }
 0x313   : > { %15209 = vst [vmem:[#allocation142_spill] sm:$0xff] %v11222_v26  ;;  %v3870_v51 = vxor.u32 %v3806_v31, %v3742_v38  ;;  %v5580_v5 = vmin.f32 %v11215_v39, %v11222_v26  ;;  %v4221_v13 = vcvt.s32.f32 %v4157_v16  ;;  %v3499_v9 = vmul.u32 256, %v11188_v30  ;;  %v15214_v38 = vld [vmem:[#allocation52_spill] sm:$0xff] }
 0x314   : > { %v2576_v10 = vmul.f32 1.442695, %v15210_v53  ;;  %v4222_v47 = vcvt.s32.f32 %v4158_v23  ;;  %7312 = vpow2.f32 %v11170_v18  ;;  %v3933_v15 = vmul.u32 3266489909, %v3869_v22 }
 0x315   : > { %v3934_v57 = vmul.u32 3266489909, %v3870_v51  ;;  %v3452_v40 = vadd.s32 32, %v10724_v37  ;;  %v2438_v32 = vsub.f32 %v15212_v28, %v11228_v50  ;;  %v2439_v62 = vsub.f32 %v15213_v43, %v11228_v50  ;;  %5581 = vmin.xlane.f32.xlu0 %v5580_v5  ;;  %v11244_v51 = vpop.xlane.xlu0 %3056 }
 0x316   : > { %v4285_v45 = vmul.f32 1.1920929e-07, %v4221_v13  ;;  %v4286_v55 = vmul.f32 1.1920929e-07, %v4222_v47  ;;  %v7307_v17 = vpop.eup %7306  ;;  %7314 = vpow2.f32 %v2576_v10  ;;  %v3997_v30 = vshrl.u32 %v3933_v15, 16  ;;  %15217 = vst [vmem:[#allocation144_spill] sm:$0xff] %v11244_v51 }
 0x317   : > { %v3998_v18 = vshrl.u32 %v3934_v57, 16  ;;  %v7309_v6 = vpop.eup %7308  ;;  %v4390_v14 = vmul.f32 0.6931472, %v7307_v17  ;;  %v3532_v21 = vadd.s32 %v10733_v56, %v3499_v9  ;;  %v3484_v23 = vmul.u32 256, %v3452_v40 }
 0x318   : > { %v4349_v48 = vadd.f32 1.1920929e-07, %v4285_v45  ;;  %v4350_v11 = vadd.f32 1.1920929e-07, %v4286_v55  ;;  %v11242_v29 = vpop.eup %7310  ;;  %v4392_v25 = vmul.f32 0.6931472, %v7309_v6  ;;  %v4061_v31 = vxor.u32 %v3997_v30, %v3933_v15  ;;  %v15221_v55 = vld [vmem:[#allocation72_spill] sm:$0xff] }
 0x319   : > { %15216 = vst [vmem:[#allocation103_spill] sm:$0xff] %v11242_v29  ;;  %v4062_v16 = vxor.u32 %v3998_v18, %v3934_v57  ;;  %v2514_v53 = vmul.f32 1.442695, %v2438_v32  ;;  %v2516_v22 = vmul.f32 1.442695, %v2439_v62  ;;  %v11256_v57 = vpop.xlane.xlu2 %2397  ;;  %v3583_v40 = vadd.s32 %v3532_v21, %v9700_v54  ;;  %v15220_v62 = vld [vmem:[#allocation90_spill] sm:$0xff] }
 0x31a   : > { %v11246_v5 = vmin.f32 %v4390_v14, -1e-12  ;;  %7316 = vlog2.f32 %v4349_v48  ;;  %v11248_v10 = vpop.eup %7312  ;;  %v11250_v13 = vmin.f32 %v4392_v25, -1e-12  ;;  %v4125_v47 = vand.u32 8388607, %v4061_v31 }
 0x31b   : > { %7318 = vlog2.f32 %v4350_v11  ;;  %v4126_v9 = vand.u32 8388607, %v4062_v16  ;;  %15218 = vst [vmem:[#allocation145_spill] sm:$0xff] %v11256_v57  ;;  %v3517_v30 = vadd.s32 %v10733_v56, %v3484_v23  ;;  %v3584_v18 = vadd.s32 %v3532_v21, %v9717_v3 }
 0x31c   : > { %7320 = vrcp.f32 %v11246_v5  ;;  %v11260_v32 = vpop.eup %7314  ;;  %v4189_v14 = vcvt.s32.f32 %v4125_v47  ;;  %v3647_v21 = vshrl.u32 %v3583_v40, 16  ;;  %v11276_v60 = vadd.s32 160, %v10724_v37 }
 0x31d   : > { %15219 = vst [vmem:[#allocation146_spill] sm:$0xff] %v11260_v32  ;;  %7322 = vrcp.f32 %v11250_v13  ;;  %v4190_v48 = vcvt.s32.f32 %v4126_v9  ;;  %v11279_v9 = vadd.s32 %v3517_v30, %v9700_v54  ;;  %v3648_v11 = vshrl.u32 %v3584_v18, 16 }
 0x31e   : > { %7324 = vpow2.f32 %v2514_v53  ;;  %v4253_v23 = vmul.f32 1.1920929e-07, %v4189_v14  ;;  %vm4664_vm9 = vweird.f32 %v11246_v5  ;;  %v4668_v15 = vand.u32 2147483647, %v11246_v5 }
 0x31f   : > { %7326 = vpow2.f32 %v2516_v22  ;;  %v4254_v17 = vmul.f32 1.1920929e-07, %v4190_v48  ;;  %v11282_v22 = vadd.s32 %v3517_v30, %v9717_v3  ;;  %v4670_v25 = vand.u32 2147483648, %v11246_v5  ;;  %v11293_v30 = vpop.xlane.xlu0 %2400 }
 0x320   : > { %v7317_v16 = vpop.eup %7316  ;;  %v4317_v48 = vadd.f32 1.1920929e-07, %v4253_v23  ;;  %15223 = vst [vmem:[#allocation148_spill] sm:$0xff] %v11293_v30  ;;  %v4685_v51 = vand.u32 2147483648, %v11250_v13  ;;  %vm4679_vm6 = vweird.f32 %v11250_v13  ;;  %vm11315_vm1 = vcmp.eq.f32.partialorder %v4668_v15, 8.507059e+37 }
 0x321   : > { %v7319_v53 = vpop.eup %7318  ;;  %v4450_v47 = vmul.f32 0.6931472, %v7317_v16  ;;  %v4683_v16 = vand.u32 2147483647, %v11250_v13  ;;  %v4318_v50 = vadd.f32 1.1920929e-07, %v4254_v17  ;;  %v11306_v17 = vxor.u32 %v3647_v21, %v3583_v40 }
 0x322   : > { %v7321_v6 = vpop.eup %7320  ;;  %v4452_v14 = vmul.f32 0.6931472, %v7319_v53  ;;  %7328 = vlog2.f32 %v4317_v48  ;;  %v3500_v48 = vmul.u32 256, %v11276_v60  ;;  %v3617_v40 = vshrl.u32 %v11279_v9, 16 }
 0x323   : > { %v7323_v45 = vpop.eup %7322  ;;  %v4660_v31 = vmul.f32 %v7321_v6, %v11246_v5  ;;  %v11289_v61 = vmin.f32 %v4450_v47, -1e-12  ;;  %vm4665_vm15 = vweird.f32 %v7321_v6  ;;  %vm11323_vm7 = vcmp.eq.f32.partialorder %v4683_v16, 8.507059e+37 }
 0x324   : > { %v11291_v1 = vpop.eup %7324  ;;  %v4675_v34 = vmul.f32 %v7323_v45, %v11250_v13  ;;  %v11296_v27 = vmin.f32 %v4452_v14, -1e-12  ;;  %vm4680_vm14 = vweird.f32 %v7323_v45  ;;  %vm11311_vm4 = vmor %vm4664_vm9, %vm4665_vm15  ;;  %v4671_v13 = vor.u32 1.1754944e-38, %v4670_v25 }
 0x325   : > { %15222 = vst [vmem:[#allocation147_spill] sm:$0xff] %v11291_v1  ;;  %v11298_v23 = vpop.eup %7326  ;;  %v4661_v53 = vsub.f32 1.0, %v4660_v31  ;;  %7330 = vrcp.f32 %v11289_v61  ;;  %vm11319_vm8 = vmor %vm4679_vm6, %vm4680_vm14  ;;  %v4686_v5 = vor.u32 1.1754944e-38, %v4685_v51  ;;  %vm5114_vm10 = vweird.f32 %v11289_v61 }
 0x326   : > { %15224 = vst [vmem:[#allocation149_spill] sm:$0xff] %v11298_v23  ;;  %v4676_v47 = vsub.f32 1.0, %v4675_v34  ;;  %7332 = vrcp.f32 %v11296_v27  ;;  %v3618_v25 = vshrl.u32 %v11282_v22, 16  ;;  %v5118_v16 = vand.u32 2147483647, %v11289_v61  ;;  %v15234_v34 = vld [vmem:[#allocation125_spill] sm:$0xff] }
 0x327   : > { %v4662_v7 = vmul.f32 %v7321_v6, %v4661_v53  ;;  %7334 = vlog2.f32 %v4318_v50  ;;  %v5120_v14 = vand.u32 2147483648, %v11289_v61  ;;  %vm5129_vm13 = vweird.f32 %v11296_v27 }
 0x328   : > { %v4677_v46 = vmul.f32 %v7323_v45, %v4676_v47  ;;  %v7329_v21 = vpop.eup %7328  ;;  %v11330_v47 = vxor.u32 %v3648_v11, %v3584_v18  ;;  %v5135_v11 = vand.u32 2147483648, %v11296_v27  ;;  %vm5119_vm9 = vcmp.eq.f32.partialorder %v5118_v16, 8.507059e+37 }
 0x329   : > { %v4663_v0 = vadd.f32 %v7321_v6, %v4662_v7  ;;  %v4386_v2 = vmul.f32 0.6931472, %v7329_v21 }
 0x32a   : > { %v4678_v15 = vadd.f32 %v7323_v45, %v4677_v46 }
 0x32b   : > { %v7331_v7 = vpop.eup %7330  ;;  %v4667_v50 = vsel %vm11311_vm4, %v7321_v6, %v4663_v0 }
 0x32c   : > { %v7333_v51 = vpop.eup %7332  ;;  %v4672_v26 = vsel %vm11315_vm1, %v4671_v13, %v4667_v50  ;;  %v4682_v46 = vsel %vm11319_vm8, %v7323_v45, %v4678_v15  ;;  %v5110_v39 = vmul.f32 %v7331_v7, %v11289_v61  ;;  %vm5115_vm12 = vweird.f32 %v7331_v7 }
 0x32d   : > { %v11343_v18 = vmul.f32 %v10920_v35, %v4672_v26  ;;  %v4687_v0 = vsel %vm11323_vm7, %v4686_v5, %v4682_v46  ;;  %v5125_v6 = vmul.f32 %v7333_v51, %v11296_v27  ;;  %v7335_v31 = vpop.eup %7334  ;;  %v4509_v45 = vmin.f32 %v4386_v2, -1e-12  ;;  %vm11358_vm11 = vmor %vm5114_vm10, %vm5115_vm12 }
 0x32e   : > { %v11350_v13 = vmul.f32 %v15234_v34, %v4687_v0  ;;  %v5111_v53 = vsub.f32 1.0, %v5110_v39  ;;  %vm5130_vm5 = vweird.f32 %v7333_v51  ;;  %v5133_v15 = vand.u32 2147483647, %v11296_v27 }
 0x32f   : > { %15233 = vst [vmem:[#allocation150_spill] sm:$0xff] %v11343_v18  ;;  %v5126_v21 = vsub.f32 1.0, %v5125_v6  ;;  %v4388_v26 = vmul.f32 0.6931472, %v7335_v31  ;;  %7336 = vrcp.f32 %v4509_v45  ;;  %v3681_v50 = vxor.u32 %v3617_v40, %v11279_v9  ;;  %vm11368_vm15 = vmor %vm5129_vm13, %vm5130_vm5 }
 0x330   : > { %15235 = vst [vmem:[#allocation125_spill] sm:$0xff] %v11350_v13  ;;  %v5538_v60 = vmin.f32 %v11343_v18, %v11350_v13  ;;  %v5112_v5 = vmul.f32 %v7331_v7, %v5111_v53  ;;  %v5121_v39 = vor.u32 1.1754944e-38, %v5120_v14  ;;  %v3775_v6 = vmul.u32 2246822507, %v11306_v17  ;;  %v15244_v13 = vld [vmem:[#allocation124_spill] sm:$0xff] }
 0x331   : > { %v5127_v2 = vmul.f32 %v7333_v51, %v5126_v21  ;;  %v11362_v0 = vmin.f32 %v4388_v26, -1e-12  ;;  %v5136_v61 = vor.u32 1.1754944e-38, %v5135_v11  ;;  %v3682_v40 = vxor.u32 %v3618_v25, %v11282_v22 }
 0x332   : > { %5539 = vmin.xlane.f32.xlu1 %v5538_v60  ;;  %v5113_v31 = vadd.f32 %v7331_v7, %v5112_v5  ;;  %vm5134_vm6 = vcmp.eq.f32.partialorder %v5133_v15, 8.507059e+37  ;;  %v4638_v14 = vand.u32 2147483647, %v4509_v45  ;;  %v4640_v21 = vand.u32 2147483648, %v4509_v45  ;;  %v15240_v15 = vld [vmem:[#allocation122_spill] sm:$0xff] }
 0x333   : > { %v5128_v53 = vadd.f32 %v7333_v51, %v5127_v2  ;;  %7338 = vrcp.f32 %v11362_v0  ;;  %v3745_v16 = vmul.u32 2246822507, %v3681_v50  ;;  %v3533_v26 = vadd.s32 %v10733_v56, %v3500_v48 }
 0x334   : > { %v5117_v17 = vsel %vm11358_vm11, %v7331_v7, %v5113_v31  ;;  %v4653_v11 = vand.u32 2147483647, %v11362_v0  ;;  %v3776_v22 = vmul.u32 2246822507, %v11330_v47  ;;  %v4655_v46 = vand.u32 2147483648, %v11362_v0  ;;  %v15242_v7 = vld [vmem:[#allocation126_spill] sm:$0xff] }
 0x335   : > { %v5122_v27 = vsel %vm5119_vm9, %v5121_v39, %v5117_v17  ;;  %v5132_v60 = vsel %vm11368_vm15, %v7333_v51, %v5128_v53  ;;  %v7337_v25 = vpop.eup %7336  ;;  %v15243_v31 = vld [vmem:[#allocation127_spill] sm:$0xff]  ;;  %vm4634_vm14 = vweird.f32 %v4509_v45  ;;  %vm11390_vm4 = vcmp.eq.f32.partialorder %v4638_v14, 8.507059e+37 }
 0x336   : > { %v11382_v5 = vmul.f32 %v15240_v15, %v5122_v27  ;;  %v5137_v2 = vsel %vm5134_vm6, %v5136_v61, %v5132_v60  ;;  %v2675_v50 = vadd.f32 %v15243_v31, %v15242_v7  ;;  %v4630_v39 = vmul.f32 %v7337_v25, %v4509_v45 }
 0x337   : > { %v11388_v48 = vmul.f32 %v15244_v13, %v5137_v2  ;;  %v4641_v47 = vor.u32 1.1754944e-38, %v4640_v21  ;;  %vm4649_vm1 = vweird.f32 %v11362_v0  ;;  %v3746_v9 = vmul.u32 2246822507, %v3682_v40 }
 0x338   : > { %15241 = vst [vmem:[#allocation122_spill] sm:$0xff] %v11382_v5  ;;  %v3809_v53 = vshrl.u32 %v3745_v16, 13  ;;  %v4631_v27 = vsub.f32 1.0, %v4630_v39  ;;  %vm4635_vm8 = vweird.f32 %v7337_v25  ;;  %vm11397_vm7 = vcmp.eq.f32.partialorder %v4653_v11, 8.507059e+37 }
 0x339   : > { %15245 = vst [vmem:[#allocation126_spill] sm:$0xff] %v11388_v48  ;;  %v7339_v61 = vpop.eup %7338  ;;  %v5583_v17 = vmin.f32 %v11382_v5, %v11388_v48  ;;  %v4656_v2 = vor.u32 1.1754944e-38, %v4655_v46  ;;  %v3810_v21 = vshrl.u32 %v3746_v9, 13  ;;  %v3839_v23 = vshrl.u32 %v3775_v6, 13  ;;  %vm11403_vm13 = vmor %vm4634_vm14, %vm4635_vm8 }
 0x33a   : > { %v4645_v14 = vmul.f32 %v7339_v61, %v11362_v0  ;;  %vm4650_vm10 = vweird.f32 %v7339_v61  ;;  %2676 = vadd.xlane.f32.xlu1 %v2675_v50  ;;  %v4632_v18 = vmul.f32 %v7337_v25, %v4631_v27  ;;  %v3873_v40 = vxor.u32 %v3809_v53, %v3745_v16 }
 0x33b   : > { %5584 = vmin.xlane.f32.xlu2 %v5583_v17  ;;  %v3840_v1 = vshrl.u32 %v3776_v22, 13  ;;  %v3874_v39 = vxor.u32 %v3810_v21, %v3746_v9  ;;  %v3585_v5 = vadd.s32 %v3533_v26, %v9700_v54  ;;  %v3586_v36 = vadd.s32 %v3533_v26, %v9717_v3  ;;  %vm11414_vm12 = vmor %vm4649_vm1, %vm4650_vm10 }
 0x33c   : > { %v4646_v11 = vsub.f32 1.0, %v4645_v14  ;;  %v4633_v20 = vadd.f32 %v7337_v25, %v4632_v18  ;;  %v3937_v46 = vmul.u32 3266489909, %v3873_v40  ;;  %v3903_v50 = vxor.u32 %v3839_v23, %v3775_v6 }
 0x33d   : > { %v3904_v32 = vxor.u32 %v3840_v1, %v3776_v22  ;;  %v3938_v27 = vmul.u32 3266489909, %v3874_v39  ;;  %v3649_v16 = vshrl.u32 %v3585_v5, 16  ;;  %v3650_v53 = vshrl.u32 %v3586_v36, 16 }
 0x33e   : > { %v4647_v17 = vmul.f32 %v7339_v61, %v4646_v11  ;;  %v4637_v45 = vsel %vm11403_vm13, %v7337_v25, %v4633_v20  ;;  %v4001_v14 = vshrl.u32 %v3937_v46, 16  ;;  %v3967_v26 = vmul.u32 3266489909, %v3903_v50 }
 0x33f   : > { %v3968_v18 = vmul.u32 3266489909, %v3904_v32  ;;  %v4642_v1 = vsel %vm11390_vm4, %v4641_v47, %v4637_v45  ;;  %v4002_v6 = vshrl.u32 %v3938_v27, 16  ;;  %v3713_v22 = vxor.u32 %v3649_v16, %v3585_v5 }
 0x340   : > { %v4648_v23 = vadd.f32 %v7339_v61, %v4647_v17  ;;  %v15254_v48 = vsub.f32 %v15214_v38, %v11256_v57  ;;  %v11424_v25 = vmul.f32 %v10897_v33, %v4642_v1  ;;  %v4065_v0 = vxor.u32 %v4001_v14, %v3937_v46 }
 0x341   : > { %v4031_v21 = vshrl.u32 %v3967_v26, 16  ;;  %v4066_v11 = vxor.u32 %v4002_v6, %v3938_v27  ;;  %v4032_v32 = vshrl.u32 %v3968_v18, 16  ;;  %v3714_v39 = vxor.u32 %v3650_v53, %v3586_v36 }
 0x342   : > { %v2578_v20 = vmul.f32 1.442695, %v15254_v48  ;;  %15255 = vst [vmem:[#allocation127_spill] sm:$0xff] %v11424_v25  ;;  %v4652_v40 = vsel %vm11414_vm12, %v7339_v61, %v4648_v23  ;;  %v4129_v47 = vand.u32 8388607, %v4065_v0  ;;  %v3469_v61 = vadd.s32 168, %v10724_v37 }
 0x343   : > { %v4657_v51 = vsel %vm11397_vm7, %v4656_v2, %v4652_v40  ;;  %v4095_v5 = vxor.u32 %v4031_v21, %v3967_v26  ;;  %v3777_v50 = vmul.u32 2246822507, %v3713_v22  ;;  %v4130_v16 = vand.u32 8388607, %v4066_v11 }
 0x344   : > { %v11431_v17 = vmul.f32 %v10908_v49, %v4657_v51  ;;  %v4096_v33 = vxor.u32 %v4032_v32, %v3968_v18  ;;  %v3778_v45 = vmul.u32 2246822507, %v3714_v39  ;;  %v4193_v46 = vcvt.s32.f32 %v4129_v47 }
 0x345   : > { %v4159_v14 = vand.u32 8388607, %v4095_v5  ;;  %v3841_v1 = vshrl.u32 %v3777_v50, 13  ;;  %v4194_v27 = vcvt.s32.f32 %v4130_v16  ;;  %v3501_v23 = vmul.u32 256, %v3469_v61 }
 0x346   : > { %15256 = vst [vmem:[#allocation124_spill] sm:$0xff] %v11431_v17  ;;  %v5535_v36 = vmin.f32 %v11424_v25, %v11431_v17  ;;  %v4160_v60 = vand.u32 8388607, %v4096_v33  ;;  %v3842_v2 = vshrl.u32 %v3778_v45, 13  ;;  %v4257_v53 = vmul.f32 1.1920929e-07, %v4193_v46 }
 0x347   : > { %v4223_v9 = vcvt.s32.f32 %v4159_v14  ;;  %v3905_v26 = vxor.u32 %v3841_v1, %v3777_v50  ;;  %v4258_v49 = vmul.f32 1.1920929e-07, %v4194_v27  ;;  %v2630_v18 = vadd.f32 %v11054_v42, %v11045_v52  ;;  %v15259_v27 = vld [vmem:[#allocation62_spill] sm:$0xff] }
 0x348   : > { %5536 = vmin.xlane.f32.xlu0 %v5535_v36  ;;  %v4224_v6 = vcvt.s32.f32 %v4160_v60  ;;  %v3906_v22 = vxor.u32 %v3842_v2, %v3778_v45  ;;  %v4321_v48 = vadd.f32 1.1920929e-07, %v4257_v53  ;;  %v3534_v40 = vadd.s32 %v10733_v56, %v3501_v23  ;;  %v15260_v60 = vld [vmem:[#allocation57_spill] sm:$0xff] }
 0x349   : > { %v4287_v0 = vmul.f32 1.1920929e-07, %v4223_v9  ;;  %v3969_v21 = vmul.u32 3266489909, %v3905_v26  ;;  %v15257_v11 = vsub.f32 %v15215_v12, %v11256_v57  ;;  %v4322_v39 = vadd.f32 1.1920929e-07, %v4258_v49  ;;  %2631 = vadd.xlane.f32.xlu1 %v2630_v18  ;;  %v11453_v26 = vpop.xlane.xlu2 %2352 }
 0x34a   : > { %v4288_v51 = vmul.f32 1.1920929e-07, %v4224_v6  ;;  %v3970_v47 = vmul.u32 3266489909, %v3906_v22  ;;  %7340 = vlog2.f32 %v4321_v48  ;;  %v3587_v16 = vadd.s32 %v3534_v40, %v9700_v54  ;;  %15261 = vst [vmem:[#allocation62_spill] sm:$0xff] %v11453_v26 }
 0x34b   : > { %v2580_v32 = vmul.f32 1.442695, %v15257_v11  ;;  %v4351_v5 = vadd.f32 1.1920929e-07, %v4287_v0  ;;  %v4033_v50 = vshrl.u32 %v3969_v21, 16  ;;  %7342 = vlog2.f32 %v4322_v39 }
 0x34c   : > { %v4352_v33 = vadd.f32 1.1920929e-07, %v4288_v51  ;;  %v4034_v45 = vshrl.u32 %v3970_v47, 16  ;;  %v3453_v46 = vadd.s32 40, %v10724_v37  ;;  %v2473_v14 = vsub.f32 %v15221_v55, %v11293_v30 }
 0x34d   : > { %v15258_v1 = vsub.f32 %v15220_v62, %v11293_v30  ;;  %7344 = vlog2.f32 %v4351_v5  ;;  %v4097_v36 = vxor.u32 %v4033_v50, %v3969_v21  ;;  %v2672_v53 = vadd.f32 %v15244_v13, %v15240_v15 }
 0x34e   : > { %7346 = vlog2.f32 %v4352_v33  ;;  %v4098_v9 = vxor.u32 %v4034_v45, %v3970_v47  ;;  %v3588_v49 = vadd.s32 %v3534_v40, %v9717_v3  ;;  %v3651_v18 = vshrl.u32 %v3587_v16, 16 }
 0x34f   : > { %v2582_v61 = vmul.f32 1.442695, %v15258_v1  ;;  %7348 = vpow2.f32 %v2578_v20  ;;  %v4161_v23 = vand.u32 8388607, %v4097_v36  ;;  %v3485_v21 = vmul.u32 256, %v3453_v46  ;;  %v11462_v20 = vpop.xlane.xlu0 %2355 }
 0x350   : > { %7350 = vpow2.f32 %v2580_v32  ;;  %2673 = vadd.xlane.f32.xlu0 %v2672_v53  ;;  %v4162_v0 = vand.u32 8388607, %v4098_v9  ;;  %v7341_v11 = vpop.eup %7340  ;;  %v11460_v15 = vmul.f32 1.442695, %v2473_v14  ;;  %15266 = vst [vmem:[#allocation57_spill] sm:$0xff] %v11462_v20  ;;  %v2440_v40 = vsub.f32 %v10207_v41, %v11453_v26 }
 0x351   : > { %7352 = vpow2.f32 %v2582_v61  ;;  %v4225_v47 = vcvt.s32.f32 %v4161_v23  ;;  %v7343_v5 = vpop.eup %7342  ;;  %v2441_v32 = vsub.f32 %v10217_v19, %v11453_v26  ;;  %v4394_v50 = vmul.f32 0.6931472, %v7341_v11 }
 0x352   : > { %v4226_v33 = vcvt.s32.f32 %v4162_v0  ;;  %v4396_v46 = vmul.f32 0.6931472, %v7343_v5  ;;  %v3652_v36 = vshrl.u32 %v3588_v49, 16  ;;  %v11468_v53 = vxor.u32 %v3651_v18, %v3587_v16 }
 0x353   : > { %v7345_v45 = vpop.eup %7344  ;;  %v4289_v1 = vmul.f32 1.1920929e-07, %v4225_v47  ;;  %v11472_v9 = vmin.f32 %v4394_v50, -1e-12  ;;  %v3518_v2 = vadd.s32 %v10733_v56, %v3485_v21  ;;  %v11481_v16 = vmul.f32 1.442695, %v2440_v40 }
 0x354   : > { %v7347_v14 = vpop.eup %7346  ;;  %v4454_v23 = vmul.f32 0.6931472, %v7345_v45  ;;  %v11477_v48 = vmin.f32 %v4396_v46, -1e-12  ;;  %v4290_v11 = vmul.f32 1.1920929e-07, %v4226_v33  ;;  %v2627_v50 = vadd.f32 %v15234_v34, %v10920_v35 }
 0x355   : > { %v11475_v13 = vpop.eup %7348  ;;  %v4456_v0 = vmul.f32 0.6931472, %v7347_v14  ;;  %v4353_v5 = vadd.f32 1.1920929e-07, %v4289_v1  ;;  %7354 = vrcp.f32 %v11472_v9  ;;  %v11490_v45 = vmul.f32 1.442695, %v2441_v32 }
 0x356   : > { %15267 = vst [vmem:[#allocation151_spill] sm:$0xff] %v11475_v13  ;;  %v11479_v47 = vpop.eup %7350  ;;  %7356 = vrcp.f32 %v11477_v48  ;;  %v11493_v33 = vxor.u32 %v3652_v36, %v3588_v49  ;;  %v14694_v46 = vmul.u32 2246822507, %v11468_v53  ;;  %v4698_v40 = vand.u32 2147483647, %v11472_v9 }
 0x357   : > { %15268 = vst [vmem:[#allocation152_spill] sm:$0xff] %v11479_v47  ;;  %v11488_v21 = vpop.eup %7352  ;;  %v11499_v1 = vadd.f32 %v11037_v24, %v11030_v8  ;;  %v11501_v14 = vmin.f32 %v4454_v23, -1e-12  ;;  %v11503_v35 = vmin.f32 %v4456_v0, -1e-12  ;;  %v4700_v34 = vand.u32 2147483648, %v11472_v9 }
 0x358   : > { %15269 = vst [vmem:[#allocation153_spill] sm:$0xff] %v11488_v21  ;;  %2628 = vadd.xlane.f32.xlu0 %v2627_v50  ;;  %v4354_v32 = vadd.f32 1.1920929e-07, %v4290_v11  ;;  %7358 = vlog2.f32 %v4353_v5  ;;  %v11507_v49 = vadd.s32 %v3518_v2, %v9700_v54  ;;  %v4713_v36 = vand.u32 2147483647, %v11477_v48  ;;  %v15270_v23 = vld [vmem:[#allocation133_spill] sm:$0xff] }
 0x359   : > { %v4715_v18 = vand.u32 2147483648, %v11477_v48  ;;  %7360 = vrcp.f32 %v11501_v14  ;;  %v11513_v61 = vadd.s32 %v3518_v2, %v9717_v3  ;;  %v11518_v0 = vadd.f32 %v11242_v29, %v15270_v23 }
 0x35a   : > { %7362 = vrcp.f32 %v11503_v35  ;;  %v11523_v5 = vshrl.u32 %v14694_v46, 13  ;;  %vm4694_vm5 = vweird.f32 %v11472_v9  ;;  %vm11526_vm11 = vcmp.eq.f32.partialorder %v4698_v40, 8.507059e+37 }
 0x35b   : > { %v7355_v50 = vpop.eup %7354  ;;  %vm4709_vm9 = vweird.f32 %v11477_v48  ;;  %7364 = vlog2.f32 %v4354_v32  ;;  %v4701_v26 = vor.u32 1.1754944e-38, %v4700_v34  ;;  %v5148_v11 = vand.u32 2147483647, %v11501_v14 }
 0x35c   : > { %v7357_v2 = vpop.eup %7356  ;;  %v4690_v57 = vmul.f32 %v7355_v50, %v11472_v9  ;;  %v5150_v17 = vand.u32 2147483648, %v11501_v14  ;;  %vm11535_vm15 = vcmp.eq.f32.partialorder %v4713_v36, 8.507059e+37  ;;  %v4716_v40 = vor.u32 1.1754944e-38, %v4715_v18 }
 0x35d   : > { %v4705_v46 = vmul.f32 %v7357_v2, %v11477_v48  ;;  %vm5144_vm6 = vweird.f32 %v11501_v14  ;;  %vm4695_vm14 = vweird.f32 %v7355_v50  ;;  %vm5159_vm4 = vweird.f32 %v11503_v35 }
 0x35e   : > { %v7359_v62 = vpop.eup %7358  ;;  %v4691_v55 = vsub.f32 1.0, %v4690_v57  ;;  %v5163_v34 = vand.u32 2147483647, %v11503_v35  ;;  %vm4710_vm1 = vweird.f32 %v7357_v2  ;;  %v5165_v12 = vand.u32 2147483648, %v11503_v35  ;;  %vm11550_vm7 = vmor %vm4694_vm5, %vm4695_vm14 }
 0x35f   : > { %v7361_v32 = vpop.eup %7360  ;;  %v4706_v38 = vsub.f32 1.0, %v4705_v46  ;;  %v4458_v29 = vmul.f32 0.6931472, %v7359_v62  ;;  %vm11544_vm8 = vcmp.eq.f32.partialorder %v5148_v11, 8.507059e+37  ;;  %v5151_v57 = vor.u32 1.1754944e-38, %v5150_v17  ;;  %vm11560_vm10 = vmor %vm4709_vm9, %vm4710_vm1  ;;  %v11613_v17 = vpop.xlane.xlu1 %3104 }
 0x360   : > { %v7363_v36 = vpop.eup %7362  ;;  %v4692_v21 = vmul.f32 %v7355_v50, %v4691_v55  ;;  %v5140_v23 = vmul.f32 %v7361_v32, %v11501_v14  ;;  %v15279_v55 = vmul.u32 2246822507, %v11493_v33  ;;  %vm5145_vm13 = vweird.f32 %v7361_v32  ;;  %15291 = vst [vmem:[#allocation156_spill] sm:$0xff] %v11613_v17 }
 0x361   : > { %v7365_v39 = vpop.eup %7364  ;;  %v4707_v46 = vmul.f32 %v7357_v2, %v4706_v38  ;;  %v5155_v6 = vmul.f32 %v7363_v36, %v11503_v35  ;;  %v4545_v62 = vmin.f32 %v4458_v29, -1e-12  ;;  %vm5160_vm12 = vweird.f32 %v7363_v36  ;;  %vm11578_vm9 = vmor %vm5144_vm6, %vm5145_vm13 }
 0x362   : > { %v3844_v22 = vshrl.u32 %v15279_v55, 13  ;;  %v4693_v41 = vadd.f32 %v7355_v50, %v4692_v21  ;;  %v5141_v9 = vsub.f32 1.0, %v5140_v23  ;;  %v4460_v11 = vmul.f32 0.6931472, %v7365_v39 }
 0x363   : > { %v4708_v19 = vadd.f32 %v7357_v2, %v4707_v46  ;;  %v5156_v28 = vsub.f32 1.0, %v5155_v6  ;;  %7366 = vrcp.f32 %v4545_v62  ;;  %vm11566_vm5 = vcmp.eq.f32.partialorder %v5163_v34, 8.507059e+37 }
 0x364   : > { %v4697_v38 = vsel %vm11550_vm7, %v7355_v50, %v4693_v41  ;;  %v5142_v29 = vmul.f32 %v7361_v32, %v5141_v9  ;;  %v11570_v48 = vmin.f32 %v4460_v11, -1e-12  ;;  %v5166_v51 = vor.u32 1.1754944e-38, %v5165_v12 }
 0x365   : > { %v4702_v55 = vsel %vm11526_vm11, %v4701_v26, %v4697_v38  ;;  %v4712_v39 = vsel %vm11560_vm10, %v7357_v2, %v4708_v19  ;;  %v5157_v41 = vmul.f32 %v7363_v36, %v5156_v28  ;;  %vm11589_vm11 = vmor %vm5159_vm4, %vm5160_vm12  ;;  %v5178_v19 = vand.u32 2147483647, %v4545_v62 }
 0x366   : > { %v11583_v23 = vmul.f32 %v11045_v52, %v4702_v55  ;;  %v4717_v50 = vsel %vm11535_vm15, %v4716_v40, %v4712_v39  ;;  %v5143_v34 = vadd.f32 %v7361_v32, %v5142_v29  ;;  %v5180_v28 = vand.u32 2147483648, %v4545_v62 }
 0x367   : > { %v11594_v26 = vmul.f32 %v11054_v42, %v4717_v50  ;;  %v5158_v14 = vadd.f32 %v7363_v36, %v5157_v41  ;;  %7368 = vrcp.f32 %v11570_v48  ;;  %vm5174_vm6 = vweird.f32 %v4545_v62 }
 0x368   : > { %15286 = vst [vmem:[#allocation154_spill] sm:$0xff] %v11583_v23  ;;  %v5147_v52 = vsel %vm11578_vm9, %v7361_v32, %v5143_v34  ;;  %v11601_v12 = vadd.f32 %v11479_v47, %v11475_v13  ;;  %v15290_v25 = vmul.u32 2246822507, %v11468_v53  ;;  %v5193_v32 = vand.u32 2147483647, %v11570_v48 }
 0x369   : > { %15289 = vst [vmem:[#allocation155_spill] sm:$0xff] %v11594_v26  ;;  %v7367_v2 = vpop.eup %7366  ;;  %v5541_v42 = vmin.f32 %v11583_v23, %v11594_v26  ;;  %v5152_v40 = vsel %vm11544_vm8, %v5151_v57, %v5147_v52  ;;  %v5162_v46 = vsel %vm11589_vm11, %v7363_v36, %v5158_v14  ;;  %v5195_v11 = vand.u32 2147483648, %v11570_v48 }
 0x36a   : > { %v3907_v35 = vxor.u32 %v11523_v5, %v15290_v25  ;;  %v11616_v9 = vmul.f32 %v15242_v7, %v5152_v40  ;;  %v5167_v53 = vsel %vm11566_vm5, %v5166_v51, %v5162_v46  ;;  %v5170_v5 = vmul.f32 %v7367_v2, %v4545_v62 }
 0x36b   : > { %5542 = vmin.xlane.f32.xlu2 %v5541_v42  ;;  %v11622_v18 = vmul.f32 %v15243_v31, %v5167_v53  ;;  %vm11624_vm15 = vcmp.eq.f32.partialorder %v5178_v19, 8.507059e+37  ;;  %v5181_v36 = vor.u32 1.1754944e-38, %v5180_v28  ;;  %vm5189_vm14 = vweird.f32 %v11570_v48  ;;  %v11647_v28 = vpop.xlane.xlu2 %3107 }
 0x36c   : > { %15292 = vst [vmem:[#allocation157_spill] sm:$0xff] %v11616_v9  ;;  %v5171_v38 = vsub.f32 1.0, %v5170_v5  ;;  %vm5175_vm4 = vweird.f32 %v7367_v2  ;;  %v15296_v7 = vmul.u32 2246822507, %v11493_v33  ;;  %v3971_v21 = vmul.u32 3266489909, %v3907_v35 }
 0x36d   : > { %15293 = vst [vmem:[#allocation158_spill] sm:$0xff] %v11622_v18  ;;  %v7369_v55 = vpop.eup %7368  ;;  %v5586_v39 = vmin.f32 %v11616_v9, %v11622_v18  ;;  %vm11633_vm1 = vcmp.eq.f32.partialorder %v5193_v32, 8.507059e+37  ;;  %v3619_v6 = vshrl.u32 %v11507_v49, 16  ;;  %v3620_v41 = vshrl.u32 %v11513_v61, 16  ;;  %vm11641_vm7 = vmor %vm5174_vm6, %vm5175_vm4 }
 0x36e   : > { %v3908_v29 = vxor.u32 %v3844_v22, %v15296_v7  ;;  %v5172_v51 = vmul.f32 %v7367_v2, %v5171_v38  ;;  %v5185_v50 = vmul.f32 %v7369_v55, %v11570_v48  ;;  %vm5190_vm8 = vweird.f32 %v7369_v55  ;;  %15301 = vst [vmem:[#allocation159_spill] sm:$0xff] %v11647_v28 }
 0x36f   : > { %v5196_v34 = vor.u32 1.1754944e-38, %v5195_v11  ;;  %5587 = vmin.xlane.f32.xlu1 %v5586_v39  ;;  %v4035_v30 = vshrl.u32 %v3971_v21, 16  ;;  %v3683_v19 = vxor.u32 %v3619_v6, %v11507_v49  ;;  %v3684_v14 = vxor.u32 %v3620_v41, %v11513_v61  ;;  %vm11659_vm10 = vmor %vm5189_vm14, %vm5190_vm8  ;;  %v11663_v39 = vpop.xlane.xlu1 %3059 }
 0x370   : > { %v3972_v33 = vmul.u32 3266489909, %v3908_v29  ;;  %v5173_v52 = vadd.f32 %v7367_v2, %v5172_v51  ;;  %v5186_v25 = vsub.f32 1.0, %v5185_v50  ;;  %v3470_v35 = vadd.s32 176, %v10724_v37  ;;  %15304 = vst [vmem:[#allocation160_spill] sm:$0xff] %v11663_v39  ;;  %v15335_v39 = vld [vmem:[#allocation92_spill] sm:$0xff] }
 0x371   : > { %v3472_v42 = vadd.s32 192, %v10724_v37  ;;  %v4099_v62 = vxor.u32 %v4035_v30, %v3971_v21  ;;  %v3747_v46 = vmul.u32 2246822507, %v3683_v19  ;;  %v3748_v32 = vmul.u32 2246822507, %v3684_v14 }
 0x372   : > { %v4036_v40 = vshrl.u32 %v3972_v33, 16  ;;  %v5177_v53 = vsel %vm11641_vm7, %v7367_v2, %v5173_v52  ;;  %v5187_v5 = vmul.f32 %v7369_v55, %v5186_v25  ;;  %v3502_v11 = vmul.u32 256, %v3470_v35  ;;  %v11665_v2 = vpop.xlane.xlu0 %3110 }
 0x373   : > { %v3504_v49 = vmul.u32 256, %v3472_v42  ;;  %2679 = vadd.xlane.f32.xlu2 %v11499_v1  ;;  %v5182_v61 = vsel %vm11624_vm15, %v5181_v36, %v5177_v53  ;;  %v4163_v29 = vand.u32 8388607, %v4099_v62  ;;  %v3811_v21 = vshrl.u32 %v3747_v46, 13  ;;  %15305 = vst [vmem:[#allocation161_spill] sm:$0xff] %v11665_v2 }
 0x374   : > { %v4100_v7 = vxor.u32 %v4036_v40, %v3972_v33  ;;  %v11668_v6 = vmul.f32 %v11030_v8, %v5182_v61  ;;  %v5188_v1 = vadd.f32 %v7369_v55, %v5187_v5  ;;  %v3812_v57 = vshrl.u32 %v3748_v32, 13  ;;  %v11683_v5 = vpop.xlane.xlu2 %3062 }
 0x375   : > { %v3535_v36 = vadd.s32 %v10733_v56, %v3502_v11  ;;  %v4227_v48 = vcvt.s32.f32 %v4163_v29  ;;  %v3875_v51 = vxor.u32 %v3811_v21, %v3747_v46  ;;  %v3537_v50 = vadd.s32 %v10733_v56, %v3504_v49  ;;  %15308 = vst [vmem:[#allocation164_spill] sm:$0xff] %v11683_v5  ;;  %v15333_v5 = vld [vmem:[#allocation84_spill] sm:$0xff] }
 0x376   : > { %15306 = vst [vmem:[#allocation162_spill] sm:$0xff] %v11668_v6  ;;  %v4164_v41 = vand.u32 8388607, %v4100_v7  ;;  %v5192_v22 = vsel %vm11659_vm10, %v7369_v55, %v5188_v1  ;;  %v3876_v33 = vxor.u32 %v3812_v57, %v3748_v32  ;;  %v15309_v21 = vsub.f32 %v10273_v4, %v11462_v20 }
 0x377   : > { %v3589_v30 = vadd.s32 %v3535_v36, %v9700_v54  ;;  %v3590_v19 = vadd.s32 %v3535_v36, %v9717_v3  ;;  %v5197_v8 = vsel %vm11633_vm1, %v5196_v34, %v5192_v22  ;;  %2685 = vadd.xlane.f32.xlu1 %v11601_v12  ;;  %v4291_v52 = vmul.f32 1.1920929e-07, %v4227_v48 }
 0x378   : > { %v4228_v14 = vcvt.s32.f32 %v4164_v41  ;;  %v3939_v25 = vmul.u32 3266489909, %v3875_v51  ;;  %v11680_v35 = vmul.f32 %v11037_v24, %v5197_v8  ;;  %v3940_v42 = vmul.u32 3266489909, %v3876_v33  ;;  %v15310_v41 = vld [vmem:[#allocation66_spill] sm:$0xff] }
 0x379   : > { %v3653_v40 = vshrl.u32 %v3589_v30, 16  ;;  %v3654_v62 = vshrl.u32 %v3590_v19, 16  ;;  %v4355_v46 = vadd.f32 1.1920929e-07, %v4291_v52  ;;  %v3593_v53 = vadd.s32 %v3537_v50, %v9700_v54  ;;  %v15315_v52 = vld [vmem:[#allocation106_spill] sm:$0xff] }
 0x37a   : > { %15307 = vst [vmem:[#allocation163_spill] sm:$0xff] %v11680_v35  ;;  %v4292_v55 = vmul.f32 1.1920929e-07, %v4228_v14  ;;  %v4003_v32 = vshrl.u32 %v3939_v25, 16  ;;  %v5589_v31 = vmin.f32 %v11668_v6, %v11680_v35  ;;  %v4004_v12 = vshrl.u32 %v3940_v42, 16  ;;  %v11701_v22 = vpop.xlane.xlu0 %3065 }
 0x37b   : > { %v3717_v34 = vxor.u32 %v3653_v40, %v3589_v30  ;;  %v3718_v11 = vxor.u32 %v3654_v62, %v3590_v19  ;;  %2634 = vadd.xlane.f32.xlu2 %v11518_v0  ;;  %7370 = vlog2.f32 %v4355_v46  ;;  %v3594_v61 = vadd.s32 %v3537_v50, %v9717_v3  ;;  %v15311_v0 = vld [vmem:[#allocation67_spill] sm:$0xff]  ;;  %v11699_v50 = vpop.xlane.xlu1 %2403 }
 0x37c   : > { %v4356_v24 = vadd.f32 1.1920929e-07, %v4292_v55  ;;  %v4067_v49 = vxor.u32 %v4003_v32, %v3939_v25  ;;  %7372 = vpow2.f32 %v11481_v16  ;;  %5590 = vmin.xlane.f32.xlu0 %v5589_v31  ;;  %v4068_v38 = vxor.u32 %v4004_v12, %v3940_v42  ;;  %15313 = vst [vmem:[#allocation66_spill] sm:$0xff] %v11699_v50  ;;  %v15316_v25 = vld [vmem:[#allocation68_spill] sm:$0xff]  ;;  %v15330_v42 = vld [vmem:[#allocation109_spill] sm:$0xff] }
 0x37d   : > { %v3781_v7 = vmul.u32 2246822507, %v3717_v34  ;;  %v3782_v29 = vmul.u32 2246822507, %v3718_v11  ;;  %v2522_v1 = vmul.f32 1.442695, %v15309_v21  ;;  %v15312_v51 = vsub.f32 %v10287_v63, %v11462_v20 }
 0x37e   : > { %7374 = vlog2.f32 %v4356_v24  ;;  %v4131_v57 = vand.u32 8388607, %v4067_v49  ;;  %v3657_v36 = vshrl.u32 %v3593_v53, 16  ;;  %15314 = vst [vmem:[#allocation67_spill] sm:$0xff] %v11701_v22  ;;  %v4132_v33 = vand.u32 8388607, %v4068_v38 }
 0x37f   : > { %7376 = vpow2.f32 %v11490_v45  ;;  %v2524_v16 = vmul.f32 1.442695, %v15312_v51  ;;  %v3845_v19 = vshrl.u32 %v3781_v7, 13  ;;  %v3658_v8 = vshrl.u32 %v3594_v61, 16  ;;  %v15334_v22 = vld [vmem:[#allocation81_spill] sm:$0xff] }
 0x380   : > { %v4195_v30 = vcvt.s32.f32 %v4131_v57  ;;  %v3454_v14 = vadd.s32 48, %v10724_v37  ;;  %7378 = vpow2.f32 %v11460_v15  ;;  %v4196_v45 = vcvt.s32.f32 %v4132_v33  ;;  %v11719_v57 = vpop.xlane.xlu2 %2406 }
 0x381   : > { %v3846_v40 = vshrl.u32 %v3782_v29, 13  ;;  %v7371_v62 = vpop.eup %7370  ;;  %7380 = vpow2.f32 %v2522_v1  ;;  %v2474_v55 = vsub.f32 %v10326_v59, %v11699_v50  ;;  %v3721_v32 = vxor.u32 %v3657_v36, %v3593_v53  ;;  %15319 = vst [vmem:[#allocation165_spill] sm:$0xff] %v11719_v57 }
 0x382   : > { %v4259_v46 = vmul.f32 1.1920929e-07, %v4195_v30  ;;  %v11709_v31 = vpop.eup %7372  ;;  %7382 = vpow2.f32 %v2524_v16  ;;  %v2475_v12 = vsub.f32 %v10329_v58, %v11699_v50  ;;  %v4462_v34 = vmul.f32 0.6931472, %v7371_v62 }
 0x383   : > { %15317 = vst [vmem:[#allocation106_spill] sm:$0xff] %v11709_v31  ;;  %v4260_v11 = vmul.f32 1.1920929e-07, %v4196_v45  ;;  %v11713_v15 = vxor.u32 %v3845_v19, %v3781_v7  ;;  %v11715_v38 = vxor.u32 %v3658_v8, %v3594_v61  ;;  %v3486_v21 = vmul.u32 256, %v3454_v14  ;;  %v15329_v45 = vld [vmem:[#allocation56_spill] sm:$0xff] }
 0x384   : > { %v7375_v24 = vpop.eup %7374  ;;  %v4323_v49 = vadd.f32 1.1920929e-07, %v4259_v46  ;;  %v11721_v36 = vmin.f32 %v4462_v34, -1e-12  ;;  %v11723_v16 = vxor.u32 %v3846_v40, %v3782_v29  ;;  %v2586_v62 = vmul.f32 1.442695, %v2474_v55 }
 0x385   : > { %v11717_v1 = vpop.eup %7376  ;;  %v4464_v53 = vmul.f32 0.6931472, %v7375_v24  ;;  %v4324_v51 = vadd.f32 1.1920929e-07, %v4260_v11  ;;  %v3785_v7 = vmul.u32 2246822507, %v3721_v32  ;;  %v2476_v29 = vsub.f32 %v15259_v27, %v11719_v57  ;;  %v11743_v11 = vpop.xlane.xlu0 %2409  ;;  %v15336_v24 = vld [vmem:[#allocation93_spill] sm:$0xff] }
 0x386   : > { %15318 = vst [vmem:[#allocation68_spill] sm:$0xff] %v11717_v1  ;;  %7384 = vlog2.f32 %v4323_v49  ;;  %v11727_v19 = vpop.eup %7378  ;;  %v2588_v46 = vmul.f32 1.442695, %v2475_v12  ;;  %v2639_v40 = vadd.f32 %v11717_v1, %v11709_v31  ;;  %v3786_v55 = vmul.u32 2246822507, %v11715_v38 }
 0x387   : > { %v11731_v48 = vmin.f32 %v4464_v53, -1e-12  ;;  %7386 = vrcp.f32 %v11721_v36  ;;  %v11734_v34 = vpop.eup %7380  ;;  %15326 = vst [vmem:[#allocation168_spill] sm:$0xff] %v11743_v11  ;;  %v11749_v49 = vadd.s32 %v10733_v56, %v3486_v21  ;;  %v15327_v53 = vld [vmem:[#allocation73_spill] sm:$0xff]  ;;  %v3849_v38 = vshrl.u32 %v3785_v7, 13 }
 0x388   : > { %15324 = vst [vmem:[#allocation166_spill] sm:$0xff] %v11734_v34  ;;  %7388 = vlog2.f32 %v4324_v51  ;;  %v11741_v32 = vpop.eup %7382  ;;  %v15328_v51 = vld [vmem:[#allocation55_spill] sm:$0xff]  ;;  %2640 = vadd.xlane.f32.xlu1 %v2639_v40  ;;  %v11763_v35 = vmul.f32 1.442695, %v2476_v29  ;;  %v3850_v40 = vshrl.u32 %v3786_v55, 13  ;;  %vm5204_vm13 = vweird.f32 %v11721_v36 }
 0x389   : > { %15325 = vst [vmem:[#allocation167_spill] sm:$0xff] %v11741_v32  ;;  %7390 = vrcp.f32 %v11731_v48  ;;  %v15337_v17 = vmul.u32 3266489909, %v11713_v15  ;;  %v15338_v12 = vmul.u32 3266489909, %v11723_v16  ;;  %v11778_v18 = vxor.u32 %v3849_v38, %v3785_v7 }
 0x38a   : > { %7392 = vpow2.f32 %v2586_v62  ;;  %v5208_v14 = vand.u32 2147483647, %v11721_v36  ;;  %v5210_v62 = vand.u32 2147483648, %v11721_v36  ;;  %v5225_v13 = vand.u32 2147483648, %v11731_v48 }
 0x38b   : > { %7394 = vpow2.f32 %v2588_v46  ;;  %v4037_v26 = vshrl.u32 %v15337_v17, 16  ;;  %v4038_v23 = vshrl.u32 %v15338_v12, 16  ;;  %v11773_v46 = vadd.s32 %v11749_v49, %v9700_v54 }
 0x38c   : > { %v7385_v21 = vpop.eup %7384  ;;  %v5223_v17 = vand.u32 2147483647, %v11731_v48  ;;  %vm5219_vm5 = vweird.f32 %v11731_v48  ;;  %vm11806_vm6 = vcmp.eq.f32.partialorder %v5208_v14, 8.507059e+37  ;;  %v11811_v50 = vxor.u32 %v3850_v40, %v3786_v55  ;;  %v15350_v55 = vld [vmem:[#allocation111_spill] sm:$0xff] }
 0x38d   : > { %v7387_v28 = vpop.eup %7386  ;;  %v4398_v6 = vmul.f32 0.6931472, %v7385_v21  ;;  %v15351_v40 = vld [vmem:[#allocation87_spill] sm:$0xff] }
 0x38e   : > { %v7389_v20 = vpop.eup %7388  ;;  %v5200_v29 = vmul.f32 %v7387_v28, %v11721_v36  ;;  %vm5205_vm12 = vweird.f32 %v7387_v28  ;;  %vm11821_vm15 = vcmp.eq.f32.partialorder %v5223_v17, 8.507059e+37  ;;  %v15352_v33 = vpack.c.bf16 %v15350_v55, %v15351_v40  ;;  %v15400_v40 = vld [vmem:[#allocation153_spill] sm:$0xff] }
 0x38f   : > { %v7391_v21 = vpop.eup %7390  ;;  %v4400_v12 = vmul.f32 0.6931472, %v7389_v20  ;;  %v11782_v9 = vmin.f32 %v4398_v6, -1e-12  ;;  %vm11802_vm11 = vmor %vm5204_vm13, %vm5205_vm12 }
 0x390   : > { %v11784_v1 = vpop.eup %7392  ;;  %v5201_v31 = vsub.f32 1.0, %v5200_v29  ;;  %v5215_v47 = vmul.f32 %v7391_v21, %v11731_v48  ;;  %vm5220_vm9 = vweird.f32 %v7391_v21  ;;  %2264 = vst [vmem:[%s11815_s28 + $0x8] sm:$0xff] %v15352_v33  ;;  %v15358_v33 = vld [vmem:[#allocation112_spill] sm:$0xff] }
 0x391   : > { %15339 = vst [vmem:[#allocation73_spill] sm:$0xff] %v11784_v1  ;;  %v11791_v7 = vpop.eup %7394  ;;  %v11794_v20 = vmin.f32 %v4400_v12, -1e-12  ;;  %7396 = vrcp.f32 %v11782_v9  ;;  %v4728_v29 = vand.u32 2147483647, %v11782_v9  ;;  %v4730_v1 = vand.u32 2147483648, %v11782_v9  ;;  %vm11832_vm14 = vmor %vm5219_vm5, %vm5220_vm9 }
 0x392   : > { %15340 = vst [vmem:[#allocation55_spill] sm:$0xff] %v11791_v7  ;;  %v5202_v6 = vmul.f32 %v7387_v28, %v5201_v31  ;;  %v5216_v38 = vsub.f32 1.0, %v5215_v47  ;;  %v5211_v12 = vor.u32 1.1754944e-38, %v5210_v62  ;;  %v15345_v47 = vld [vmem:[#allocation96_spill] sm:$0xff]  ;;  %v15346_v31 = vld [vmem:[#allocation95_spill] sm:$0xff]  ;;  %v5226_v62 = vor.u32 1.1754944e-38, %v5225_v13 }
 0x393   : > { %7398 = vrcp.f32 %v11794_v20  ;;  %v15347_v61 = vpack.c.bf16 %v15345_v47, %v15346_v31  ;;  %vm4724_vm4 = vweird.f32 %v11782_v9  ;;  %vm4739_vm1 = vweird.f32 %v11794_v20  ;;  %v15369_v7 = vld [vmem:[#allocation116_spill] sm:$0xff] }
 0x394   : > { %v5203_v36 = vadd.f32 %v7387_v28, %v5202_v6  ;;  %v5217_v14 = vmul.f32 %v7391_v21, %v5216_v38  ;;  %v15356_v13 = vmul.u32 3266489909, %v11723_v16  ;;  %v15357_v38 = vld [vmem:[#allocation113_spill] sm:$0xff]  ;;  %vm11848_vm8 = vcmp.eq.f32.partialorder %v4728_v29, 8.507059e+37  ;;  %v15365_v29 = vld [vmem:[#allocation115_spill] sm:$0xff] }
 0x395   : > { %2263 = vst [vmem:[%s11815_s28] sm:$0xff] %v15347_v61  ;;  %v15355_v61 = vmul.u32 3266489909, %v11713_v15  ;;  %v15359_v31 = vpack.c.bf16 %v15357_v38, %v15358_v33  ;;  %v4731_v30 = vor.u32 1.1754944e-38, %v4730_v1  ;;  %v4743_v15 = vand.u32 2147483647, %v11794_v20 }
 0x396   : > { %v4102_v6 = vxor.u32 %v4038_v23, %v15356_v13  ;;  %v5207_v48 = vsel %vm11802_vm11, %v7387_v28, %v5203_v36  ;;  %v5218_v55 = vadd.f32 %v7391_v21, %v5217_v14  ;;  %v4745_v28 = vand.u32 2147483648, %v11794_v20  ;;  %v15366_v14 = vld [vmem:[#allocation65_spill] sm:$0xff] }
 0x397   : > { %v4101_v17 = vxor.u32 %v4037_v26, %v15355_v61  ;;  %2265 = vst [vmem:[%s11815_s28 + $0x10] sm:$0xff] %v15359_v31  ;;  %v15362_v26 = vld [vmem:[#allocation60_spill] sm:$0xff]  ;;  %v15363_v61 = vld [vmem:[#allocation114_spill] sm:$0xff]  ;;  %v7397_v23 = vpop.eup %7396  ;;  %v5212_v13 = vsel %vm11806_vm6, %v5211_v12, %v5207_v48  ;;  %v15367_v38 = vpack.c.bf16 %v15365_v29, %v15366_v14  ;;  %v15370_v12 = vpack.c.bf16 %v15170_v44, %v15369_v7  ;;  %v15376_v14 = vld [vmem:[#allocation43_spill] sm:$0xff] }
 0x398   : > { %v15364_v16 = vpack.c.bf16 %v15362_v26, %v15363_v61  ;;  %v4166_v36 = vand.u32 8388607, %v4102_v6  ;;  %v11865_v1 = vmul.f32 %v11248_v10, %v5212_v13  ;;  %v5222_v33 = vsel %vm11832_vm14, %v7391_v21, %v5218_v55  ;;  %v15373_v21 = vld [vmem:[#allocation146_spill] sm:$0xff]  ;;  %v15375_v29 = vld [vmem:[#allocation44_spill] sm:$0xff] }
 0x399   : > { %v4165_v2 = vand.u32 8388607, %v4101_v17  ;;  %2267 = vst [vmem:[%s11815_s28 + $0x20] sm:$0xff] %v15367_v38  ;;  %v4720_v31 = vmul.f32 %v7397_v23, %v11782_v9  ;;  %vm4725_vm7 = vweird.f32 %v7397_v23  ;;  %v7399_v17 = vpop.eup %7398  ;;  %v5227_v6 = vsel %vm11821_vm15, %v5226_v62, %v5222_v33 }
 0x39a   : > { %2266 = vst [vmem:[%s11815_s28 + $0x18] sm:$0xff] %v15364_v16  ;;  %v4230_v26 = vcvt.s32.f32 %v4166_v36  ;;  %v3977_v61 = vmul.u32 3266489909, %v11778_v18  ;;  %v15371_v16 = vld [vmem:[#allocation49_spill] sm:$0xff]  ;;  %v11882_v55 = vmul.f32 %v15373_v21, %v5227_v6  ;;  %v4735_v44 = vmul.f32 %v7399_v17, %v11794_v20  ;;  %v15380_v6 = vld [vmem:[#allocation64_spill] sm:$0xff]  ;;  %vm11905_vm13 = vmor %vm4724_vm4, %vm4725_vm7 }
 0x39b   : > { %15368 = vst [vmem:[#allocation56_spill] sm:$0xff] %v11865_v1  ;;  %v4229_v48 = vcvt.s32.f32 %v4165_v2  ;;  %v15372_v47 = vpack.c.bf16 %v15213_v43, %v15371_v16  ;;  %v4721_v13 = vsub.f32 1.0, %v4720_v31  ;;  %vm4740_vm10 = vweird.f32 %v7399_v17 }
 0x39c   : > { %2268 = vst [vmem:[%s11815_s28 + $0x28] sm:$0xff] %v15370_v12  ;;  %v15377_v8 = vpack.c.bf16 %v15375_v29, %v15376_v14  ;;  %v4294_v2 = vmul.f32 1.1920929e-07, %v4230_v26  ;;  %v3978_v18 = vmul.u32 3266489909, %v11811_v50  ;;  %v4041_v36 = vshrl.u32 %v3977_v61, 16  ;;  %v15379_v12 = vld [vmem:[#allocation101_spill] sm:$0xff]  ;;  %vm11924_vm5 = vmor %vm4739_vm1, %vm4740_vm10 }
 0x39d   : > { %2269 = vst [vmem:[%s11815_s28 + $0x30] sm:$0xff] %v15372_v47  ;;  %v4293_v62 = vmul.f32 1.1920929e-07, %v4229_v48  ;;  %v15378_v43 = vpack.c.bf16 %v10287_v63, %v10273_v4  ;;  %v5592_v38 = vmin.f32 %v11865_v1, %v11882_v55  ;;  %v4722_v33 = vmul.f32 %v7397_v23, %v4721_v13  ;;  %v15384_v47 = vld [vmem:[#allocation46_spill] sm:$0xff]  ;;  %v15385_v13 = vld [vmem:[#allocation45_spill] sm:$0xff] }
 0x39e   : > { %15374 = vst [vmem:[#allocation109_spill] sm:$0xff] %v11882_v55  ;;  %v4736_v31 = vsub.f32 1.0, %v4735_v44  ;;  %v3558_v7 = vadd.s32 %v11749_v49, %v9717_v3  ;;  %v15381_v48 = vpack.c.bf16 %v15379_v12, %v15380_v6  ;;  %v4358_v63 = vadd.f32 1.1920929e-07, %v4294_v2  ;;  %v15407_v14 = vld [vmem:[#allocation98_spill] sm:$0xff] }
 0x39f   : > { %2270 = vst [vmem:[%s11815_s28 + $0x38] sm:$0xff] %v15377_v8  ;;  %v4357_v4 = vadd.f32 1.1920929e-07, %v4293_v62  ;;  %v4042_v26 = vshrl.u32 %v3978_v18, 16  ;;  %v4105_v16 = vxor.u32 %v4041_v36, %v3977_v61  ;;  %v15386_v44 = vpack.c.bf16 %v15384_v47, %v15385_v13  ;;  %5593 = vmin.xlane.f32.xlu2 %v5592_v38  ;;  %v15402_v61 = vld [vmem:[#allocation54_spill] sm:$0xff] }
 0x3a0   : > { %2271 = vst [vmem:[%s11815_s28 + $0x40] sm:$0xff] %v15378_v43  ;;  %v4723_v49 = vadd.f32 %v7397_v23, %v4722_v33  ;;  %v4737_v29 = vmul.f32 %v7399_v17, %v4736_v31  ;;  %vm11913_vm12 = vcmp.eq.f32.partialorder %v4743_v15, 8.507059e+37  ;;  %v4746_v9 = vor.u32 1.1754944e-38, %v4745_v28 }
 0x3a1   : > { %2272 = vst [vmem:[%s11815_s28 + $0x48] sm:$0xff] %v15381_v48  ;;  %v15389_v8 = vpack.c.bf16 %v15316_v25, %v15315_v52  ;;  %7400 = vlog2.f32 %v4357_v4  ;;  %v4106_v62 = vxor.u32 %v4042_v26, %v3978_v18  ;;  %v4169_v2 = vand.u32 8388607, %v4105_v16 }
 0x3a2   : > { %2273 = vst [vmem:[%s11815_s28 + $0x50] sm:$0xff] %v15386_v44  ;;  %v3621_v15 = vshrl.u32 %v11773_v46, 16  ;;  %v15392_v28 = vpack.c.bf16 %v15328_v51, %v15327_v53  ;;  %v4727_v36 = vsel %vm11905_vm13, %v7397_v23, %v4723_v49  ;;  %v4738_v43 = vadd.f32 %v7399_v17, %v4737_v29 }
 0x3a3   : > { %2274 = vst [vmem:[%s11815_s28 + $0x58] sm:$0xff] %v15389_v8  ;;  %7402 = vlog2.f32 %v4358_v63  ;;  %v3622_v20 = vshrl.u32 %v3558_v7, 16  ;;  %v15393_v38 = vpack.c.bf16 %v15330_v42, %v15329_v45  ;;  %v15394_v18 = vsub.f32 %v15260_v60, %v11719_v57  ;;  %v15397_v63 = vld [vmem:[#allocation133_spill] sm:$0xff] }
 0x3a4   : > { %2275 = vst [vmem:[%s11815_s28 + $0x60] sm:$0xff] %v15392_v28  ;;  %v15395_v31 = vsub.f32 %v15310_v41, %v11743_v11  ;;  %v4732_v50 = vsel %vm11848_vm8, %v4731_v30, %v4727_v36  ;;  %v3455_v23 = vadd.s32 56, %v10724_v37  ;;  %v15396_v4 = vpack.c.bf16 %v15334_v22, %v15333_v5  ;;  %v15401_v36 = vld [vmem:[#allocation76_spill] sm:$0xff] }
 0x3a5   : > { %2276 = vst [vmem:[%s11815_s28 + $0x68] sm:$0xff] %v15393_v38  ;;  %v2592_v33 = vmul.f32 1.442695, %v15394_v18  ;;  %v11953_v26 = vmul.f32 %v15397_v63, %v4732_v50  ;;  %v4742_v16 = vsel %vm11924_vm5, %v7399_v17, %v4738_v43  ;;  %v4170_v44 = vand.u32 8388607, %v4106_v62  ;;  %v15404_v62 = vld [vmem:[#allocation103_spill] sm:$0xff] }
 0x3a6   : > { %v2594_v48 = vmul.f32 1.442695, %v15395_v31  ;;  %2277 = vst [vmem:[%s11815_s28 + $0x70] sm:$0xff] %v15396_v4  ;;  %v4233_v49 = vcvt.s32.f32 %v4169_v2  ;;  %v15399_v29 = vpack.c.bf16 %v15336_v24, %v15335_v39  ;;  %7404 = vpow2.f32 %v11763_v35  ;;  %v15406_v18 = vld [vmem:[#allocation100_spill] sm:$0xff]  ;;  %v15410_v63 = vld [vmem:[#allocation61_spill] sm:$0xff]  ;;  %v15447_v24 = vld [vmem:[#allocation74_spill] sm:$0xff] }
 0x3a7   : > { %15398 = vst [vmem:[#allocation84_spill] sm:$0xff] %v11953_v26  ;;  %v4747_v30 = vsel %vm11913_vm12, %v4746_v9, %v4742_v16  ;;  %v2687_v8 = vadd.f32 %v11727_v19, %v15400_v40  ;;  %v3685_v28 = vxor.u32 %v3621_v15, %v11773_v46  ;;  %v15403_v17 = vpack.c.bf16 %v15401_v36, %v15402_v61  ;;  %v7401_v9 = vpop.eup %7400  ;;  %v11980_v15 = vpop.xlane.xlu2 %2361  ;;  %v15411_v16 = vld [vmem:[#allocation50_spill] sm:$0xff] }
 0x3a8   : > { %2278 = vst [vmem:[%s11815_s28 + $0x78] sm:$0xff] %v15399_v29  ;;  %v11972_v2 = vmul.f32 %v15404_v62, %v4747_v30  ;;  %v4234_v43 = vcvt.s32.f32 %v4170_v44  ;;  %v4297_v38 = vmul.f32 1.1920929e-07, %v4233_v49  ;;  %v3686_v35 = vxor.u32 %v3622_v20, %v3558_v7  ;;  %v15413_v49 = vld [vmem:[#allocation83_spill] sm:$0xff]  ;;  %v11992_v61 = vpop.xlane.xlu1 %2358 }
 0x3a9   : > { %2279 = vst [vmem:[%s11815_s28 + $0x80] sm:$0xff] %v15403_v17  ;;  %v15408_v31 = vpack.c.bf16 %v15406_v18, %v15407_v14  ;;  %7406 = vpow2.f32 %v2592_v33  ;;  %v2479_v46 = vsub.f32 %v15311_v0, %v11743_v11  ;;  %v3749_v50 = vmul.u32 2246822507, %v3685_v28  ;;  %v7403_v44 = vpop.eup %7402  ;;  %2688 = vadd.xlane.f32.xlu2 %v2687_v8  ;;  %v15414_v30 = vld [vmem:[#allocation99_spill] sm:$0xff]  ;;  %v15417_v14 = vld [vmem:[#allocation94_spill] sm:$0xff] }
 0x3aa   : > { %15405 = vst [vmem:[#allocation96_spill] sm:$0xff] %v11972_v2  ;;  %v3487_v4 = vmul.u32 256, %v3455_v23  ;;  %v15412_v29 = vpack.c.bf16 %v15410_v63, %v15411_v16  ;;  %7408 = vpow2.f32 %v2594_v48  ;;  %v5544_v7 = vmin.f32 %v11953_v26, %v11972_v2  ;;  %v15446_v26 = vld [vmem:[#allocation75_spill] sm:$0xff] }
 0x3ab   : > { %2280 = vst [vmem:[%s11815_s28 + $0x88] sm:$0xff] %v15408_v31  ;;  %v4466_v20 = vmul.f32 0.6931472, %v7401_v9  ;;  %v4298_v33 = vmul.f32 1.1920929e-07, %v4234_v43  ;;  %v15415_v36 = vpack.c.bf16 %v15413_v49, %v15414_v30  ;;  %v4468_v23 = vmul.f32 0.6931472, %v7403_v44 }
 0x3ac   : > { %15409 = vst [vmem:[#allocation95_spill] sm:$0xff] %v11980_v15  ;;  %v4361_v28 = vadd.f32 1.1920929e-07, %v4297_v38  ;;  %v3750_v17 = vmul.u32 2246822507, %v3686_v35  ;;  %v3813_v62 = vshrl.u32 %v3749_v50, 13  ;;  %5545 = vmin.xlane.f32.xlu0 %v5544_v7  ;;  %v2446_v48 = vsub.f32 %v15385_v13, %v11980_v15  ;;  %v15418_v31 = vld [vmem:[#allocation53_spill] sm:$0xff]  ;;  %v12003_v63 = vpop.eup %7404 }
 0x3ad   : > { %2281 = vst [vmem:[%s11815_s28 + $0x90] sm:$0xff] %v15412_v29  ;;  %v11996_v18 = vmin.f32 %v4466_v20, -1e-12  ;;  %v4362_v8 = vadd.f32 1.1920929e-07, %v4298_v33  ;;  %v3520_v43 = vadd.s32 %v10733_v56, %v3487_v4  ;;  %v15419_v9 = vpack.c.bf16 %v15417_v14, %v15418_v31  ;;  %v15420_v29 = vld [vmem:[#allocation51_spill] sm:$0xff]  ;;  %v15423_v7 = vld [vmem:[#allocation85_spill] sm:$0xff] }
 0x3ae   : > { %2282 = vst [vmem:[%s11815_s28 + $0x98] sm:$0xff] %v15415_v36  ;;  %v12005_v38 = vmin.f32 %v4468_v23, -1e-12  ;;  %7410 = vlog2.f32 %v4361_v28  ;;  %v3814_v35 = vshrl.u32 %v3750_v17, 13  ;;  %v3877_v16 = vxor.u32 %v3813_v62, %v3749_v50  ;;  %v15421_v44 = vld [vmem:[#allocation47_spill] sm:$0xff]  ;;  %v15424_v20 = vld [vmem:[#allocation86_spill] sm:$0xff] }
 0x3af   : > { %15416 = vst [vmem:[#allocation111_spill] sm:$0xff] %v11992_v61  ;;  %v15422_v13 = vpack.c.bf16 %v15420_v29, %v15421_v44  ;;  %v2261_v33 = vpack.c.bf16 %v15424_v20, %v15423_v7  ;;  %v15425_v4 = vld [vmem:[#allocation88_spill] sm:$0xff]  ;;  %v15426_v49 = vld [vmem:[#allocation89_spill] sm:$0xff]  ;;  %7412 = vrcp.f32 %v11996_v18  ;;  %v12022_v50 = vpop.eup %7406  ;;  %v12026_v31 = vmul.f32 1.442695, %v2479_v46  ;;  %v15431_v44 = vld [vmem:[#allocation90_spill] sm:$0xff] }
 0x3b0   : > { %2283 = vst [vmem:[%s11815_s28 + $0xa0] sm:$0xff] %v15419_v9  ;;  %v2262_v30 = vpack.c.bf16 %v15426_v49, %v15425_v4  ;;  %v15427_v23 = vld [vmem:[#allocation48_spill] sm:$0xff]  ;;  %7414 = vrcp.f32 %v12005_v38  ;;  %v12035_v36 = vpop.eup %7408  ;;  %v3878_v46 = vxor.u32 %v3814_v35, %v3750_v17  ;;  %v2681_v62 = vadd.f32 %v15373_v21, %v11248_v10  ;;  %v15435_v17 = vld [vmem:[#allocation147_spill] sm:$0xff] }
 0x3b1   : > { %2284 = vst [vmem:[%s11815_s28 + $0xa8] sm:$0xff] %v15422_v13  ;;  %v15428_v28 = vld [vmem:[#allocation52_spill] sm:$0xff]  ;;  %7416 = vlog2.f32 %v4362_v8  ;;  %vm5234_vm9 = vweird.f32 %v11996_v18  ;;  %v15436_v8 = vld [vmem:[#allocation149_spill] sm:$0xff]  ;;  %v3560_v10 = vadd.s32 %v3520_v43, %v9717_v3  ;;  %v15437_v21 = vpack.c.bf16 %v15311_v0, %v15310_v41 }
 0x3b2   : > { %v15429_v14 = vpack.c.bf16 %v15427_v23, %v15428_v28  ;;  %v15430_v29 = vld [vmem:[#allocation72_spill] sm:$0xff]  ;;  %v12037_v23 = vmul.f32 1.442695, %v2446_v48  ;;  %v2642_v28 = vadd.f32 %v11741_v32, %v11734_v34  ;;  %v15434_v48 = vpack.c.bf16 %v15260_v60, %v15259_v27  ;;  %2293 = vst [vmem:[%s11815_s28 + $0xf0] sm:$0xff] %v2261_v33 }
 0x3b3   : > { %v15432_v13 = vpack.c.bf16 %v15430_v29, %v15431_v44  ;;  %v5238_v29 = vand.u32 2147483647, %v11996_v18  ;;  %v3941_v44 = vmul.u32 3266489909, %v3877_v16  ;;  %2289 = vst [vmem:[%s11815_s28 + $0xd0] sm:$0xff] %v15437_v21  ;;  %v5240_v16 = vand.u32 2147483648, %v11996_v18 }
 0x3b4   : > { %2285 = vst [vmem:[%s11815_s28 + $0xb0] sm:$0xff] %v15429_v14  ;;  %v15433_v14 = vpack.c.bf16 %v10329_v58, %v10326_v59  ;;  %2643 = vadd.xlane.f32.xlu2 %v2642_v28  ;;  %v2636_v59 = vadd.f32 %v15436_v8, %v15435_v17  ;;  %v3942_v58 = vmul.u32 3266489909, %v3878_v46  ;;  %v7411_v35 = vpop.eup %7410  ;;  %v5253_v27 = vand.u32 2147483647, %v12005_v38  ;;  %v15438_v28 = vld [vmem:[#allocation79_spill] sm:$0xff]  ;;  %2682 = vadd.xlane.f32.xlu0 %v2681_v62 }
 0x3b5   : > { %2286 = vst [vmem:[%s11815_s28 + $0xb8] sm:$0xff] %v15432_v13  ;;  %v3559_v13 = vadd.s32 %v3520_v43, %v9700_v54  ;;  %v4005_v60 = vshrl.u32 %v3941_v44, 16  ;;  %v7413_v11 = vpop.eup %7412  ;;  %vm5249_vm11 = vweird.f32 %v12005_v38  ;;  %v5255_v41 = vand.u32 2147483648, %v12005_v38  ;;  %v15441_v46 = vld [vmem:[#allocation59_spill] sm:$0xff]  ;;  %v15442_v21 = vld [vmem:[#allocation58_spill] sm:$0xff] }
 0x3b6   : > { %2287 = vst [vmem:[%s11815_s28 + $0xc0] sm:$0xff] %v15433_v14  ;;  %v4474_v0 = vmul.f32 0.6931472, %v7411_v35  ;;  %v4006_v43 = vshrl.u32 %v3942_v58, 16  ;;  %v15443_v57 = vpack.c.bf16 %v15441_v46, %v15442_v21  ;;  %v7415_v55 = vpop.eup %7414  ;;  %v5230_v1 = vmul.f32 %v7413_v11, %v11996_v18 }
 0x3b7   : > { %2288 = vst [vmem:[%s11815_s28 + $0xc8] sm:$0xff] %v15434_v48  ;;  %v3623_v14 = vshrl.u32 %v3559_v13, 16  ;;  %v15439_v48 = vld [vmem:[#allocation97_spill] sm:$0xff]  ;;  %vm12074_vm6 = vcmp.eq.f32.partialorder %v5238_v29, 8.507059e+37  ;;  %v4069_v62 = vxor.u32 %v4005_v60, %v3941_v44  ;;  %v15448_v39 = vpack.c.bf16 %v15446_v26, %v15447_v24  ;;  %v7417_v35 = vpop.eup %7416 }
 0x3b8   : > { %v15440_v9 = vpack.c.bf16 %v15438_v28, %v15439_v48  ;;  %2291 = vst [vmem:[%s11815_s28 + $0xe0] sm:$0xff] %v15443_v57  ;;  %v5245_v49 = vmul.f32 %v7415_v55, %v12005_v38  ;;  %v12083_v4 = vmin.f32 %v4474_v0, -1e-12  ;;  %v4070_v57 = vxor.u32 %v4006_v43, %v3942_v58 }
 0x3b9   : > { %2292 = vst [vmem:[%s11815_s28 + $0xe8] sm:$0xff] %v15448_v39  ;;  %v3687_v20 = vxor.u32 %v3623_v14, %v3559_v13  ;;  %v5231_v7 = vsub.f32 1.0, %v5230_v1  ;;  %vm5235_vm15 = vweird.f32 %v7413_v11  ;;  %v4476_v29 = vmul.f32 0.6931472, %v7417_v35 }
 0x3ba   : > { %2290 = vst [vmem:[%s11815_s28 + $0xd8] sm:$0xff] %v15440_v9  ;;  %v3624_v9 = vshrl.u32 %v3560_v10, 16  ;;  %v4133_v22 = vand.u32 8388607, %v4069_v62  ;;  %v5246_v32 = vsub.f32 1.0, %v5245_v49  ;;  %vm5250_vm14 = vweird.f32 %v7415_v55  ;;  %vm12093_vm4 = vmor %vm5234_vm9, %vm5235_vm15 }
 0x3bb   : > { %2294 = vst [vmem:[%s11815_s28 + $0xf8] sm:$0xff] %v2262_v30  ;;  %7418 = vrcp.f32 %v12083_v4  ;;  %v3473_v44 = vadd.s32 200, %v10724_v37  ;;  %v5232_v39 = vmul.f32 %v7413_v11, %v5231_v7  ;;  %v12089_v60 = vmin.f32 %v4476_v29, -1e-12  ;;  %vm12099_vm1 = vmor %vm5249_vm11, %vm5250_vm14  ;;  %v15454_v29 = vld [vmem:[#allocation152_spill] sm:$0xff] }
 0x3bc   : > { %v4134_v34 = vand.u32 8388607, %v4070_v57  ;;  %v3688_v0 = vxor.u32 %v3624_v9, %v3560_v10  ;;  %v5241_v1 = vor.u32 1.1754944e-38, %v5240_v16  ;;  %v5247_v13 = vmul.f32 %v7415_v55, %v5246_v32  ;;  %2637 = vadd.xlane.f32.xlu0 %v2636_v59  ;;  %v15453_v59 = vld [vmem:[#allocation151_spill] sm:$0xff] }
 0x3bd   : > { %v4197_v30 = vcvt.s32.f32 %v4133_v22  ;;  %v3751_v49 = vmul.u32 2246822507, %v3687_v20  ;;  %v5233_v58 = vadd.f32 %v7413_v11, %v5232_v39  ;;  %v5256_v7 = vor.u32 1.1754944e-38, %v5255_v41 }
 0x3be   : > { %v5300_v10 = vand.u32 2147483648, %v12083_v4  ;;  %7420 = vrcp.f32 %v12089_v60  ;;  %v5248_v18 = vadd.f32 %v7415_v55, %v5247_v13  ;;  %vm5254_vm8 = vcmp.eq.f32.partialorder %v5253_v27, 8.507059e+37 }
 0x3bf   : > { %v4198_v43 = vcvt.s32.f32 %v4134_v34  ;;  %v3505_v16 = vmul.u32 256, %v3473_v44  ;;  %v5237_v22 = vsel %vm12093_vm4, %v7413_v11, %v5233_v58  ;;  %v4261_v32 = vmul.f32 1.1920929e-07, %v4197_v30 }
 0x3c0   : > { %v3752_v20 = vmul.u32 2246822507, %v3688_v0  ;;  %v3815_v38 = vshrl.u32 %v3751_v49, 13  ;;  %v5242_v9 = vsel %vm12074_vm6, %v5241_v1, %v5237_v22  ;;  %v5252_v41 = vsel %vm12099_vm1, %v7415_v55, %v5248_v18 }
 0x3c1   : > { %v7419_v62 = vpop.eup %7418  ;;  %vm5294_vm7 = vweird.f32 %v12083_v4  ;;  %v5298_v27 = vand.u32 2147483647, %v12083_v4  ;;  %v12114_v34 = vmul.f32 %v15453_v59, %v5242_v9  ;;  %v5257_v35 = vsel %vm5254_vm8, %v5256_v7, %v5252_v41 }
 0x3c2   : > { %v5290_v11 = vmul.f32 %v7419_v62, %v12083_v4  ;;  %v5301_v57 = vor.u32 1.1754944e-38, %v5300_v10  ;;  %v12118_v44 = vmul.f32 %v15454_v29, %v5257_v35  ;;  %v4262_v39 = vmul.f32 1.1920929e-07, %v4198_v43 }
 0x3c3   : > { %v4325_v2 = vadd.f32 1.1920929e-07, %v4261_v32  ;;  %v3816_v0 = vshrl.u32 %v3752_v20, 13  ;;  %vm5295_vm10 = vweird.f32 %v7419_v62  ;;  %vm5309_vm13 = vweird.f32 %v12089_v60 }
 0x3c4   : > { %15455 = vst [vmem:[#allocation87_spill] sm:$0xff] %v12118_v44  ;;  %v7421_v33 = vpop.eup %7420  ;;  %v5291_v1 = vsub.f32 1.0, %v5290_v11  ;;  %v3879_v55 = vxor.u32 %v3815_v38, %v3751_v49  ;;  %v5595_v13 = vmin.f32 %v12114_v34, %v12118_v44  ;;  %v5315_v58 = vand.u32 2147483648, %v12089_v60  ;;  %vm12127_vm12 = vmor %vm5294_vm7, %vm5295_vm10  ;;  %v12172_v11 = vpop.xlane.xlu0 %2364 }
 0x3c5   : > { %v5305_v30 = vmul.f32 %v7421_v33, %v12089_v60  ;;  %v4326_v14 = vadd.f32 1.1920929e-07, %v4262_v39  ;;  %7422 = vlog2.f32 %v4325_v2  ;;  %v3880_v10 = vxor.u32 %v3816_v0, %v3752_v20  ;;  %v12147_v2 = vpop.xlane.xlu1 %3113  ;;  %15467 = vst [vmem:[#allocation114_spill] sm:$0xff] %v12172_v11 }
 0x3c6   : > { %v5292_v7 = vmul.f32 %v7419_v62, %v5291_v1  ;;  %v3943_v18 = vmul.u32 3266489909, %v3879_v55  ;;  %5596 = vmin.xlane.f32.xlu1 %v5595_v13  ;;  %vm5310_vm5 = vweird.f32 %v7421_v33  ;;  %v5313_v22 = vand.u32 2147483647, %v12089_v60  ;;  %15461 = vst [vmem:[#allocation113_spill] sm:$0xff] %v12147_v2  ;;  %v15462_v1 = vld [vmem:[#allocation73_spill] sm:$0xff] }
 0x3c7   : > { %v5306_v49 = vsub.f32 1.0, %v5305_v30  ;;  %7424 = vlog2.f32 %v4326_v14  ;;  %v15458_v32 = vsub.f32 %v15384_v47, %v11980_v15  ;;  %vm5299_vm9 = vcmp.eq.f32.partialorder %v5298_v27, 8.507059e+37  ;;  %vm12142_vm11 = vmor %vm5309_vm13, %vm5310_vm5 }
 0x3c8   : > { %v5293_v9 = vadd.f32 %v7419_v62, %v5292_v7  ;;  %v3538_v20 = vadd.s32 %v10733_v56, %v3505_v16  ;;  %7426 = vpow2.f32 %v12026_v31  ;;  %v3944_v41 = vmul.u32 3266489909, %v3880_v10 }
 0x3c9   : > { %v2532_v38 = vmul.f32 1.442695, %v15458_v32  ;;  %v5307_v4 = vmul.f32 %v7421_v33, %v5306_v49  ;;  %v4007_v59 = vshrl.u32 %v3943_v18, 16  ;;  %7428 = vpow2.f32 %v12037_v23 }
 0x3ca   : > { %v5297_v35 = vsel %vm12127_vm12, %v7419_v62, %v5293_v9  ;;  %v5316_v47 = vor.u32 1.1754944e-38, %v5315_v58  ;;  %v3471_v27 = vadd.s32 184, %v10724_v37  ;;  %vm5314_vm6 = vcmp.eq.f32.partialorder %v5313_v22, 8.507059e+37  ;;  %v15465_v22 = vld [vmem:[#allocation55_spill] sm:$0xff] }
 0x3cb   : > { %v5302_v16 = vsel %vm5299_vm9, %v5301_v57, %v5297_v35  ;;  %v5308_v29 = vadd.f32 %v7421_v33, %v5307_v4  ;;  %v4008_v31 = vshrl.u32 %v3944_v41, 16  ;;  %v7423_v39 = vpop.eup %7422  ;;  %7430 = vpow2.f32 %v2532_v38 }
 0x3cc   : > { %v2693_v23 = vadd.f32 %v12022_v50, %v12003_v63  ;;  %v4071_v62 = vxor.u32 %v4007_v59, %v3943_v18  ;;  %v3595_v60 = vadd.s32 %v3538_v20, %v9700_v54  ;;  %v12153_v55 = vmul.f32 %v15462_v1, %v5302_v16  ;;  %v12340_v44 = vpop.xlane.xlu0 %3119 }
 0x3cd   : > { %v7425_v0 = vpop.eup %7424  ;;  %v5312_v57 = vsel %vm12142_vm11, %v7421_v33, %v5308_v29  ;;  %v4402_v13 = vmul.f32 0.6931472, %v7423_v39  ;;  %v4072_v30 = vxor.u32 %v4008_v31, %v3944_v41  ;;  %v3503_v10 = vmul.u32 256, %v3471_v27  ;;  %15496 = vst [vmem:[#allocation46_spill] sm:$0xff] %v12340_v44 }
 0x3ce   : > { %15463 = vst [vmem:[#allocation112_spill] sm:$0xff] %v12153_v55  ;;  %v5317_v58 = vsel %vm5314_vm6, %v5316_v47, %v5312_v57  ;;  %v4404_v14 = vmul.f32 0.6931472, %v7425_v0  ;;  %v4135_v7 = vand.u32 8388607, %v4071_v62  ;;  %v12157_v43 = vpop.eup %7426  ;;  %v15464_v18 = vsub.f32 %v15380_v6, %v11992_v61  ;;  %2694 = vadd.xlane.f32.xlu1 %v2693_v23 }
 0x3cf   : > { %v12163_v32 = vmul.f32 %v15465_v22, %v5317_v58  ;;  %v12165_v38 = vmin.f32 %v4402_v13, -1e-12  ;;  %v4136_v9 = vand.u32 8388607, %v4072_v30  ;;  %v12167_v33 = vpop.eup %7428  ;;  %v3596_v59 = vadd.s32 %v3538_v20, %v9717_v3 }
 0x3d0   : > { %v2526_v49 = vmul.f32 1.442695, %v15464_v18  ;;  %v12169_v4 = vmin.f32 %v4404_v14, -1e-12  ;;  %v4199_v41 = vcvt.s32.f32 %v4135_v7  ;;  %v3659_v35 = vshrl.u32 %v3595_v60, 16 }
 0x3d1   : > { %15466 = vst [vmem:[#allocation60_spill] sm:$0xff] %v12163_v32  ;;  %v5601_v6 = vmin.f32 %v12153_v55, %v12163_v32  ;;  %7432 = vrcp.f32 %v12165_v38  ;;  %v12177_v47 = vpop.eup %7430  ;;  %v3536_v27 = vadd.s32 %v10733_v56, %v3503_v10  ;;  %v15468_v16 = vsub.f32 %v15379_v12, %v11992_v61  ;;  %v12192_v12 = vpop.xlane.xlu1 %3068 }
 0x3d2   : > { %7434 = vrcp.f32 %v12169_v4  ;;  %v4200_v20 = vcvt.s32.f32 %v4136_v9  ;;  %v4263_v31 = vmul.f32 1.1920929e-07, %v4199_v41  ;;  %v2448_v39 = vsub.f32 %v15315_v52, %v12172_v11  ;;  %15469 = vst [vmem:[#allocation115_spill] sm:$0xff] %v12192_v12 }
 0x3d3   : > { %v12184_v29 = vmul.f32 1.442695, %v15468_v16  ;;  %5602 = vmin.xlane.f32.xlu2 %v5601_v6  ;;  %7436 = vpow2.f32 %v2526_v49  ;;  %v3660_v23 = vshrl.u32 %v3596_v59, 16  ;;  %v3723_v62 = vxor.u32 %v3659_v35, %v3595_v60 }
 0x3d4   : > { %v2449_v0 = vsub.f32 %v15316_v25, %v12172_v11  ;;  %v2648_v57 = vadd.f32 %v12177_v47, %v12167_v33  ;;  %v4264_v13 = vmul.f32 1.1920929e-07, %v4200_v20  ;;  %v4327_v30 = vadd.f32 1.1920929e-07, %v4263_v31 }
 0x3d5   : > { %v2696_v58 = vadd.f32 %v12157_v43, %v12035_v36  ;;  %v3724_v14 = vxor.u32 %v3660_v23, %v3596_v59  ;;  %v3787_v7 = vmul.u32 2246822507, %v3723_v62  ;;  %v3591_v10 = vadd.s32 %v3536_v27, %v9700_v54 }
 0x3d6   : > { %vm4754_vm15 = vweird.f32 %v12165_v38  ;;  %v4758_v60 = vand.u32 2147483647, %v12165_v38  ;;  %2649 = vadd.xlane.f32.xlu1 %v2648_v57  ;;  %v4328_v25 = vadd.f32 1.1920929e-07, %v4264_v13  ;;  %7438 = vlog2.f32 %v4327_v30 }
 0x3d7   : > { %v7433_v52 = vpop.eup %7432  ;;  %v4760_v9 = vand.u32 2147483648, %v12165_v38  ;;  %v3788_v41 = vmul.u32 2246822507, %v3724_v14  ;;  %v3851_v35 = vshrl.u32 %v3787_v7, 13  ;;  %vm4769_vm14 = vweird.f32 %v12169_v4 }
 0x3d8   : > { %v7435_v18 = vpop.eup %7434  ;;  %v4750_v49 = vmul.f32 %v7433_v52, %v12165_v38  ;;  %v4773_v6 = vand.u32 2147483647, %v12169_v4  ;;  %7440 = vlog2.f32 %v4328_v25  ;;  %vm4755_vm4 = vweird.f32 %v7433_v52 }
 0x3d9   : > { %v4765_v59 = vmul.f32 %v7435_v18, %v12169_v4  ;;  %v12204_v16 = vpop.eup %7436  ;;  %v4775_v31 = vand.u32 2147483648, %v12169_v4  ;;  %v3592_v23 = vadd.s32 %v3536_v27, %v9717_v3  ;;  %vm4770_vm1 = vweird.f32 %v7435_v18  ;;  %vm12210_vm8 = vmor %vm4754_vm15, %vm4755_vm4 }
 0x3da   : > { %v4751_v20 = vsub.f32 1.0, %v4750_v49  ;;  %v3852_v57 = vshrl.u32 %v3788_v41, 13  ;;  %v3915_v13 = vxor.u32 %v3851_v35, %v3787_v7  ;;  %v2534_v30 = vmul.f32 1.442695, %v2448_v39  ;;  %vm12217_vm10 = vmor %vm4769_vm14, %vm4770_vm1 }
 0x3db   : > { %v4766_v62 = vsub.f32 1.0, %v4765_v59  ;;  %2697 = vadd.xlane.f32.xlu2 %v2696_v58  ;;  %v2536_v14 = vmul.f32 1.442695, %v2449_v0  ;;  %v3655_v12 = vshrl.u32 %v3591_v10, 16  ;;  %v4761_v49 = vor.u32 1.1754944e-38, %v4760_v9  ;;  %v12221_v9 = vpop.xlane.xlu1 %2412 }
 0x3dc   : > { %v4752_v2 = vmul.f32 %v7433_v52, %v4751_v20  ;;  %v7439_v32 = vpop.eup %7438  ;;  %v3916_v11 = vxor.u32 %v3852_v57, %v3788_v41  ;;  %v3979_v27 = vmul.u32 3266489909, %v3915_v13  ;;  %vm4759_vm7 = vcmp.eq.f32.partialorder %v4758_v60, 8.507059e+37  ;;  %15474 = vst [vmem:[#allocation65_spill] sm:$0xff] %v12221_v9 }
 0x3dd   : > { %v4767_v55 = vmul.f32 %v7435_v18, %v4766_v62  ;;  %v4776_v0 = vor.u32 1.1754944e-38, %v4775_v31  ;;  %v4406_v58 = vmul.f32 0.6931472, %v7439_v32  ;;  %vm4774_vm13 = vcmp.eq.f32.partialorder %v4773_v6, 8.507059e+37 }
 0x3de   : > { %v4753_v59 = vadd.f32 %v7433_v52, %v4752_v2  ;;  %v7441_v38 = vpop.eup %7440  ;;  %v3980_v35 = vmul.u32 3266489909, %v3916_v11  ;;  %v3656_v20 = vshrl.u32 %v3592_v23, 16  ;;  %v3719_v62 = vxor.u32 %v3655_v12, %v3591_v10 }
 0x3df   : > { %v4768_v7 = vadd.f32 %v7435_v18, %v4767_v55  ;;  %v4408_v60 = vmul.f32 0.6931472, %v7441_v38  ;;  %v4519_v41 = vmin.f32 %v4406_v58, -1e-12  ;;  %v4043_v13 = vshrl.u32 %v3979_v27, 16 }
 0x3e0   : > { %v4757_v2 = vsel %vm12210_vm8, %v7433_v52, %v4753_v59  ;;  %v4044_v31 = vshrl.u32 %v3980_v35, 16  ;;  %v3720_v12 = vxor.u32 %v3656_v20, %v3592_v23  ;;  %v3783_v39 = vmul.u32 2246822507, %v3719_v62 }
 0x3e1   : > { %v4762_v4 = vsel %vm4759_vm7, %v4761_v49, %v4757_v2  ;;  %v4772_v57 = vsel %vm12217_vm10, %v7435_v18, %v4768_v7  ;;  %v12230_v11 = vmin.f32 %v4408_v60, -1e-12  ;;  %7442 = vrcp.f32 %v4519_v41  ;;  %v12239_v18 = vpop.xlane.xlu2 %3116 }
 0x3e2   : > { %v12228_v32 = vmul.f32 %v15435_v17, %v4762_v4  ;;  %v4777_v55 = vsel %vm4774_vm13, %v4776_v0, %v4772_v57  ;;  %7444 = vpow2.f32 %v2534_v30  ;;  %15477 = vst [vmem:[#allocation146_spill] sm:$0xff] %v12239_v18  ;;  %v4788_v25 = vand.u32 2147483647, %v4519_v41 }
 0x3e3   : > { %v12235_v6 = vmul.f32 %v15436_v8, %v4777_v55  ;;  %v4790_v17 = vand.u32 2147483648, %v4519_v41  ;;  %7446 = vrcp.f32 %v12230_v11  ;;  %v4805_v49 = vand.u32 2147483648, %v12230_v11 }
 0x3e4   : > { %15475 = vst [vmem:[#allocation116_spill] sm:$0xff] %v12228_v32  ;;  %7448 = vpow2.f32 %v2536_v14  ;;  %v4107_v59 = vxor.u32 %v4043_v13, %v3979_v27  ;;  %vm4784_vm12 = vweird.f32 %v4519_v41  ;;  %v4803_v8 = vand.u32 2147483647, %v12230_v11 }
 0x3e5   : > { %15476 = vst [vmem:[#allocation49_spill] sm:$0xff] %v12235_v6  ;;  %v5547_v30 = vmin.f32 %v12228_v32, %v12235_v6  ;;  %v4108_v23 = vxor.u32 %v4044_v31, %v3980_v35  ;;  %vm4799_vm5 = vweird.f32 %v12230_v11  ;;  %v3784_v58 = vmul.u32 2246822507, %v3720_v12 }
 0x3e6   : > { %v4171_v0 = vand.u32 8388607, %v4107_v59  ;;  %v3458_v38 = vadd.s32 80, %v10724_v37  ;;  %vm12248_vm9 = vcmp.eq.f32.partialorder %v4788_v25, 8.507059e+37  ;;  %v4791_v20 = vor.u32 1.1754944e-38, %v4790_v17 }
 0x3e7   : > { %5548 = vmin.xlane.f32.xlu0 %v5547_v30  ;;  %v7443_v7 = vpop.eup %7442  ;;  %v4172_v2 = vand.u32 8388607, %v4108_v23  ;;  %v3847_v27 = vshrl.u32 %v3783_v39, 13  ;;  %v4806_v35 = vor.u32 1.1754944e-38, %v4805_v49  ;;  %v3848_v57 = vshrl.u32 %v3784_v58, 13 }
 0x3e8   : > { %v12252_v60 = vpop.eup %7444  ;;  %v4780_v4 = vmul.f32 %v7443_v7, %v4519_v41  ;;  %v4235_v62 = vcvt.s32.f32 %v4171_v0  ;;  %vm4785_vm11 = vweird.f32 %v7443_v7  ;;  %v3490_v12 = vmul.u32 256, %v3458_v38 }
 0x3e9   : > { %v7447_v13 = vpop.eup %7446  ;;  %v4236_v31 = vcvt.s32.f32 %v4172_v2  ;;  %v3911_v55 = vxor.u32 %v3847_v27, %v3783_v39  ;;  %v3475_v17 = vadd.s32 216, %v10724_v37  ;;  %v3912_v52 = vxor.u32 %v3848_v57, %v3784_v58  ;;  %v12259_v2 = vpop.xlane.xlu2 %3071  ;;  %vm12263_vm15 = vmor %vm4784_vm12, %vm4785_vm11 }
 0x3ea   : > { %v12254_v30 = vpop.eup %7448  ;;  %v4781_v25 = vsub.f32 1.0, %v4780_v4  ;;  %v4795_v59 = vmul.f32 %v7447_v13, %v12230_v11  ;;  %v4299_v10 = vmul.f32 1.1920929e-07, %v4235_v62  ;;  %v3523_v49 = vadd.s32 %v10733_v56, %v3490_v12  ;;  %15480 = vst [vmem:[#allocation44_spill] sm:$0xff] %v12259_v2 }
 0x3eb   : > { %v4300_v23 = vmul.f32 1.1920929e-07, %v4236_v31  ;;  %v3975_v18 = vmul.u32 3266489909, %v3911_v55  ;;  %vm4800_vm6 = vweird.f32 %v7447_v13  ;;  %v3976_v27 = vmul.u32 3266489909, %v3912_v52 }
 0x3ec   : > { %v4782_v0 = vmul.f32 %v7443_v7, %v4781_v25  ;;  %v4796_v6 = vsub.f32 1.0, %v4795_v59  ;;  %v4363_v32 = vadd.f32 1.1920929e-07, %v4299_v10  ;;  %v3565_v58 = vadd.s32 %v3523_v49, %v9700_v54  ;;  %vm12271_vm14 = vmor %vm4799_vm5, %vm4800_vm6 }
 0x3ed   : > { %v4364_v38 = vadd.f32 1.1920929e-07, %v4300_v23  ;;  %v4039_v4 = vshrl.u32 %v3975_v18, 16  ;;  %v3566_v31 = vadd.s32 %v3523_v49, %v9717_v3  ;;  %v2651_v41 = vadd.f32 %v12254_v30, %v12252_v60 }
 0x3ee   : > { %v4783_v62 = vadd.f32 %v7443_v7, %v4782_v0  ;;  %v4797_v57 = vmul.f32 %v7447_v13, %v4796_v6  ;;  %7450 = vlog2.f32 %v4363_v32  ;;  %v4040_v55 = vshrl.u32 %v3976_v27, 16 }
 0x3ef   : > { %7452 = vlog2.f32 %v4364_v38  ;;  %v4103_v52 = vxor.u32 %v4039_v4, %v3975_v18  ;;  %vm4804_vm4 = vcmp.eq.f32.partialorder %v4803_v8, 8.507059e+37  ;;  %v3507_v32 = vmul.u32 256, %v3475_v17  ;;  %2652 = vadd.xlane.f32.xlu2 %v2651_v41  ;;  %v15486_v18 = vld [vmem:[#allocation106_spill] sm:$0xff] }
 0x3f0   : > { %v4787_v12 = vsel %vm12263_vm15, %v7443_v7, %v4783_v62  ;;  %v4798_v25 = vadd.f32 %v7447_v13, %v4797_v57  ;;  %v4104_v11 = vxor.u32 %v4040_v55, %v3976_v27  ;;  %v3629_v23 = vshrl.u32 %v3565_v58, 16 }
 0x3f1   : > { %v4792_v6 = vsel %vm12248_vm9, %v4791_v20, %v4787_v12  ;;  %v4167_v59 = vand.u32 8388607, %v4103_v52  ;;  %7454 = vpow2.f32 %v12184_v29  ;;  %v15485_v49 = vsub.f32 %v15439_v48, %v12221_v9  ;;  %v15489_v29 = vld [vmem:[#allocation68_spill] sm:$0xff] }
 0x3f2   : > { %v12286_v38 = vmul.f32 %v15486_v18, %v4792_v6  ;;  %v4802_v8 = vsel %vm12271_vm14, %v7447_v13, %v4798_v25  ;;  %v4168_v17 = vand.u32 8388607, %v4104_v11  ;;  %v3630_v20 = vshrl.u32 %v3566_v31, 16 }
 0x3f3   : > { %v2598_v0 = vmul.f32 1.442695, %v15485_v49  ;;  %v4807_v7 = vsel %vm4804_vm4, %v4806_v35, %v4802_v8  ;;  %v4231_v14 = vcvt.s32.f32 %v4167_v59  ;;  %v15488_v27 = vsub.f32 %v15438_v28, %v12221_v9  ;;  %v12300_v28 = vpop.xlane.xlu2 %2415 }
 0x3f4   : > { %15487 = vst [vmem:[#allocation43_spill] sm:$0xff] %v12286_v38  ;;  %v7451_v39 = vpop.eup %7450  ;;  %v12294_v62 = vmul.f32 %v15489_v29, %v4807_v7  ;;  %v3693_v48 = vxor.u32 %v3629_v23, %v3565_v58  ;;  %v3456_v57 = vadd.s32 64, %v10724_v37  ;;  %v4232_v52 = vcvt.s32.f32 %v4168_v17 }
 0x3f5   : > { %v2600_v4 = vmul.f32 1.442695, %v15488_v27  ;;  %v7453_v41 = vpop.eup %7452  ;;  %v4478_v55 = vmul.f32 0.6931472, %v7451_v39  ;;  %v4295_v10 = vmul.f32 1.1920929e-07, %v4231_v14  ;;  %v3540_v35 = vadd.s32 %v10733_v56, %v3507_v32  ;;  %15491 = vst [vmem:[#allocation64_spill] sm:$0xff] %v12300_v28 }
 0x3f6   : > { %15490 = vst [vmem:[#allocation101_spill] sm:$0xff] %v12294_v62  ;;  %v5550_v13 = vmin.f32 %v12286_v38, %v12294_v62  ;;  %v4480_v12 = vmul.f32 0.6931472, %v7453_v41  ;;  %v3694_v25 = vxor.u32 %v3630_v20, %v3566_v31  ;;  %v3757_v6 = vmul.u32 2246822507, %v3693_v48 }
 0x3f7   : > { %7456 = vpow2.f32 %v2598_v0  ;;  %v12302_v11 = vmin.f32 %v4478_v55, -1e-12  ;;  %v4296_v58 = vmul.f32 1.1920929e-07, %v4232_v52  ;;  %v4359_v59 = vadd.f32 1.1920929e-07, %v4295_v10  ;;  %v12304_v23 = vpop.eup %7454 }
 0x3f8   : > { %7458 = vpow2.f32 %v2600_v4  ;;  %5551 = vmin.xlane.f32.xlu0 %v5550_v13  ;;  %v12306_v49 = vmin.f32 %v4480_v12, -1e-12  ;;  %v3758_v32 = vmul.u32 2246822507, %v3694_v25  ;;  %v3821_v18 = vshrl.u32 %v3757_v6, 13 }
 0x3f9   : > { %7460 = vrcp.f32 %v12302_v11  ;;  %v3599_v31 = vadd.s32 %v3540_v35, %v9700_v54  ;;  %v3600_v0 = vadd.s32 %v3540_v35, %v9717_v3  ;;  %v3488_v8 = vmul.u32 256, %v3456_v57 }
 0x3fa   : > { %v5328_v14 = vand.u32 2147483647, %v12302_v11  ;;  %7462 = vrcp.f32 %v12306_v49  ;;  %v5330_v20 = vand.u32 2147483648, %v12302_v11  ;;  %v5343_v39 = vand.u32 2147483647, %v12306_v49 }
 0x3fb   : > { %v4360_v27 = vadd.f32 1.1920929e-07, %v4296_v58  ;;  %7464 = vlog2.f32 %v4359_v59  ;;  %vm5324_vm1 = vweird.f32 %v12302_v11  ;;  %vm5339_vm8 = vweird.f32 %v12306_v49 }
 0x3fc   : > { %v3822_v4 = vshrl.u32 %v3758_v32, 13  ;;  %v3885_v29 = vxor.u32 %v3821_v18, %v3757_v6  ;;  %v3663_v57 = vshrl.u32 %v3599_v31, 16  ;;  %v3664_v41 = vshrl.u32 %v3600_v0, 16 }
 0x3fd   : > { %v12321_v48 = vpop.eup %7456  ;;  %7466 = vlog2.f32 %v4360_v27  ;;  %v3521_v55 = vadd.s32 %v10733_v56, %v3488_v8  ;;  %vm12326_vm7 = vcmp.eq.f32.partialorder %v5328_v14, 8.507059e+37  ;;  %v5345_v35 = vand.u32 2147483648, %v12306_v49 }
 0x3fe   : > { %v12324_v52 = vpop.eup %7458  ;;  %v3886_v13 = vxor.u32 %v3822_v4, %v3758_v32  ;;  %v3949_v12 = vmul.u32 3266489909, %v3885_v29  ;;  %v5331_v58 = vor.u32 1.1754944e-38, %v5330_v20  ;;  %vm12331_vm10 = vcmp.eq.f32.partialorder %v5343_v39, 8.507059e+37 }
 0x3ff   : > { %v7461_v25 = vpop.eup %7460  ;;  %v3727_v59 = vxor.u32 %v3663_v57, %v3599_v31  ;;  %v3728_v18 = vxor.u32 %v3664_v41, %v3600_v0  ;;  %v3561_v7 = vadd.s32 %v3521_v55, %v9700_v54 }
 0x400   : > { %v7463_v27 = vpop.eup %7462  ;;  %v5320_v8 = vmul.f32 %v7461_v25, %v12302_v11  ;;  %v3950_v17 = vmul.u32 3266489909, %v3886_v13  ;;  %v4013_v14 = vshrl.u32 %v3949_v12, 16  ;;  %vm5325_vm13 = vweird.f32 %v7461_v25 }
 0x401   : > { %v7465_v9 = vpop.eup %7464  ;;  %v5335_v32 = vmul.f32 %v7463_v27, %v12306_v49  ;;  %v3791_v4 = vmul.u32 2246822507, %v3727_v59  ;;  %v3792_v29 = vmul.u32 2246822507, %v3728_v18  ;;  %vm5340_vm12 = vweird.f32 %v7463_v27  ;;  %vm12345_vm5 = vmor %vm5324_vm1, %vm5325_vm13 }
 0x402   : > { %v5321_v20 = vsub.f32 1.0, %v5320_v8  ;;  %v4470_v39 = vmul.f32 0.6931472, %v7465_v9  ;;  %v4014_v2 = vshrl.u32 %v3950_v17, 16  ;;  %v4077_v61 = vxor.u32 %v4013_v14, %v3949_v12  ;;  %vm12352_vm9 = vmor %vm5339_vm8, %vm5340_vm12 }
 0x403   : > { %v7467_v15 = vpop.eup %7466  ;;  %v5336_v31 = vsub.f32 1.0, %v5335_v32  ;;  %v3855_v0 = vshrl.u32 %v3791_v4, 13  ;;  %v3856_v57 = vshrl.u32 %v3792_v29, 13  ;;  %v5346_v12 = vor.u32 1.1754944e-38, %v5345_v35 }
 0x404   : > { %v5322_v41 = vmul.f32 %v7461_v25, %v5321_v20  ;;  %v4472_v13 = vmul.f32 0.6931472, %v7467_v15  ;;  %v12338_v62 = vmin.f32 %v4470_v39, -1e-12  ;;  %v4078_v38 = vxor.u32 %v4014_v2, %v3950_v17 }
 0x405   : > { %v5337_v9 = vmul.f32 %v7463_v27, %v5336_v31  ;;  %v3562_v18 = vadd.s32 %v3521_v55, %v9717_v3  ;;  %v3625_v8 = vshrl.u32 %v3561_v7, 16  ;;  %v4141_v11 = vand.u32 8388607, %v4077_v61 }
 0x406   : > { %v5323_v14 = vadd.f32 %v7461_v25, %v5322_v41  ;;  %v12356_v2 = vmin.f32 %v4472_v13, -1e-12  ;;  %7468 = vrcp.f32 %v12338_v62  ;;  %v5270_v32 = vand.u32 2147483648, %v12338_v62 }
 0x407   : > { %v5338_v17 = vadd.f32 %v7463_v27, %v5337_v9  ;;  %v4142_v20 = vand.u32 8388607, %v4078_v38  ;;  %v3919_v35 = vxor.u32 %v3855_v0, %v3791_v4  ;;  %vm5264_vm11 = vweird.f32 %v12338_v62 }
 0x408   : > { %v5327_v55 = vsel %vm12345_vm5, %v7461_v25, %v5323_v14  ;;  %7470 = vrcp.f32 %v12356_v2  ;;  %v3920_v49 = vxor.u32 %v3856_v57, %v3792_v29  ;;  %v5268_v61 = vand.u32 2147483647, %v12338_v62 }
 0x409   : > { %v5332_v39 = vsel %vm12326_vm7, %v5331_v58, %v5327_v55  ;;  %v5342_v31 = vsel %vm12352_vm9, %v7463_v27, %v5338_v17  ;;  %vm5279_vm6 = vweird.f32 %v12356_v2  ;;  %v5271_v4 = vor.u32 1.1754944e-38, %v5270_v32  ;;  %v12383_v32 = vpop.xlane.xlu1 %2367 }
 0x40a   : > { %v12371_v38 = vmul.f32 %v12003_v63, %v5332_v39  ;;  %v5347_v25 = vsel %vm12331_vm10, %v5346_v12, %v5342_v31  ;;  %v5283_v0 = vand.u32 2147483647, %v12356_v2  ;;  %v4205_v10 = vcvt.s32.f32 %v4141_v11  ;;  %15503 = vst [vmem:[#allocation153_spill] sm:$0xff] %v12383_v32 }
 0x40b   : > { %v12377_v29 = vmul.f32 %v12022_v50, %v5347_v25  ;;  %v4206_v58 = vcvt.s32.f32 %v4142_v20  ;;  %v3983_v57 = vmul.u32 3266489909, %v3919_v35  ;;  %v5285_v41 = vand.u32 2147483648, %v12356_v2  ;;  %v12385_v20 = vpop.xlane.xlu0 %3074 }
 0x40c   : > { %15501 = vst [vmem:[#allocation45_spill] sm:$0xff] %v12371_v38  ;;  %v7469_v27 = vpop.eup %7468  ;;  %v3984_v13 = vmul.u32 3266489909, %v3920_v49  ;;  %v3626_v59 = vshrl.u32 %v3562_v18, 16  ;;  %v3689_v9 = vxor.u32 %v3625_v8, %v3561_v7  ;;  %v4269_v12 = vmul.f32 1.1920929e-07, %v4205_v10 }
 0x40d   : > { %15502 = vst [vmem:[#allocation133_spill] sm:$0xff] %v12377_v29  ;;  %v5604_v63 = vmin.f32 %v12371_v38, %v12377_v29  ;;  %v5260_v6 = vmul.f32 %v7469_v27, %v12338_v62  ;;  %vm5265_vm15 = vweird.f32 %v7469_v27  ;;  %v4270_v15 = vmul.f32 1.1920929e-07, %v4206_v58 }
 0x40e   : > { %v7471_v14 = vpop.eup %7470  ;;  %v4047_v50 = vshrl.u32 %v3983_v57, 16  ;;  %v4048_v17 = vshrl.u32 %v3984_v13, 16  ;;  %v3690_v11 = vxor.u32 %v3626_v59, %v3562_v18  ;;  %15504 = vst [vmem:[#allocation76_spill] sm:$0xff] %v12385_v20  ;;  %v4333_v8 = vadd.f32 1.1920929e-07, %v4269_v12  ;;  %vm12391_vm4 = vmor %vm5264_vm11, %vm5265_vm15 }
 0x40f   : > { %5605 = vmin.xlane.f32.xlu1 %v5604_v63  ;;  %v5261_v35 = vsub.f32 1.0, %v5260_v6  ;;  %v5275_v7 = vmul.f32 %v7471_v14, %v12356_v2  ;;  %vm5280_vm14 = vweird.f32 %v7471_v14  ;;  %v4334_v55 = vadd.f32 1.1920929e-07, %v4270_v15 }
 0x410   : > { %v4111_v49 = vxor.u32 %v4047_v50, %v3983_v57  ;;  %v4112_v39 = vxor.u32 %v4048_v17, %v3984_v13  ;;  %v3753_v31 = vmul.u32 2246822507, %v3689_v9  ;;  %7472 = vlog2.f32 %v4333_v8  ;;  %v12395_v9 = vpop.xlane.xlu2 %2370  ;;  %vm12400_vm8 = vmor %vm5279_vm6, %vm5280_vm14 }
 0x411   : > { %v5262_v25 = vmul.f32 %v7469_v27, %v5261_v35  ;;  %v5276_v10 = vsub.f32 1.0, %v5275_v7  ;;  %v3754_v58 = vmul.u32 2246822507, %v3690_v11  ;;  %7474 = vlog2.f32 %v4334_v55  ;;  %15507 = vst [vmem:[#allocation54_spill] sm:$0xff] %v12395_v9 }
 0x412   : > { %v4175_v59 = vand.u32 8388607, %v4111_v49  ;;  %v4176_v63 = vand.u32 8388607, %v4112_v39  ;;  %v3817_v6 = vshrl.u32 %v3753_v31, 13  ;;  %vm5269_vm1 = vcmp.eq.f32.partialorder %v5268_v61, 8.507059e+37 }
 0x413   : > { %v5263_v12 = vadd.f32 %v7469_v27, %v5262_v25  ;;  %v5277_v57 = vmul.f32 %v7471_v14, %v5276_v10  ;;  %v5286_v13 = vor.u32 1.1754944e-38, %v5285_v41  ;;  %v3818_v17 = vshrl.u32 %v3754_v58, 13 }
 0x414   : > { %v4239_v62 = vcvt.s32.f32 %v4175_v59  ;;  %v4240_v50 = vcvt.s32.f32 %v4176_v63  ;;  %v3881_v11 = vxor.u32 %v3817_v6, %v3753_v31  ;;  %v15510_v35 = vsub.f32 %v15442_v21, %v12300_v28  ;;  %v12418_v63 = vpop.xlane.xlu1 %3122 }
 0x415   : > { %v5267_v61 = vsel %vm12391_vm4, %v7469_v27, %v5263_v12  ;;  %v5278_v41 = vadd.f32 %v7471_v14, %v5277_v57  ;;  %vm5284_vm7 = vcmp.eq.f32.partialorder %v5283_v0, 8.507059e+37  ;;  %v3882_v49 = vxor.u32 %v3818_v17, %v3754_v58  ;;  %15512 = vst [vmem:[#allocation100_spill] sm:$0xff] %v12418_v63  ;;  %v12420_v58 = vpop.xlane.xlu0 %2418 }
 0x416   : > { %v2602_v7 = vmul.f32 1.442695, %v15510_v35  ;;  %v5272_v8 = vsel %vm5269_vm1, %v5271_v4, %v5267_v61  ;;  %v4303_v55 = vmul.f32 1.1920929e-07, %v4239_v62  ;;  %v4304_v2 = vmul.f32 1.1920929e-07, %v4240_v50  ;;  %v7473_v39 = vpop.eup %7472  ;;  %15513 = vst [vmem:[#allocation98_spill] sm:$0xff] %v12420_v58 }
 0x417   : > { %v2452_v25 = vsub.f32 %v15329_v45, %v12395_v9  ;;  %v12412_v10 = vmul.f32 %v15400_v40, %v5272_v8  ;;  %v5282_v21 = vsel %vm12400_vm8, %v7471_v14, %v5278_v41  ;;  %v3945_v31 = vmul.u32 3266489909, %v3881_v11  ;;  %v7475_v59 = vpop.eup %7474 }
 0x418   : > { %v2453_v27 = vsub.f32 %v15330_v42, %v12395_v9  ;;  %v5287_v0 = vsel %vm5284_vm7, %v5286_v13, %v5282_v21  ;;  %v4418_v4 = vmul.f32 0.6931472, %v7473_v39  ;;  %v4367_v18 = vadd.f32 1.1920929e-07, %v4303_v55 }
 0x419   : > { %15511 = vst [vmem:[#allocation103_spill] sm:$0xff] %v12412_v10  ;;  %v12423_v45 = vmul.f32 %v11727_v19, %v5287_v0  ;;  %v4420_v40 = vmul.f32 0.6931472, %v7475_v59  ;;  %v4368_v6 = vadd.f32 1.1920929e-07, %v4304_v2  ;;  %v3946_v12 = vmul.u32 3266489909, %v3882_v49 }
 0x41a   : > { %v4525_v57 = vmin.f32 %v4418_v4, -1e-12  ;;  %7476 = vlog2.f32 %v4367_v18  ;;  %v4009_v14 = vshrl.u32 %v3945_v31, 16  ;;  %v3460_v15 = vadd.s32 96, %v10724_v37 }
 0x41b   : > { %15514 = vst [vmem:[#allocation61_spill] sm:$0xff] %v12423_v45  ;;  %v5598_v42 = vmin.f32 %v12412_v10, %v12423_v45  ;;  %v4526_v13 = vmin.f32 %v4420_v40, -1e-12  ;;  %7478 = vlog2.f32 %v4368_v6  ;;  %v4010_v62 = vshrl.u32 %v3946_v12, 16 }
 0x41c   : > { %v15515_v50 = vsub.f32 %v15441_v46, %v12300_v28  ;;  %7480 = vrcp.f32 %v4525_v57  ;;  %v12435_v35 = vmul.f32 1.442695, %v2452_v25  ;;  %v4073_v61 = vxor.u32 %v4009_v14, %v3945_v31  ;;  %v12442_v6 = vpop.xlane.xlu1 %3077 }
 0x41d   : > { %5599 = vmin.xlane.f32.xlu0 %v5598_v42  ;;  %7482 = vrcp.f32 %v4526_v13  ;;  %v4074_v41 = vxor.u32 %v4010_v62, %v3946_v12  ;;  %v12437_v8 = vmul.f32 1.442695, %v2453_v27  ;;  %v4878_v55 = vand.u32 2147483647, %v4525_v57  ;;  %15516 = vst [vmem:[#allocation50_spill] sm:$0xff] %v12442_v6  ;;  %v12444_v12 = vpop.xlane.xlu0 %2373 }
 0x41e   : > { %v2604_v17 = vmul.f32 1.442695, %v15515_v50  ;;  %7484 = vpow2.f32 %v2602_v7  ;;  %v3492_v2 = vmul.u32 256, %v3460_v15  ;;  %v4137_v49 = vand.u32 8388607, %v4073_v61  ;;  %15517 = vst [vmem:[#allocation83_spill] sm:$0xff] %v12444_v12 }
 0x41f   : > { %v4138_v39 = vand.u32 8388607, %v4074_v41  ;;  %v12440_v21 = vadd.s32 72, %v10724_v37  ;;  %vm4874_vm10 = vweird.f32 %v4525_v57  ;;  %v4880_v0 = vand.u32 2147483648, %v4525_v57 }
 0x420   : > { %v7477_v46 = vpop.eup %7476  ;;  %7486 = vpow2.f32 %v2604_v17  ;;  %vm4889_vm13 = vweird.f32 %v4526_v13  ;;  %v4893_v31 = vand.u32 2147483647, %v4526_v13  ;;  %v4895_v18 = vand.u32 2147483648, %v4526_v13 }
 0x421   : > { %v7479_v59 = vpop.eup %7478  ;;  %v4486_v25 = vmul.f32 0.6931472, %v7477_v46  ;;  %v4201_v27 = vcvt.s32.f32 %v4137_v49  ;;  %vm12446_vm12 = vcmp.eq.f32.partialorder %v4878_v55, 8.507059e+37  ;;  %v3525_v62 = vadd.s32 %v10733_v56, %v3492_v2 }
 0x422   : > { %v7481_v4 = vpop.eup %7480  ;;  %v4488_v7 = vmul.f32 0.6931472, %v7479_v59  ;;  %v4202_v61 = vcvt.s32.f32 %v4138_v39  ;;  %v4881_v59 = vor.u32 1.1754944e-38, %v4880_v0  ;;  %vm12460_vm11 = vcmp.eq.f32.partialorder %v4893_v31, 8.507059e+37 }
 0x423   : > { %v7483_v40 = vpop.eup %7482  ;;  %v4870_v14 = vmul.f32 %v7481_v4, %v4525_v57  ;;  %v12450_v42 = vmin.f32 %v4486_v25, -1e-12  ;;  %v4265_v41 = vmul.f32 1.1920929e-07, %v4201_v27  ;;  %vm4875_vm5 = vweird.f32 %v7481_v4 }
 0x424   : > { %v4885_v50 = vmul.f32 %v7483_v40, %v4526_v13  ;;  %v12453_v17 = vmin.f32 %v4488_v7, -1e-12  ;;  %v12455_v46 = vpop.eup %7484  ;;  %vm4890_vm9 = vweird.f32 %v7483_v40  ;;  %v4896_v39 = vor.u32 1.1754944e-38, %v4895_v18  ;;  %vm12468_vm6 = vmor %vm4874_vm10, %vm4875_vm5 }
 0x425   : > { %v4871_v49 = vsub.f32 1.0, %v4870_v14  ;;  %7488 = vrcp.f32 %v12450_v42  ;;  %v3569_v7 = vadd.s32 %v3525_v62, %v9700_v54  ;;  %v3489_v27 = vmul.u32 256, %v12440_v21  ;;  %vm12474_vm14 = vmor %vm4889_vm13, %vm4890_vm9  ;;  %v12493_v20 = vpop.xlane.xlu0 %3128 }
 0x426   : > { %v12458_v55 = vpop.eup %7486  ;;  %v4886_v11 = vsub.f32 1.0, %v4885_v50  ;;  %7490 = vrcp.f32 %v12453_v17  ;;  %vm5384_vm15 = vweird.f32 %v12450_v42  ;;  %v4266_v31 = vmul.f32 1.1920929e-07, %v4202_v61  ;;  %15527 = vst [vmem:[#allocation94_spill] sm:$0xff] %v12493_v20 }
 0x427   : > { %v4872_v2 = vmul.f32 %v7481_v4, %v4871_v49  ;;  %v4329_v50 = vadd.f32 1.1920929e-07, %v4265_v41  ;;  %v5388_v18 = vand.u32 2147483647, %v12450_v42  ;;  %v5390_v21 = vand.u32 2147483648, %v12450_v42 }
 0x428   : > { %v4887_v14 = vmul.f32 %v7483_v40, %v4886_v11  ;;  %v3570_v57 = vadd.s32 %v3525_v62, %v9717_v3  ;;  %vm5399_vm4 = vweird.f32 %v12453_v17  ;;  %v4330_v11 = vadd.f32 1.1920929e-07, %v4266_v31 }
 0x429   : > { %v4873_v19 = vadd.f32 %v7481_v4, %v4872_v2  ;;  %7492 = vlog2.f32 %v4329_v50  ;;  %v5403_v13 = vand.u32 2147483647, %v12453_v17  ;;  %v3633_v41 = vshrl.u32 %v3569_v7, 16  ;;  %v12491_v50 = vpop.xlane.xlu1 %2421 }
 0x42a   : > { %v4888_v49 = vadd.f32 %v7483_v40, %v4887_v14  ;;  %v3634_v2 = vshrl.u32 %v3570_v57, 16  ;;  %v5405_v31 = vand.u32 2147483648, %v12453_v17  ;;  %15526 = vst [vmem:[#allocation99_spill] sm:$0xff] %v12491_v50  ;;  %7494 = vlog2.f32 %v4330_v11 }
 0x42b   : > { %v7489_v44 = vpop.eup %7488  ;;  %v4877_v61 = vsel %vm12468_vm6, %v7481_v4, %v4873_v19  ;;  %v5391_v25 = vor.u32 1.1754944e-38, %v5390_v21  ;;  %7496 = vpow2.f32 %v12435_v35  ;;  %vm5389_vm10 = vcmp.eq.f32.partialorder %v5388_v18, 8.507059e+37 }
 0x42c   : > { %v7491_v28 = vpop.eup %7490  ;;  %v4882_v6 = vsel %vm12446_vm12, %v4881_v59, %v4877_v61  ;;  %v4892_v62 = vsel %vm12474_vm14, %v7483_v40, %v4888_v49  ;;  %v5380_v14 = vmul.f32 %v7489_v44, %v12450_v42  ;;  %v3476_v59 = vadd.s32 224, %v10724_v37 }
 0x42d   : > { %v12496_v19 = vmul.f32 %v12167_v33, %v4882_v6  ;;  %v4897_v4 = vsel %vm12460_vm11, %v4896_v39, %v4892_v62  ;;  %v5395_v15 = vmul.f32 %v7491_v28, %v12453_v17  ;;  %vm5385_vm1 = vweird.f32 %v7489_v44 }
 0x42e   : > { %v12503_v63 = vmul.f32 %v12177_v47, %v4897_v4  ;;  %v5381_v40 = vsub.f32 1.0, %v5380_v14  ;;  %vm5400_vm8 = vweird.f32 %v7491_v28  ;;  %v3697_v49 = vxor.u32 %v3633_v41, %v3569_v7  ;;  %vm12510_vm7 = vmor %vm5384_vm15, %vm5385_vm1 }
 0x42f   : > { %15528 = vst [vmem:[#allocation53_spill] sm:$0xff] %v12496_v19  ;;  %v5396_v0 = vsub.f32 1.0, %v5395_v15  ;;  %v3698_v61 = vxor.u32 %v3634_v2, %v3570_v57  ;;  %v7493_v20 = vpop.eup %7492  ;;  %v3522_v39 = vadd.s32 %v10733_v56, %v3489_v27  ;;  %vm12518_vm13 = vmor %vm5399_vm4, %vm5400_vm8  ;;  %v5406_v42 = vor.u32 1.1754944e-38, %v5405_v31 }
 0x430   : > { %15529 = vst [vmem:[#allocation51_spill] sm:$0xff] %v12503_v63  ;;  %v5559_v33 = vmin.f32 %v12496_v19, %v12503_v63  ;;  %v5382_v6 = vmul.f32 %v7489_v44, %v5381_v40  ;;  %v4410_v11 = vmul.f32 0.6931472, %v7493_v20  ;;  %v3761_v14 = vmul.u32 2246822507, %v3697_v49  ;;  %v7495_v41 = vpop.eup %7494 }
 0x431   : > { %v5397_v62 = vmul.f32 %v7491_v28, %v5396_v0  ;;  %v3762_v4 = vmul.u32 2246822507, %v3698_v61  ;;  %vm5404_vm12 = vcmp.eq.f32.partialorder %v5403_v13, 8.507059e+37  ;;  %v3508_v20 = vmul.u32 256, %v3476_v59  ;;  %v12539_v49 = vpop.xlane.xlu1 %2376 }
 0x432   : > { %5560 = vmin.xlane.f32.xlu1 %v5559_v33  ;;  %v5383_v7 = vadd.f32 %v7489_v44, %v5382_v6  ;;  %v12522_v57 = vmin.f32 %v4410_v11, -1e-12  ;;  %v3825_v2 = vshrl.u32 %v3761_v14, 13  ;;  %v3563_v18 = vadd.s32 %v3522_v39, %v9700_v54  ;;  %15536 = vst [vmem:[#allocation48_spill] sm:$0xff] %v12539_v49  ;;  %v2620_v33 = vpop.xlane.xlu0 %2619 }
 0x433   : > { %v5398_v21 = vadd.f32 %v7491_v28, %v5397_v62  ;;  %v3826_v15 = vshrl.u32 %v3762_v4, 13  ;;  %v4412_v0 = vmul.f32 0.6931472, %v7495_v41  ;;  %v15534_v13 = vsub.f32 %v15327_v53, %v12383_v32 }
 0x434   : > { %v5387_v35 = vsel %vm12510_vm7, %v7489_v44, %v5383_v7  ;;  %7498 = vrcp.f32 %v12522_v57  ;;  %v3541_v6 = vadd.s32 %v10733_v56, %v3508_v20  ;;  %v3564_v53 = vadd.s32 %v3522_v39, %v9717_v3 }
 0x435   : > { %v5392_v40 = vsel %vm5389_vm10, %v5391_v25, %v5387_v35  ;;  %v5402_v17 = vsel %vm12518_vm13, %v7491_v28, %v5398_v21  ;;  %v12533_v31 = vmul.f32 1.442695, %v15534_v13  ;;  %7500 = vpow2.f32 %v12437_v8  ;;  %v12548_v25 = vpop.eup %7496 }
 0x436   : > { %v12537_v44 = vmul.f32 %v12321_v48, %v5392_v40  ;;  %v5407_v59 = vsel %vm5404_vm12, %v5406_v42, %v5402_v17  ;;  %v12544_v28 = vmin.f32 %v4412_v0, -1e-12  ;;  %v2702_v8 = vadd.f32 %v12458_v55, %v12455_v46 }
 0x437   : > { %v12542_v61 = vmul.f32 %v12324_v52, %v5407_v59  ;;  %v3889_v47 = vxor.u32 %v3825_v2, %v3761_v14  ;;  %v3890_v62 = vxor.u32 %v3826_v15, %v3762_v4  ;;  %v3627_v11 = vshrl.u32 %v3563_v18, 16  ;;  %v12577_v14 = vpop.xlane.xlu2 %3125 }
 0x438   : > { %15535 = vst [vmem:[#allocation47_spill] sm:$0xff] %v12537_v44  ;;  %v4818_v27 = vand.u32 2147483647, %v12522_v57  ;;  %v4820_v42 = vand.u32 2147483648, %v12522_v57  ;;  %7502 = vrcp.f32 %v12544_v28  ;;  %v15538_v39 = vsub.f32 %v15328_v51, %v12383_v32 }
 0x439   : > { %15537 = vst [vmem:[#allocation52_spill] sm:$0xff] %v12542_v61  ;;  %v5610_v7 = vmin.f32 %v12537_v44, %v12542_v61  ;;  %7504 = vlog2.f32 %v2620_v33  ;;  %v3953_v41 = vmul.u32 3266489909, %v3889_v47  ;;  %v3954_v35 = vmul.u32 3266489909, %v3890_v62 }
 0x43a   : > { %v12560_v21 = vmul.f32 1.442695, %v15538_v39  ;;  %2703 = vadd.xlane.f32.xlu1 %v2702_v8  ;;  %v7499_v4 = vpop.eup %7498  ;;  %v3601_v2 = vadd.s32 %v3541_v6, %v9700_v54  ;;  %v3628_v15 = vshrl.u32 %v3564_v53, 16  ;;  %vm4814_vm5 = vweird.f32 %v12522_v57  ;;  %15541 = vst [vmem:[#allocation72_spill] sm:$0xff] %v12577_v14 }
 0x43b   : > { %5611 = vmin.xlane.f32.xlu2 %v5610_v7  ;;  %v12567_v40 = vpop.eup %7500  ;;  %v4810_v51 = vmul.f32 %v7499_v4, %v12522_v57  ;;  %v4835_v17 = vand.u32 2147483648, %v12544_v28  ;;  %v3691_v0 = vxor.u32 %v3627_v11, %v3563_v18  ;;  %vm12572_vm9 = vcmp.eq.f32.partialorder %v4818_v27, 8.507059e+37 }
 0x43c   : > { %v4821_v59 = vor.u32 1.1754944e-38, %v4820_v42  ;;  %v4017_v33 = vshrl.u32 %v3953_v41, 16  ;;  %v4018_v8 = vshrl.u32 %v3954_v35, 16  ;;  %vm4815_vm11 = vweird.f32 %v7499_v4 }
 0x43d   : > { %v4811_v47 = vsub.f32 1.0, %v4810_v51  ;;  %v3602_v62 = vadd.s32 %v3541_v6, %v9717_v3  ;;  %v3665_v7 = vshrl.u32 %v3601_v2, 16  ;;  %vm4829_vm6 = vweird.f32 %v12544_v28  ;;  %vm12584_vm15 = vmor %vm4814_vm5, %vm4815_vm11  ;;  %v12588_v51 = vpop.xlane.xlu1 %2667 }
 0x43e   : > { %v7503_v39 = vpop.eup %7502  ;;  %v4081_v20 = vxor.u32 %v4017_v33, %v3953_v41  ;;  %v4082_v32 = vxor.u32 %v4018_v8, %v3954_v35  ;;  %v3692_v18 = vxor.u32 %v3628_v15, %v3564_v53  ;;  %v4833_v42 = vand.u32 2147483647, %v12544_v28  ;;  %15544 = vst [vmem:[#allocation90_spill] sm:$0xff] %v12588_v51 }
 0x43f   : > { %v7505_v11 = vpop.eup %7504  ;;  %v4812_v27 = vmul.f32 %v7499_v4, %v4811_v47  ;;  %v4825_v9 = vmul.f32 %v7503_v39, %v12544_v28  ;;  %v4836_v61 = vor.u32 1.1754944e-38, %v4835_v17  ;;  %vm4830_vm14 = vweird.f32 %v7503_v39 }
 0x440   : > { %v4145_v14 = vand.u32 8388607, %v4081_v20  ;;  %v4146_v41 = vand.u32 8388607, %v4082_v32  ;;  %v3666_v35 = vshrl.u32 %v3602_v62, 16  ;;  %v3729_v33 = vxor.u32 %v3665_v7, %v3601_v2  ;;  %vm12597_vm4 = vmor %vm4829_vm6, %vm4830_vm14 }
 0x441   : > { %v4813_v53 = vadd.f32 %v7499_v4, %v4812_v27  ;;  %v4826_v15 = vsub.f32 1.0, %v4825_v9  ;;  %v3755_v8 = vmul.u32 2246822507, %v3691_v0  ;;  %v3756_v17 = vmul.u32 2246822507, %v3692_v18  ;;  %v15547_v18 = vld [vmem:[#allocation166_spill] sm:$0xff] }
 0x442   : > { %v4209_v47 = vcvt.s32.f32 %v4145_v14  ;;  %v4210_v44 = vcvt.s32.f32 %v4146_v41  ;;  %v3730_v29 = vxor.u32 %v3666_v35, %v3602_v62  ;;  %v3793_v63 = vmul.u32 2246822507, %v3729_v33  ;;  %v15550_v35 = vld [vmem:[#allocation167_spill] sm:$0xff] }
 0x443   : > { %v4817_v57 = vsel %vm12584_vm15, %v7499_v4, %v4813_v53  ;;  %v4827_v38 = vmul.f32 %v7503_v39, %v4826_v15  ;;  %v3819_v19 = vshrl.u32 %v3755_v8, 13  ;;  %vm4834_vm1 = vcmp.eq.f32.partialorder %v4833_v42, 8.507059e+37 }
 0x444   : > { %v4822_v51 = vsel %vm12572_vm9, %v4821_v59, %v4817_v57  ;;  %v4273_v9 = vmul.f32 1.1920929e-07, %v4209_v47  ;;  %v4274_v20 = vmul.f32 1.1920929e-07, %v4210_v44  ;;  %v3794_v14 = vmul.u32 2246822507, %v3730_v29  ;;  %v12608_v29 = vpop.xlane.xlu2 %3080 }
 0x445   : > { %v4828_v2 = vadd.f32 %v7503_v39, %v4827_v38  ;;  %v3857_v0 = vshrl.u32 %v3793_v63, 13  ;;  %v3820_v4 = vshrl.u32 %v3756_v17, 13  ;;  %v2454_v62 = vsub.f32 %v15333_v5, %v12444_v12  ;;  %15549 = vst [vmem:[#allocation149_spill] sm:$0xff] %v12608_v29 }
 0x446   : > { %v4337_v7 = vadd.f32 1.1920929e-07, %v4273_v9  ;;  %v4338_v13 = vadd.f32 1.1920929e-07, %v4274_v20  ;;  %v3858_v59 = vshrl.u32 %v3794_v14, 13  ;;  %v12604_v27 = vmul.f32 %v15547_v18, %v4822_v51 }
 0x447   : > { %v4832_v28 = vsel %vm12597_vm4, %v7503_v39, %v4828_v2  ;;  %v2715_v6 = vmul.f32 0.6931472, %v7505_v11  ;;  %v3883_v41 = vxor.u32 %v3819_v19, %v3755_v8  ;;  %v3921_v38 = vxor.u32 %v3857_v0, %v3793_v63  ;;  %v15553_v63 = vld [vmem:[#allocation71_spill] sm:$0xff] }
 0x448   : > { %15548 = vst [vmem:[#allocation147_spill] sm:$0xff] %v12604_v27  ;;  %v4837_v44 = vsel %vm4834_vm1, %v4836_v61, %v4832_v28  ;;  %7506 = vlog2.f32 %v4337_v7  ;;  %v3884_v42 = vxor.u32 %v3820_v4, %v3756_v17  ;;  %v2657_v5 = vadd.f32 %v12567_v40, %v12548_v25  ;;  %v2623_v61 = vpop.xlane.xlu1 %2622  ;;  %v15555_v17 = vld [vmem:[#allocation81_spill] sm:$0xff]  ;;  %v15556_v2 = vld [vmem:[#allocation63_spill] sm:$0xff] }
 0x449   : > { %v12611_v53 = vmul.f32 %v15550_v35, %v4837_v44  ;;  %7508 = vlog2.f32 %v4338_v13  ;;  %v3922_v51 = vxor.u32 %v3858_v59, %v3794_v14  ;;  %v15552_v39 = vsub.f32 %v15447_v24, %v12420_v58 }
 0x44a   : > { %7510 = vpow2.f32 %v12533_v31  ;;  %v2778_v15 = vadd.f32 %v2715_v6, %v15553_v63  ;;  %2658 = vadd.xlane.f32.xlu1 %v2657_v5  ;;  %v15554_v33 = vsub.f32 %v15446_v26, %v12420_v58  ;;  %v3985_v47 = vmul.u32 3266489909, %v3921_v38 }
 0x44b   : > { %15551 = vst [vmem:[#allocation79_spill] sm:$0xff] %v12611_v53  ;;  %v2606_v19 = vmul.f32 1.442695, %v15552_v39  ;;  %v5553_v11 = vmin.f32 %v12604_v27, %v12611_v53  ;;  %7512 = vlog2.f32 %v2623_v61  ;;  %v3947_v31 = vmul.u32 3266489909, %v3883_v41  ;;  %v15579_v27 = vld [vmem:[#allocation11_spill] sm:$0xff] }
 0x44c   : > { %7514 = vpow2.f32 %v12560_v21  ;;  %v2608_v8 = vmul.f32 1.442695, %v15554_v33  ;;  %v2455_v24 = vsub.f32 %v15555_v17, %v12444_v12  ;;  %v2546_v57 = vmul.f32 1.442695, %v2454_v62 }
 0x44d   : > { %5554 = vmin.xlane.f32.xlu0 %v5553_v11  ;;  %v3986_v32 = vmul.u32 3266489909, %v3922_v51  ;;  %v3948_v9 = vmul.u32 3266489909, %v3884_v42  ;;  %7516 = vpow2.f32 %v2606_v19  ;;  %v3130_v0 = vsub.f32 %v2778_v15, %v15556_v2  ;;  %v12637_v42 = vpop.xlane.xlu2 %2424 }
 0x44e   : > { %v7507_v20 = vpop.eup %7506  ;;  %v4049_v21 = vshrl.u32 %v3985_v47, 16  ;;  %7518 = vpow2.f32 %v2608_v8  ;;  %v4011_v59 = vshrl.u32 %v3947_v31, 16  ;;  %v2548_v62 = vmul.f32 1.442695, %v2455_v24  ;;  %15557 = vst [vmem:[#allocation97_spill] sm:$0xff] %v12637_v42 }
 0x44f   : > { %v7509_v14 = vpop.eup %7508  ;;  %v4426_v4 = vmul.f32 0.6931472, %v7507_v20  ;;  %v4050_v7 = vshrl.u32 %v3986_v32, 16  ;;  %v4012_v18 = vshrl.u32 %v3948_v9, 16  ;;  %7520 = vpow2.f32 %v2546_v57 }
 0x450   : > { %v12629_v13 = vpop.eup %7510  ;;  %v4428_v26 = vmul.f32 0.6931472, %v7509_v14  ;;  %v2690_v38 = vadd.f32 %v15465_v22, %v15462_v1  ;;  %v12640_v5 = vadd.s32 208, %v10724_v37  ;;  %v3194_v39 = vsel %vm3162_vm3, %v3130_v0, 0.0  ;;  %v15559_v1 = vld [vmem:[#allocation102_spill] sm:$0xff] }
 0x451   : > { %v7513_v28 = vpop.eup %7512  ;;  %v4529_v6 = vmin.f32 %v4426_v4, -1e-12  ;;  %v4113_v19 = vxor.u32 %v4049_v21, %v3985_v47  ;;  %v4114_v61 = vxor.u32 %v4050_v7, %v3986_v32  ;;  %v4075_v63 = vxor.u32 %v4011_v59, %v3947_v31  ;;  %v15561_v32 = vld [vmem:[#allocation82_spill] sm:$0xff] }
 0x452   : > { %v12631_v41 = vpop.eup %7514  ;;  %v12633_v44 = vmin.f32 %v4428_v26, -1e-12  ;;  %v2717_v35 = vmul.f32 0.6931472, %v7513_v28  ;;  %v4076_v15 = vxor.u32 %v4012_v18, %v3948_v9  ;;  %v3227_v8 = vsel %vm3226_vm0, %v3194_v39, 0.0 }
 0x453   : > { %7522 = vrcp.f32 %v4529_v6  ;;  %v12644_v11 = vpop.eup %7516  ;;  %vm4934_vm8 = vweird.f32 %v4529_v6  ;;  %v2645_v17 = vadd.f32 %v12304_v23, %v12204_v16  ;;  %v3506_v47 = vmul.u32 256, %v12640_v5 }
 0x454   : > { %7524 = vrcp.f32 %v12633_v44  ;;  %v2779_v22 = vadd.f32 %v2717_v35, %v15559_v1  ;;  %v12648_v33 = vpop.eup %7518  ;;  %v4938_v57 = vand.u32 2147483647, %v4529_v6  ;;  %v4177_v9 = vand.u32 8388607, %v4113_v19 }
 0x455   : > { %7526 = vpow2.f32 %v2548_v62  ;;  %2691 = vadd.xlane.f32.xlu0 %v2690_v38  ;;  %v12654_v24 = vpop.eup %7520  ;;  %v4178_v20 = vand.u32 8388607, %v4114_v61  ;;  %v4940_v14 = vand.u32 2147483648, %v4529_v6  ;;  %vm4949_vm3 = vweird.f32 %v12633_v44 }
 0x456   : > { %15560 = vst [vmem:[#allocation59_spill] sm:$0xff] %v12654_v24  ;;  %v3131_v31 = vsub.f32 %v2779_v22, %v15561_v32  ;;  %v4139_v2 = vand.u32 8388607, %v4075_v63  ;;  %v4140_v0 = vand.u32 8388607, %v4076_v15  ;;  %v4241_v59 = vcvt.s32.f32 %v4177_v9  ;;  %v12672_v15 = vpop.xlane.xlu2 %2670 }
 0x457   : > { %v4953_v21 = vand.u32 2147483647, %v12633_v44  ;;  %v4242_v18 = vcvt.s32.f32 %v4178_v20  ;;  %v4955_v38 = vand.u32 2147483648, %v12633_v44  ;;  %vm12665_vm10 = vcmp.eq.f32.partialorder %v4938_v57, 8.507059e+37  ;;  %15566 = vst [vmem:[#allocation75_spill] sm:$0xff] %v12672_v15 }
 0x458   : > { %v3195_v26 = vsel %vm3163_vm2, %v3131_v31, 0.0  ;;  %v4203_v5 = vcvt.s32.f32 %v4139_v2  ;;  %v4305_v1 = vmul.f32 1.1920929e-07, %v4241_v59  ;;  %v4204_v32 = vcvt.s32.f32 %v4140_v0 }
 0x459   : > { %v7523_v4 = vpop.eup %7522  ;;  %v3228_v35 = vsel %vm3226_vm0, %v3195_v26, 0.0  ;;  %v4306_v22 = vmul.f32 1.1920929e-07, %v4242_v18  ;;  %v3461_v20 = vadd.s32 104, %v10724_v37  ;;  %vm4954_vm5 = vcmp.eq.f32.partialorder %v4953_v21, 8.507059e+37 }
 0x45a   : > { %v7525_v28 = vpop.eup %7524  ;;  %v4930_v62 = vmul.f32 %v7523_v4, %v4529_v6  ;;  %vm4935_vm7 = vweird.f32 %v7523_v4  ;;  %v12670_v61 = vadd.f32 %v3228_v35, %v3227_v8  ;;  %v4267_v9 = vmul.f32 1.1920929e-07, %v4203_v5 }
 0x45b   : > { %v12663_v51 = vpop.eup %7526  ;;  %v4945_v19 = vmul.f32 %v7525_v28, %v12633_v44  ;;  %vm4950_vm2 = vweird.f32 %v7525_v28  ;;  %v4369_v2 = vadd.f32 1.1920929e-07, %v4305_v1  ;;  %v4370_v7 = vadd.f32 1.1920929e-07, %v4306_v22  ;;  %vm12677_vm13 = vmor %vm4934_vm8, %vm4935_vm7 }
 0x45c   : > { %15563 = vst [vmem:[#allocation58_spill] sm:$0xff] %v12663_v51  ;;  %v4931_v63 = vsub.f32 1.0, %v4930_v62  ;;  %v4268_v26 = vmul.f32 1.1920929e-07, %v4204_v32  ;;  %v4941_v62 = vor.u32 1.1754944e-38, %v4940_v14  ;;  %v4331_v18 = vadd.f32 1.1920929e-07, %v4267_v9  ;;  %vm4951_vm12 = vmor %vm4949_vm3, %vm4950_vm2 }
 0x45d   : > { %v4946_v31 = vsub.f32 1.0, %v4945_v19  ;;  %2646 = vadd.xlane.f32.xlu0 %v2645_v17  ;;  %v3493_v0 = vmul.u32 256, %v3461_v20  ;;  %v4956_v17 = vor.u32 1.1754944e-38, %v4955_v38  ;;  %7528 = vlog2.f32 %v4369_v2 }
 0x45e   : > { %v4932_v57 = vmul.f32 %v7523_v4, %v4931_v63  ;;  %v4332_v5 = vadd.f32 1.1920929e-07, %v4268_v26  ;;  %7530 = vlog2.f32 %v4370_v7  ;;  %v3539_v14 = vadd.s32 %v10733_v56, %v3506_v47  ;;  %v2626_v9 = vpop.xlane.xlu2 %2625 }
 0x45f   : > { %v4947_v59 = vmul.f32 %v7525_v28, %v4946_v31  ;;  %v3526_v6 = vadd.s32 %v10733_v56, %v3493_v0  ;;  %7532 = vlog2.f32 %v4331_v18  ;;  %v2705_v26 = vadd.f32 %v12648_v33, %v12644_v11 }
 0x460   : > { %v4933_v35 = vadd.f32 %v7523_v4, %v4932_v57  ;;  %7534 = vlog2.f32 %v4332_v5  ;;  %v12710_v0 = vadd.f32 %v12663_v51, %v12654_v24  ;;  %vm15580_vm7 = vcmp.ne.s32.totalorder %v15579_v27, 0 }
 0x461   : > { %v4948_v19 = vadd.f32 %v7525_v28, %v4947_v59  ;;  %v3571_v32 = vadd.s32 %v3526_v6, %v9700_v54  ;;  %7536 = vlog2.f32 %v2626_v9  ;;  %v3572_v20 = vadd.s32 %v3526_v6, %v9717_v3 }
 0x462   : > { %v4937_v63 = vsel %vm12677_vm13, %v7523_v4, %v4933_v35  ;;  %v12697_v4 = vadd.s32 %v3539_v14, %v9700_v54  ;;  %v3478_v35 = vadd.s32 240, %v10724_v37 }
 0x463   : > { %v4942_v1 = vsel %vm12665_vm10, %v4941_v62, %v4937_v63  ;;  %v4952_v22 = vsel %vm4951_vm12, %v7525_v28, %v4948_v19  ;;  %v7529_v31 = vpop.eup %7528  ;;  %v3635_v7 = vshrl.u32 %v3571_v32, 16  ;;  %v3636_v19 = vshrl.u32 %v3572_v20, 16 }
 0x464   : > { %v12690_v44 = vmul.f32 %v12629_v13, %v4942_v1  ;;  %v4957_v38 = vsel %vm4954_vm5, %v4956_v17, %v4952_v22  ;;  %v7531_v47 = vpop.eup %7530  ;;  %v4490_v28 = vmul.f32 0.6931472, %v7529_v31  ;;  %v12714_v17 = vadd.s32 %v3539_v14, %v9717_v3 }
 0x465   : > { %v12693_v21 = vmul.f32 %v12631_v41, %v4957_v38  ;;  %v7533_v57 = vpop.eup %7532  ;;  %v4492_v2 = vmul.f32 0.6931472, %v7531_v47  ;;  %v3699_v22 = vxor.u32 %v3635_v7, %v3571_v32  ;;  %v12726_v47 = vadd.s32 88, %v10724_v37 }
 0x466   : > { %15569 = vst [vmem:[#allocation74_spill] sm:$0xff] %v12690_v44  ;;  %v12704_v8 = vmin.f32 %v4490_v28, -1e-12  ;;  %v4414_v62 = vmul.f32 0.6931472, %v7533_v57  ;;  %v7535_v59 = vpop.eup %7534  ;;  %v3510_v28 = vmul.u32 256, %v3478_v35  ;;  %v3700_v58 = vxor.u32 %v3636_v19, %v3572_v20 }
 0x467   : > { %15570 = vst [vmem:[#allocation151_spill] sm:$0xff] %v12693_v21  ;;  %v5565_v39 = vmin.f32 %v12690_v44, %v12693_v21  ;;  %v12706_v18 = vmin.f32 %v4492_v2, -1e-12  ;;  %v7537_v38 = vpop.eup %7536  ;;  %v4416_v9 = vmul.f32 0.6931472, %v7535_v59  ;;  %v15573_v59 = vld [vmem:[#allocation69_spill] sm:$0xff] }
 0x468   : > { %7538 = vrcp.f32 %v12704_v8  ;;  %v5420_v5 = vand.u32 2147483648, %v12704_v8  ;;  %v5418_v63 = vand.u32 2147483647, %v12704_v8  ;;  %v12723_v14 = vmin.f32 %v4414_v62, -1e-12 }
 0x469   : > { %5566 = vmin.xlane.f32.xlu2 %v5565_v39  ;;  %7540 = vrcp.f32 %v12706_v18  ;;  %v5433_v1 = vand.u32 2147483647, %v12706_v18  ;;  %v5435_v31 = vand.u32 2147483648, %v12706_v18  ;;  %vm5414_vm9 = vweird.f32 %v12704_v8 }
 0x46a   : > { %vm5429_vm11 = vweird.f32 %v12706_v18  ;;  %v2719_v39 = vmul.f32 0.6931472, %v7537_v38  ;;  %v5421_v57 = vor.u32 1.1754944e-38, %v5420_v5  ;;  %v12730_v2 = vmin.f32 %v4416_v9, -1e-12 }
 0x46b   : > { %7542 = vrcp.f32 %v12723_v14  ;;  %v4848_v32 = vand.u32 2147483647, %v12723_v14  ;;  %vm12734_vm6 = vcmp.eq.f32.partialorder %v5418_v63, 8.507059e+37  ;;  %v4850_v62 = vand.u32 2147483648, %v12723_v14 }
 0x46c   : > { %v2780_v6 = vadd.f32 %v2719_v39, %v15573_v59  ;;  %v3763_v29 = vmul.u32 2246822507, %v3699_v22  ;;  %vm12740_vm15 = vcmp.eq.f32.partialorder %v5433_v1, 8.507059e+37  ;;  %v5436_v5 = vor.u32 1.1754944e-38, %v5435_v31  ;;  %v15576_v22 = vld [vmem:[#allocation107_spill] sm:$0xff] }
 0x46d   : > { %vm4844_vm14 = vweird.f32 %v12723_v14  ;;  %7544 = vrcp.f32 %v12730_v2  ;;  %vm4859_vm1 = vweird.f32 %v12730_v2  ;;  %v4863_v20 = vand.u32 2147483647, %v12730_v2 }
 0x46e   : > { %v7539_v12 = vpop.eup %7538  ;;  %v4865_v19 = vand.u32 2147483648, %v12730_v2  ;;  %v4851_v1 = vor.u32 1.1754944e-38, %v4850_v62  ;;  %v3132_v31 = vsub.f32 %v2780_v6, %v15576_v22  ;;  %vm12752_vm3 = vcmp.eq.f32.partialorder %v4848_v32, 8.507059e+37 }
 0x46f   : > { %v7541_v63 = vpop.eup %7540  ;;  %v5410_v38 = vmul.f32 %v7539_v12, %v12704_v8  ;;  %vm5415_vm4 = vweird.f32 %v7539_v12  ;;  %v3764_v15 = vmul.u32 2246822507, %v3700_v58  ;;  %v3827_v21 = vshrl.u32 %v3763_v29, 13 }
 0x470   : > { %vm5430_vm8 = vweird.f32 %v7541_v63  ;;  %v4866_v59 = vor.u32 1.1754944e-38, %v4865_v19  ;;  %v3196_v45 = vsel %vm15580_vm7, %v3132_v31, 0.0  ;;  %v3543_v10 = vadd.s32 %v10733_v56, %v3510_v28  ;;  %vm12769_vm13 = vmor %vm5414_vm9, %vm5415_vm4 }
 0x471   : > { %2706 = vadd.xlane.f32.xlu2 %v2705_v26  ;;  %v5425_v26 = vmul.f32 %v7541_v63, %v12706_v18  ;;  %v5411_v9 = vsub.f32 1.0, %v5410_v38  ;;  %v7543_v44 = vpop.eup %7542  ;;  %v3662_v51 = vshrl.u32 %v12714_v17, 16  ;;  %vm12761_vm2 = vcmp.eq.f32.partialorder %v4863_v20, 8.507059e+37  ;;  %vm12779_vm12 = vmor %vm5429_vm11, %vm5430_vm8 }
 0x472   : > { %v4840_v6 = vmul.f32 %v7543_v44, %v12723_v14  ;;  %vm4845_vm10 = vweird.f32 %v7543_v44  ;;  %v3230_v58 = vsel %vm3226_vm0, %v3196_v45, 0.0  ;;  %v3891_v22 = vxor.u32 %v3827_v21, %v3763_v29 }
 0x473   : > { %v5426_v53 = vsub.f32 1.0, %v5425_v26  ;;  %v5412_v62 = vmul.f32 %v7539_v12, %v5411_v9  ;;  %v7545_v38 = vpop.eup %7544  ;;  %v12774_v19 = vadd.f32 %v3230_v58, %v12670_v61  ;;  %v3828_v26 = vshrl.u32 %v3764_v15, 13  ;;  %vm12796_vm9 = vmor %vm4844_vm14, %vm4845_vm10 }
 0x474   : > { %v4841_v31 = vsub.f32 1.0, %v4840_v6  ;;  %v4855_v8 = vmul.f32 %v7545_v38, %v12730_v2  ;;  %vm4860_vm5 = vweird.f32 %v7545_v38  ;;  %v3955_v61 = vmul.u32 3266489909, %v3891_v22 }
 0x475   : > { %v5427_v28 = vmul.f32 %v7541_v63, %v5426_v53  ;;  %v5413_v20 = vadd.f32 %v7539_v12, %v5412_v62  ;;  %v3892_v53 = vxor.u32 %v3828_v26, %v3764_v15  ;;  %v3605_v58 = vadd.s32 %v3543_v10, %v9700_v54  ;;  %vm12811_vm11 = vmor %vm4859_vm1, %vm4860_vm5 }
 0x476   : > { %v4842_v21 = vmul.f32 %v7543_v44, %v4841_v31  ;;  %v4856_v18 = vsub.f32 1.0, %v4855_v8  ;;  %v3606_v62 = vadd.s32 %v3543_v10, %v9717_v3  ;;  %v4019_v27 = vshrl.u32 %v3955_v61, 16 }
 0x477   : > { %v5428_v9 = vadd.f32 %v7541_v63, %v5427_v28  ;;  %v5417_v29 = vsel %vm12769_vm13, %v7539_v12, %v5413_v20  ;;  %v3669_v22 = vshrl.u32 %v3605_v58, 16 }
 0x478   : > { %v5422_v6 = vsel %vm12734_vm6, %v5421_v57, %v5417_v29  ;;  %v4843_v7 = vadd.f32 %v7543_v44, %v4842_v21  ;;  %v4857_v57 = vmul.f32 %v7545_v38, %v4856_v18  ;;  %v4083_v26 = vxor.u32 %v4019_v27, %v3955_v61 }
 0x479   : > { %2661 = vadd.xlane.f32.xlu2 %v12710_v0  ;;  %v5432_v24 = vsel %vm12779_vm12, %v7541_v63, %v5428_v9  ;;  %v3956_v0 = vmul.u32 3266489909, %v3892_v53  ;;  %v12801_v12 = vmul.f32 %v12455_v46, %v5422_v6  ;;  %v3733_v9 = vxor.u32 %v3669_v22, %v3605_v58 }
 0x47a   : > { %v5437_v10 = vsel %vm12740_vm15, %v5436_v5, %v5432_v24  ;;  %v4847_v46 = vsel %vm12796_vm9, %v7543_v44, %v4843_v7  ;;  %v4858_v35 = vadd.f32 %v7545_v38, %v4857_v57  ;;  %v3670_v24 = vshrl.u32 %v3606_v62, 16 }
 0x47b   : > { %15589 = vst [vmem:[#allocation152_spill] sm:$0xff] %v12801_v12  ;;  %v12806_v28 = vmul.f32 %v12458_v55, %v5437_v10  ;;  %v4020_v63 = vshrl.u32 %v3956_v0, 16  ;;  %v15593_v5 = vshrl.u32 %v12697_v4, 16  ;;  %v4852_v2 = vsel %vm12752_vm3, %v4851_v1, %v4847_v46 }
 0x47c   : > { %v4147_v31 = vand.u32 8388607, %v4083_v26  ;;  %v12825_v8 = vmul.f32 %v12204_v16, %v4852_v2  ;;  %v4862_v44 = vsel %vm12811_vm11, %v7545_v38, %v4858_v35  ;;  %v3734_v53 = vxor.u32 %v3670_v24, %v3606_v62  ;;  %v15597_v24 = vld [vmem:[#allocation86_spill] sm:$0xff] }
 0x47d   : > { %15590 = vst [vmem:[#allocation73_spill] sm:$0xff] %v12806_v28  ;;  %v3725_v55 = vxor.u32 %v15593_v5, %v12697_v4  ;;  %v5613_v20 = vmin.f32 %v12801_v12, %v12806_v28  ;;  %v4084_v45 = vxor.u32 %v4020_v63, %v3956_v0  ;;  %v4867_v4 = vsel %vm12761_vm2, %v4866_v59, %v4862_v44 }
 0x47e   : > { %15594 = vst [vmem:[#allocation55_spill] sm:$0xff] %v12825_v8  ;;  %v4211_v29 = vcvt.s32.f32 %v4147_v31  ;;  %v3726_v21 = vxor.u32 %v3662_v51, %v12714_v17  ;;  %v12833_v1 = vmul.f32 %v12304_v23, %v4867_v4  ;;  %v3797_v39 = vmul.u32 2246822507, %v3733_v9 }
 0x47f   : > { %5614 = vmin.xlane.f32.xlu1 %v5613_v20  ;;  %v4148_v61 = vand.u32 8388607, %v4084_v45  ;;  %v3798_v18 = vmul.u32 2246822507, %v3734_v53  ;;  %v3789_v16 = vmul.u32 2246822507, %v3725_v55  ;;  %v2487_v5 = vsub.f32 %v15597_v24, %v12491_v50 }
 0x480   : > { %15595 = vst [vmem:[#allocation106_spill] sm:$0xff] %v12833_v1  ;;  %v4275_v15 = vmul.f32 1.1920929e-07, %v4211_v29  ;;  %v3790_v0 = vmul.u32 2246822507, %v3726_v21  ;;  %v3491_v38 = vmul.u32 256, %v12726_v47  ;;  %v5556_v58 = vmin.f32 %v12825_v8, %v12833_v1  ;;  %v15596_v47 = vld [vmem:[#allocation85_spill] sm:$0xff] }
 0x481   : > { %v4212_v6 = vcvt.s32.f32 %v4148_v61  ;;  %v3861_v32 = vshrl.u32 %v3797_v39, 13  ;;  %v3862_v59 = vshrl.u32 %v3798_v18, 13  ;;  %v3853_v62 = vshrl.u32 %v3789_v16, 13 }
 0x482   : > { %v4339_v10 = vadd.f32 1.1920929e-07, %v4275_v15  ;;  %v3854_v51 = vshrl.u32 %v3790_v0, 13  ;;  %5557 = vmin.xlane.f32.xlu0 %v5556_v58  ;;  %v3524_v63 = vadd.s32 %v10733_v56, %v3491_v38  ;;  %v2486_v26 = vsub.f32 %v15596_v47, %v12491_v50 }
 0x483   : > { %v4276_v27 = vmul.f32 1.1920929e-07, %v4212_v6  ;;  %v3925_v23 = vxor.u32 %v3861_v32, %v3797_v39  ;;  %v3926_v17 = vxor.u32 %v3862_v59, %v3798_v18  ;;  %v3917_v7 = vxor.u32 %v3853_v62, %v3789_v16  ;;  %v15598_v16 = vld [vmem:[#allocation88_spill] sm:$0xff] }
 0x484   : > { %7546 = vlog2.f32 %v4339_v10  ;;  %v3918_v14 = vxor.u32 %v3854_v51, %v3790_v0  ;;  %v3567_v44 = vadd.s32 %v3524_v63, %v9700_v54  ;;  %v2610_v9 = vmul.f32 1.442695, %v2486_v26 }
 0x485   : > { %v4340_v57 = vadd.f32 1.1920929e-07, %v4276_v27  ;;  %v3989_v22 = vmul.u32 3266489909, %v3925_v23  ;;  %v3990_v46 = vmul.u32 3266489909, %v3926_v17  ;;  %v3568_v18 = vadd.s32 %v3524_v63, %v9717_v3  ;;  %v15599_v17 = vld [vmem:[#allocation89_spill] sm:$0xff] }
 0x486   : > { %v3981_v35 = vmul.u32 3266489909, %v3917_v7  ;;  %v3982_v55 = vmul.u32 3266489909, %v3918_v14  ;;  %v2612_v29 = vmul.f32 1.442695, %v2487_v5  ;;  %v2488_v6 = vsub.f32 %v15598_v16, %v12637_v42 }
 0x487   : > { %7548 = vlog2.f32 %v4340_v57  ;;  %v4053_v20 = vshrl.u32 %v3989_v22, 16  ;;  %v4054_v2 = vshrl.u32 %v3990_v46, 16  ;;  %v3631_v62 = vshrl.u32 %v3567_v44, 16 }
 0x488   : > { %v4045_v45 = vshrl.u32 %v3981_v35, 16  ;;  %v4046_v31 = vshrl.u32 %v3982_v55, 16  ;;  %7550 = vpow2.f32 %v2610_v9  ;;  %v2489_v7 = vsub.f32 %v15599_v17, %v12637_v42 }
 0x489   : > { %v4117_v53 = vxor.u32 %v4053_v20, %v3989_v22  ;;  %v4118_v4 = vxor.u32 %v4054_v2, %v3990_v46  ;;  %v3632_v14 = vshrl.u32 %v3568_v18, 16  ;;  %v2614_v63 = vmul.f32 1.442695, %v2488_v6 }
 0x48a   : > { %v7547_v61 = vpop.eup %7546  ;;  %v4109_v21 = vxor.u32 %v4045_v45, %v3981_v35  ;;  %v4110_v39 = vxor.u32 %v4046_v31, %v3982_v55  ;;  %v3695_v24 = vxor.u32 %v3631_v62, %v3567_v44  ;;  %v3463_v5 = vadd.s32 120, %v10724_v37 }
 0x48b   : > { %v4430_v15 = vmul.f32 0.6931472, %v7547_v61  ;;  %v4181_v0 = vand.u32 8388607, %v4117_v53  ;;  %v4182_v38 = vand.u32 8388607, %v4118_v4  ;;  %v3696_v2 = vxor.u32 %v3632_v14, %v3568_v18 }
 0x48c   : > { %v4173_v32 = vand.u32 8388607, %v4109_v21  ;;  %v4174_v59 = vand.u32 8388607, %v4110_v39  ;;  %v2616_v53 = vmul.f32 1.442695, %v2489_v7 }
 0x48d   : > { %v7549_v58 = vpop.eup %7548  ;;  %v4531_v10 = vmin.f32 %v4430_v15, -1e-12  ;;  %v4245_v51 = vcvt.s32.f32 %v4181_v0  ;;  %v4246_v23 = vcvt.s32.f32 %v4182_v38  ;;  %v3759_v4 = vmul.u32 2246822507, %v3695_v24 }
 0x48e   : > { %v4432_v27 = vmul.f32 0.6931472, %v7549_v58  ;;  %v4237_v57 = vcvt.s32.f32 %v4173_v32  ;;  %v4238_v26 = vcvt.s32.f32 %v4174_v59  ;;  %v12850_v9 = vpop.eup %7550  ;;  %v3495_v44 = vmul.u32 256, %v3463_v5 }
 0x48f   : > { %7552 = vrcp.f32 %v4531_v10  ;;  %v4309_v22 = vmul.f32 1.1920929e-07, %v4245_v51  ;;  %v4310_v46 = vmul.f32 1.1920929e-07, %v4246_v23  ;;  %v4968_v21 = vand.u32 2147483647, %v4531_v10 }
 0x490   : > { %v4532_v47 = vmin.f32 %v4432_v27, -1e-12  ;;  %v4301_v35 = vmul.f32 1.1920929e-07, %v4237_v57  ;;  %v4302_v45 = vmul.f32 1.1920929e-07, %v4238_v26  ;;  %v3760_v6 = vmul.u32 2246822507, %v3696_v2 }
 0x491   : > { %v4373_v55 = vadd.f32 1.1920929e-07, %v4309_v22  ;;  %v4374_v20 = vadd.f32 1.1920929e-07, %v4310_v46  ;;  %vm4964_vm6 = vweird.f32 %v4531_v10  ;;  %v4970_v15 = vand.u32 2147483648, %v4531_v10 }
 0x492   : > { %7554 = vrcp.f32 %v4532_v47  ;;  %v4365_v31 = vadd.f32 1.1920929e-07, %v4301_v35  ;;  %v4366_v39 = vadd.f32 1.1920929e-07, %v4302_v45  ;;  %v4983_v18 = vand.u32 2147483647, %v4532_v47 }
 0x493   : > { %7556 = vpow2.f32 %v2612_v29  ;;  %v3823_v32 = vshrl.u32 %v3759_v4, 13  ;;  %vm12856_vm14 = vcmp.eq.f32.partialorder %v4968_v21, 8.507059e+37  ;;  %v4985_v27 = vand.u32 2147483648, %v4532_v47 }
 0x494   : > { %7558 = vpow2.f32 %v2614_v63  ;;  %v3528_v51 = vadd.s32 %v10733_v56, %v3495_v44  ;;  %vm4979_vm4 = vweird.f32 %v4532_v47  ;;  %v4971_v63 = vor.u32 1.1754944e-38, %v4970_v15 }
 0x495   : > { %7560 = vlog2.f32 %v4373_v55  ;;  %v7553_v61 = vpop.eup %7552  ;;  %vm12866_vm3 = vcmp.eq.f32.partialorder %v4983_v18, 8.507059e+37  ;;  %v3824_v46 = vshrl.u32 %v3760_v6, 13  ;;  %v4986_v2 = vor.u32 1.1754944e-38, %v4985_v27 }
 0x496   : > { %7562 = vlog2.f32 %v4374_v20  ;;  %v4960_v16 = vmul.f32 %v7553_v61, %v4531_v10  ;;  %vm4965_vm15 = vweird.f32 %v7553_v61  ;;  %v12870_v20 = vxor.u32 %v3823_v32, %v3759_v4 }
 0x497   : > { %7564 = vlog2.f32 %v4365_v31  ;;  %vm12862_vm8 = vmor %vm4964_vm6, %vm4965_vm15  ;;  %v3575_v31 = vadd.s32 %v3528_v51, %v9700_v54  ;;  %v12895_v62 = vadd.s32 232, %v10724_v37 }
 0x498   : > { %v7555_v29 = vpop.eup %7554  ;;  %7566 = vlog2.f32 %v4366_v39  ;;  %v4961_v38 = vsub.f32 1.0, %v4960_v16 }
 0x499   : > { %v12852_v0 = vpop.eup %7556  ;;  %v4975_v58 = vmul.f32 %v7555_v29, %v4532_v47  ;;  %7568 = vpow2.f32 %v2616_v53  ;;  %vm4980_vm1 = vweird.f32 %v7555_v29  ;;  %v3576_v53 = vadd.s32 %v3528_v51, %v9717_v3 }
 0x49a   : > { %v12854_v59 = vpop.eup %7558  ;;  %v4962_v17 = vmul.f32 %v7553_v61, %v4961_v38  ;;  %vm12872_vm7 = vmor %vm4979_vm4, %vm4980_vm1  ;;  %v12884_v38 = vxor.u32 %v3824_v46, %v3760_v6 }
 0x49b   : > { %v7561_v23 = vpop.eup %7560  ;;  %v4976_v7 = vsub.f32 1.0, %v4975_v58  ;;  %v3640_v14 = vshrl.u32 %v3576_v53, 16 }
 0x49c   : > { %v7563_v57 = vpop.eup %7562  ;;  %v4498_v22 = vmul.f32 0.6931472, %v7561_v23  ;;  %v4963_v24 = vadd.f32 %v7553_v61, %v4962_v17  ;;  %v3639_v23 = vshrl.u32 %v3575_v31, 16 }
 0x49d   : > { %v7565_v35 = vpop.eup %7564  ;;  %v4977_v5 = vmul.f32 %v7555_v29, %v4976_v7  ;;  %v4500_v55 = vmul.f32 0.6931472, %v7563_v57 }
 0x49e   : > { %v7567_v47 = vpop.eup %7566  ;;  %v4565_v45 = vmin.f32 %v4498_v22, -1e-12  ;;  %v4967_v21 = vsel %vm12862_vm8, %v7553_v61, %v4963_v24  ;;  %v4482_v16 = vmul.f32 0.6931472, %v7565_v35  ;;  %v3951_v61 = vmul.u32 3266489909, %v12870_v20 }
 0x49f   : > { %v4978_v39 = vadd.f32 %v7555_v29, %v4977_v5  ;;  %v4566_v44 = vmin.f32 %v4500_v55, -1e-12  ;;  %v12880_v15 = vpop.eup %7568  ;;  %v4972_v4 = vsel %vm12856_vm14, %v4971_v63, %v4967_v21  ;;  %v4484_v18 = vmul.f32 0.6931472, %v7567_v47 }
 0x4a0   : > { %7570 = vrcp.f32 %v4565_v45  ;;  %v12887_v58 = vmul.f32 %v12548_v25, %v4972_v4  ;;  %v5478_v51 = vand.u32 2147483647, %v4565_v45  ;;  %v5480_v17 = vand.u32 2147483648, %v4565_v45 }
 0x4a1   : > { %v4982_v32 = vsel %vm12872_vm7, %v7555_v29, %v4978_v39  ;;  %7572 = vrcp.f32 %v4566_v44  ;;  %v5493_v25 = vand.u32 2147483647, %v4566_v44  ;;  %v12900_v7 = vmin.f32 %v4482_v16, -1e-12 }
 0x4a2   : > { %15608 = vst [vmem:[#allocation68_spill] sm:$0xff] %v12887_v58  ;;  %v4987_v27 = vsel %vm12866_vm3, %v4986_v2, %v4982_v32  ;;  %v5495_v57 = vand.u32 2147483648, %v4566_v44  ;;  %v12902_v29 = vmin.f32 %v4484_v18, -1e-12  ;;  %v3952_v63 = vmul.u32 3266489909, %v12884_v38 }
 0x4a3   : > { %v12898_v6 = vmul.f32 %v12567_v40, %v4987_v27  ;;  %7574 = vrcp.f32 %v12900_v7  ;;  %v2711_v22 = vadd.f32 %v12880_v15, %v12854_v59  ;;  %v4015_v40 = vshrl.u32 %v3951_v61, 16 }
 0x4a4   : > { %vm5474_vm10 = vweird.f32 %v4565_v45  ;;  %vm12910_vm2 = vcmp.eq.f32.partialorder %v5478_v51, 8.507059e+37  ;;  %vm5489_vm13 = vweird.f32 %v4566_v44  ;;  %7576 = vrcp.f32 %v12902_v29 }
 0x4a5   : > { %15609 = vst [vmem:[#allocation166_spill] sm:$0xff] %v12898_v6  ;;  %v5568_v26 = vmin.f32 %v12887_v58, %v12898_v6  ;;  %v5481_v55 = vor.u32 1.1754944e-38, %v5480_v17  ;;  %vm12915_vm12 = vcmp.eq.f32.partialorder %v5493_v25, 8.507059e+37  ;;  %v5358_v47 = vand.u32 2147483647, %v12900_v7 }
 0x4a6   : > { %v7571_v46 = vpop.eup %7570  ;;  %v5496_v2 = vor.u32 1.1754944e-38, %v5495_v57  ;;  %vm5354_vm5 = vweird.f32 %v12900_v7  ;;  %v5360_v21 = vand.u32 2147483648, %v12900_v7  ;;  %vm5369_vm11 = vweird.f32 %v12902_v29 }
 0x4a7   : > { %v7573_v24 = vpop.eup %7572  ;;  %5569 = vmin.xlane.f32.xlu1 %v5568_v26  ;;  %v5470_v5 = vmul.f32 %v7571_v46, %v4565_v45  ;;  %vm5475_vm9 = vweird.f32 %v7571_v46  ;;  %v5373_v16 = vand.u32 2147483647, %v12902_v29  ;;  %v5375_v18 = vand.u32 2147483648, %v12902_v29 }
 0x4a8   : > { %v5485_v10 = vmul.f32 %v7573_v24, %v4566_v44  ;;  %vm5490_vm6 = vweird.f32 %v7573_v24  ;;  %v3703_v38 = vxor.u32 %v3639_v23, %v3575_v31  ;;  %vm12925_vm15 = vcmp.eq.f32.partialorder %v5358_v47, 8.507059e+37  ;;  %vm12930_vm14 = vmor %vm5474_vm10, %vm5475_vm9 }
 0x4a9   : > { %v5471_v39 = vsub.f32 1.0, %v5470_v5  ;;  %v7575_v32 = vpop.eup %7574  ;;  %v3704_v17 = vxor.u32 %v3640_v14, %v3576_v53  ;;  %v4016_v25 = vshrl.u32 %v3952_v63, 16  ;;  %v5361_v42 = vor.u32 1.1754944e-38, %v5360_v21  ;;  %vm12937_vm1 = vmor %vm5489_vm13, %vm5490_vm6 }
 0x4aa   : > { %v5486_v4 = vsub.f32 1.0, %v5485_v10  ;;  %v7577_v57 = vpop.eup %7576  ;;  %v5350_v10 = vmul.f32 %v7575_v32, %v12900_v7  ;;  %vm5355_vm4 = vweird.f32 %v7575_v32  ;;  %v3767_v45 = vmul.u32 2246822507, %v3703_v38 }
 0x4ab   : > { %v5472_v27 = vmul.f32 %v7571_v46, %v5471_v39  ;;  %v5365_v53 = vmul.f32 %v7577_v57, %v12902_v29  ;;  %vm5370_vm8 = vweird.f32 %v7577_v57  ;;  %v3768_v39 = vmul.u32 2246822507, %v3704_v17  ;;  %vm12958_vm3 = vmor %vm5354_vm5, %vm5355_vm4 }
 0x4ac   : > { %v5487_v5 = vmul.f32 %v7573_v24, %v5486_v4  ;;  %v5351_v47 = vsub.f32 1.0, %v5350_v10  ;;  %v4079_v50 = vxor.u32 %v4015_v40, %v3951_v61  ;;  %v12942_v4 = vpop.xlane.xlu0 %5530  ;;  %v3831_v44 = vshrl.u32 %v3767_v45, 13  ;;  %vm12968_vm7 = vmor %vm5369_vm11, %vm5370_vm8 }
 0x4ad   : > { %v5473_v31 = vadd.f32 %v7571_v46, %v5472_v27  ;;  %v5366_v27 = vsub.f32 1.0, %v5365_v53  ;;  %v4080_v1 = vxor.u32 %v4016_v25, %v3952_v63  ;;  %v5376_v40 = vor.u32 1.1754944e-38, %v5375_v18 }
 0x4ae   : > { %v5488_v14 = vadd.f32 %v7573_v24, %v5487_v5  ;;  %v5352_v38 = vmul.f32 %v7575_v32, %v5351_v47  ;;  %v3832_v5 = vshrl.u32 %v3768_v39, 13  ;;  %vm5374_vm10 = vcmp.eq.f32.partialorder %v5373_v16, 8.507059e+37 }
 0x4af   : > { %v5477_v21 = vsel %vm12930_vm14, %v7571_v46, %v5473_v31  ;;  %2712 = vadd.xlane.f32.xlu1 %v2711_v22  ;;  %v5367_v63 = vmul.f32 %v7577_v57, %v5366_v27  ;;  %v4144_v20 = vand.u32 8388607, %v4080_v1  ;;  %v3509_v23 = vmul.u32 256, %v12895_v62  ;;  %v15628_v27 = vld [vmem:[#allocation92_spill] sm:$0xff] }
 0x4b0   : > { %v5482_v8 = vsel %vm12910_vm2, %v5481_v55, %v5477_v21  ;;  %v5492_v28 = vsel %vm12937_vm1, %v7573_v24, %v5488_v14  ;;  %v5353_v35 = vadd.f32 %v7575_v32, %v5352_v38  ;;  %v3896_v24 = vxor.u32 %v3832_v5, %v3768_v39 }
 0x4b1   : > { %v12951_v17 = vmul.f32 %v12850_v9, %v5482_v8  ;;  %v5497_v61 = vsel %vm12915_vm12, %v5496_v2, %v5492_v28  ;;  %v3895_v28 = vxor.u32 %v3831_v44, %v3767_v45  ;;  %v5368_v7 = vadd.f32 %v7577_v57, %v5367_v63 }
 0x4b2   : > { %v12963_v46 = vmul.f32 %v12852_v0, %v5497_v61  ;;  %v4143_v55 = vand.u32 8388607, %v4079_v50  ;;  %v5357_v18 = vsel %vm12958_vm3, %v7575_v32, %v5353_v35  ;;  %v3960_v26 = vmul.u32 3266489909, %v3896_v24 }
 0x4b3   : > { %15620 = vst [vmem:[#allocation167_spill] sm:$0xff] %v12951_v17  ;;  %v3959_v25 = vmul.u32 3266489909, %v3895_v28  ;;  %v5362_v29 = vsel %vm12925_vm15, %v5361_v42, %v5357_v18  ;;  %v5372_v10 = vsel %vm12968_vm7, %v7577_v57, %v5368_v7  ;;  %v4208_v45 = vcvt.s32.f32 %v4144_v20  ;;  %v15629_v28 = vld [vmem:[#allocation93_spill] sm:$0xff] }
 0x4b4   : > { %15623 = vst [vmem:[#allocation71_spill] sm:$0xff] %v12963_v46  ;;  %v5619_v2 = vmin.f32 %v12951_v17, %v12963_v46  ;;  %v4207_v31 = vcvt.s32.f32 %v4143_v55  ;;  %v12982_v50 = vmul.f32 %v12035_v36, %v5362_v29  ;;  %v5377_v1 = vsel %vm5374_vm10, %v5376_v40, %v5372_v10  ;;  %v12988_v57 = vpop.xlane.xlu0 %5533 }
 0x4b5   : > { %v4023_v16 = vshrl.u32 %v3959_v25, 16  ;;  %v4024_v53 = vshrl.u32 %v3960_v26, 16  ;;  %v12985_v32 = vmul.f32 %v12157_v43, %v5377_v1  ;;  %v3479_v47 = vadd.s32 248, %v10724_v37 }
 0x4b6   : > { %5620 = vmin.xlane.f32.xlu2 %v5619_v2  ;;  %15626 = vst [vmem:[#allocation81_spill] sm:$0xff] %v12982_v50  ;;  %v4271_v14 = vmul.f32 1.1920929e-07, %v4207_v31  ;;  %v4272_v39 = vmul.f32 1.1920929e-07, %v4208_v45  ;;  %v3542_v21 = vadd.s32 %v10733_v56, %v3509_v23  ;;  %v2456_v44 = vsub.f32 %v15628_v27, %v12539_v49 }
 0x4b7   : > { %15627 = vst [vmem:[#allocation63_spill] sm:$0xff] %v12985_v32  ;;  %v4087_v51 = vxor.u32 %v4023_v16, %v3959_v25  ;;  %v4088_v42 = vxor.u32 %v4024_v53, %v3960_v26  ;;  %v5607_v62 = vmin.f32 %v12982_v50, %v12985_v32  ;;  %v3511_v5 = vmul.u32 256, %v3479_v47  ;;  %v13002_v53 = vpop.xlane.xlu1 %5578 }
 0x4b8   : > { %v4335_v36 = vadd.f32 1.1920929e-07, %v4271_v14  ;;  %v4336_v61 = vadd.f32 1.1920929e-07, %v4272_v39  ;;  %v3603_v22 = vadd.s32 %v3542_v21, %v9700_v54  ;;  %v3604_v63 = vadd.s32 %v3542_v21, %v9717_v3 }
 0x4b9   : > { %v4151_v43 = vand.u32 8388607, %v4087_v51  ;;  %v4152_v38 = vand.u32 8388607, %v4088_v42  ;;  %5608 = vmin.xlane.f32.xlu0 %v5607_v62  ;;  %v3544_v8 = vadd.s32 %v10733_v56, %v3511_v5  ;;  %v2457_v24 = vsub.f32 %v15629_v28, %v12539_v49 }
 0x4ba   : > { %7578 = vlog2.f32 %v4335_v36  ;;  %v2550_v18 = vmul.f32 1.442695, %v2456_v44  ;;  %v3667_v25 = vshrl.u32 %v3603_v22, 16  ;;  %v3668_v26 = vshrl.u32 %v3604_v63, 16 }
 0x4bb   : > { %v4215_v40 = vcvt.s32.f32 %v4151_v43  ;;  %v4216_v35 = vcvt.s32.f32 %v4152_v38  ;;  %7580 = vlog2.f32 %v4336_v61  ;;  %v3607_v20 = vadd.s32 %v3544_v8, %v9700_v54  ;;  %v15630_v43 = vld [vmem:[#allocation140_spill] sm:$0xff] }
 0x4bc   : > { %v3608_v2 = vadd.s32 %v3544_v8, %v9717_v3  ;;  %v2552_v16 = vmul.f32 1.442695, %v2457_v24  ;;  %v5582_v42 = vpop.xlane.xlu0 %5581  ;;  %v3731_v62 = vxor.u32 %v3667_v25, %v3603_v22  ;;  %v3462_v39 = vadd.s32 112, %v10724_v37  ;;  %v15631_v37 = vld [vmem:[#allocation142_spill] sm:$0xff] }
 0x4bd   : > { %v4279_v7 = vmul.f32 1.1920929e-07, %v4215_v40  ;;  %v4280_v55 = vmul.f32 1.1920929e-07, %v4216_v35  ;;  %v3671_v31 = vshrl.u32 %v3607_v20, 16  ;;  %v13007_v27 = vxor.u32 %v3668_v26, %v3604_v63 }
 0x4be   : > { %v3672_v23 = vshrl.u32 %v3608_v2, 16  ;;  %vm5659_vm2 = vcmp.eq.f32.partialorder %v15630_v43, %v5582_v42  ;;  %v3795_v40 = vmul.u32 2246822507, %v3731_v62  ;;  %v3494_v22 = vmul.u32 256, %v3462_v39 }
 0x4bf   : > { %v4343_v29 = vadd.f32 1.1920929e-07, %v4279_v7  ;;  %v4344_v10 = vadd.f32 1.1920929e-07, %v4280_v55  ;;  %v3735_v14 = vxor.u32 %v3671_v31, %v3607_v20  ;;  %vm5660_vm13 = vcmp.eq.f32.partialorder %v15631_v37, %v5582_v42 }
 0x4c0   : > { %v7579_v1 = vpop.eup %7578  ;;  %v3736_v47 = vxor.u32 %v3672_v23, %v3608_v2  ;;  %v3796_v63 = vmul.u32 2246822507, %v13007_v27  ;;  %v13018_v24 = vsel %vm5659_vm2, %v9700_v54, 256  ;;  %v13028_v31 = vsel %vm5660_vm13, %v9717_v3, 256 }
 0x4c1   : > { %7582 = vlog2.f32 %v4343_v29  ;;  %v4422_v45 = vmul.f32 0.6931472, %v7579_v1  ;;  %v7581_v51 = vpop.eup %7580  ;;  %v3799_v44 = vmul.u32 2246822507, %v3735_v14  ;;  %v3859_v1 = vshrl.u32 %v3795_v40, 13  ;;  %v13037_v14 = vpop.xlane.xlu1 %5539 }
 0x4c2   : > { %7584 = vlog2.f32 %v4344_v10  ;;  %v4424_v36 = vmul.f32 0.6931472, %v7581_v51  ;;  %v3800_v5 = vmul.u32 2246822507, %v3736_v47  ;;  %v3860_v42 = vshrl.u32 %v3796_v63, 13 }
 0x4c3   : > { %7586 = vpow2.f32 %v2550_v18  ;;  %v13005_v21 = vmin.f32 %v4422_v45, -1e-12  ;;  %v3863_v61 = vshrl.u32 %v3799_v44, 13  ;;  %v3923_v37 = vxor.u32 %v3859_v1, %v3795_v40 }
 0x4c4   : > { %7588 = vpow2.f32 %v2552_v16  ;;  %v13010_v38 = vmin.f32 %v4424_v36, -1e-12  ;;  %v3864_v26 = vshrl.u32 %v3800_v5, 13  ;;  %v13033_v16 = vadd.s32 %v10733_v56, %v3494_v22  ;;  %v13043_v47 = vpop.xlane.xlu0 %5536 }
 0x4c5   : > { %7590 = vrcp.f32 %v13005_v21  ;;  %v4908_v8 = vand.u32 2147483647, %v13005_v21  ;;  %v4910_v55 = vand.u32 2147483648, %v13005_v21  ;;  %v3927_v29 = vxor.u32 %v3863_v61, %v3799_v44  ;;  %v13050_v44 = vpop.xlane.xlu2 %5584 }
 0x4c6   : > { %7592 = vrcp.f32 %v13010_v38  ;;  %v4923_v20 = vand.u32 2147483647, %v13010_v38  ;;  %v4925_v25 = vand.u32 2147483648, %v13010_v38  ;;  %vm4904_vm12 = vweird.f32 %v13005_v21 }
 0x4c7   : > { %v7583_v35 = vpop.eup %7582  ;;  %vm4919_vm5 = vweird.f32 %v13010_v38  ;;  %vm13046_vm9 = vcmp.eq.f32.partialorder %v4908_v8, 8.507059e+37  ;;  %v4911_v56 = vor.u32 1.1754944e-38, %v4910_v55  ;;  %v3928_v39 = vxor.u32 %v3864_v26, %v3800_v5 }
 0x4c8   : > { %v7585_v28 = vpop.eup %7584  ;;  %v4438_v7 = vmul.f32 0.6931472, %v7583_v35  ;;  %v3991_v36 = vmul.u32 3266489909, %v3927_v29  ;;  %vm13054_vm11 = vcmp.eq.f32.partialorder %v4923_v20, 8.507059e+37  ;;  %v4926_v22 = vor.u32 1.1754944e-38, %v4925_v25 }
 0x4c9   : > { %v13022_v2 = vpop.eup %7586  ;;  %v4440_v18 = vmul.f32 0.6931472, %v7585_v28  ;;  %v3992_v20 = vmul.u32 3266489909, %v3928_v39  ;;  %v3924_v40 = vxor.u32 %v3860_v42, %v3796_v63  ;;  %v3987_v17 = vmul.u32 3266489909, %v3923_v37  ;;  %v13090_v37 = vpop.xlane.xlu1 %2676 }
 0x4ca   : > { %v13025_v10 = vpop.eup %7588  ;;  %v13030_v23 = vmin.f32 %v4438_v7, -1e-12  ;;  %v15646_v25 = vld [vmem:[#allocation127_spill] sm:$0xff] }
 0x4cb   : > { %v13035_v45 = vpop.eup %7590  ;;  %v13039_v51 = vmin.f32 %v4440_v18, -1e-12  ;;  %v4055_v18 = vshrl.u32 %v3991_v36, 16  ;;  %v4056_v49 = vshrl.u32 %v3992_v20, 16 }
 0x4cc   : > { %7594 = vrcp.f32 %v13030_v23  ;;  %v7593_v27 = vpop.eup %7592  ;;  %v5028_v43 = vand.u32 2147483647, %v13030_v23  ;;  %vm5024_vm6 = vweird.f32 %v13030_v23  ;;  %v5030_v35 = vand.u32 2147483648, %v13030_v23 }
 0x4cd   : > { %7596 = vrcp.f32 %v13039_v51  ;;  %v4900_v5 = vmul.f32 %v13035_v45, %v13005_v21  ;;  %vm5039_vm15 = vweird.f32 %v13039_v51  ;;  %v5043_v8 = vand.u32 2147483647, %v13039_v51 }
 0x4ce   : > { %v5045_v28 = vand.u32 2147483648, %v13039_v51  ;;  %v4915_v7 = vmul.f32 %v7593_v27, %v13010_v38  ;;  %vm4905_vm14 = vweird.f32 %v13035_v45  ;;  %vm13067_vm4 = vcmp.eq.f32.partialorder %v5028_v43, 8.507059e+37 }
 0x4cf   : > { %v4901_v55 = vsub.f32 1.0, %v4900_v5  ;;  %vm4920_vm1 = vweird.f32 %v7593_v27  ;;  %v4119_v46 = vxor.u32 %v4055_v18, %v3991_v36  ;;  %v5031_v6 = vor.u32 1.1754944e-38, %v5030_v35  ;;  %vm13077_vm8 = vmor %vm4904_vm12, %vm4905_vm14 }
 0x4d0   : > { %v4916_v26 = vsub.f32 1.0, %v4915_v7  ;;  %v5046_v58 = vor.u32 1.1754944e-38, %v5045_v28  ;;  %vm13086_vm7 = vmor %vm4919_vm5, %vm4920_vm1  ;;  %v3988_v35 = vmul.u32 3266489909, %v3924_v40  ;;  %v4120_v7 = vxor.u32 %v4056_v49, %v3992_v20 }
 0x4d1   : > { %v4902_v1 = vmul.f32 %v13035_v45, %v4901_v55  ;;  %v4051_v38 = vshrl.u32 %v3987_v17, 16  ;;  %vm5044_vm12 = vcmp.eq.f32.partialorder %v5043_v8, 8.507059e+37  ;;  %vm6025_vm5 = vcmp.lt.s32.totalorder %v13018_v24, %v13028_v31 }
 0x4d2   : > { %v7595_v29 = vpop.eup %7594  ;;  %v4917_v63 = vmul.f32 %v7593_v27, %v4916_v26  ;;  %v13095_v26 = vpop.xlane.xlu0 %2673  ;;  %v3573_v49 = vadd.s32 %v13033_v16, %v9700_v54 }
 0x4d3   : > { %v7597_v12 = vpop.eup %7596  ;;  %v5020_v5 = vmul.f32 %v7595_v29, %v13030_v23  ;;  %vm5025_vm3 = vweird.f32 %v7595_v29  ;;  %v4903_v36 = vadd.f32 %v13035_v45, %v4902_v1  ;;  %v4183_v1 = vand.u32 8388607, %v4119_v46 }
 0x4d4   : > { %v5035_v42 = vmul.f32 %v7597_v12, %v13039_v51  ;;  %vm5040_vm10 = vweird.f32 %v7597_v12  ;;  %v4918_v28 = vadd.f32 %v7593_v27, %v4917_v63  ;;  %v4184_v63 = vand.u32 8388607, %v4120_v7  ;;  %vm13106_vm2 = vmor %vm5024_vm6, %vm5025_vm3 }
 0x4d5   : > { %v5021_v21 = vsub.f32 1.0, %v5020_v5  ;;  %v4907_v18 = vsel %vm13077_vm8, %v13035_v45, %v4903_v36  ;;  %v13101_v5 = vpop.xlane.xlu2 %5542  ;;  %vm13118_vm13 = vmor %vm5039_vm15, %vm5040_vm10 }
 0x4d6   : > { %v5036_v55 = vsub.f32 1.0, %v5035_v42  ;;  %v4912_v50 = vsel %vm13046_vm9, %v4911_v56, %v4907_v18  ;;  %v4922_v40 = vsel %vm13086_vm7, %v7593_v27, %v4918_v28  ;;  %v4247_v56 = vcvt.s32.f32 %v4183_v1 }
 0x4d7   : > { %v5022_v32 = vmul.f32 %v7595_v29, %v5021_v21  ;;  %v13111_v46 = vmul.f32 %v12252_v60, %v4912_v50  ;;  %v4927_v62 = vsel %vm13054_vm11, %v4926_v22, %v4922_v40  ;;  %v4248_v39 = vcvt.s32.f32 %v4184_v63 }
 0x4d8   : > { %v5037_v45 = vmul.f32 %v7597_v12, %v5036_v55  ;;  %v13123_v23 = vmul.f32 %v12254_v30, %v4927_v62  ;;  %v4052_v42 = vshrl.u32 %v3988_v35, 16  ;;  %v4311_v60 = vmul.f32 1.1920929e-07, %v4247_v56  ;;  %v2632_v55 = vpop.xlane.xlu1 %2631 }
 0x4d9   : > { %v5023_v20 = vadd.f32 %v7595_v29, %v5022_v32  ;;  %v4115_v50 = vxor.u32 %v4051_v38, %v3987_v17  ;;  %v4312_v51 = vmul.f32 1.1920929e-07, %v4248_v39  ;;  %vm5629_vm9 = vcmp.eq.f32.partialorder %v15646_v25, %v13043_v47 }
 0x4da   : > { %v5038_v36 = vadd.f32 %v7597_v12, %v5037_v45  ;;  %v5562_v32 = vmin.f32 %v13111_v46, %v13123_v23  ;;  %v4116_v22 = vxor.u32 %v4052_v42, %v3988_v35  ;;  %v4375_v21 = vadd.f32 1.1920929e-07, %v4311_v60  ;;  %v2629_v1 = vpop.xlane.xlu0 %2628 }
 0x4db   : > { %v5027_v61 = vsel %vm13106_vm2, %v7595_v29, %v5023_v20  ;;  %v4179_v28 = vand.u32 8388607, %v4115_v50  ;;  %v4376_v7 = vadd.f32 1.1920929e-07, %v4312_v51  ;;  %v13149_v40 = vsel %vm6025_vm5, %v13018_v24, %v13028_v31 }
 0x4dc   : > { %v5032_v43 = vsel %vm13067_vm4, %v5031_v6, %v5027_v61  ;;  %v5042_v30 = vsel %vm13118_vm13, %v7597_v12, %v5038_v36  ;;  %5563 = vmin.xlane.f32.xlu0 %v5562_v32  ;;  %v4180_v29 = vand.u32 8388607, %v4116_v22  ;;  %7598 = vlog2.f32 %v4375_v21  ;;  %v15647_v12 = vld [vmem:[#allocation124_spill] sm:$0xff]  ;;  %v15648_v32 = vld [vmem:[#allocation134_spill] sm:$0xff] }
 0x4dd   : > { %v13134_v8 = vmul.f32 %v13022_v2, %v5032_v43  ;;  %v5047_v17 = vsel %vm5044_vm12, %v5046_v58, %v5042_v30  ;;  %v4243_v6 = vcvt.s32.f32 %v4179_v28  ;;  %vm5630_vm11 = vcmp.eq.f32.partialorder %v15647_v12, %v13043_v47  ;;  %v13151_v63 = vpop.xlane.xlu2 %2679 }
 0x4de   : > { %v13139_v35 = vmul.f32 %v13025_v10, %v5047_v17  ;;  %7600 = vlog2.f32 %v4376_v7  ;;  %v4244_v58 = vcvt.s32.f32 %v4180_v29  ;;  %v5693_v47 = vsel %vm5629_vm9, %v9700_v54, 256  ;;  %v15649_v17 = vld [vmem:[#allocation135_spill] sm:$0xff] }
 0x4df   : > { %7602 = vlog2.f32 %v2632_v55  ;;  %v4307_v38 = vmul.f32 1.1920929e-07, %v4243_v6  ;;  %v5694_v45 = vsel %vm5630_vm11, %v9717_v3, 256  ;;  %v3574_v62 = vadd.s32 %v13033_v16, %v9717_v3  ;;  %v15650_v6 = vld [vmem:[#allocation123_spill] sm:$0xff] }
 0x4e0   : > { %v5574_v18 = vmin.f32 %v13134_v8, %v13139_v35  ;;  %v2699_v56 = vadd.f32 %v12324_v52, %v12321_v48  ;;  %7604 = vlog2.f32 %v2629_v1  ;;  %v4308_v20 = vmul.f32 1.1920929e-07, %v4244_v58  ;;  %v5588_v21 = vpop.xlane.xlu1 %5587 }
 0x4e1   : > { %v6028_v31 = vshra.s32 %v13149_v40, 16  ;;  %v4371_v27 = vadd.f32 1.1920929e-07, %v4307_v38  ;;  %vm5785_vm6 = vcmp.lt.s32.totalorder %v5693_v47, %v5694_v45  ;;  %v3637_v36 = vshrl.u32 %v3573_v49, 16  ;;  %v15651_v38 = vld [vmem:[#allocation157_spill] sm:$0xff] }
 0x4e2   : > { %5575 = vmin.xlane.f32.xlu2 %v5574_v18  ;;  %v7599_v24 = vpop.eup %7598  ;;  %v3638_v61 = vshrl.u32 %v3574_v62, 16  ;;  %vm5657_vm15 = vcmp.eq.f32.partialorder %v15648_v32, %v13002_v53  ;;  %v4372_v52 = vadd.f32 1.1920929e-07, %v4308_v20  ;;  %v13166_v51 = vsel %vm5785_vm6, %v5693_v47, %v5694_v45  ;;  %v15653_v47 = vld [vmem:[#allocation136_spill] sm:$0xff]  ;;  %v15654_v45 = vld [vmem:[#allocation137_spill] sm:$0xff]  ;;  %v15672_v32 = vld [vmem:[#allocation14_spill] sm:$0xff] }
 0x4e3   : > { %v4502_v42 = vmul.f32 0.6931472, %v7599_v24  ;;  %v13170_v43 = vcvt.s32.f32 %v6028_v31  ;;  %7606 = vlog2.f32 %v4371_v27  ;;  %v13173_v28 = vxor.u32 %v3637_v36, %v3573_v49  ;;  %v15652_v49 = vld [vmem:[#allocation158_spill] sm:$0xff]  ;;  %v15655_v24 = vld [vmem:[#allocation119_spill] sm:$0xff] }
 0x4e4   : > { %v7601_v39 = vpop.eup %7600  ;;  %2700 = vadd.xlane.f32.xlu0 %v2699_v56  ;;  %vm5658_vm14 = vcmp.eq.f32.partialorder %v15649_v17, %v13002_v53  ;;  %v13178_v7 = vsel %vm5657_vm15, %v9700_v54, 256  ;;  %v13182_v29 = vxor.u32 %v3638_v61, %v3574_v62  ;;  %v5788_v12 = vshra.s32 %v13166_v51, 16  ;;  %v15656_v27 = vld [vmem:[#allocation118_spill] sm:$0xff] }
 0x4e5   : > { %v7603_v60 = vpop.eup %7602  ;;  %v4504_v50 = vmul.f32 0.6931472, %v7601_v39  ;;  %v13164_v16 = vmin.f32 %v4502_v42, -1e-12  ;;  %v2654_v55 = vadd.f32 %v12631_v41, %v12629_v13  ;;  %v2635_v58 = vpop.xlane.xlu2 %2634  ;;  %vm5663_vm4 = vcmp.eq.f32.partialorder %v15651_v38, %v5588_v21  ;;  %v15664_v38 = vld [vmem:[#allocation15_spill] sm:$0xff] }
 0x4e6   : > { %v2723_v48 = vmul.f32 0.6931472, %v7603_v60  ;;  %v7605_v30 = vpop.eup %7604  ;;  %vm5664_vm1 = vcmp.eq.f32.partialorder %v15652_v49, %v5588_v21  ;;  %vm5627_vm8 = vcmp.eq.f32.partialorder %v15653_v47, %v12988_v57  ;;  %vm5628_vm3 = vcmp.eq.f32.partialorder %v15654_v45, %v12988_v57  ;;  %v15661_v21 = vld [vmem:[#allocation91_spill] sm:$0xff] }
 0x4e7   : > { %v13168_v22 = vmin.f32 %v4504_v50, -1e-12  ;;  %7608 = vrcp.f32 %v13164_v16  ;;  %v5508_v18 = vand.u32 2147483647, %v13164_v16  ;;  %v2721_v1 = vmul.f32 0.6931472, %v7605_v30 }
 0x4e8   : > { %v2782_v25 = vadd.f32 %v2723_v48, %v15650_v6  ;;  %v13199_v13 = vsel %vm5658_vm14, %v9717_v3, 256  ;;  %v5510_v41 = vand.u32 2147483648, %v13164_v16  ;;  %v3765_v56 = vmul.u32 2246822507, %v13173_v28 }
 0x4e9   : > { %7610 = vrcp.f32 %v13168_v22  ;;  %v5523_v62 = vand.u32 2147483647, %v13168_v22  ;;  %v7607_v20 = vpop.eup %7606  ;;  %v2781_v39 = vadd.f32 %v2721_v1, %v15656_v27  ;;  %vm5504_vm7 = vweird.f32 %v13164_v16 }
 0x4ea   : > { %6031 = vmin.xlane.f32.xlu2 %v13170_v43  ;;  %7612 = vlog2.f32 %v4372_v52  ;;  %v3134_v31 = vsub.f32 %v2782_v25, %v15655_v24  ;;  %vm5519_vm10 = vweird.f32 %v13168_v22  ;;  %v5727_v53 = vsel %vm5663_vm4, %v9700_v54, 256 }
 0x4eb   : > { %7614 = vlog2.f32 %v2635_v58  ;;  %v5728_v60 = vsel %vm5664_vm1, %v9717_v3, 256  ;;  %vm13216_vm2 = vcmp.eq.f32.partialorder %v5508_v18, 8.507059e+37  ;;  %v5525_v48 = vand.u32 2147483648, %v13168_v22  ;;  %v15662_v18 = vld [vmem:[#allocation16_spill] sm:$0xff] }
 0x4ec   : > { %2655 = vadd.xlane.f32.xlu0 %v2654_v55  ;;  %v13221_v52 = vcvt.s32.f32 %v5788_v12  ;;  %v5511_v17 = vor.u32 1.1754944e-38, %v5510_v41  ;;  %vm13224_vm13 = vcmp.eq.f32.partialorder %v5523_v62, 8.507059e+37  ;;  %v3133_v55 = vsub.f32 %v2781_v39, %v15661_v21 }
 0x4ed   : > { %v7609_v36 = vpop.eup %7608  ;;  %vm15663_vm5 = vcmp.ne.s32.totalorder %v15662_v18, 0  ;;  %vm6057_vm9 = vcmp.lt.s32.totalorder %v5727_v53, %v5728_v60  ;;  %vm15665_vm6 = vcmp.ne.s32.totalorder %v15664_v38, 0  ;;  %v4494_v41 = vmul.f32 0.6931472, %v7607_v20 }
 0x4ee   : > { %v5500_v61 = vmul.f32 %v7609_v36, %v13164_v16  ;;  %vm5505_vm12 = vweird.f32 %v7609_v36  ;;  %v3198_v1 = vsel %vm15663_vm5, %v3134_v31, 0.0  ;;  %v3197_v49 = vsel %vm15665_vm6, %v3133_v55, 0.0 }
 0x4ef   : > { %v7611_v50 = vpop.eup %7610  ;;  %v5526_v27 = vor.u32 1.1754944e-38, %v5525_v48  ;;  %v3232_v42 = vsel %vm3226_vm0, %v3197_v49, 0.0  ;;  %vm13237_vm15 = vmor %vm5504_vm7, %vm5505_vm12  ;;  %v4563_v18 = vmin.f32 %v4494_v41, -1e-12  ;;  %v3234_v48 = vsel %vm3226_vm0, %v3198_v1, 0.0  ;;  %v15671_v41 = vld [vmem:[#allocation132_spill] sm:$0xff] }
 0x4f0   : > { %v7613_v30 = vpop.eup %7612  ;;  %v5515_v6 = vmul.f32 %v7611_v50, %v13168_v22  ;;  %v5501_v58 = vsub.f32 1.0, %v5500_v61  ;;  %vm5520_vm11 = vweird.f32 %v7611_v50  ;;  %v13250_v16 = vsel %vm6057_vm9, %v5727_v53, %v5728_v60  ;;  %v13265_v60 = vpop.xlane.xlu0 %5590 }
 0x4f1   : > { %v7615_v62 = vpop.eup %7614  ;;  %v4496_v39 = vmul.f32 0.6931472, %v7613_v30  ;;  %vm13244_vm14 = vmor %vm5519_vm10, %vm5520_vm11  ;;  %7616 = vrcp.f32 %v4563_v18  ;;  %v5691_v22 = vsel %vm5627_vm8, %v9700_v54, 256  ;;  %v3829_v1 = vshrl.u32 %v3765_v56, 13 }
 0x4f2   : > { %5791 = vmin.xlane.f32.xlu2 %v13221_v52  ;;  %v5516_v12 = vsub.f32 1.0, %v5515_v6  ;;  %v5502_v24 = vmul.f32 %v7609_v36, %v5501_v58  ;;  %v3233_v6 = vadd.f32 %v3232_v42, %v12774_v19  ;;  %v2725_v21 = vmul.f32 0.6931472, %v7615_v62  ;;  %v15670_v58 = vld [vmem:[#allocation130_spill] sm:$0xff] }
 0x4f3   : > { %v13252_v30 = vmin.f32 %v4496_v39, -1e-12  ;;  %v5692_v42 = vsel %vm5628_vm3, %v9717_v3, 256  ;;  %vm6009_vm4 = vcmp.lt.s32.totalorder %v13178_v7, %v13199_v13  ;;  %vm15673_vm1 = vcmp.ne.s32.totalorder %v15672_v32, 0 }
 0x4f4   : > { %v5517_v31 = vmul.f32 %v7611_v50, %v5516_v12  ;;  %v5503_v38 = vadd.f32 %v7609_v36, %v5502_v24  ;;  %v2783_v12 = vadd.f32 %v2725_v21, %v15670_v58  ;;  %v3235_v19 = vadd.f32 %v3234_v48, %v3233_v6  ;;  %v15675_v21 = vld [vmem:[#allocation154_spill] sm:$0xff] }
 0x4f5   : > { %v6060_v24 = vshra.s32 %v13250_v16, 16  ;;  %7618 = vrcp.f32 %v13252_v30  ;;  %vm5769_vm8 = vcmp.lt.s32.totalorder %v5691_v22, %v5692_v42  ;;  %v13295_v25 = vsel %vm6009_vm4, %v13178_v7, %v13199_v13 }
 0x4f6   : > { %v5518_v55 = vadd.f32 %v7611_v50, %v5517_v31  ;;  %v5507_v53 = vsel %vm13237_vm15, %v7609_v36, %v5503_v38  ;;  %v3135_v62 = vsub.f32 %v2783_v12, %v15671_v41  ;;  %vm5633_vm3 = vcmp.eq.f32.partialorder %v15675_v21, %v13101_v5  ;;  %v13305_v38 = vpop.xlane.xlu1 %2685 }
 0x4f7   : > { %v5512_v49 = vsel %vm13216_vm2, %v5511_v17, %v5507_v53  ;;  %v7617_v31 = vpop.eup %7616  ;;  %v13301_v6 = vcvt.s32.f32 %v6060_v24  ;;  %v5448_v28 = vand.u32 2147483647, %v4563_v18  ;;  %vm5444_vm7 = vweird.f32 %v4563_v18 }
 0x4f8   : > { %v5522_v47 = vsel %vm13244_vm14, %v7611_v50, %v5518_v55  ;;  %v13278_v57 = vmul.f32 %v12854_v59, %v5512_v49  ;;  %v3199_v17 = vsel %vm15673_vm1, %v3135_v62, 0.0  ;;  %v15674_v50 = vmul.u32 2246822507, %v13182_v29  ;;  %v5546_v41 = vpop.xlane.xlu0 %5545 }
 0x4f9   : > { %v5527_v45 = vsel %vm13224_vm13, %v5526_v27, %v5522_v47  ;;  %v3236_v61 = vsel %vm3226_vm0, %v3199_v17, 0.0  ;;  %v3893_v59 = vxor.u32 %v3829_v1, %v3765_v56  ;;  %v5440_v20 = vmul.f32 %v7617_v31, %v4563_v18 }
 0x4fa   : > { %v13283_v36 = vmul.f32 %v12880_v15, %v5527_v45  ;;  %v3830_v39 = vshrl.u32 %v15674_v50, 13  ;;  %v13299_v27 = vadd.f32 %v3236_v61, %v3235_v19  ;;  %v5450_v56 = vand.u32 2147483648, %v4563_v18  ;;  %6063 = vmin.xlane.f32.xlu2 %v13301_v6  ;;  %v15677_v19 = vld [vmem:[#allocation155_spill] sm:$0xff]  ;;  %v15683_v61 = vld [vmem:[#allocation96_spill] sm:$0xff] }
 0x4fb   : > { %v15676_v7 = vmov %v15674_v50  ;;  %v5441_v48 = vsub.f32 1.0, %v5440_v20  ;;  %vm5445_vm10 = vweird.f32 %v7617_v31  ;;  %v3957_v55 = vmul.u32 3266489909, %v3893_v59  ;;  %v7619_v58 = vpop.eup %7618 }
 0x4fc   : > { %v5622_v15 = vmin.f32 %v13278_v57, %v13283_v36  ;;  %v3894_v13 = vxor.u32 %v3830_v39, %v15676_v7  ;;  %v13311_v12 = vsel %vm5769_vm8, %v5691_v22, %v5692_v42  ;;  %vm5634_vm2 = vcmp.eq.f32.partialorder %v15677_v19, %v13101_v5  ;;  %vm13322_vm12 = vmor %vm5444_vm7, %vm5445_vm10  ;;  %v15682_v39 = vld [vmem:[#allocation84_spill] sm:$0xff]  ;;  %v15690_v7 = vld [vmem:[#allocation87_spill] sm:$0xff] }
 0x4fd   : > { %v5697_v53 = vsel %vm5633_vm3, %v9700_v54, 256  ;;  %v6012_v1 = vshra.s32 %v13295_v25, 16  ;;  %v5442_v49 = vmul.f32 %v7617_v31, %v5441_v48  ;;  %vm13317_vm13 = vcmp.eq.f32.partialorder %v5448_v28, 8.507059e+37 }
 0x4fe   : > { %5623 = vmin.xlane.f32.xlu1 %v5622_v15  ;;  %v5451_v29 = vor.u32 1.1754944e-38, %v5450_v56  ;;  %v5455_v18 = vmul.f32 %v7619_v58, %v13252_v30  ;;  %vm5459_vm5 = vweird.f32 %v13252_v30  ;;  %v5463_v22 = vand.u32 2147483647, %v13252_v30 }
 0x4ff   : > { %v5465_v42 = vand.u32 2147483648, %v13252_v30  ;;  %v3958_v24 = vmul.u32 3266489909, %v3894_v13  ;;  %v5443_v45 = vadd.f32 %v7617_v31, %v5442_v49  ;;  %vm5460_vm9 = vweird.f32 %v7619_v58 }
 0x500   : > { %v5456_v32 = vsub.f32 1.0, %v5455_v18  ;;  %v4021_v17 = vshrl.u32 %v3957_v55, 16  ;;  %v13329_v50 = vcvt.s32.f32 %v6012_v1  ;;  %vm5635_vm11 = vcmp.eq.f32.partialorder %v15682_v39, %v5546_v41  ;;  %vm13344_vm15 = vmor %vm5459_vm5, %vm5460_vm9 }
 0x501   : > { %vm5636_vm6 = vcmp.eq.f32.partialorder %v15683_v61, %v5546_v41  ;;  %v4022_v59 = vshrl.u32 %v3958_v24, 16  ;;  %v5698_v15 = vsel %vm5634_vm2, %v9717_v3, 256  ;;  %v5447_v21 = vsel %vm13322_vm12, %v7617_v31, %v5443_v45  ;;  %v15687_v45 = vld [vmem:[#allocation163_spill] sm:$0xff] }
 0x502   : > { %v5457_v20 = vmul.f32 %v7619_v58, %v5456_v32  ;;  %v4085_v28 = vxor.u32 %v4021_v17, %v3957_v55  ;;  %v5452_v56 = vsel %vm13317_vm13, %v5451_v29, %v5447_v21  ;;  %vm5464_vm14 = vcmp.eq.f32.partialorder %v5463_v22, 8.507059e+37  ;;  %v2641_v55 = vpop.xlane.xlu1 %2640 }
 0x503   : > { %v5466_v13 = vor.u32 1.1754944e-38, %v5465_v42  ;;  %v4086_v5 = vxor.u32 %v4022_v59, %v3958_v24  ;;  %v5699_v19 = vsel %vm5635_vm11, %v9700_v54, 256  ;;  %v5700_v31 = vsel %vm5636_vm6, %v9717_v3, 256  ;;  %v15686_v24 = vld [vmem:[#allocation162_spill] sm:$0xff] }
 0x504   : > { %v5458_v48 = vadd.f32 %v7619_v58, %v5457_v20  ;;  %v4149_v1 = vand.u32 8388607, %v4085_v28  ;;  %v5772_v49 = vshra.s32 %v13311_v12, 16  ;;  %v13352_v29 = vmul.f32 %v12644_v11, %v5452_v56 }
 0x505   : > { %v4150_v47 = vand.u32 8388607, %v4086_v5  ;;  %vm5817_vm4 = vcmp.lt.s32.totalorder %v5697_v53, %v5698_v15  ;;  %vm5833_vm1 = vcmp.lt.s32.totalorder %v5699_v19, %v5700_v31  ;;  %vm5665_vm8 = vcmp.eq.f32.partialorder %v15686_v24, %v13265_v60 }
 0x506   : > { %6015 = vmin.xlane.f32.xlu1 %v13329_v50  ;;  %v5462_v30 = vsel %vm13344_vm15, %v7619_v58, %v5458_v48  ;;  %v4213_v18 = vcvt.s32.f32 %v4149_v1  ;;  %vm5666_vm3 = vcmp.eq.f32.partialorder %v15687_v45, %v13265_v60  ;;  %v13363_v11 = vcvt.s32.f32 %v5772_v49  ;;  %v13387_v48 = vpop.xlane.xlu2 %5593 }
 0x507   : > { %v5467_v41 = vsel %vm5464_vm14, %v5466_v13, %v5462_v30  ;;  %v4214_v62 = vcvt.s32.f32 %v4150_v47  ;;  %v13365_v17 = vsel %vm5817_vm4, %v5697_v53, %v5698_v15  ;;  %v13369_v39 = vsel %vm5833_vm1, %v5699_v19, %v5700_v31  ;;  %v13375_v53 = vpop.xlane.xlu0 %2682 }
 0x508   : > { %v13357_v22 = vmul.f32 %v12648_v33, %v5467_v41  ;;  %v4277_v42 = vmul.f32 1.1920929e-07, %v4213_v18  ;;  %15688 = vst [vmem:[#allocation13_spill] sm:$0xff] %v13369_v39  ;;  %v5729_v59 = vsel %vm5665_vm8, %v9700_v54, 256  ;;  %v5730_v21 = vsel %vm5666_vm3, %v9717_v3, 256 }
 0x509   : > { %v4278_v32 = vmul.f32 1.1920929e-07, %v4214_v62  ;;  %v5820_v60 = vshra.s32 %v13365_v17, 16  ;;  %v5836_v15 = vshra.s32 %v13369_v39, 16  ;;  %vm6073_vm7 = vcmp.lt.s32.totalorder %v5729_v59, %v5730_v21 }
 0x50a   : > { %v5616_v58 = vmin.f32 %v13352_v29, %v13357_v22  ;;  %v4341_v61 = vadd.f32 1.1920929e-07, %v4277_v42  ;;  %v5597_v20 = vpop.xlane.xlu1 %5596  ;;  %v13385_v5 = vsel %vm6073_vm7, %v5729_v59, %v5730_v21  ;;  %v13395_v18 = vadd.f32 %v13025_v10, %v13022_v2  ;;  %v15694_v59 = vld [vmem:[#allocation62_spill] sm:$0xff] }
 0x50b   : > { %v4342_v33 = vadd.f32 1.1920929e-07, %v4278_v32  ;;  %v13378_v28 = vcvt.s32.f32 %v5836_v15  ;;  %v13380_v56 = vcvt.s32.f32 %v5820_v60  ;;  %vm5669_vm10 = vcmp.eq.f32.partialorder %v12114_v34, %v5597_v20  ;;  %15691 = vst [vmem:[#allocation82_spill] sm:$0xff] %v13385_v5 }
 0x50c   : > { %5617 = vmin.xlane.f32.xlu0 %v5616_v58  ;;  %7620 = vlog2.f32 %v4341_v61  ;;  %vm5670_vm2 = vcmp.eq.f32.partialorder %v15690_v7, %v5597_v20  ;;  %v5733_v49 = vsel %vm5669_vm10, %v9700_v54, 256  ;;  %v6076_v30 = vshra.s32 %v13385_v5, 16 }
 0x50d   : > { %7622 = vlog2.f32 %v4342_v33  ;;  %15689 = vst [vmem:[#allocation102_spill] sm:$0xff] %v13378_v28  ;;  %5839 = vmin.xlane.f32.xlu2 %v13378_v28 }
 0x50e   : > { %5775 = vmin.xlane.f32.xlu1 %v13363_v11  ;;  %7624 = vlog2.f32 %v2641_v55  ;;  %v5734_v55 = vsel %vm5670_vm2, %v9717_v3, 256  ;;  %v13399_v24 = vcvt.s32.f32 %v6076_v30  ;;  %v13404_v58 = vpop.xlane.xlu2 %2688 }
 0x50f   : > { %v2638_v34 = vpop.xlane.xlu0 %2637  ;;  %vm6105_vm13 = vcmp.lt.s32.totalorder %v5733_v49, %v5734_v55 }
 0x510   : > { %15692 = vst [vmem:[#allocation12_spill] sm:$0xff] %v13399_v24  ;;  %v13401_v32 = vsel %vm6105_vm13, %v5733_v49, %v5734_v55 }
 0x511   : > { %15693 = vst [vmem:[#allocation69_spill] sm:$0xff] %v13401_v32  ;;  %v6108_v2 = vshra.s32 %v13401_v32, 16 }
 0x512   : > { %v7621_v13 = vpop.eup %7620  ;;  %v13397_v62 = vpop.xlane.xlu1 %2694 }
 0x513   : > { %v7623_v19 = vpop.eup %7622  ;;  %v4434_v31 = vmul.f32 0.6931472, %v7621_v13 }
 0x514   : > { %v4436_v1 = vmul.f32 0.6931472, %v7623_v19  ;;  %v7625_v42 = vpop.eup %7624  ;;  %v13412_v19 = vcvt.s32.f32 %v6108_v2 }
 0x515   : > { %v4533_v47 = vmin.f32 %v4434_v31, -1e-12  ;;  %v2729_v45 = vmul.f32 0.6931472, %v7625_v42 }
 0x516   : > { %5823 = vmin.xlane.f32.xlu1 %v13380_v56  ;;  %v4534_v41 = vmin.f32 %v4436_v1, -1e-12  ;;  %15695 = vst [vmem:[#allocation107_spill] sm:$0xff] %v13412_v19  ;;  %6111 = vmin.xlane.f32.xlu2 %v13412_v19  ;;  %v15700_v19 = vld [vmem:[#allocation141_spill] sm:$0xff] }
 0x517   : > { %7626 = vrcp.f32 %v4533_v47  ;;  %v13407_v10 = vpop.xlane.xlu0 %5548  ;;  %v2785_v21 = vadd.f32 %v2729_v45, %v15694_v59  ;;  %vm4994_vm12 = vweird.f32 %v4533_v47  ;;  %v4998_v20 = vand.u32 2147483647, %v4533_v47  ;;  %v15696_v45 = vld [vmem:[#allocation144_spill] sm:$0xff] }
 0x518   : > { %7628 = vrcp.f32 %v4534_v41  ;;  %v5000_v7 = vand.u32 2147483648, %v4533_v47  ;;  %vm5009_vm9 = vweird.f32 %v4534_v41  ;;  %v5015_v49 = vand.u32 2147483648, %v4534_v41 }
 0x519   : > { %7630 = vlog2.f32 %v2638_v34  ;;  %v5013_v30 = vand.u32 2147483647, %v4534_v41  ;;  %v3137_v59 = vsub.f32 %v2785_v21, %v15696_v45  ;;  %vm4999_vm15 = vcmp.eq.f32.partialorder %v4998_v20, 8.507059e+37  ;;  %v2644_v21 = vpop.xlane.xlu2 %2643  ;;  %v15703_v20 = vld [vmem:[#allocation19_spill] sm:$0xff] }
 0x51a   : > { %v13410_v15 = vpop.xlane.xlu1 %2649  ;;  %v5001_v2 = vor.u32 1.1754944e-38, %v5000_v7  ;;  %v15701_v7 = vld [vmem:[#allocation18_spill] sm:$0xff]  ;;  %vm15704_vm8 = vcmp.ne.s32.totalorder %v15703_v20, 0  ;;  %7632 = vlog2.f32 %v2644_v21 }
 0x51b   : > { %vm5014_vm4 = vcmp.eq.f32.partialorder %v5013_v30, 8.507059e+37  ;;  %vm15702_vm1 = vcmp.ne.s32.totalorder %v15701_v7, 0  ;;  %7634 = vlog2.f32 %v13410_v15  ;;  %v15734_v15 = vld [vmem:[#allocation125_spill] sm:$0xff] }
 0x51d   : > { %v7627_v61 = vpop.eup %7626 }
 0x51e   : > { %6079 = vmin.xlane.f32.xlu1 %v13399_v24  ;;  %v7629_v33 = vpop.eup %7628  ;;  %v4990_v60 = vmul.f32 %v7627_v61, %v4533_v47  ;;  %vm4995_vm5 = vweird.f32 %v7627_v61 }
 0x51f   : > { %v5005_v13 = vmul.f32 %v7629_v33, %v4534_v41  ;;  %v7631_v31 = vpop.eup %7630  ;;  %vm5010_vm11 = vweird.f32 %v7629_v33  ;;  %vm13417_vm6 = vmor %vm4994_vm12, %vm4995_vm5  ;;  %v5552_v32 = vpop.xlane.xlu0 %5551 }
 0x520   : > { %v4991_v1 = vsub.f32 1.0, %v4990_v60  ;;  %v2727_v34 = vmul.f32 0.6931472, %v7631_v31  ;;  %v15699_v60 = vld [vmem:[#allocation143_spill] sm:$0xff]  ;;  %vm5011_vm14 = vmor %vm5009_vm9, %vm5010_vm11 }
 0x521   : > { %v5006_v55 = vsub.f32 1.0, %v5005_v13  ;;  %v5016_v13 = vor.u32 1.1754944e-38, %v5015_v49  ;;  %v15705_v49 = vld [vmem:[#allocation59_spill] sm:$0xff] }
 0x522   : > { %v4992_v42 = vmul.f32 %v7627_v61, %v4991_v1  ;;  %v2784_v28 = vadd.f32 %v2727_v34, %v15699_v60  ;;  %v13426_v45 = vpop.xlane.xlu1 %5605  ;;  %v15707_v60 = vld [vmem:[#allocation43_spill] sm:$0xff] }
 0x523   : > { %v5007_v5 = vmul.f32 %v7629_v33, %v5006_v55  ;;  %v3201_v55 = vsel %vm15702_vm1, %v3137_v59, 0.0  ;;  %vm5639_vm3 = vcmp.eq.f32.partialorder %v15707_v60, %v5552_v32  ;;  %v15708_v59 = vld [vmem:[#allocation101_spill] sm:$0xff] }
 0x524   : > { %v4993_v39 = vadd.f32 %v7627_v61, %v4992_v42  ;;  %v3136_v1 = vsub.f32 %v2784_v28, %v15700_v19  ;;  %v15706_v19 = vld [vmem:[#allocation58_spill] sm:$0xff]  ;;  %vm5640_vm7 = vcmp.eq.f32.partialorder %v15708_v59, %v5552_v32 }
 0x525   : > { %v5008_v31 = vadd.f32 %v7629_v33, %v5007_v5 }
 0x526   : > { %v4997_v47 = vsel %vm13417_vm6, %v7627_v61, %v4993_v39  ;;  %v3200_v41 = vsel %vm15704_vm8, %v3136_v1, 0.0  ;;  %v3240_v61 = vsel %vm3226_vm0, %v3201_v55, 0.0  ;;  %v15710_v55 = vld [vmem:[#allocation61_spill] sm:$0xff] }
 0x527   : > { %v5002_v34 = vsel %vm4999_vm15, %v5001_v2, %v4997_v47  ;;  %v5012_v42 = vsel %vm5011_vm14, %v7629_v33, %v5008_v31  ;;  %v3238_v28 = vsel %vm3226_vm0, %v3200_v41, 0.0  ;;  %v5704_v31 = vsel %vm5640_vm7, %v9717_v3, 256  ;;  %v15709_v47 = vld [vmem:[#allocation103_spill] sm:$0xff]  ;;  %v15712_v41 = vld [vmem:[#allocation53_spill] sm:$0xff] }
 0x528   : > { %v13433_v5 = vmul.f32 %v15705_v49, %v5002_v34  ;;  %v5017_v30 = vsel %vm5014_vm4, %v5016_v13, %v5012_v42  ;;  %v3239_v39 = vadd.f32 %v3238_v28, %v13299_v27  ;;  %v5703_v13 = vsel %vm5639_vm3, %v9700_v54, 256  ;;  %v5600_v27 = vpop.xlane.xlu0 %5599  ;;  %v13455_v42 = vpop.xlane.xlu2 %5602  ;;  %v15713_v49 = vld [vmem:[#allocation51_spill] sm:$0xff]  ;;  %v15714_v28 = vld [vmem:[#allocation129_spill] sm:$0xff] }
 0x529   : > { %v13437_v24 = vmul.f32 %v15706_v19, %v5017_v30  ;;  %vm5865_vm10 = vcmp.lt.s32.totalorder %v5703_v13, %v5704_v31  ;;  %vm5671_vm2 = vcmp.eq.f32.partialorder %v15709_v47, %v5600_v27  ;;  %vm5672_vm13 = vcmp.eq.f32.partialorder %v15710_v55, %v5600_v27  ;;  %v7633_v30 = vpop.eup %7632  ;;  %v15715_v19 = vld [vmem:[#allocation131_spill] sm:$0xff] }
 0x52a   : > { %v13445_v2 = vadd.f32 %v3240_v61, %v3239_v39  ;;  %v13449_v1 = vsel %vm5865_vm10, %v5703_v13, %v5704_v31  ;;  %v5561_v7 = vpop.xlane.xlu1 %5560  ;;  %v5735_v32 = vsel %vm5671_vm2, %v9700_v54, 256  ;;  %v5736_v20 = vsel %vm5672_vm13, %v9717_v3, 256  ;;  %v15717_v47 = vld [vmem:[#allocation147_spill] sm:$0xff] }
 0x52b   : > { %v5571_v33 = vmin.f32 %v13433_v5, %v13437_v24  ;;  %v5868_v34 = vshra.s32 %v13449_v1, 16  ;;  %vm6121_vm12 = vcmp.lt.s32.totalorder %v5735_v32, %v5736_v20  ;;  %vm5645_vm5 = vcmp.eq.f32.partialorder %v15712_v41, %v5561_v7  ;;  %v15722_v41 = vld [vmem:[#allocation133_spill] sm:$0xff] }
 0x52c   : > { %vm5646_vm9 = vcmp.eq.f32.partialorder %v15713_v49, %v5561_v7  ;;  %vm5625_vm11 = vcmp.eq.f32.partialorder %v15714_v28, %v12942_v4  ;;  %vm5626_vm6 = vcmp.eq.f32.partialorder %v15715_v19, %v12942_v4  ;;  %v13466_v39 = vsel %vm6121_vm12, %v5735_v32, %v5736_v20  ;;  %v15720_v32 = vld [vmem:[#allocation57_spill] sm:$0xff]  ;;  %v15724_v19 = vld [vmem:[#allocation122_spill] sm:$0xff] }
 0x52d   : > { %5572 = vmin.xlane.f32.xlu0 %v5571_v33  ;;  %v13458_v21 = vcvt.s32.f32 %v5868_v34  ;;  %15716 = vst [vmem:[#allocation85_spill] sm:$0xff] %v13466_v39  ;;  %v2708_v61 = vadd.f32 %v12852_v0, %v12850_v9  ;;  %v5709_v60 = vsel %vm5645_vm5, %v9700_v54, 256  ;;  %v5710_v59 = vsel %vm5646_vm9, %v9717_v3, 256  ;;  %v15718_v9 = vld [vmem:[#allocation79_spill] sm:$0xff]  ;;  %v15721_v20 = vld [vmem:[#allocation45_spill] sm:$0xff] }
 0x52e   : > { %v5689_v33 = vsel %vm5625_vm11, %v9700_v54, 256  ;;  %v5690_v13 = vsel %vm5626_vm6, %v9717_v3, 256  ;;  %v2731_v31 = vmul.f32 0.6931472, %v7633_v30  ;;  %v6124_v4 = vshra.s32 %v13466_v39, 16 }
 0x52f   : > { %15711 = vst [vmem:[#allocation11_spill] sm:$0xff] %v13458_v21  ;;  %5871 = vmin.xlane.f32.xlu1 %v13458_v21  ;;  %vm5913_vm14 = vcmp.lt.s32.totalorder %v5709_v60, %v5710_v59  ;;  %vm5753_vm4 = vcmp.lt.s32.totalorder %v5689_v33, %v5690_v13  ;;  %vm5675_vm8 = vcmp.eq.f32.partialorder %v15721_v20, %v13426_v45 }
 0x530   : > { %v5555_v27 = vpop.xlane.xlu0 %5554  ;;  %v13479_v7 = vcvt.s32.f32 %v6124_v4  ;;  %v2786_v34 = vadd.f32 %v2731_v31, %v15720_v32  ;;  %vm5676_vm3 = vcmp.eq.f32.partialorder %v15722_v41, %v13426_v45  ;;  %v13489_v30 = vpop.xlane.xlu2 %2697  ;;  %v13491_v28 = vsel %vm5913_vm14, %v5709_v60, %v5710_v59  ;;  %v15727_v60 = vld [vmem:[#allocation160_spill] sm:$0xff] }
 0x531   : > { %vm5641_vm15 = vcmp.eq.f32.partialorder %v15717_v47, %v5555_v27  ;;  %vm5642_vm1 = vcmp.eq.f32.partialorder %v15718_v9, %v5555_v27  ;;  %15723 = vst [vmem:[#allocation88_spill] sm:$0xff] %v13491_v28  ;;  %vm5661_vm10 = vcmp.eq.f32.partialorder %v15724_v19, %v13050_v44  ;;  %v13501_v27 = vsel %vm5753_vm4, %v5689_v33, %v5690_v13  ;;  %v15733_v19 = vld [vmem:[#allocation150_spill] sm:$0xff] }
 0x532   : > { %v5705_v0 = vsel %vm5641_vm15, %v9700_v54, 256  ;;  %15719 = vst [vmem:[#allocation86_spill] sm:$0xff] %v13479_v7  ;;  %v13481_v55 = vpop.xlane.xlu1 %2703  ;;  %v5706_v49 = vsel %vm5642_vm1, %v9717_v3, 256  ;;  %v5739_v45 = vsel %vm5675_vm8, %v9700_v54, 256  ;;  %v5740_v4 = vsel %vm5676_vm3, %v9717_v3, 256 }
 0x533   : > { %vm5881_vm7 = vcmp.lt.s32.totalorder %v5705_v0, %v5706_v49  ;;  %v3138_v59 = vsub.f32 %v2786_v34, %v15727_v60  ;;  %v5916_v9 = vshra.s32 %v13491_v28, 16  ;;  %v5756_v33 = vshra.s32 %v13501_v27, 16  ;;  %v15729_v34 = vld [vmem:[#allocation17_spill] sm:$0xff]  ;;  %v15743_v28 = vld [vmem:[#allocation116_spill] sm:$0xff] }
 0x534   : > { %v13497_v31 = vsel %vm5881_vm7, %v5705_v0, %v5706_v49  ;;  %v5725_v0 = vsel %vm5661_vm10, %v9700_v54, 256  ;;  %vm6153_vm13 = vcmp.lt.s32.totalorder %v5739_v45, %v5740_v4  ;;  %vm15730_vm5 = vcmp.ne.s32.totalorder %v15729_v34, 0 }
 0x535   : > { %2709 = vadd.xlane.f32.xlu0 %v2708_v61  ;;  %v15725_v61 = vld [vmem:[#allocation126_spill] sm:$0xff]  ;;  %15726 = vst [vmem:[#allocation89_spill] sm:$0xff] %v13497_v31  ;;  %v13519_v20 = vcvt.s32.f32 %v5916_v9  ;;  %v13522_v41 = vsel %vm6153_vm13, %v5739_v45, %v5740_v4  ;;  %vm5631_vm9 = vcmp.eq.f32.partialorder %v15733_v19, %v13037_v14  ;;  %vm5632_vm11 = vcmp.eq.f32.partialorder %v15734_v15, %v13037_v14 }
 0x536   : > { %vm5662_vm2 = vcmp.eq.f32.partialorder %v15725_v61, %v13050_v44  ;;  %v5884_v44 = vshra.s32 %v13497_v31, 16  ;;  %15732 = vst [vmem:[#allocation140_spill] sm:$0xff] %v13522_v41  ;;  %v13530_v61 = vcvt.s32.f32 %v5756_v33  ;;  %v6156_v34 = vshra.s32 %v13522_v41, 16 }
 0x537   : > { %6127 = vmin.xlane.f32.xlu1 %v13479_v7  ;;  %v5726_v32 = vsel %vm5662_vm2, %v9717_v3, 256  ;;  %15731 = vst [vmem:[#allocation93_spill] sm:$0xff] %v13519_v20  ;;  %v5695_v19 = vsel %vm5631_vm9, %v9700_v54, 256  ;;  %v5696_v14 = vsel %vm5632_vm11, %v9717_v3, 256  ;;  %v15739_v7 = vld [vmem:[#allocation95_spill] sm:$0xff]  ;;  %vm5637_vm1 = vcmp.eq.f32.partialorder %v15743_v28, %v13407_v10 }
 0x538   : > { %v13507_v47 = vpop.xlane.xlu0 %2691  ;;  %v13515_v13 = vcvt.s32.f32 %v5884_v44  ;;  %vm6041_vm12 = vcmp.lt.s32.totalorder %v5725_v0, %v5726_v32  ;;  %v2653_v9 = vpop.xlane.xlu2 %2652  ;;  %vm5801_vm6 = vcmp.lt.s32.totalorder %v5695_v19, %v5696_v14  ;;  %v5701_v28 = vsel %vm5637_vm1, %v9700_v54, 256 }
 0x539   : > { %v13533_v60 = vsel %vm6041_vm12, %v5725_v0, %v5726_v32  ;;  %v7635_v44 = vpop.eup %7634  ;;  %v13542_v32 = vcvt.s32.f32 %v6156_v34 }
 0x53a   : > { %15728 = vst [vmem:[#allocation92_spill] sm:$0xff] %v13515_v13  ;;  %5887 = vmin.xlane.f32.xlu2 %v13515_v13  ;;  %v13524_v49 = vpop.xlane.xlu1 %2658  ;;  %v6044_v33 = vshra.s32 %v13533_v60, 16  ;;  %v2735_v0 = vmul.f32 0.6931472, %v7635_v44 }
 0x53b   : > { %15735 = vst [vmem:[#allocation142_spill] sm:$0xff] %v13542_v32 }
 0x53c   : > { %v13549_v15 = vcvt.s32.f32 %v6044_v33  ;;  %v2788_v39 = vadd.f32 %v2735_v0, %v15739_v7  ;;  %v15741_v33 = vld [vmem:[#allocation111_spill] sm:$0xff] }
 0x53d   : > { %2664 = vadd.xlane.f32.xlu0 %v13395_v18  ;;  %v3202_v18 = vsel %vm15730_vm5, %v3138_v59, 0.0 }
 0x53e   : > { %v3242_v59 = vsel %vm3226_vm0, %v3202_v18, 0.0  ;;  %v15736_v18 = vld [vmem:[#allocation56_spill] sm:$0xff] }
 0x53f   : > { %5919 = vmin.xlane.f32.xlu1 %v13519_v20  ;;  %v3243_v45 = vadd.f32 %v3242_v59, %v13445_v2  ;;  %vm5667_vm15 = vcmp.eq.f32.partialorder %v15736_v18, %v13387_v48  ;;  %v15737_v2 = vld [vmem:[#allocation109_spill] sm:$0xff]  ;;  %v13551_v59 = vsel %vm5801_vm6, %v5695_v19, %v5696_v14  ;;  %v15740_v19 = vld [vmem:[#allocation67_spill] sm:$0xff] }
 0x540   : > { %v2647_v4 = vpop.xlane.xlu0 %2646  ;;  %vm5668_vm14 = vcmp.eq.f32.partialorder %v15737_v2, %v13387_v48  ;;  %15738 = vst [vmem:[#allocation127_spill] sm:$0xff] %v13551_v59  ;;  %v5731_v13 = vsel %vm5667_vm15, %v9700_v54, 256  ;;  %v13561_v20 = vpop.xlane.xlu2 %5611  ;;  %v3140_v14 = vsub.f32 %v2788_v39, %v15740_v19  ;;  %v15742_v2 = vld [vmem:[#allocation164_spill] sm:$0xff] }
 0x541   : > { %7636 = vlog2.f32 %v2647_v4  ;;  %v5732_v18 = vsel %vm5668_vm14, %v9717_v3, 256  ;;  %v15748_v19 = vld [vmem:[#allocation20_spill] sm:$0xff] }
 0x542   : > { %6159 = vmin.xlane.f32.xlu2 %v13542_v32  ;;  %7638 = vlog2.f32 %v2653_v9  ;;  %v13554_v4 = vpop.xlane.xlu1 %5614  ;;  %v5804_v9 = vshra.s32 %v13551_v59, 16  ;;  %vm6089_vm4 = vcmp.lt.s32.totalorder %v5731_v13, %v5732_v18  ;;  %v15744_v32 = vld [vmem:[#allocation49_spill] sm:$0xff]  ;;  %vm15749_vm7 = vcmp.ne.s32.totalorder %v15748_v19, 0 }
 0x543   : > { %vm5638_vm8 = vcmp.eq.f32.partialorder %v15744_v32, %v13407_v10  ;;  %v13573_v21 = vsel %vm6089_vm4, %v5731_v13, %v5732_v18  ;;  %v15750_v13 = vld [vmem:[#allocation81_spill] sm:$0xff]  ;;  %7640 = vlog2.f32 %v13524_v49 }
 0x544   : > { %v13571_v41 = vcvt.s32.f32 %v5804_v9  ;;  %v5702_v10 = vsel %vm5638_vm8, %v9717_v3, 256 }
 0x545   : > { %5759 = vmin.xlane.f32.xlu0 %v13530_v61  ;;  %vm5849_vm13 = vcmp.lt.s32.totalorder %v5701_v28, %v5702_v10 }
 0x546   : > { %15745 = vst [vmem:[#allocation124_spill] sm:$0xff] %v13571_v41 }
 0x547   : > { %v7637_v44 = vpop.eup %7636 }
 0x548   : > { %v13557_v34 = vpop.xlane.xlu0 %5557  ;;  %v2733_v48 = vmul.f32 0.6931472, %v7637_v44  ;;  %v7639_v0 = vpop.eup %7638  ;;  %v15746_v44 = vld [vmem:[#allocation21_spill] sm:$0xff] }
 0x549   : > { %vm15747_vm3 = vcmp.ne.s32.totalorder %v15746_v44, 0  ;;  %v2737_v39 = vmul.f32 0.6931472, %v7639_v0  ;;  %v15751_v0 = vld [vmem:[#allocation63_spill] sm:$0xff]  ;;  %v13588_v44 = vpop.xlane.xlu2 %5566 }
 0x54a   : > { %v2787_v7 = vadd.f32 %v2733_v48, %v15741_v33  ;;  %v3204_v59 = vsel %vm15747_vm3, %v3140_v14, 0.0  ;;  %v5570_v9 = vpop.xlane.xlu1 %5569  ;;  %v6092_v14 = vshra.s32 %v13573_v21, 16 }
 0x54b   : > { %v3246_v18 = vsel %vm3226_vm0, %v3204_v59, 0.0  ;;  %v15755_v59 = vld [vmem:[#allocation112_spill] sm:$0xff] }
 0x54c   : > { %v3139_v31 = vsub.f32 %v2787_v7, %v15742_v2  ;;  %vm5673_vm11 = vcmp.eq.f32.partialorder %v15755_v59, %v13455_v42 }
 0x54d   : > { %6047 = vmin.xlane.f32.xlu0 %v13549_v15 }
 0x54e   : > { %v3203_v48 = vsel %vm15749_vm7, %v3139_v31, 0.0  ;;  %v15752_v31 = vld [vmem:[#allocation114_spill] sm:$0xff] }
 0x54f   : > { %v3244_v33 = vsel %vm3226_vm0, %v3203_v48, 0.0  ;;  %v2789_v2 = vadd.f32 %v2737_v39, %v15752_v31 }
 0x550   : > { %v5609_v7 = vpop.xlane.xlu0 %5608  ;;  %v3245_v32 = vadd.f32 %v3244_v33, %v3243_v45  ;;  %v15753_v45 = vld [vmem:[#allocation68_spill] sm:$0xff]  ;;  %v15754_v33 = vld [vmem:[#allocation166_spill] sm:$0xff] }
 0x551   : > { %vm5677_vm10 = vcmp.eq.f32.partialorder %v15750_v13, %v5609_v7  ;;  %vm5678_vm2 = vcmp.eq.f32.partialorder %v15751_v0, %v5609_v7  ;;  %vm5651_vm12 = vcmp.eq.f32.partialorder %v15753_v45, %v5570_v9  ;;  %vm5652_vm5 = vcmp.eq.f32.partialorder %v15754_v33, %v5570_v9  ;;  %v15756_v7 = vld [vmem:[#allocation60_spill] sm:$0xff] }
 0x552   : > { %v3247_v19 = vadd.f32 %v3246_v18, %v3245_v32  ;;  %v5741_v48 = vsel %vm5677_vm10, %v9700_v54, 256  ;;  %vm5674_vm6 = vcmp.eq.f32.partialorder %v15756_v7, %v13455_v42  ;;  %v13600_v13 = vcvt.s32.f32 %v6092_v14  ;;  %v15758_v18 = vld [vmem:[#allocation115_spill] sm:$0xff]  ;;  %v15759_v14 = vld [vmem:[#allocation22_spill] sm:$0xff]  ;;  %v15762_v7 = vld [vmem:[#allocation152_spill] sm:$0xff] }
 0x553   : > { %v13602_v32 = vsel %vm5849_vm13, %v5701_v28, %v5702_v10  ;;  %v3141_v0 = vsub.f32 %v2789_v2, %v15758_v18  ;;  %v5715_v31 = vsel %vm5651_vm12, %v9700_v54, 256  ;;  %v5716_v45 = vsel %vm5652_vm5, %v9717_v3, 256  ;;  %v15765_v18 = vld [vmem:[#allocation106_spill] sm:$0xff] }
 0x554   : > { %v5737_v9 = vsel %vm5673_vm11, %v9700_v54, 256  ;;  %v5738_v33 = vsel %vm5674_vm6, %v9717_v3, 256  ;;  %vm5961_vm4 = vcmp.lt.s32.totalorder %v5715_v31, %v5716_v45  ;;  %vm15760_vm8 = vcmp.ne.s32.totalorder %v15759_v14, 0 }
 0x555   : > { %5807 = vmin.xlane.f32.xlu0 %v13571_v41  ;;  %v5742_v41 = vsel %vm5678_vm2, %v9717_v3, 256  ;;  %vm6137_vm1 = vcmp.lt.s32.totalorder %v5737_v9, %v5738_v33  ;;  %v3205_v2 = vsel %vm15760_vm8, %v3141_v0, 0.0  ;;  %vm5681_vm7 = vcmp.eq.f32.partialorder %v15762_v7, %v13554_v4 }
 0x556   : > { %vm6169_vm9 = vcmp.lt.s32.totalorder %v5741_v48, %v5742_v41  ;;  %vm5644_vm13 = vcmp.eq.f32.partialorder %v15765_v18, %v13557_v34  ;;  %v3248_v14 = vsel %vm3226_vm0, %v3205_v2, 0.0  ;;  %v7641_v18 = vpop.eup %7640 }
 0x557   : > { %v13598_v39 = vsel %vm6169_vm9, %v5741_v48, %v5742_v41  ;;  %v5852_v41 = vshra.s32 %v13602_v32, 16 }
 0x558   : > { %15757 = vst [vmem:[#allocation134_spill] sm:$0xff] %v13598_v39  ;;  %v5564_v59 = vpop.xlane.xlu0 %5563  ;;  %v6172_v42 = vshra.s32 %v13598_v39, 16  ;;  %v13630_v39 = vsel %vm5961_vm4, %v5715_v31, %v5716_v45 }
 0x559   : > { %vm5647_vm15 = vcmp.eq.f32.partialorder %v13111_v46, %v5564_v59  ;;  %vm5648_vm14 = vcmp.eq.f32.partialorder %v13123_v23, %v5564_v59  ;;  %v15763_v46 = vld [vmem:[#allocation73_spill] sm:$0xff]  ;;  %v15764_v23 = vld [vmem:[#allocation55_spill] sm:$0xff]  ;;  %v13628_v59 = vpop.xlane.xlu2 %2706  ;;  %15766 = vst [vmem:[#allocation123_spill] sm:$0xff] %v13630_v39  ;;  %v13638_v7 = vcvt.s32.f32 %v5852_v41  ;;  %v5964_v45 = vshra.s32 %v13630_v39, 16 }
 0x55a   : > { %v5711_v28 = vsel %vm5647_vm15, %v9700_v54, 256  ;;  %v5712_v10 = vsel %vm5648_vm14, %v9717_v3, 256  ;;  %v13618_v48 = vcvt.s32.f32 %v6172_v42  ;;  %vm5682_vm10 = vcmp.eq.f32.partialorder %v15763_v46, %v13554_v4  ;;  %v15780_v39 = vld [vmem:[#allocation151_spill] sm:$0xff] }
 0x55b   : > { %vm5929_vm3 = vcmp.lt.s32.totalorder %v5711_v28, %v5712_v10  ;;  %vm5643_vm2 = vcmp.eq.f32.partialorder %v15764_v23, %v13557_v34  ;;  %v13635_v42 = vsel %vm6137_vm1, %v5737_v9, %v5738_v33  ;;  %v5745_v4 = vsel %vm5681_vm7, %v9700_v54, 256 }
 0x55c   : > { %15761 = vst [vmem:[#allocation135_spill] sm:$0xff] %v13618_v48  ;;  %v13632_v0 = vsel %vm5929_vm3, %v5711_v28, %v5712_v10  ;;  %6175 = vmin.xlane.f32.xlu1 %v13618_v48  ;;  %v5746_v46 = vsel %vm5682_vm10, %v9717_v3, 256  ;;  %v5707_v34 = vsel %vm5643_vm2, %v9700_v54, 256  ;;  %v5708_v23 = vsel %vm5644_vm13, %v9717_v3, 256  ;;  %v15773_v48 = vld [vmem:[#allocation47_spill] sm:$0xff] }
 0x55d   : > { %6095 = vmin.xlane.f32.xlu0 %v13600_v13  ;;  %15767 = vst [vmem:[#allocation157_spill] sm:$0xff] %v13632_v0  ;;  %v5932_v9 = vshra.s32 %v13632_v0, 16  ;;  %v3249_v33 = vadd.f32 %v3248_v14, %v3247_v19  ;;  %vm6201_vm12 = vcmp.lt.s32.totalorder %v5745_v4, %v5746_v46  ;;  %v6140_v41 = vshra.s32 %v13635_v42, 16  ;;  %v15774_v19 = vld [vmem:[#allocation52_spill] sm:$0xff] }
 0x55e   : > { %15768 = vst [vmem:[#allocation158_spill] sm:$0xff] %v13635_v42  ;;  %vm5897_vm5 = vcmp.lt.s32.totalorder %v5707_v34, %v5708_v23  ;;  %v13653_v10 = vcvt.s32.f32 %v5964_v45  ;;  %v13656_v49 = vsel %vm6201_vm12, %v5745_v4, %v5746_v46  ;;  %vm5679_vm9 = vcmp.eq.f32.partialorder %v15773_v48, %v13561_v20  ;;  %v15789_v42 = vld [vmem:[#allocation23_spill] sm:$0xff] }
 0x55f   : > { %v13651_v28 = vcvt.s32.f32 %v5932_v9  ;;  %15771 = vst [vmem:[#allocation119_spill] sm:$0xff] %v13656_v49  ;;  %v13658_v2 = vsel %vm5897_vm5, %v5707_v34, %v5708_v23  ;;  %vm5680_vm11 = vcmp.eq.f32.partialorder %v15774_v19, %v13561_v20  ;;  %v13665_v14 = vcvt.s32.f32 %v6140_v41  ;;  %v15778_v41 = vld [vmem:[#allocation54_spill] sm:$0xff] }
 0x560   : > { %v13646_v31 = vpop.xlane.xlu0 %2700  ;;  %15770 = vst [vmem:[#allocation137_spill] sm:$0xff] %v13653_v10  ;;  %v5900_v4 = vshra.s32 %v13658_v2, 16  ;;  %v6204_v34 = vshra.s32 %v13656_v49, 16  ;;  %v5743_v23 = vsel %vm5679_vm9, %v9700_v54, 256  ;;  %v5744_v45 = vsel %vm5680_vm11, %v9717_v3, 256  ;;  %v15784_v49 = vld [vmem:[#allocation44_spill] sm:$0xff] }
 0x561   : > { %15769 = vst [vmem:[#allocation136_spill] sm:$0xff] %v13651_v28  ;;  %5935 = vmin.xlane.f32.xlu2 %v13651_v28  ;;  %v13667_v9 = vpop.xlane.xlu2 %2661  ;;  %vm6185_vm6 = vcmp.lt.s32.totalorder %v5743_v23, %v5744_v45  ;;  %vm5650_vm14 = vcmp.eq.f32.partialorder %v15780_v39, %v13588_v44  ;;  %v15785_v39 = vld [vmem:[#allocation24_spill] sm:$0xff]  ;;  %vm15790_vm7 = vcmp.ne.s32.totalorder %v15789_v42, 0  ;;  %v13711_v42 = vpop.xlane.xlu1 %2712 }
 0x562   : > { %15772 = vst [vmem:[#allocation118_spill] sm:$0xff] %v13658_v2  ;;  %v13674_v48 = vcvt.s32.f32 %v6204_v34  ;;  %v13676_v20 = vcvt.s32.f32 %v5900_v4  ;;  %v15779_v2 = vld [vmem:[#allocation74_spill] sm:$0xff]  ;;  %v13684_v0 = vsel %vm6185_vm6, %v5743_v23, %v5744_v45  ;;  %v5714_v4 = vsel %vm5650_vm14, %v9717_v3, 256  ;;  %v15782_v34 = vld [vmem:[#allocation76_spill] sm:$0xff]  ;;  %v15787_v45 = vld [vmem:[#allocation167_spill] sm:$0xff] }
 0x563   : > { %15775 = vst [vmem:[#allocation91_spill] sm:$0xff] %v13665_v14  ;;  %vm5649_vm15 = vcmp.eq.f32.partialorder %v15779_v2, %v13588_v44  ;;  %vm15786_vm1 = vcmp.ne.s32.totalorder %v15785_v39, 0 }
 0x564   : > { %5967 = vmin.xlane.f32.xlu1 %v13653_v10  ;;  %v2741_v10 = vmul.f32 0.6931472, %v7641_v18  ;;  %15776 = vst [vmem:[#allocation16_spill] sm:$0xff] %v13674_v48 }
 0x565   : > { %5855 = vmin.xlane.f32.xlu0 %v13638_v7  ;;  %15777 = vst [vmem:[#allocation15_spill] sm:$0xff] %v13676_v20 }
 0x566   : > { %v2791_v19 = vadd.f32 %v2741_v10, %v15778_v41  ;;  %15781 = vst [vmem:[#allocation130_spill] sm:$0xff] %v13684_v0  ;;  %v6188_v10 = vshra.s32 %v13684_v0, 16  ;;  %v15783_v41 = vld [vmem:[#allocation153_spill] sm:$0xff] }
 0x568   : > { %v2656_v46 = vpop.xlane.xlu0 %2655 }
 0x569   : > { %7642 = vlog2.f32 %v2656_v46  ;;  %6207 = vmin.xlane.f32.xlu2 %v13674_v48  ;;  %v5713_v46 = vsel %vm5649_vm15, %v9700_v54, 256  ;;  %v3143_v48 = vsub.f32 %v2791_v19, %v15782_v34 }
 0x56a   : > { %vm5945_vm4 = vcmp.lt.s32.totalorder %v5713_v46, %v5714_v4 }
 0x56b   : > { %v3207_v23 = vsel %vm15786_vm1, %v3143_v48, 0.0  ;;  %v13701_v34 = vsel %vm5945_vm4, %v5713_v46, %v5714_v4 }
 0x56d   : > { %6143 = vmin.xlane.f32.xlu0 %v13665_v14  ;;  %v5621_v14 = vpop.xlane.xlu2 %5620 }
 0x56e   : > { %vm5685_vm8 = vcmp.eq.f32.partialorder %v15787_v45, %v5621_v14 }
 0x56f   : > { %v7643_v28 = vpop.eup %7642  ;;  %v5749_v48 = vsel %vm5685_vm8, %v9700_v54, 256 }
 0x570   : > { %v2739_v18 = vmul.f32 0.6931472, %v7643_v28  ;;  %v15788_v28 = vld [vmem:[#allocation71_spill] sm:$0xff] }
 0x571   : > { %vm5686_vm3 = vcmp.eq.f32.partialorder %v15788_v28, %v5621_v14  ;;  %v5948_v14 = vshra.s32 %v13701_v34, 16 }
 0x572   : > { %v2790_v2 = vadd.f32 %v2739_v18, %v15783_v41  ;;  %v5750_v41 = vsel %vm5686_vm3, %v9717_v3, 256 }
 0x573   : > { %vm6233_vm13 = vcmp.lt.s32.totalorder %v5749_v48, %v5750_v41  ;;  %v13719_v4 = vcvt.s32.f32 %v5948_v14 }
 0x574   : > { %v3142_v44 = vsub.f32 %v2790_v2, %v15784_v49  ;;  %v3252_v49 = vsel %vm3226_vm0, %v3207_v23, 0.0  ;;  %v13723_v39 = vsel %vm6233_vm13, %v5749_v48, %v5750_v41  ;;  %v6027_v48 = vand.u32 65535, %v13149_v40 }
 0x575   : > { %5903 = vmin.xlane.f32.xlu0 %v13676_v20  ;;  %v13697_v20 = vcvt.s32.f32 %v6188_v10  ;;  %v5576_v46 = vpop.xlane.xlu2 %5575 }
 0x576   : > { %v3206_v19 = vsel %vm15790_vm7, %v3142_v44, 0.0  ;;  %vm5655_vm5 = vcmp.eq.f32.partialorder %v13134_v8, %v5576_v46  ;;  %vm5656_vm9 = vcmp.eq.f32.partialorder %v13139_v35, %v5576_v46  ;;  %v6236_v8 = vshra.s32 %v13723_v39, 16  ;;  %v13733_v35 = vpop.xlane.xlu1 %5623 }
 0x577   : > { %v3250_v0 = vsel %vm3226_vm0, %v3206_v19, 0.0  ;;  %v5720_v23 = vsel %vm5656_vm9, %v9717_v3, 256  ;;  %v6011_v46 = vand.u32 65535, %v13295_v25 }
 0x578   : > { %v3251_v18 = vadd.f32 %v3250_v0, %v3249_v33  ;;  %v13735_v28 = vcvt.s32.f32 %v6236_v8  ;;  %v5771_v8 = vand.u32 65535, %v13311_v12 }
 0x57a   : > { %v13709_v10 = vadd.f32 %v3252_v49, %v3251_v18 }
 0x57d   : > { %6191 = vmin.xlane.f32.xlu0 %v13697_v20  ;;  %v13741_v49 = vpop.xlane.xlu2 %6031 }
 0x57e   : > { %vm6033_vm6 = vcmp.eq.f32.partialorder %v13170_v43, %v13741_v49  ;;  %v13748_v14 = vpop.xlane.xlu1 %6015  ;;  %v15794_v43 = vld [vmem:[#allocation75_spill] sm:$0xff] }
 0x57f   : > { %v5618_v2 = vpop.xlane.xlu0 %5617  ;;  %vm6017_vm15 = vcmp.eq.f32.partialorder %v13329_v50, %v13748_v14 }
 0x580   : > { %vm5683_vm10 = vcmp.eq.f32.partialorder %v13352_v29, %v5618_v2  ;;  %vm5684_vm2 = vcmp.eq.f32.partialorder %v13357_v22, %v5618_v2  ;;  %v5719_v22 = vsel %vm5655_vm5, %v9700_v54, 256  ;;  %v6029_v2 = vcvt.s32.f32 %v6027_v48 }
 0x581   : > { %v5747_v0 = vsel %vm5683_vm10, %v9700_v54, 256  ;;  %v5748_v33 = vsel %vm5684_vm2, %v9717_v3, 256  ;;  %vm5993_vm11 = vcmp.lt.s32.totalorder %v5719_v22, %v5720_v23  ;;  %v5773_v48 = vcvt.s32.f32 %v5771_v8 }
 0x582   : > { %vm6217_vm12 = vcmp.lt.s32.totalorder %v5747_v0, %v5748_v33  ;;  %v13737_v19 = vsel %vm5993_vm11, %v5719_v22, %v5720_v23  ;;  %v15793_v22 = vld [vmem:[#allocation90_spill] sm:$0xff]  ;;  %v6059_v8 = vand.u32 65535, %v13250_v16  ;;  %vm5687_vm10 = vcmp.eq.f32.partialorder %v13278_v57, %v13733_v35 }
 0x583   : > { %v13721_v44 = vsel %vm6217_vm12, %v5747_v0, %v5748_v33  ;;  %v5996_v18 = vshra.s32 %v13737_v19, 16  ;;  %v6034_v0 = vsel %vm6033_vm6, %v6029_v2, inf  ;;  %v6013_v33 = vcvt.s32.f32 %v6011_v46 }
 0x584   : > { %15791 = vst [vmem:[#allocation132_spill] sm:$0xff] %v13721_v44  ;;  %v6220_v29 = vshra.s32 %v13721_v44, 16  ;;  %7644 = vlog2.f32 %v15793_v22  ;;  %vm5688_vm2 = vcmp.eq.f32.partialorder %v13283_v36, %v13733_v35  ;;  %v5755_v35 = vand.u32 65535, %v13501_v27 }
 0x585   : > { %5951 = vmin.xlane.f32.xlu0 %v13719_v4  ;;  %v13744_v41 = vcvt.s32.f32 %v5996_v18  ;;  %v6018_v40 = vsel %vm6017_vm15, %v6013_v33, inf  ;;  %7646 = vlog2.f32 %v15794_v43  ;;  %v5752_v36 = vsel %vm5688_vm2, %v9717_v3, 256 }
 0x586   : > { %v13729_v45 = vcvt.s32.f32 %v6220_v29  ;;  %v13754_v29 = vpop.xlane.xlu2 %5791  ;;  %v13758_v23 = vpop.xlane.xlu1 %5775  ;;  %7648 = vlog2.f32 %v13090_v37 }
 0x587   : > { %vm5777_vm14 = vcmp.eq.f32.partialorder %v13363_v11, %v13758_v23  ;;  %7650 = vlog2.f32 %v13095_v26  ;;  %vm5793_vm3 = vcmp.eq.f32.partialorder %v13221_v52, %v13754_v29 }
 0x588   : > { %15792 = vst [vmem:[#allocation14_spill] sm:$0xff] %v13729_v45  ;;  %6223 = vmin.xlane.f32.xlu1 %v13729_v45  ;;  %7652 = vlog2.f32 %v13667_v9  ;;  %v5778_v46 = vsel %vm5777_vm14, %v5773_v48, inf }
 0x589   : > { %7654 = vlog2.f32 %v13151_v63  ;;  %v5787_v63 = vand.u32 65535, %v13166_v51 }
 0x58a   : > { %v7645_v2 = vpop.eup %7644  ;;  %7656 = vlog2.f32 %v13305_v38 }
 0x58b   : > { %v7647_v12 = vpop.eup %7646  ;;  %7658 = vlog2.f32 %v13404_v58 }
 0x58c   : > { %v7649_v11 = vpop.eup %7648  ;;  %7660 = vlog2.f32 %v13375_v53 }
 0x58d   : > { %6239 = vmin.xlane.f32.xlu0 %v13735_v28  ;;  %v2753_v26 = vmul.f32 0.6931472, %v7649_v11  ;;  %v7651_v43 = vpop.eup %7650 }
 0x58e   : > { %v7653_v9 = vpop.eup %7652  ;;  %v13784_v48 = vpop.xlane.xlu1 %5823  ;;  %v2751_v11 = vmul.f32 0.6931472, %v7651_v43 }
 0x58f   : > { %v2743_v45 = vmul.f32 0.6931472, %v7653_v9  ;;  %vm5825_vm5 = vcmp.eq.f32.partialorder %v13380_v56, %v13784_v48 }
 0x590   : > { %6035 = vmin.xlane.f32.xlu1 %v6034_v0  ;;  %v2747_v0 = vmul.f32 0.6931472, %v7645_v2  ;;  %v15796_v2 = vld [vmem:[#allocation78_spill] sm:$0xff] }
 0x595   : > { %5999 = vmin.xlane.f32.xlu0 %v13744_v41 }
 0x59d   : > { %6019 = vmin.xlane.f32.xlu0 %v6018_v40  ;;  %v2749_v40 = vmul.f32 0.6931472, %v7647_v12 }
 0x5a0   : > { %v5573_v25 = vpop.xlane.xlu0 %5572 }
 0x5a1   : > { %vm5653_vm4 = vcmp.eq.f32.partialorder %v13433_v5, %v5573_v25  ;;  %vm5654_vm1 = vcmp.eq.f32.partialorder %v13437_v24, %v5573_v25  ;;  %v13774_v24 = vpop.xlane.xlu2 %6063  ;;  %v7655_v25 = vpop.eup %7654 }
 0x5a2   : > { %v5717_v50 = vsel %vm5653_vm4, %v9700_v54, 256  ;;  %v5718_v18 = vsel %vm5654_vm1, %v9717_v3, 256  ;;  %vm6065_vm7 = vcmp.eq.f32.partialorder %v13301_v6, %v13774_v24  ;;  %v2755_v51 = vmul.f32 0.6931472, %v7655_v25  ;;  %v7657_v52 = vpop.eup %7656  ;;  %v15801_v6 = vld [vmem:[#allocation105_spill] sm:$0xff] }
 0x5a3   : > { %vm5977_vm8 = vcmp.lt.s32.totalorder %v5717_v50, %v5718_v18  ;;  %v15803_v25 = vld [vmem:[#allocation121_spill] sm:$0xff] }
 0x5a4   : > { %v13770_v37 = vsel %vm5977_vm8, %v5717_v50, %v5718_v18  ;;  %v15795_v50 = vld [vmem:[#allocation104_spill] sm:$0xff] }
 0x5a5   : > { %5779 = vmin.xlane.f32.xlu0 %v5778_v46  ;;  %v5980_v5 = vshra.s32 %v13770_v37, 16  ;;  %v2794_v18 = vadd.f32 %v2747_v0, %v15795_v50  ;;  %v2795_v46 = vadd.f32 %v2749_v40, %v15796_v2  ;;  %v6061_v0 = vcvt.s32.f32 %v6059_v8  ;;  %v15799_v50 = vld [vmem:[#allocation77_spill] sm:$0xff]  ;;  %v15802_v8 = vld [vmem:[#allocation110_spill] sm:$0xff] }
 0x5a6   : > { %v5789_v40 = vcvt.s32.f32 %v5787_v63  ;;  %v2796_v63 = vadd.f32 %v2751_v11, %v15802_v8  ;;  %v15808_v11 = vld [vmem:[#allocation50_spill] sm:$0xff] }
 0x5a7   : > { %v13776_v33 = vcvt.s32.f32 %v5980_v5  ;;  %v15797_v5 = vld [vmem:[#allocation120_spill] sm:$0xff]  ;;  %v3147_v38 = vsub.f32 %v2795_v46, %v15799_v50  ;;  %v6066_v58 = vsel %vm6065_vm7, %v6061_v0, inf  ;;  %v5819_v46 = vand.u32 65535, %v13365_v17  ;;  %v7659_v0 = vpop.eup %7658  ;;  %v13818_v17 = vpop.xlane.xlu1 %6079 }
 0x5a8   : > { %v13778_v22 = vpop.xlane.xlu0 %2709  ;;  %v2797_v12 = vadd.f32 %v2753_v26, %v15797_v5  ;;  %v15798_v26 = vld [vmem:[#allocation70_spill] sm:$0xff]  ;;  %v5794_v9 = vsel %vm5793_vm3, %v5789_v40, inf  ;;  %v15800_v5 = vld [vmem:[#allocation83_spill] sm:$0xff]  ;;  %v15806_v50 = vld [vmem:[#allocation28_spill] sm:$0xff] }
 0x5a9   : > { %5983 = vmin.xlane.f32.xlu2 %v13776_v33  ;;  %v13795_v16 = vpop.xlane.xlu2 %5839  ;;  %v3146_v43 = vsub.f32 %v2794_v18, %v15798_v26  ;;  %v2792_v44 = vadd.f32 %v2743_v45, %v15800_v5  ;;  %5795 = vmin.xlane.f32.xlu1 %v5794_v9  ;;  %v2798_v18 = vadd.f32 %v2755_v51, %v15803_v25  ;;  %v7661_v45 = vpop.eup %7660  ;;  %v15804_v40 = vld [vmem:[#allocation27_spill] sm:$0xff]  ;;  %v5751_v26 = vsel %vm5687_vm10, %v9700_v54, 256  ;;  %v15809_v51 = vld [vmem:[#allocation30_spill] sm:$0xff]  ;;  %v15811_v9 = vld [vmem:[#allocation80_spill] sm:$0xff] }
 0x5aa   : > { %v3149_v53 = vsub.f32 %v2797_v12, %v15801_v6  ;;  %vm15805_vm13 = vcmp.ne.s32.totalorder %v15804_v40, 0  ;;  %vm15807_vm12 = vcmp.ne.s32.totalorder %v15806_v50, 0  ;;  %vm15810_vm9 = vcmp.ne.s32.totalorder %v15809_v51, 0  ;;  %v15812_v6 = vld [vmem:[#allocation128_spill] sm:$0xff]  ;;  %v15813_v50 = vld [vmem:[#allocation145_spill] sm:$0xff] }
 0x5ab   : > { %v3210_v57 = vsel %vm15805_vm13, %v3146_v43, 0.0  ;;  %v3211_v12 = vsel %vm15807_vm12, %v3147_v38, 0.0  ;;  %v3148_v5 = vsub.f32 %v2796_v63, %v15811_v9  ;;  %v3150_v3 = vsub.f32 %v2798_v18, %v15812_v6  ;;  %v15814_v18 = vld [vmem:[#allocation25_spill] sm:$0xff]  ;;  %v15818_v9 = vld [vmem:[#allocation148_spill] sm:$0xff] }
 0x5ac   : > { %v3213_v43 = vsel %vm15810_vm9, %v3149_v53, 0.0  ;;  %v5821_v27 = vcvt.s32.f32 %v5819_v46  ;;  %v2761_v38 = vmul.f32 0.6931472, %v7659_v0  ;;  %vm6249_vm11 = vcmp.lt.s32.totalorder %v5751_v26, %v5752_v36  ;;  %v15816_v0 = vld [vmem:[#allocation48_spill] sm:$0xff]  ;;  %v15819_v6 = vld [vmem:[#allocation117_spill] sm:$0xff] }
 0x5ad   : > { %6067 = vmin.xlane.f32.xlu0 %v6066_v58  ;;  %v3144_v58 = vsub.f32 %v2792_v44, %v15808_v11  ;;  %v5757_v53 = vcvt.s32.f32 %v5755_v35  ;;  %vm15815_vm6 = vcmp.ne.s32.totalorder %v15814_v18, 0  ;;  %v15817_v11 = vld [vmem:[#allocation69_spill] sm:$0xff]  ;;  %v3258_v35 = vsel %vm3226_vm0, %v3210_v57, 0.0  ;;  %v15826_v18 = vld [vmem:[#allocation139_spill] sm:$0xff] }
 0x5ae   : > { %v5826_v40 = vsel %vm5825_vm5, %v5821_v27, inf  ;;  %v6107_v51 = vand.u32 65535, %v15817_v11 }
 0x5af   : > { %v3208_v46 = vsel %vm15815_vm6, %v3144_v58, 0.0  ;;  %v3264_v58 = vsel %vm3226_vm0, %v3213_v43, 0.0 }
 0x5b0   : > { %v2665_v2 = vpop.xlane.xlu0 %2664 }
 0x5b1   : > { %7662 = vlog2.f32 %v2665_v2  ;;  %v2759_v2 = vmul.f32 0.6931472, %v7657_v52  ;;  %v13824_v8 = vpop.xlane.xlu2 %6111  ;;  %v2757_v52 = vmul.f32 0.6931472, %v7661_v45 }
 0x5b2   : > { %7664 = vlog2.f32 %v13397_v62  ;;  %v13836_v62 = vsel %vm6249_vm11, %v5751_v26, %v5752_v36  ;;  %v15822_v36 = vld [vmem:[#allocation149_spill] sm:$0xff] }
 0x5b3   : > { %7666 = vlog2.f32 %v13507_v47  ;;  %v2800_v63 = vadd.f32 %v2759_v2, %v15813_v50  ;;  %v3260_v2 = vsel %vm3226_vm0, %v3211_v12, 0.0  ;;  %v2799_v27 = vadd.f32 %v2757_v52, %v15819_v6  ;;  %v13855_v50 = vpop.xlane.xlu1 %5871  ;;  %v15830_v6 = vld [vmem:[#allocation138_spill] sm:$0xff] }
 0x5b4   : > { %7668 = vlog2.f32 %v13489_v30  ;;  %v2801_v30 = vadd.f32 %v2761_v38, %v15818_v9  ;;  %v3254_v12 = vsel %vm3226_vm0, %v3208_v46, 0.0  ;;  %v15825_v38 = vld [vmem:[#allocation107_spill] sm:$0xff]  ;;  %v6252_v52 = vshra.s32 %v13836_v62, 16  ;;  %v15829_v46 = vld [vmem:[#allocation156_spill] sm:$0xff] }
 0x5b5   : > { %5827 = vmin.xlane.f32.xlu0 %v5826_v40  ;;  %vm6113_vm1 = vcmp.eq.f32.partialorder %v15825_v38, %v13824_v8  ;;  %7670 = vlog2.f32 %v13646_v31  ;;  %v15832_v38 = vld [vmem:[#allocation127_spill] sm:$0xff] }
 0x5b6   : > { %v3153_v9 = vsub.f32 %v2801_v30, %v15829_v46  ;;  %7672 = vlog2.f32 %v13481_v55  ;;  %v13875_v30 = vcvt.s32.f32 %v6252_v52  ;;  %v15833_v52 = vld [vmem:[#allocation33_spill] sm:$0xff] }
 0x5b7   : > { %v7663_v25 = vpop.eup %7662  ;;  %7674 = vlog2.f32 %v13628_v59  ;;  %vm15834_vm7 = vcmp.ne.s32.totalorder %v15833_v52, 0  ;;  %v15835_v59 = vld [vmem:[#allocation34_spill] sm:$0xff] }
 0x5b8   : > { %v2745_v56 = vmul.f32 0.6931472, %v7663_v25  ;;  %v13828_v44 = vpop.xlane.xlu0 %5759  ;;  %v7665_v40 = vpop.eup %7664  ;;  %vm15836_vm10 = vcmp.ne.s32.totalorder %v15835_v59, 0  ;;  %7676 = vlog2.f32 %v13778_v22 }
 0x5b9   : > { %vm5761_vm15 = vcmp.eq.f32.partialorder %v13530_v61, %v13828_v44  ;;  %v15820_v61 = vld [vmem:[#allocation29_spill] sm:$0xff]  ;;  %v7667_v43 = vpop.eup %7666  ;;  %v13861_v11 = vpop.xlane.xlu2 %5887  ;;  %7678 = vlog2.f32 %v13711_v42  ;;  %v15844_v42 = vld [vmem:[#allocation140_spill] sm:$0xff] }
 0x5ba   : > { %v2793_v47 = vadd.f32 %v2745_v56, %v15816_v0  ;;  %v5762_v45 = vsel %vm5761_vm15, %v5757_v53, inf  ;;  %vm15821_vm14 = vcmp.ne.s32.totalorder %v15820_v61, 0  ;;  %v6043_v56 = vand.u32 65535, %v13533_v60  ;;  %v15823_v53 = vld [vmem:[#allocation31_spill] sm:$0xff] }
 0x5bb   : > { %5763 = vmin.xlane.f32.xlu2 %v5762_v45  ;;  %v3212_v26 = vsel %vm15821_vm14, %v3148_v5, 0.0  ;;  %vm15824_vm4 = vcmp.ne.s32.totalorder %v15823_v53, 0  ;;  %v3152_v5 = vsub.f32 %v2800_v63, %v15826_v18  ;;  %v3255_v0 = vadd.f32 %v3254_v12, %v13709_v10 }
 0x5bc   : > { %v3145_v25 = vsub.f32 %v2793_v47, %v15822_v36  ;;  %v3214_v57 = vsel %vm15824_vm4, %v3150_v3, 0.0  ;;  %v15827_v47 = vld [vmem:[#allocation26_spill] sm:$0xff]  ;;  %v6109_v45 = vcvt.s32.f32 %v6107_v51  ;;  %v7669_v3 = vpop.eup %7668  ;;  %v3151_v61 = vsub.f32 %v2799_v27, %v15830_v6  ;;  %v15840_v6 = vld [vmem:[#allocation11_spill] sm:$0xff] }
 0x5bd   : > { %vm15828_vm8 = vcmp.ne.s32.totalorder %v15827_v47, 0  ;;  %v6045_v51 = vcvt.s32.f32 %v6043_v56  ;;  %v2763_v12 = vmul.f32 0.6931472, %v7667_v43  ;;  %v5867_v27 = vand.u32 65535, %v13449_v1  ;;  %v15831_v56 = vld [vmem:[#allocation13_spill] sm:$0xff]  ;;  %v7671_v1 = vpop.eup %7670 }
 0x5be   : > { %v3209_v60 = vsel %vm15828_vm8, %v3145_v25, 0.0  ;;  %v6114_v10 = vsel %vm6113_vm1, %v6109_v45, inf  ;;  %v2765_v25 = vmul.f32 0.6931472, %v7665_v40  ;;  %v3262_v18 = vsel %vm3226_vm0, %v3212_v26, 0.0  ;;  %v15837_v45 = vld [vmem:[#allocation32_spill] sm:$0xff] }
 0x5bf   : > { %v3256_v36 = vsel %vm3226_vm0, %v3209_v60, 0.0  ;;  %6115 = vmin.xlane.f32.xlu0 %v6114_v10  ;;  %v5835_v40 = vand.u32 65535, %v15831_v56  ;;  %v5803_v43 = vand.u32 65535, %v15832_v38  ;;  %v3216_v47 = vsel %vm15834_vm7, %v3152_v5, 0.0 }
 0x5c0   : > { %v3257_v63 = vadd.f32 %v3256_v36, %v3255_v0  ;;  %v13868_v53 = vpop.xlane.xlu0 %6047  ;;  %v2767_v0 = vmul.f32 0.6931472, %v7669_v3  ;;  %vm15838_vm2 = vcmp.ne.s32.totalorder %v15837_v45, 0  ;;  %v15839_v3 = vld [vmem:[#allocation165_spill] sm:$0xff]  ;;  %vm5873_vm13 = vcmp.eq.f32.partialorder %v15840_v6, %v13855_v50  ;;  %v7673_v36 = vpop.eup %7672 }
 0x5c1   : > { %vm6049_vm3 = vcmp.eq.f32.partialorder %v13549_v15, %v13868_v53  ;;  %v3266_v15 = vsel %vm3226_vm0, %v3214_v57, 0.0  ;;  %v3215_v26 = vsel %vm15838_vm2, %v3151_v61, 0.0  ;;  %v2803_v46 = vadd.f32 %v2765_v25, %v15839_v3  ;;  %v15841_v57 = vld [vmem:[#allocation66_spill] sm:$0xff]  ;;  %v13899_v25 = vpop.xlane.xlu1 %6127  ;;  %v7675_v22 = vpop.eup %7674 }
 0x5c2   : > { %v3259_v31 = vadd.f32 %v3258_v35, %v3257_v63  ;;  %v6050_v55 = vsel %vm6049_vm3, %v6045_v51, inf  ;;  %v3217_v35 = vsel %vm15836_vm10, %v3153_v9, 0.0  ;;  %v2802_v63 = vadd.f32 %v2763_v12, %v15841_v57  ;;  %v15842_v9 = vld [vmem:[#allocation168_spill] sm:$0xff]  ;;  %v15843_v51 = vld [vmem:[#allocation102_spill] sm:$0xff]  ;;  %v13903_v12 = vpop.xlane.xlu2 %6159  ;;  %v7677_v6 = vpop.eup %7676  ;;  %v15848_v57 = vld [vmem:[#allocation113_spill] sm:$0xff] }
 0x5c3   : > { %6255 = vmin.xlane.f32.xlu2 %v13875_v30  ;;  %6051 = vmin.xlane.f32.xlu1 %v6050_v55  ;;  %v5869_v10 = vcvt.s32.f32 %v5867_v27  ;;  %vm5841_vm12 = vcmp.eq.f32.partialorder %v15843_v51, %v13795_v16  ;;  %v5837_v61 = vcvt.s32.f32 %v5835_v40  ;;  %v2769_v55 = vmul.f32 0.6931472, %v7671_v1  ;;  %v15846_v40 = vld [vmem:[#allocation124_spill] sm:$0xff] }
 0x5c4   : > { %v3261_v60 = vadd.f32 %v3260_v2, %v3259_v31  ;;  %v2804_v2 = vadd.f32 %v2767_v0, %v15842_v9  ;;  %v5805_v31 = vcvt.s32.f32 %v5803_v43  ;;  %v3268_v27 = vsel %vm3226_vm0, %v3215_v26, 0.0  ;;  %v15845_v0 = vld [vmem:[#allocation161_spill] sm:$0xff]  ;;  %v15847_v43 = vld [vmem:[#allocation159_spill] sm:$0xff]  ;;  %v15849_v26 = vld [vmem:[#allocation82_spill] sm:$0xff]  ;;  %v7679_v9 = vpop.eup %7678 }
 0x5c5   : > { %v5874_v52 = vsel %vm5873_vm13, %v5869_v10, inf  ;;  %v3155_v59 = vsub.f32 %v2803_v46, %v15845_v0  ;;  %v3154_v45 = vsub.f32 %v2802_v63, %v15847_v43  ;;  %v2773_v10 = vmul.f32 0.6931472, %v7675_v22 }
 0x5c6   : > { %v3263_v5 = vadd.f32 %v3262_v18, %v3261_v60  ;;  %v6155_v18 = vand.u32 65535, %v15844_v42  ;;  %v2771_v60 = vmul.f32 0.6931472, %v7673_v36  ;;  %v6075_v46 = vand.u32 65535, %v15849_v26  ;;  %v15850_v36 = vld [vmem:[#allocation142_spill] sm:$0xff]  ;;  %v15854_v42 = vld [vmem:[#allocation64_spill] sm:$0xff] }
 0x5c7   : > { %5875 = vmin.xlane.f32.xlu0 %v5874_v52  ;;  %vm6161_vm9 = vcmp.eq.f32.partialorder %v15850_v36, %v13903_v12  ;;  %v15851_v52 = vld [vmem:[#allocation65_spill] sm:$0xff] }
 0x5c8   : > { %v3265_v56 = vadd.f32 %v3264_v58, %v3263_v5  ;;  %v13901_v38 = vpop.xlane.xlu0 %5807  ;;  %v5842_v58 = vsel %vm5841_vm12, %v5837_v61, inf  ;;  %v3156_v5 = vsub.f32 %v2804_v2, %v15848_v57  ;;  %v2805_v63 = vadd.f32 %v2769_v55, %v15851_v52  ;;  %v15852_v2 = vld [vmem:[#allocation36_spill] sm:$0xff]  ;;  %v15857_v55 = vld [vmem:[#allocation37_spill] sm:$0xff] }
 0x5c9   : > { %vm5809_vm5 = vcmp.eq.f32.partialorder %v15846_v40, %v13901_v38  ;;  %v6157_v51 = vcvt.s32.f32 %v6155_v18  ;;  %v3270_v61 = vsel %vm3226_vm0, %v3216_v47, 0.0  ;;  %vm15853_vm11 = vcmp.ne.s32.totalorder %v15852_v2, 0  ;;  %v15855_v40 = vld [vmem:[#allocation35_spill] sm:$0xff]  ;;  %v15860_v47 = vld [vmem:[#allocation12_spill] sm:$0xff] }
 0x5ca   : > { %v3267_v1 = vadd.f32 %v3266_v15, %v3265_v56  ;;  %v5810_v3 = vsel %vm5809_vm5, %v5805_v31, inf  ;;  %v6091_v56 = vand.u32 65535, %v13573_v21  ;;  %v3272_v31 = vsel %vm3226_vm0, %v3217_v35, 0.0  ;;  %v15859_v21 = vld [vmem:[#allocation98_spill] sm:$0xff] }
 0x5cb   : > { %5843 = vmin.xlane.f32.xlu1 %v5842_v58  ;;  %5811 = vmin.xlane.f32.xlu2 %v5810_v3  ;;  %v3219_v22 = vsel %vm15853_vm11, %v3155_v59, 0.0  ;;  %v2806_v0 = vadd.f32 %v2771_v60, %v15854_v42  ;;  %vm15856_vm6 = vcmp.ne.s32.totalorder %v15855_v40, 0  ;;  %v2775_v58 = vmul.f32 0.6931472, %v7677_v6  ;;  %v15861_v35 = vld [vmem:[#allocation146_spill] sm:$0xff] }
 0x5cc   : > { %v3269_v15 = vadd.f32 %v3268_v27, %v3267_v1  ;;  %v3218_v43 = vsel %vm15856_vm6, %v3154_v45, 0.0  ;;  %v6162_v57 = vsel %vm6161_vm9, %v6157_v51, inf  ;;  %vm15858_vm15 = vcmp.ne.s32.totalorder %v15857_v55, 0  ;;  %v15862_v45 = vld [vmem:[#allocation46_spill] sm:$0xff] }
 0x5cd   : > { %v3220_v27 = vsel %vm15858_vm15, %v3156_v5, 0.0  ;;  %v2807_v18 = vadd.f32 %v2773_v10, %v15859_v21  ;;  %v2777_v1 = vmul.f32 0.6931472, %v7679_v9  ;;  %vm6081_vm14 = vcmp.eq.f32.partialorder %v15860_v47, %v13818_v17  ;;  %v15863_v5 = vld [vmem:[#allocation88_spill] sm:$0xff]  ;;  %v15864_v9 = vld [vmem:[#allocation99_spill] sm:$0xff]  ;;  %v15870_v47 = vld [vmem:[#allocation93_spill] sm:$0xff] }
 0x5ce   : > { %v3271_v3 = vadd.f32 %v3270_v61, %v3269_v15  ;;  %v3157_v26 = vsub.f32 %v2805_v63, %v15861_v35  ;;  %v6077_v60 = vcvt.s32.f32 %v6075_v46  ;;  %v6093_v52 = vcvt.s32.f32 %v6091_v56  ;;  %v13941_v63 = vpop.xlane.xlu1 %5919  ;;  %v15865_v56 = vld [vmem:[#allocation100_spill] sm:$0xff] }
 0x5cf   : > { %v3158_v6 = vsub.f32 %v2806_v0, %v15862_v45  ;;  %v3274_v15 = vsel %vm3226_vm0, %v3218_v43, 0.0  ;;  %6163 = vmin.xlane.f32.xlu0 %v6162_v57  ;;  %v5915_v10 = vand.u32 65535, %v15863_v5  ;;  %v2808_v51 = vadd.f32 %v2775_v58, %v15864_v9  ;;  %v15866_v0 = vld [vmem:[#allocation97_spill] sm:$0xff]  ;;  %v15867_v43 = vld [vmem:[#allocation38_spill] sm:$0xff]  ;;  %v15873_v35 = vld [vmem:[#allocation72_spill] sm:$0xff] }
 0x5d0   : > { %v3273_v59 = vadd.f32 %v3272_v31, %v3271_v3  ;;  %v13933_v36 = vpop.xlane.xlu0 %6095  ;;  %v6082_v61 = vsel %vm6081_vm14, %v6077_v60, inf  ;;  %v3276_v46 = vsel %vm3226_vm0, %v3219_v22, 0.0  ;;  %v3159_v42 = vsub.f32 %v2807_v18, %v15865_v56  ;;  %v15869_v3 = vld [vmem:[#allocation89_spill] sm:$0xff]  ;;  %v15871_v22 = vld [vmem:[#allocation39_spill] sm:$0xff]  ;;  %v15876_v45 = vld [vmem:[#allocation94_spill] sm:$0xff] }
 0x5d1   : > { %vm6097_vm4 = vcmp.eq.f32.partialorder %v13600_v13, %v13933_v36  ;;  %v2809_v40 = vadd.f32 %v2777_v1, %v15866_v0  ;;  %vm15868_vm1 = vcmp.ne.s32.totalorder %v15867_v43, 0  ;;  %v5883_v57 = vand.u32 65535, %v15869_v3  ;;  %v15877_v5 = vld [vmem:[#allocation92_spill] sm:$0xff] }
 0x5d2   : > { %v6098_v2 = vsel %vm6097_vm4, %v6093_v52, inf  ;;  %v3275_v31 = vadd.f32 %v3274_v15, %v3273_v59  ;;  %v3221_v13 = vsel %vm15868_vm1, %v3157_v26, 0.0  ;;  %v5851_v58 = vand.u32 65535, %v13602_v32  ;;  %v15874_v52 = vld [vmem:[#allocation40_spill] sm:$0xff] }
 0x5d3   : > { %6083 = vmin.xlane.f32.xlu2 %v6082_v61  ;;  %6099 = vmin.xlane.f32.xlu1 %v6098_v2  ;;  %v3278_v21 = vsel %vm3226_vm0, %v3220_v27, 0.0  ;;  %vm5921_vm8 = vcmp.eq.f32.partialorder %v15870_v47, %v13941_v63  ;;  %vm15872_vm3 = vcmp.ne.s32.totalorder %v15871_v22, 0  ;;  %v3160_v1 = vsub.f32 %v2808_v51, %v15873_v35 }
 0x5d4   : > { %v3277_v55 = vadd.f32 %v3276_v46, %v3275_v31  ;;  %v3222_v18 = vsel %vm15872_vm3, %v3158_v6, 0.0  ;;  %v5917_v59 = vcvt.s32.f32 %v5915_v10  ;;  %vm15875_vm7 = vcmp.ne.s32.totalorder %v15874_v52, 0  ;;  %v15878_v10 = vld [vmem:[#allocation41_spill] sm:$0xff] }
 0x5d5   : > { %v3223_v26 = vsel %vm15875_vm7, %v3159_v42, 0.0  ;;  %v3161_v15 = vsub.f32 %v2809_v40, %v15876_v45  ;;  %v3280_v32 = vsel %vm3226_vm0, %v3221_v13, 0.0  ;;  %vm5889_vm10 = vcmp.eq.f32.partialorder %v15877_v5, %v13861_v11  ;;  %v15880_v40 = vld [vmem:[#allocation42_spill] sm:$0xff]  ;;  %v15885_v45 = vld [vmem:[#allocation157_spill] sm:$0xff] }
 0x5d6   : > { %v3279_v60 = vadd.f32 %v3278_v21, %v3277_v55  ;;  %v5885_v9 = vcvt.s32.f32 %v5883_v57  ;;  %v5853_v61 = vcvt.s32.f32 %v5851_v58  ;;  %v5922_v2 = vsel %vm5921_vm8, %v5917_v59, inf  ;;  %v15882_v13 = vld [vmem:[#allocation158_spill] sm:$0xff]  ;;  %v13973_v58 = vpop.xlane.xlu2 %5935  ;;  %v13976_v21 = vpop.xlane.xlu1 %6175 }
 0x5d7   : > { %v3282_v51 = vsel %vm3226_vm0, %v3222_v18, 0.0  ;;  %5923 = vmin.xlane.f32.xlu0 %v5922_v2  ;;  %vm15879_vm13 = vcmp.ne.s32.totalorder %v15878_v10, 0  ;;  %v3284_v0 = vsel %vm3226_vm0, %v3223_v26, 0.0  ;;  %vm15881_vm12 = vcmp.ne.s32.totalorder %v15880_v40, 0  ;;  %v15887_v2 = vld [vmem:[#allocation16_spill] sm:$0xff] }
 0x5d8   : > { %v13962_v27 = vpop.xlane.xlu0 %5855  ;;  %v3281_v6 = vadd.f32 %v3280_v32, %v3279_v60  ;;  %v3224_v31 = vsel %vm15879_vm13, %v3160_v1, 0.0  ;;  %v5890_v46 = vsel %vm5889_vm10, %v5885_v9, inf  ;;  %v3225_v43 = vsel %vm15881_vm12, %v3161_v15, 0.0  ;;  %v15883_v1 = vld [vmem:[#allocation119_spill] sm:$0xff] }
 0x5d9   : > { %vm5857_vm2 = vcmp.eq.f32.partialorder %v13638_v7, %v13962_v27  ;;  %v6139_v3 = vand.u32 65535, %v15882_v13  ;;  %v3286_v7 = vsel %vm3226_vm0, %v3224_v31, 0.0  ;;  %v3288_v47 = vsel %vm3226_vm0, %v3225_v43, 0.0  ;;  %v15884_v60 = vld [vmem:[#allocation91_spill] sm:$0xff]  ;;  %v15889_v43 = vld [vmem:[#allocation137_spill] sm:$0xff]  ;;  %v15890_v13 = vld [vmem:[#allocation130_spill] sm:$0xff] }
 0x5da   : > { %v5858_v56 = vsel %vm5857_vm2, %v5853_v61, inf  ;;  %v3283_v42 = vadd.f32 %v3282_v51, %v3281_v6  ;;  %v6203_v59 = vand.u32 65535, %v15883_v1  ;;  %v5931_v15 = vand.u32 65535, %v15885_v45  ;;  %v15886_v61 = vld [vmem:[#allocation136_spill] sm:$0xff] }
 0x5db   : > { %5891 = vmin.xlane.f32.xlu1 %v5890_v46  ;;  %5859 = vmin.xlane.f32.xlu2 %v5858_v56  ;;  %v6141_v18 = vcvt.s32.f32 %v6139_v3  ;;  %vm5937_vm9 = vcmp.eq.f32.partialorder %v15886_v61, %v13973_v58  ;;  %v6187_v3 = vand.u32 65535, %v15890_v13  ;;  %v6022_v61 = vcvt.f32.s32 %v13748_v14  ;;  %v15892_v14 = vld [vmem:[#allocation86_spill] sm:$0xff] }
 0x5dc   : > { %v3285_v57 = vadd.f32 %v3284_v0, %v3283_v42  ;;  %v6205_v9 = vcvt.s32.f32 %v6203_v59  ;;  %v5933_v51 = vcvt.s32.f32 %v5931_v15  ;;  %v15888_v42 = vld [vmem:[#allocation123_spill] sm:$0xff]  ;;  %vm6129_vm14 = vcmp.eq.f32.partialorder %v15892_v14, %v13899_v25 }
 0x5dd   : > { %v5963_v0 = vand.u32 65535, %v15888_v42  ;;  %v15896_v14 = vld [vmem:[#allocation135_spill] sm:$0xff]  ;;  %vm3430_vm12 = vcmp.eq.s32.totalorder %v9700_v54, 1 }
 0x5de   : > { %v3287_v55 = vadd.f32 %v3286_v7, %v3285_v57  ;;  %v13985_v5 = vpop.xlane.xlu2 %6207  ;;  %v13993_v46 = vpop.xlane.xlu1 %5967  ;;  %v5938_v56 = vsel %vm5937_vm9, %v5933_v51, inf  ;;  %vm6177_vm3 = vcmp.eq.f32.partialorder %v15896_v14, %v13976_v21 }
 0x5df   : > { %vm6209_vm11 = vcmp.eq.f32.partialorder %v15887_v2, %v13985_v5  ;;  %vm5969_vm6 = vcmp.eq.f32.partialorder %v15889_v43, %v13993_v46  ;;  %v5965_v57 = vcvt.s32.f32 %v5963_v0 }
 0x5e0   : > { %v13979_v22 = vpop.xlane.xlu0 %6143  ;;  %v3289_v35 = vadd.f32 %v3288_v47, %v3287_v55  ;;  %v6210_v10 = vsel %vm6209_vm11, %v6205_v9, inf }
 0x5e1   : > { %vm6145_vm5 = vcmp.eq.f32.partialorder %v15884_v60, %v13979_v22  ;;  %6211 = vmin.xlane.f32.xlu0 %v6210_v10  ;;  %v5970_v55 = vsel %vm5969_vm6, %v5965_v57, inf }
 0x5e2   : > { %v6146_v52 = vsel %vm6145_vm5, %v6141_v18, inf  ;;  %v3290_v26 = vrot.slane %v3289_v35, 4  ;;  %v6189_v18 = vcvt.s32.f32 %v6187_v3  ;;  %vm3429_vm5 = vcmp.eq.s32.totalorder %v9700_v54, 0 }
 0x5e3   : > { %6147 = vmin.xlane.f32.xlu1 %v6146_v52 }
 0x5e4   : > { %v3291_v32 = vadd.f32 %v3290_v26, %v3289_v35  ;;  %v6038_v26 = vcvt.f32.s32 %v13741_v49  ;;  %v5782_v49 = vcvt.f32.s32 %v13758_v23  ;;  %v15893_v23 = vld [vmem:[#allocation118_spill] sm:$0xff] }
 0x5e6   : > { %v3292_v6 = vrot.slane %v3291_v32, 2  ;;  %v5783_v43 = vshll.u32 %v5782_v49, 16  ;;  %v15895_v49 = vld [vmem:[#allocation134_spill] sm:$0xff] }
 0x5e8   : > { %v13991_v31 = vpop.xlane.xlu0 %5903  ;;  %v3293_v40 = vadd.f32 %v3292_v6, %v3291_v32  ;;  %v6039_v32 = vshll.u32 %v6038_v26, 16  ;;  %v6023_v6 = vshll.u32 %v6022_v61, 16  ;;  %v15894_v26 = vld [vmem:[#allocation15_spill] sm:$0xff] }
 0x5e9   : > { %5971 = vmin.xlane.f32.xlu0 %v5970_v55  ;;  %vm5905_vm1 = vcmp.eq.f32.partialorder %v15894_v26, %v13991_v31  ;;  %v6251_v26 = vand.u32 65535, %v13836_v62 }
 0x5ea   : > { %v3294_v7 = vrot.slane %v3293_v40, 1 }
 0x5eb   : > { %5939 = vmin.xlane.f32.xlu1 %v5938_v56  ;;  %v15891_v56 = vld [vmem:[#allocation85_spill] sm:$0xff] }
 0x5ec   : > { %v3295_v35 = vadd.f32 %v3294_v7, %v3293_v40  ;;  %v6123_v42 = vand.u32 65535, %v15891_v56  ;;  %v5979_v40 = vand.u32 65535, %v13770_v37  ;;  %v5798_v37 = vcvt.f32.s32 %v13754_v29 }
 0x5ed   : > { %v6171_v56 = vand.u32 65535, %v15895_v49  ;;  %v5814_v49 = vcvt.f32.s32 %v13901_v38  ;;  %v15898_v38 = vld [vmem:[#allocation14_spill] sm:$0xff] }
 0x5ee   : > { %v6125_v13 = vcvt.s32.f32 %v6123_v42  ;;  %v5799_v61 = vshll.u32 %v5798_v37, 16 }
 0x5f0   : > { %v13999_v47 = vpop.xlane.xlu0 %6191  ;;  %v6130_v57 = vsel %vm6129_vm14, %v6125_v13, inf }
 0x5f1   : > { %vm6193_vm15 = vcmp.eq.f32.partialorder %v13697_v20, %v13999_v47 }
 0x5f2   : > { %v6194_v1 = vsel %vm6193_vm15, %v6189_v18, inf  ;;  %v5981_v18 = vcvt.s32.f32 %v5979_v40  ;;  %v5766_v40 = vcvt.f32.s32 %v13828_v44 }
 0x5f3   : > { %3439 = vperm.xlu2 %7035, %v3295_v35   ;;  %6195 = vmin.xlane.f32.xlu1 %v6194_v1  ;;  %v5899_v35 = vand.u32 65535, %v15893_v23 }
 0x5f4   : > { %v5767_v23 = vshll.u32 %v5766_v40, 16 }
 0x5f8   : > { %v14003_v59 = vpop.xlane.xlu0 %5951 }
 0x5f9   : > { %vm5953_vm7 = vcmp.eq.f32.partialorder %v13719_v4, %v14003_v59  ;;  %v5995_v4 = vand.u32 65535, %v13737_v19 }
 0x5fb   : > { %v14007_v52 = vpop.xlane.xlu1 %6223 }
 0x5fc   : > { %vm6225_vm13 = vcmp.eq.f32.partialorder %v15898_v38, %v14007_v52 }
 0x600   : > { %v14005_v60 = vpop.xlane.xlu0 %6239 }
 0x601   : > { %vm6241_vm8 = vcmp.eq.f32.partialorder %v13735_v28, %v14005_v60  ;;  %v5830_v28 = vcvt.f32.s32 %v13784_v48 }
 0x603   : > { %v6036_v15 = vpop.xlane.xlu1 %6035 }
 0x604   : > { %v6037_v9 = vcvt.f32.s32 %v6036_v15  ;;  %v6235_v15 = vand.u32 65535, %v13723_v39 }
 0x606   : > { %v6040_v2 = vadd.s32 %v6039_v32, %v6037_v9  ;;  %v6070_v32 = vcvt.f32.s32 %v13774_v24  ;;  %v5901_v9 = vcvt.s32.f32 %v5899_v35 }
 0x608   : > { %v14010_v45 = vpop.xlane.xlu0 %5999  ;;  %6282 = vst.msk [vmem:[%s14015_s23 + $0x88] sm:$0xff] %vm3226_vm0, %v6040_v2  ;;  %v6071_v29 = vshll.u32 %v6070_v32, 16 }
 0x609   : > { %vm6001_vm2 = vcmp.eq.f32.partialorder %v13744_v41, %v14010_v45 }
 0x610   : > { %v6020_v20 = vpop.xlane.xlu0 %6019 }
 0x611   : > { %v6021_v51 = vcvt.f32.s32 %v6020_v20 }
 0x613   : > { %v6024_v10 = vadd.s32 %v6023_v6, %v6021_v51  ;;  %v6237_v6 = vcvt.s32.f32 %v6235_v15  ;;  %v6054_v15 = vcvt.f32.s32 %v13868_v53 }
 0x615   : > { %6281 = vst.msk [vmem:[%s14015_s23 + $0x80] sm:$0xff] %vm3226_vm0, %v6024_v10  ;;  %v6242_v39 = vsel %vm6241_vm8, %v6237_v6, inf }
 0x618   : > { %v5780_v0 = vpop.xlane.xlu0 %5779 }
 0x619   : > { %v5781_v3 = vcvt.f32.s32 %v5780_v0  ;;  %v6173_v0 = vcvt.s32.f32 %v6171_v56 }
 0x61b   : > { %v5784_v7 = vadd.s32 %v5783_v43, %v5781_v3  ;;  %v6178_v43 = vsel %vm6177_vm3, %v6173_v0, inf  ;;  %v5831_v3 = vshll.u32 %v5830_v28, 16  ;;  %v5815_v0 = vshll.u32 %v5814_v49, 16 }
 0x61c   : > { %v14026_v55 = vpop.xlane.xlu2 %5983  ;;  %6131 = vmin.xlane.f32.xlu2 %v6130_v57  ;;  %v5796_v2 = vpop.xlane.xlu1 %5795 }
 0x61d   : > { %vm5985_vm4 = vcmp.eq.f32.partialorder %v13776_v33, %v14026_v55  ;;  %6266 = vst.msk [vmem:[%s14015_s23 + $0x8] sm:$0xff] %vm3226_vm0, %v5784_v7  ;;  %v5906_v33 = vsel %vm5905_vm1, %v5901_v9, inf  ;;  %v5797_v51 = vcvt.f32.s32 %v5796_v2  ;;  %v5947_v7 = vand.u32 65535, %v13701_v34 }
 0x61e   : > { %v5986_v1 = vsel %vm5985_vm4, %v5981_v18, inf  ;;  %v6253_v2 = vcvt.s32.f32 %v6251_v26 }
 0x61f   : > { %5987 = vmin.xlane.f32.xlu1 %v5986_v1  ;;  %v5800_v42 = vadd.s32 %v5799_v61, %v5797_v51  ;;  %v6118_v1 = vcvt.f32.s32 %v13824_v8  ;;  %v5949_v37 = vcvt.s32.f32 %v5947_v7  ;;  %v5997_v51 = vcvt.s32.f32 %v5995_v4 }
 0x620   : > { %v6068_v20 = vpop.xlane.xlu0 %6067  ;;  %v5894_v4 = vcvt.f32.s32 %v13861_v11 }
 0x621   : > { %v6069_v10 = vcvt.f32.s32 %v6068_v20  ;;  %6267 = vst.msk [vmem:[%s14015_s23 + $0x10] sm:$0xff] %vm3226_vm0, %v5800_v42  ;;  %v5954_v34 = vsel %vm5953_vm7, %v5949_v37, inf  ;;  %v6119_v9 = vshll.u32 %v6118_v1, 16  ;;  %v6055_v20 = vshll.u32 %v6054_v15, 16  ;;  %v15897_v42 = vld [vmem:[#allocation132_spill] sm:$0xff] }
 0x623   : > { %v6072_v24 = vadd.s32 %v6071_v29, %v6069_v10  ;;  %v5878_v29 = vcvt.f32.s32 %v13855_v50  ;;  %v5846_v10 = vcvt.f32.s32 %v13795_v16 }
 0x624   : > { %5907 = vmin.xlane.f32.xlu2 %v5906_v33 }
 0x625   : > { %6284 = vst.msk [vmem:[%s14015_s23 + $0x98] sm:$0xff] %vm3226_vm0, %v6072_v24  ;;  %v6219_v24 = vand.u32 65535, %v15897_v42  ;;  %v5847_v50 = vshll.u32 %v5846_v10, 16 }
 0x627   : > { %6243 = vmin.xlane.f32.xlu1 %v6242_v39  ;;  %v5879_v39 = vshll.u32 %v5878_v29, 16  ;;  %v6221_v7 = vcvt.s32.f32 %v6219_v24  ;;  %v6214_v24 = vcvt.f32.s32 %v13985_v5  ;;  %v5974_v5 = vcvt.f32.s32 %v13993_v46 }
 0x628   : > { %v5828_v13 = vpop.xlane.xlu0 %5827 }
 0x629   : > { %v5829_v57 = vcvt.f32.s32 %v5828_v13  ;;  %v6166_v13 = vcvt.f32.s32 %v13903_v12  ;;  %v6215_v54 = vshll.u32 %v6214_v24, 16 }
 0x62b   : > { %v5832_v35 = vadd.s32 %v5831_v3, %v5829_v57  ;;  %v6167_v1 = vshll.u32 %v6166_v13, 16 }
 0x62c   : > { %6179 = vmin.xlane.f32.xlu2 %v6178_v43 }
 0x62d   : > { %6269 = vst.msk [vmem:[%s14015_s23 + $0x20] sm:$0xff] %vm3226_vm0, %v5832_v35  ;;  %v6226_v35 = vsel %vm6225_vm13, %v6221_v7, inf  ;;  %v6198_v7 = vcvt.f32.s32 %v13999_v47 }
 0x62e   : > { %v5764_v18 = vpop.xlane.xlu2 %5763 }
 0x62f   : > { %v5765_v48 = vcvt.f32.s32 %v5764_v18  ;;  %v6086_v18 = vcvt.f32.s32 %v13818_v17 }
 0x631   : > { %v5768_v44 = vadd.s32 %v5767_v23, %v5765_v48  ;;  %v6102_v23 = vcvt.f32.s32 %v13933_v36  ;;  %v5926_v36 = vcvt.f32.s32 %v13941_v63  ;;  %v5895_v63 = vshll.u32 %v5894_v4, 16 }
 0x632   : > { %v6116_v32 = vpop.xlane.xlu0 %6115 }
 0x633   : > { %6265 = vst.msk [vmem:[%s14015_s23] sm:$0xff] %vm3226_vm0, %v5768_v44  ;;  %v6117_v33 = vcvt.f32.s32 %v6116_v32  ;;  %v6087_v44 = vshll.u32 %v6086_v18, 16  ;;  %v6103_v15 = vshll.u32 %v6102_v23, 16  ;;  %v5975_v18 = vshll.u32 %v5974_v5, 16 }
 0x634   : > { %5955 = vmin.xlane.f32.xlu2 %v5954_v34 }
 0x635   : > { %v6120_v6 = vadd.s32 %v6119_v9, %v6117_v33 }
 0x636   : > { %v14060_v61 = vpop.xlane.xlu2 %6255  ;;  %v6052_v8 = vpop.xlane.xlu1 %6051 }
 0x637   : > { %vm6257_vm10 = vcmp.eq.f32.partialorder %v13875_v30, %v14060_v61  ;;  %v6053_v62 = vcvt.f32.s32 %v6052_v8  ;;  %6287 = vst.msk [vmem:[%s14015_s23 + $0xb0] sm:$0xff] %vm3226_vm0, %v6120_v6  ;;  %v6002_v30 = vsel %vm6001_vm2, %v5997_v51, inf  ;;  %v5862_v8 = vcvt.f32.s32 %v13962_v27 }
 0x638   : > { %v6258_v53 = vsel %vm6257_vm10, %v6253_v2, inf  ;;  %v6150_v27 = vcvt.f32.s32 %v13979_v22 }
 0x639   : > { %v6056_v19 = vadd.s32 %v6055_v20, %v6053_v62  ;;  %6259 = vmin.xlane.f32.xlu0 %v6258_v53  ;;  %v5927_v20 = vshll.u32 %v5926_v36, 16  ;;  %v5863_v29 = vshll.u32 %v5862_v8, 16  ;;  %v5910_v36 = vcvt.f32.s32 %v13991_v31 }
 0x63a   : > { %v5876_v56 = vpop.xlane.xlu0 %5875  ;;  %v6151_v42 = vshll.u32 %v6150_v27, 16  ;;  %v6006_v27 = vcvt.f32.s32 %v14010_v45 }
 0x63b   : > { %6283 = vst.msk [vmem:[%s14015_s23 + $0x90] sm:$0xff] %vm3226_vm0, %v6056_v19  ;;  %v5877_v41 = vcvt.f32.s32 %v5876_v56 }
 0x63c   : > { %6003 = vmin.xlane.f32.xlu2 %v6002_v30  ;;  %v15899_v30 = vld [vmem:[#allocation108_spill] sm:$0xff] }
 0x63d   : > { %v5880_v40 = vadd.s32 %v5879_v39, %v5877_v41  ;;  %v3436_v56 = vsel %vm3430_vm12, %v15899_v30, 0.0 }
 0x63e   : > { %v5844_v14 = vpop.xlane.xlu1 %5843  ;;  %v5812_v28 = vpop.xlane.xlu2 %5811 }
 0x63f   : > { %v5845_v16 = vcvt.f32.s32 %v5844_v14  ;;  %v5813_v43 = vcvt.f32.s32 %v5812_v28  ;;  %6272 = vst.msk [vmem:[%s14015_s23 + $0x38] sm:$0xff] %vm3226_vm0, %v5880_v40 }
 0x641   : > { %v5848_v3 = vadd.s32 %v5847_v50, %v5845_v16  ;;  %v5816_v57 = vadd.s32 %v5815_v0, %v5813_v43  ;;  %v5942_v0 = vcvt.f32.s32 %v13973_v58 }
 0x642   : > { %v6164_v48 = vpop.xlane.xlu0 %6163 }
 0x643   : > { %6270 = vst.msk [vmem:[%s14015_s23 + $0x28] sm:$0xff] %vm3226_vm0, %v5848_v3  ;;  %v6165_v12 = vcvt.f32.s32 %v6164_v48  ;;  %v5943_v38 = vshll.u32 %v5942_v0, 16  ;;  %v6199_v48 = vshll.u32 %v6198_v7, 16 }
 0x644   : > { %6268 = vst.msk [vmem:[%s14015_s23 + $0x18] sm:$0xff] %vm3226_vm0, %v5816_v57  ;;  %6227 = vmin.xlane.f32.xlu2 %v6226_v35 }
 0x645   : > { %v6168_v32 = vadd.s32 %v6167_v1, %v6165_v12  ;;  %v6134_v12 = vcvt.f32.s32 %v13899_v25 }
 0x646   : > { %v6084_v37 = vpop.xlane.xlu2 %6083  ;;  %v6100_v26 = vpop.xlane.xlu1 %6099 }
 0x647   : > { %v6085_v34 = vcvt.f32.s32 %v6084_v37  ;;  %v6101_v17 = vcvt.f32.s32 %v6100_v26  ;;  %6290 = vst.msk [vmem:[%s14015_s23 + $0xc8] sm:$0xff] %vm3226_vm0, %v6168_v32  ;;  %v6135_v37 = vshll.u32 %v6134_v12, 16 }
 0x649   : > { %v6088_v9 = vadd.s32 %v6087_v44, %v6085_v34  ;;  %v6104_v33 = vadd.s32 %v6103_v15, %v6101_v17  ;;  %v5990_v44 = vcvt.f32.s32 %v14026_v55  ;;  %v5911_v55 = vshll.u32 %v5910_v36, 16 }
 0x64a   : > { %v5924_v2 = vpop.xlane.xlu0 %5923 }
 0x64b   : > { %6285 = vst.msk [vmem:[%s14015_s23 + $0xa0] sm:$0xff] %vm3226_vm0, %v6088_v9  ;;  %v5925_v6 = vcvt.f32.s32 %v5924_v2  ;;  %v5991_v17 = vshll.u32 %v5990_v44, 16 }
 0x64c   : > { %6286 = vst.msk [vmem:[%s14015_s23 + $0xa8] sm:$0xff] %vm3226_vm0, %v6104_v33  ;;  %v6246_v33 = vcvt.f32.s32 %v14005_v60 }
 0x64d   : > { %v5928_v11 = vadd.s32 %v5927_v20, %v5925_v6 }
 0x64e   : > { %v5892_v62 = vpop.xlane.xlu1 %5891  ;;  %v5860_v53 = vpop.xlane.xlu2 %5859  ;;  %v6247_v20 = vshll.u32 %v6246_v33, 16 }
 0x64f   : > { %v5893_v19 = vcvt.f32.s32 %v5892_v62  ;;  %v5861_v51 = vcvt.f32.s32 %v5860_v53  ;;  %6275 = vst.msk [vmem:[%s14015_s23 + $0x50] sm:$0xff] %vm3226_vm0, %v5928_v11 }
 0x651   : > { %v5896_v10 = vadd.s32 %v5895_v63, %v5893_v19  ;;  %v5864_v49 = vadd.s32 %v5863_v29, %v5861_v51  ;;  %v6182_v63 = vcvt.f32.s32 %v13976_v21  ;;  %v5958_v19 = vcvt.f32.s32 %v14003_v59 }
 0x652   : > { %v6262_v21 = vcvt.f32.s32 %v14060_v61  ;;  %v6230_v61 = vcvt.f32.s32 %v14007_v52 }
 0x653   : > { %6273 = vst.msk [vmem:[%s14015_s23 + $0x40] sm:$0xff] %vm3226_vm0, %v5896_v10  ;;  %v6183_v60 = vshll.u32 %v6182_v63, 16  ;;  %v5959_v11 = vshll.u32 %v5958_v19, 16 }
 0x654   : > { %6271 = vst.msk [vmem:[%s14015_s23 + $0x30] sm:$0xff] %vm3226_vm0, %v5864_v49  ;;  %v6212_v28 = vpop.xlane.xlu0 %6211 }
 0x655   : > { %v6213_v40 = vcvt.f32.s32 %v6212_v28 }
 0x656   : > { %v3440_v39 = vpop.permute.xlu2 %3439  ;;  %v6148_v41 = vpop.xlane.xlu1 %6147 }
 0x657   : > { %v3442_v50 = vsel %vm3429_vm5, %v3440_v39, %v3436_v56  ;;  %v6149_v14 = vcvt.f32.s32 %v6148_v41  ;;  %v6216_v16 = vadd.s32 %v6215_v54, %v6213_v40  ;;  %v6263_v56 = vshll.u32 %v6262_v21, 16 }
 0x658   : > { %3443 = vst [vmem:[%s14106_s10] sm:$0xff] %v3442_v50 }
 0x659   : > { %v6152_v22 = vadd.s32 %v6151_v42, %v6149_v14  ;;  %6293 = vst.msk [vmem:[%s14015_s23 + $0xe0] sm:$0xff] %vm3226_vm0, %v6216_v16  ;;  %v6007_v42 = vshll.u32 %v6006_v27, 16  ;;  %v6231_v14 = vshll.u32 %v6230_v61, 16 }
 0x65b   : > { %6289 = vst.msk [vmem:[%s14015_s23 + $0xc0] sm:$0xff] %vm3226_vm0, %v6152_v22 }
 0x65c   : > { %v5972_v57 = vpop.xlane.xlu0 %5971 }
 0x65d   : > { %v5973_v58 = vcvt.f32.s32 %v5972_v57 }
 0x65e   : > { %v5940_v43 = vpop.xlane.xlu1 %5939 }
 0x65f   : > { %v5941_v13 = vcvt.f32.s32 %v5940_v43  ;;  %v5976_v23 = vadd.s32 %v5975_v18, %v5973_v58 }
 0x661   : > { %v5944_v3 = vadd.s32 %v5943_v38, %v5941_v13  ;;  %6278 = vst.msk [vmem:[%s14015_s23 + $0x68] sm:$0xff] %vm3226_vm0, %v5976_v23 }
 0x663   : > { %6276 = vst.msk [vmem:[%s14015_s23 + $0x58] sm:$0xff] %vm3226_vm0, %v5944_v3 }
 0x666   : > { %v6196_v35 = vpop.xlane.xlu1 %6195 }
 0x667   : > { %v6197_v1 = vcvt.f32.s32 %v6196_v35 }
 0x669   : > { %v6200_v46 = vadd.s32 %v6199_v48, %v6197_v1 }
 0x66b   : > { %6292 = vst.msk [vmem:[%s14015_s23 + $0xd8] sm:$0xff] %vm3226_vm0, %v6200_v46 }
 0x68f   : > { %v6132_v47 = vpop.xlane.xlu2 %6131 }
 0x690   : > { %v6133_v26 = vcvt.f32.s32 %v6132_v47 }
 0x692   : > { %v6136_v15 = vadd.s32 %v6135_v37, %v6133_v26  ;;  %v5988_v34 = vpop.xlane.xlu1 %5987 }
 0x693   : > { %v5989_v32 = vcvt.f32.s32 %v5988_v34 }
 0x694   : > { %6288 = vst.msk [vmem:[%s14015_s23 + $0xb8] sm:$0xff] %vm3226_vm0, %v6136_v15 }
 0x695   : > { %v5992_v9 = vadd.s32 %v5991_v17, %v5989_v32 }
 0x697   : > { %6279 = vst.msk [vmem:[%s14015_s23 + $0x70] sm:$0xff] %vm3226_vm0, %v5992_v9  ;;  %v5908_v25 = vpop.xlane.xlu2 %5907 }
 0x698   : > { %v5909_v4 = vcvt.f32.s32 %v5908_v25 }
 0x69a   : > { %v5912_v8 = vadd.s32 %v5911_v55, %v5909_v4  ;;  %v6244_v2 = vpop.xlane.xlu1 %6243 }
 0x69b   : > { %v6245_v6 = vcvt.f32.s32 %v6244_v2 }
 0x69c   : > { %6274 = vst.msk [vmem:[%s14015_s23 + $0x48] sm:$0xff] %vm3226_vm0, %v5912_v8 }
 0x69d   : > { %v6248_v31 = vadd.s32 %v6247_v20, %v6245_v6 }
 0x69f   : > { %6295 = vst.msk [vmem:[%s14015_s23 + $0xf0] sm:$0xff] %vm3226_vm0, %v6248_v31  ;;  %v6180_v62 = vpop.xlane.xlu2 %6179 }
 0x6a0   : > { %v6181_v53 = vcvt.f32.s32 %v6180_v62 }
 0x6a2   : > { %v6184_v29 = vadd.s32 %v6183_v60, %v6181_v53 }
 0x6a4   : > { %6291 = vst.msk [vmem:[%s14015_s23 + $0xd0] sm:$0xff] %vm3226_vm0, %v6184_v29 }
 0x6a7   : > { %v5956_v51 = vpop.xlane.xlu2 %5955 }
 0x6a8   : > { %v5957_v10 = vcvt.f32.s32 %v5956_v51 }
 0x6aa   : > { %v5960_v49 = vadd.s32 %v5959_v11, %v5957_v10 }
 0x6ac   : > { %6277 = vst.msk [vmem:[%s14015_s23 + $0x60] sm:$0xff] %vm3226_vm0, %v5960_v49  ;;  %v6260_v30 = vpop.xlane.xlu0 %6259 }
 0x6ad   : > { %v6261_v59 = vcvt.f32.s32 %v6260_v30 }
 0x6af   : > { %v6264_v39 = vadd.s32 %v6263_v56, %v6261_v59  ;;  %v6004_v41 = vpop.xlane.xlu2 %6003 }
 0x6b0   : > { %v6005_v24 = vcvt.f32.s32 %v6004_v41 }
 0x6b1   : > { %6296 = vst.msk [vmem:[%s14015_s23 + $0xf8] sm:$0xff] %vm3226_vm0, %v6264_v39 }
 0x6b2   : > { %v6008_v50 = vadd.s32 %v6007_v42, %v6005_v24 }
 0x6b4   : > { %6280 = vst.msk [vmem:[%s14015_s23 + $0x78] sm:$0xff] %vm3226_vm0, %v6008_v50 }
 0x6b7   : > { %v6228_v45 = vpop.xlane.xlu2 %6227 }
 0x6b8   : > { %v6229_v22 = vcvt.f32.s32 %v6228_v45  ;;  %6313 = sbr.rel (!%p7948_p5) target bundleno = 1757 (0x6dd), region = 48 }
 0x6ba   : > { %v6232_v28 = vadd.s32 %v6231_v14, %v6229_v22 }
 0x6bc   : > { %6294 = vst.msk [vmem:[%s14015_s23 + $0xe8] sm:$0xff] %vm3226_vm0, %v6232_v28 }
 0x6bd   : > { %s15915_s18 = smov (!%p6316_p12, %s6315_s18), 32 }
 0x6be   : > { %s6909_s22 = sshll.u32 %s15915_s18, 3 }
 0x6bf   : > { %s6320_s25 = ssub.s32 256, %s6909_s22 }
 0x6c0   : > { %s6321_s26 = sshll.u32 %s6320_s25, 4 }
 0x6c1   : > { %6322 = vsyncadd %s14810_s17, %s6321_s26  ;;  %p14159_p13 = scmp.ne.s32.totalorder %s6909_s22, 0  ;;  %s6911_s29 = sshll.u32 %s7931_s0, 8 }
 0x6c2   : > { %s15901_s7 = sld [smem:[#allocation175_spill]]  ;;  %s6328_s3 = sshll.u32 %s11815_s28, 4  ;;  %s14168_s3 = int_to_ptr.vmem [resolvable:$true] %s6328_s3 }
 0x6c3   : > { %s14811_s26 = sshll.u32 %s15915_s18, 7  ;;  %s7680_s17 = sshra.s32 %s14168_s3, 4  ;;  %s7681_s17 = int_to_ptr.vmem [resolvable:$true] %s7680_s17 }
 0x6c4   : > { %s7682_s22 = sshrl.u32 %s14811_s26, 4  ;;  %s7854_s5 = smov [#allocation4]  }
 0x6c5   : > { %s7687_s4 = scalar_lea.vmem %s7681_s17, %s7682_s22  ;;  %s7691_s1 = scalar_lea.vmem %s7854_s5, 512 }
 0x6c6   : > { %p7688_p0 = scmp.ne.s32.totalorder %s7681_s17, %s7687_s4  ;;  %p7693_p3 = scmp.lt.s32.totalorder %s7691_s1, %s7687_s4 }
 0x6c8   : > { %s6326_s2 = scalar_lea.hbm %s15901_s7, %s6911_s29  ;;  %p7689_p1 = pnand %p7688_p0, %p14159_p13 }
 0x6c9   : > { %s6330_s25 = sshll.u32 %s6326_s2, 4  ;;  %s14170_s25 = int_to_ptr.hbm [resolvable:$true] %s6330_s25 }
 0x6ca   : > { %p7690_p2 = pneg %p7689_p1 }
 0x6cc   : > { %p7695_p4 = pnand %p7693_p3, %p7690_p2 }
 0x6ce   : > { %7698 = shalt.err (!%p7695_p4)
}
 0x6cf   : > { %s7699_s2 = sshra.s32 %s14170_s25, 4  ;;  %s7710_s17 = scalar_lea.hbm %s15901_s7, 320  ;;  %s7700_s2 = int_to_ptr.hbm [resolvable:$true] %s7699_s2 }
 0x6d0   : > { %s7706_s28 = scalar_lea.hbm %s7700_s2, %s7682_s22  ;;  %p7711_p10 = scmp.lt.s32.totalorder %s7700_s2, %s15901_s7 }
 0x6d1   : > { %p7707_p7 = scmp.ne.s32.totalorder %s7700_s2, %s7706_s28  ;;  %p7712_p11 = scmp.lt.s32.totalorder %s7710_s17, %s7706_s28 }
 0x6d3   : > { %p7708_p8 = pnand %p7707_p7, %p14159_p13  ;;  %p7713_p12 = por %p7712_p11, %p7711_p10 }
 0x6d5   : > { %p7709_p9 = pneg %p7708_p8 }
 0x6d7   : > { %p7714_p0 = pnand %p7713_p12, %p7709_p9 }
 0x6d9   : > { %7717 = shalt.err (!%p7714_p0)
}
 0x6da   : > { %s7855_s4 = smov 128   ;;  %s7856_s5 = smov 8  }
 0x6db   : > { %s15902_s22 = scalar_lea.sflag [#allocation5], %s11789_s24  ;;  %s15903_s1 = sshll.u32 %s15915_s18, 7 }
 0x6dc   : > { %6336 = dma.vmem_to_hbm [thread:$0]  (%p14159_p13), %s14168_s3, %s15903_s1, %s14170_s25, %s15902_s22, %s7855_s4, %s7855_s4, %s7856_s5  }
 0x6dd PF: > { %s6884_s6 = sshll.u32 %s7931_s0, 3  ;;  %s6345_s26 = sshll.u32 %s14106_s10, 4  ;;  %s6346_s26 = int_to_ptr.vmem [resolvable:$true] %s6345_s26 }
 0x6de   : > { %s6343_s30 = scalar_lea.hbm %s14369_s8, %s6884_s6  ;;  %s7739_s27 = scalar_lea.hbm %s14369_s8, 16 }
 0x6df   : > { %s6347_s29 = sshll.u32 %s6343_s30, 4  ;;  %s6348_s29 = int_to_ptr.hbm [resolvable:$true] %s6347_s29 }
 0x6e0   : > { %s7733_s17 = sshra.s32 %s6348_s29, 4  ;;  %s7734_s17 = int_to_ptr.hbm [resolvable:$true] %s7733_s17 }
 0x6e1   : > { %s7735_s7 = scalar_lea.hbm %s7734_s17, 8  ;;  %p7740_p3 = scmp.lt.s32.totalorder %s7734_s17, %s14369_s8 }
 0x6e2   : > { %p7736_p1 = scmp.ne.s32.totalorder %s7734_s17, %s7735_s7  ;;  %p7741_p4 = scmp.lt.s32.totalorder %s7739_s27, %s7735_s7 }
 0x6e4   : > { %p7737_p2 = pnand %p7736_p1, %p7948_p5  ;;  %p7742_p7 = por %p7741_p4, %p7740_p3 }
 0x6e6   : > { %p7738_p13 = pneg %p7737_p2 }
 0x6e8   : > { %p7743_p8 = pnand %p7742_p7, %p7738_p13 }
 0x6ea   : > { %7746 = shalt.err (!%p7743_p8)
}
 0x6eb   : > { %s15904_s4 = scalar_lea.sflag [#allocation7], %s11789_s24  ;;  %6353 = sbr.rel (!%p7948_p5) target bundleno = 1840 (0x730), region = 56 }
 0x6ec   : > { %6923 = dma.vmem_to_hbm [thread:$0]  (%p7948_p5), %s6346_s26, 128, %s6348_s29, %s15904_s4  }
 0x6ed   : > { %s6355_s5 = ssub.s32 (%p7948_p5), 40, %s7974_s15  ;;  %s6912_s22 = sshll.u32 (%p7948_p5), %s7931_s0, 8 }
 0x6ee   : > { %p6356_p9 = scmp.lt.s32.totalorder (%p7948_p5), %s6355_s5, 32  ;;  %s14219_s7 = scalar_lea.vmem (%p7948_p5), %s14370_s9, %s6912_s22  }
 0x6f0   : > { %s15917_s5 = smov (!%p6356_p9, %s6355_s5), 32 }
 0x6f1   : > { %s6886_s2 = sshll.u32 %s15917_s5, 3 }
 0x6f2   : > { %p6889_p10 = scmp.eq.s32.totalorder %s6886_s2, 0 }
 0x6f3   : > { %s14225_s24 = sshrl.u32 (!%p6889_p10), %s15917_s5, 5 }
 0x6f4   : > { %6364 = sbr.rel (%p6889_p10) target bundleno = 1840 (0x730), region = 60  ;;  %p6890_p5 = scmp.le.s32.totalorder (!%p6889_p10), %s14225_s24, 0 }
 0x6f9   : > { %6697 = sbr.rel (%p6890_p5) target bundleno = 1823 (0x71f), region = 165  ;;  %s15905_s0 = smov (!%p6890_p5), %s14219_s7 }
 0x6fa   : > { %s15906_s20 = smov (!%p6890_p5), %s14015_s23  ;;  %s14234_s15 = smov (!%p6890_p5), 0  }
 0x6fb   : > { %s14236_s26 = smov (!%p6890_p5), 0  }
 0x6fe LB: >> { %v6489_v52 = vld [vmem:[%s7825_s20] sm:$0xff]  ;;  %v6491_v0 = vld [vmem:[%s7825_s20 + $0x8] sm:$0xff]  ;;  %v6493_v54 = vld [vmem:[%s7825_s20 + $0x10] sm:$0xff]  ;;  %s6553_s28 = sadd.s32 1, %s7829_s15  ;;  %s6483_s26 = sadd.s32 1, %s7833_s26   ;;  %s7833_s26 = sphi %s14236_s26, %s6483_s26   ;;  %s7829_s15 = sphi %s14234_s15, %s15909_s15   ;;  %s7825_s20 = sphi %s15906_s20, %s15908_s20   ;;  %s7821_s0 = sphi %s15905_s0, %s15907_s0  }
 0x6ff   : >> { %6490 = vst [vmem:[%s7821_s0] sm:$0xff] %v6489_v52  ;;  %v6495_v40 = vld [vmem:[%s7825_s20 + $0x18] sm:$0xff]  ;;  %p6554_p11 = scmp.ge.s32.totalorder %s6553_s28, %s14225_s24  ;;  %v6497_v16 = vld [vmem:[%s7825_s20 + $0x20] sm:$0xff]  ;;  %v6499_v43 = vld [vmem:[%s7825_s20 + $0x28] sm:$0xff]  ;;  %p6482_p12 = scmp.ge.s32.totalorder %s6483_s26, %s14225_s24 }
 0x700   : >> { %6492 = vst [vmem:[%s7821_s0 + $0x8] sm:$0xff] %v6491_v0  ;;  %v6501_v5 = vld [vmem:[%s7825_s20 + $0x30] sm:$0xff]  ;;  %v6503_v38 = vld [vmem:[%s7825_s20 + $0x38] sm:$0xff]  ;;  %v6505_v13 = vld [vmem:[%s7825_s20 + $0x40] sm:$0xff] }
 0x701   : >> { %6494 = vst [vmem:[%s7821_s0 + $0x10] sm:$0xff] %v6493_v54  ;;  %s15919_s28 = smov (%p6554_p11, %s6553_s28), 0  ;;  %v6507_v3 = vld [vmem:[%s7825_s20 + $0x48] sm:$0xff]  ;;  %v6509_v57 = vld [vmem:[%s7825_s20 + $0x50] sm:$0xff]  ;;  %v6511_v7 = vld [vmem:[%s7825_s20 + $0x58] sm:$0xff] }
 0x702   : >> { %6496 = vst [vmem:[%s7821_s0 + $0x18] sm:$0xff] %v6495_v40  ;;  %s6891_s30 = sshll.u32 %s15919_s28, 8  ;;  %v6513_v18 = vld [vmem:[%s7825_s20 + $0x60] sm:$0xff]  ;;  %v6515_v58 = vld [vmem:[%s7825_s20 + $0x68] sm:$0xff]  ;;  %v6517_v23 = vld [vmem:[%s7825_s20 + $0x70] sm:$0xff]  ;;  %s15909_s15 = smov %s15919_s28 }
 0x703   : >> { %6498 = vst [vmem:[%s7821_s0 + $0x20] sm:$0xff] %v6497_v16  ;;  %s14268_s29 = scalar_lea.vmem %s14015_s23, %s6891_s30 [#allocation8]   ;;  %s14271_s17 = scalar_lea.vmem %s14219_s7, %s6891_s30   ;;  %v6519_v35 = vld [vmem:[%s7825_s20 + $0x78] sm:$0xff]  ;;  %v6521_v48 = vld [vmem:[%s7825_s20 + $0x80] sm:$0xff]  ;;  %v6523_v1 = vld [vmem:[%s7825_s20 + $0x88] sm:$0xff] }
 0x704   : >> { %6500 = vst [vmem:[%s7821_s0 + $0x28] sm:$0xff] %v6499_v43  ;;  %v6525_v46 = vld [vmem:[%s7825_s20 + $0x90] sm:$0xff]  ;;  %v6527_v12 = vld [vmem:[%s7825_s20 + $0x98] sm:$0xff]  ;;  %v6529_v44 = vld [vmem:[%s7825_s20 + $0xa0] sm:$0xff] }
 0x705   : >> { %6502 = vst [vmem:[%s7821_s0 + $0x30] sm:$0xff] %v6501_v5  ;;  %v6531_v47 = vld [vmem:[%s7825_s20 + $0xa8] sm:$0xff]  ;;  %v6533_v37 = vld [vmem:[%s7825_s20 + $0xb0] sm:$0xff]  ;;  %v6535_v26 = vld [vmem:[%s7825_s20 + $0xb8] sm:$0xff] }
 0x706   : >> { %6504 = vst [vmem:[%s7821_s0 + $0x38] sm:$0xff] %v6503_v38  ;;  %v6537_v15 = vld [vmem:[%s7825_s20 + $0xc0] sm:$0xff]  ;;  %v6539_v34 = vld [vmem:[%s7825_s20 + $0xc8] sm:$0xff]  ;;  %v6541_v17 = vld [vmem:[%s7825_s20 + $0xd0] sm:$0xff] }
 0x707   : >> { %6506 = vst [vmem:[%s7821_s0 + $0x40] sm:$0xff] %v6505_v13  ;;  %v6543_v32 = vld [vmem:[%s7825_s20 + $0xd8] sm:$0xff]  ;;  %v6545_v36 = vld [vmem:[%s7825_s20 + $0xe0] sm:$0xff]  ;;  %v6547_v9 = vld [vmem:[%s7825_s20 + $0xe8] sm:$0xff] }
 0x708   : >> { %6508 = vst [vmem:[%s7821_s0 + $0x48] sm:$0xff] %v6507_v3  ;;  %v6549_v33 = vld [vmem:[%s7825_s20 + $0xf0] sm:$0xff]  ;;  %v6551_v25 = vld [vmem:[%s7825_s20 + $0xf8] sm:$0xff]  ;;  %s15908_s20 = smov %s14268_s29 }
 0x709   : >> { %6510 = vst [vmem:[%s7821_s0 + $0x50] sm:$0xff] %v6509_v57 }
 0x70a   : >> { %6512 = vst [vmem:[%s7821_s0 + $0x58] sm:$0xff] %v6511_v7 }
 0x70b   : >> { %6514 = vst [vmem:[%s7821_s0 + $0x60] sm:$0xff] %v6513_v18 }
 0x70c   : >> { %6516 = vst [vmem:[%s7821_s0 + $0x68] sm:$0xff] %v6515_v58 }
 0x70d   : >> { %6518 = vst [vmem:[%s7821_s0 + $0x70] sm:$0xff] %v6517_v23 }
 0x70e   : >> { %6520 = vst [vmem:[%s7821_s0 + $0x78] sm:$0xff] %v6519_v35 }
 0x70f   : >> { %6522 = vst [vmem:[%s7821_s0 + $0x80] sm:$0xff] %v6521_v48 }
 0x710   : >> { %6524 = vst [vmem:[%s7821_s0 + $0x88] sm:$0xff] %v6523_v1 }
 0x711   : >> { %6526 = vst [vmem:[%s7821_s0 + $0x90] sm:$0xff] %v6525_v46 }
 0x712   : >> { %6528 = vst [vmem:[%s7821_s0 + $0x98] sm:$0xff] %v6527_v12 }
 0x713   : >> { %6530 = vst [vmem:[%s7821_s0 + $0xa0] sm:$0xff] %v6529_v44 }
 0x714   : >> { %6532 = vst [vmem:[%s7821_s0 + $0xa8] sm:$0xff] %v6531_v47 }
 0x715   : >> { %6534 = vst [vmem:[%s7821_s0 + $0xb0] sm:$0xff] %v6533_v37 }
 0x716   : >> { %6536 = vst [vmem:[%s7821_s0 + $0xb8] sm:$0xff] %v6535_v26 }
 0x717   : >> { %6538 = vst [vmem:[%s7821_s0 + $0xc0] sm:$0xff] %v6537_v15 }
 0x718   : >> { %6540 = vst [vmem:[%s7821_s0 + $0xc8] sm:$0xff] %v6539_v34 }
 0x719   : >> { %6542 = vst [vmem:[%s7821_s0 + $0xd0] sm:$0xff] %v6541_v17 }
 0x71a   : >> { %6544 = vst [vmem:[%s7821_s0 + $0xd8] sm:$0xff] %v6543_v32  ;;  %6485 = sbr.rel (!%p6482_p12) target bundleno = 1790 (0x6fe), region = 171 }
 0x71b   : >> { %6546 = vst [vmem:[%s7821_s0 + $0xe0] sm:$0xff] %v6545_v36 }
 0x71c   : >> { %6548 = vst [vmem:[%s7821_s0 + $0xe8] sm:$0xff] %v6547_v9 }
 0x71d   : >> { %6550 = vst [vmem:[%s7821_s0 + $0xf0] sm:$0xff] %v6549_v33 }
 0x71e   : >> { %6552 = vst [vmem:[%s7821_s0 + $0xf8] sm:$0xff] %v6551_v25  ;;  %s15907_s0 = smov %s14271_s17 }
 0x71f PF: > { %s14336_s3 = sand.u32 31, %s15917_s5   ;;  %s6913_s18 = sshll.u32 %s14225_s24, 8 }
 0x720   : > { %s6564_s27 = scalar_lea.vmem %s14015_s23, %s6913_s18 [#allocation8]   ;;  %s6566_s25 = scalar_lea.vmem %s14219_s7, %s6913_s18  }
 0x721   : > { %p6896_p0 = scmp.le.s32.totalorder %s14336_s3, 0 }
 0x722   : > { %s7835_s10 = smov (!%p6896_p0), %s6566_s25   ;;  %s7839_s4 = smov (!%p6896_p0), %s6564_s27  }
 0x723   : > { %6711 = sbr.rel (%p6896_p0) target bundleno = 1840 (0x730), region = 176  ;;  %s7843_s22 = smov (!%p6896_p0), 0  }
 0x724   : > { %s7847_s1 = smov (!%p6896_p0), 0  }
 0x728 LB: >> { %v6576_v55 = vld [vmem:[%s7841_s4] sm:$0xff]  ;;  %s6578_s5 = sadd.s32 1, %s7845_s22  ;;  %s6570_s1 = sadd.s32 1, %s7849_s1   ;;  %s7849_s1 = sphi %s7847_s1, %s6570_s1   ;;  %s7845_s22 = sphi %s7843_s22, %s7844_s22   ;;  %s7841_s4 = sphi %s7839_s4, %s6583_s4   ;;  %s7837_s10 = sphi %s7835_s10, %s6584_s10  }
 0x729   : >> { %6577 = vst [vmem:[%s7837_s10] sm:$0xff] %v6576_v55  ;;  %p6579_p1 = scmp.ge.s32.totalorder %s6578_s5, %s14336_s3  ;;  %p6569_p2 = scmp.ge.s32.totalorder %s6570_s1, %s14336_s3 }
 0x72b   : >> { %s15921_s5 = smov (%p6579_p1, %s6578_s5), 0  ;;  %6572 = sbr.rel (!%p6569_p2) target bundleno = 1832 (0x728), region = 182 }
 0x72c   : >> { %s6897_s23 = sshll.u32 %s15921_s5, 3  ;;  %s7844_s22 = smov %s15921_s5  }
 0x72d   : >> { %s6583_s4 = scalar_lea.vmem %s6564_s27, %s6897_s23 [#allocation8]   ;;  %s6584_s10 = scalar_lea.vmem %s6566_s25, %s6897_s23  }
 0x730 PF: > { %p6933_p13 = scmp.ge.s32.totalorder %s7817_s14, 2  ;;  %s6596_s6 = sand.u32 1, %s7805_s11  }
 0x731   : > { %s6597_s7 = scalar_lea.sflag [#allocation5], %s6596_s6 }
 0x732   : > { %p6927_p3 = pnand %p6933_p13, %p7952_p6 }
 0x734   : > { %p6928_p4 = pneg %p6927_p3 }
 0x736   : > { %7796 = dma.done.wait (%p6928_p4), %s6597_s7, 4096  }
 0x737   : > { %7798 = vsyncadd (%p6928_p4), %s6597_s7, 4294963200  ;;  %s6607_s2 = scalar_lea.sflag [#allocation7], %s6596_s6 }
 0x738   : > { %7800 = dma.done.wait (%p6928_p4), %s6607_s2, 128  }
 0x739   : > { %7802 = vsyncadd (%p6928_p4), %s6607_s2, 4294967168  ;;  %p24_p7 = scmp.ge.s32.totalorder %s7935_s16, 4   ;;  %s15910_s11 = smov %s7809_s12 }
 0x73a   : > { %s15911_s12 = smov %s7813_s13  ;;  %s15912_s13 = smov %s7946_s19 }
 0x73b   : > { %s15913_s14 = smov %s7935_s16  ;;  %26 = sbr.rel (!%p24_p7) target bundleno = 14 (0xe), region = 193 }
 0x740   :  { %6620 = vsyncpa [#allocation5], 1 }
 0x741   :  { %6622 = vsyncpa [#allocation5 + $0x1], 1 }
 0x742   :  { %6623 = vsyncpa [#allocation7], 1 }
 0x743   :  { %6625 = vsyncpa [#allocation7 + $0x1], 1 }

</bundles_post_ra>
